<compile_context>
chip_gen: v6e
topology: v6e:2x2x1
jax: 0.10.0
libtpu: 0.0.40
codegen_flags: <defaults>
</compile_context>

<pallas_src>
import functools

import jax
import jax.numpy as jnp
from jax.experimental import pallas as pl
from jax.experimental.pallas import tpu as pltpu


# ----------------------------------------------------------------------------
# Fused whole-network kernel: one grid step == one network layer.
# ----------------------------------------------------------------------------
def _dncnn_fused_kernel(x_ref, w0_ref, b0_ref, wm_ref, g_ref, wl_ref, out_ref,
                        act_ref, acc_ref, *,
                        N, H, W, Cin, Cmid, Cout, depth, bn_eps):
    # x_ref  : (N, H, W, Cin)        f32   original input (resident across the grid)
    # w0_ref : (9*Cin, Cmid)         bf16  first-layer weight, (dy, dx, c)-major rows
    # b0_ref : (1, Cmid)             f32   first-layer bias
    # wm_ref : (1, 3, 3*Cmid, Cmid)  bf16  this layer's mid weight (per-dy, (dx,c) rows)
    # g_ref  : (1, 1, Cmid)          f32   this layer's BN gamma
    # wl_ref : (3, 3*Cmid, Cout)     bf16  last-layer weight
    # out_ref: (N, H, W, Cout)       f32   residual output (written at the last step)
    # act_ref: (N, H+2, W+2, Cmid)   f32   zero-haloed resident activation (scratch)
    # acc_ref: (N*H*W, Cmid)         f32   conv accumulator (scratch)
    step = pl.program_id(0)
    R = N * H * W
    f32 = jnp.float32

    def x3_patches(cin):
        # W-shifted channel concat: (N, H+2, W, 3*cin) bf16 for the MXU.
        return jnp.concatenate(
            [act_ref[:, :, dx:dx + W, :cin].astype(jnp.bfloat16) for dx in range(3)],
            axis=-1)

    def store_activation(y_flat):
        act_ref[:, 1:H + 1, 1:W + 1, :] = y_flat.reshape(N, H, W, Cmid)

    # ---- layer 0: conv(Cin -> Cmid) + bias + ReLU (single K=9*Cin im2col matmul) ---
    @pl.when(step == 0)
    def _first_layer():
        # Zero once: establishes the zero halo reused by every subsequent layer.
        act_ref[...] = jnp.zeros_like(act_ref)
        xv = x_ref[...]
        if Cin < Cmid:   # widen to full channel width -> lane-dense (unmasked) store
            xv = jnp.concatenate(
                [xv, jnp.zeros((N, H, W, Cmid - Cin), f32)], axis=-1)
        act_ref[:, 1:H + 1, 1:W + 1, :] = xv

        x3 = x3_patches(Cin)                                    # (N, H+2, W, 3*Cin)
        x9 = jnp.concatenate([x3[:, dy:dy + H] for dy in range(3)], axis=-1)
        acc_ref[...] = jnp.dot(x9.reshape(R, 9 * Cin), w0_ref[...],
                               preferred_element_type=f32)
        store_activation(jnp.maximum(acc_ref[...] + b0_ref[...], 0.0))

    # ---- layers 1 .. depth-2: conv(Cmid -> Cmid) + bias-free BN + ReLU -------------
    @pl.when(jnp.logical_and(step >= 1, step < depth - 1))
    def _mid_layer():
        x3 = x3_patches(Cmid)                                   # (N, H+2, W, 3*Cmid)
        acc_ref[...] = jnp.dot(x3[:, 0:H].reshape(R, 3 * Cmid), wm_ref[0, 0],
                               preferred_element_type=f32)
        acc_ref[...] += jnp.dot(x3[:, 1:H + 1].reshape(R, 3 * Cmid), wm_ref[0, 1],
                                preferred_element_type=f32)
        acc_ref[...] += jnp.dot(x3[:, 2:H + 2].reshape(R, 3 * Cmid), wm_ref[0, 2],
                                preferred_element_type=f32)
        a = acc_ref[...]
        # Bias-free BN as a per-channel scale (fused sum / sum-of-squares, ddof=1).
        s1 = jnp.sum(a, axis=0, keepdims=True)                  # (1, Cmid)
        s2 = jnp.sum(a * a, axis=0, keepdims=True)              # (1, Cmid)
        mean = s1 * (1.0 / R)
        var = (s2 - mean * s1) / (R - 1.0)
        scale = g_ref[0] / (jnp.sqrt(var) + bn_eps)             # (1, Cmid)
        store_activation(jnp.maximum(a * scale, 0.0))

    # ---- layer depth-1: conv(Cmid -> Cout) fused with residual x_last - out --------
    @pl.when(step == depth - 1)
    def _last_layer():
        x3 = x3_patches(Cmid)
        o = jnp.dot(x3[:, 0:H].reshape(R, 3 * Cmid), wl_ref[0],
                    preferred_element_type=f32)
        o = o + jnp.dot(x3[:, 1:H + 1].reshape(R, 3 * Cmid), wl_ref[1],
                        preferred_element_type=f32)
        o = o + jnp.dot(x3[:, 2:H + 2].reshape(R, 3 * Cmid), wl_ref[2],
                        preferred_element_type=f32)
        x_last = x_ref[:, :, :, Cin - 1:Cin].reshape(R, 1)
        out_ref[...] = (x_last - o).reshape(N, H, W, Cout)


# ----------------------------------------------------------------------------
# Wrapper: weight repacking + pallas_call plumbing.
# ----------------------------------------------------------------------------
def _round_up(v, m):
    return ((v + m - 1) // m) * m


def _fused_vmem_estimate(N, H, W, Cin, Cmid, Cout):
    """Rough VMEM bytes of the fused kernel incl. (8,128)-tile layout padding."""
    act = N * (H + 2) * _round_up(W + 2, 8) * _round_up(Cmid, 128) * 4
    acc = _round_up(N * H * W, 8) * _round_up(Cmid, 128) * 4
    x3 = N * (H + 2) * _round_up(W, 8) * _round_up(3 * Cmid, 128) * 2
    x_in = N * H * _round_up(W, 8) * _round_up(Cin, 128) * 4
    out = N * H * _round_up(W, 8) * _round_up(Cout, 128) * 4
    w_mid = 2 * 3 * _round_up(3 * Cmid, 8) * _round_up(Cmid, 128) * 2   # double-buffered
    return act + acc + 3 * x3 + x_in + out + w_mid + (4 << 20)


def e_step_z_forward(x_nchw, params, depth=17, bn_eps=1e-4):
    """out = dncnn(x); return x[:, -1:, :, :] - out  — whole network as one pallas_call."""
    assert depth >= 3
    N, Cin, H, W = x_nchw.shape
    Cmid = params["w0"].shape[-1]
    Cout = params[f"w{depth - 1}"].shape[-1]
    n_mid = depth - 2
    assert Cin <= Cmid

    est = _fused_vmem_estimate(N, H, W, Cin, Cmid, Cout)
    vmem_cap = 60 * 1024 * 1024            # stay under v7x's 64 MiB physical VMEM
    if est > vmem_cap:
        # TODO(synk): spatially-tiled path (halo tiles, two-pass global BN, "parallel"
        # row axis for v7x's 2nd TensorCore) for activations larger than VMEM.
        raise NotImplementedError(
            f"fused-VMEM estimate {est >> 20} MiB exceeds {vmem_cap >> 20} MiB budget")
    vmem_limit = max(32 * 1024 * 1024, min(int(est * 3 // 2), vmem_cap))

    x = jnp.transpose(x_nchw, (0, 2, 3, 1)).astype(jnp.float32)          # NCHW -> NHWC

    # Weight repacking: HWIO -> matmul-ready layouts, bf16 for the MXU.
    w0 = params["w0"].reshape(9 * Cin, Cmid).astype(jnp.bfloat16)        # (dy,dx,c)-major
    b0 = params["b0"].reshape(1, Cmid).astype(jnp.float32)
    w_mid = jnp.stack([params[f"w{i}"].reshape(3, 3 * Cmid, Cmid)
                       for i in range(1, depth - 1)]).astype(jnp.bfloat16)
    g_mid = jnp.stack([params[f"g{i}"].reshape(1, Cmid)
                       for i in range(1, depth - 1)]).astype(jnp.float32)  # (n_mid,1,C)
    w_last = params[f"w{depth - 1}"].reshape(3, 3 * Cmid, Cout).astype(jnp.bfloat16)

    kernel = functools.partial(
        _dncnn_fused_kernel,
        N=N, H=H, W=W, Cin=Cin, Cmid=Cmid, Cout=Cout,
        depth=depth, bn_eps=float(bn_eps))

    def mid_idx(l):
        return jnp.clip(l - 1, 0, n_mid - 1)

    out_nhwc = pl.pallas_call(
        kernel,
        out_shape=jax.ShapeDtypeStruct((N, H, W, Cout), jnp.float32),
        grid_spec=pltpu.PrefetchScalarGridSpec(
            num_scalar_prefetch=0,
            grid=(depth,),
            in_specs=[
                pl.BlockSpec((N, H, W, Cin), lambda l: (0, 0, 0, 0)),      # x (resident)
                pl.BlockSpec((9 * Cin, Cmid), lambda l: (0, 0)),           # w0
                pl.BlockSpec((1, Cmid), lambda l: (0, 0)),                 # b0
                pl.BlockSpec((1, 3, 3 * Cmid, Cmid),
                             lambda l: (mid_idx(l), 0, 0, 0)),             # w_mid[l-1]
                pl.BlockSpec((1, 1, Cmid), lambda l: (mid_idx(l), 0, 0)),  # gamma[l-1]
                pl.BlockSpec((3, 3 * Cmid, Cout), lambda l: (0, 0, 0)),    # w_last
            ],
            out_specs=pl.BlockSpec((N, H, W, Cout), lambda l: (0, 0, 0, 0)),
            scratch_shapes=[
                pltpu.VMEM((N, H + 2, W + 2, Cmid), jnp.float32),  # resident activation
                pltpu.VMEM((N * H * W, Cmid), jnp.float32),        # conv accumulator
            ]),
        compiler_params=pltpu.CompilerParams(
            dimension_semantics=("arbitrary",),       # layer chain is sequential
            vmem_limit_bytes=vmem_limit),
    )(x, w0, b0, w_mid, g_mid, w_last)

    return jnp.transpose(out_nhwc, (0, 3, 1, 2))                          # NHWC -> NCHW


# ----------------------------------------------------------------------------
# Parameter initialization (deterministic, mirrors _initialize_weights)
# ----------------------------------------------------------------------------
def _orthogonal_conv(key, out_ch, in_ch, k=3):
    """torch.nn.init.orthogonal_ analogue; returns weight in HWIO layout."""
    rows, cols = out_ch, in_ch * k * k
    a = jax.random.normal(key, (max(rows, cols), min(rows, cols)), jnp.float32)
    q, r = jnp.linalg.qr(a)
    q = q * jnp.sign(jnp.diagonal(r))[None, :]
    if rows < cols:
        q = q.T
    w_oikk = q[:rows, :cols].reshape(out_ch, in_ch, k, k)
    return jnp.transpose(w_oikk, (2, 3, 1, 0)).astype(jnp.float32)   # (ky,kx,Cin,Cout)


def init_e_step_z_params(key, depth=17, n_channels=64, in_chan=1, out_chan=1):
    keys = jax.random.split(key, depth)
    params = {}
    params["w0"] = _orthogonal_conv(keys[0], n_channels, in_chan)
    params["b0"] = jnp.zeros((n_channels,), jnp.float32)            # init.constant_(b, 0)
    for i in range(1, depth - 1):
        params[f"w{i}"] = _orthogonal_conv(keys[i], n_channels, n_channels)
        params[f"g{i}"] = jnp.ones((n_channels,), jnp.float32)      # BN weight = 1
    params[f"w{depth - 1}"] = _orthogonal_conv(keys[depth - 1], out_chan, n_channels)
    return params


# ----------------------------------------------------------------------------
# Pure-JAX reference emulating the kernel's numerics (bf16 MXU inputs, f32 acc).
# ----------------------------------------------------------------------------
def _ref_layer(x, w_hwio, b=None, gamma=None, bn_eps=None, relu=False):
    y = jax.lax.conv_general_dilated(
        x.astype(jnp.bfloat16), w_hwio.astype(jnp.bfloat16),
        window_strides=(1, 1), padding="SAME",
        dimension_numbers=("NHWC", "HWIO", "NHWC"),
        preferred_element_type=jnp.float32)
    if b is not None:
        y = y + b
    if bn_eps is not None:
        var = jnp.var(y, axis=(0, 1, 2), ddof=1)
        g = 1.0 if gamma is None else gamma
        y = g * y / (jnp.sqrt(var) + bn_eps)
    if relu:
        y = jnp.maximum(y, 0.0)
    return y


def e_step_z_reference(x_nchw, params, depth=17, bn_eps=1e-4):
    x = jnp.transpose(x_nchw, (0, 2, 3, 1)).astype(jnp.float32)
    h = _ref_layer(x, params["w0"], b=params["b0"], relu=True)
    for i in range(1, depth - 1):
        h = _ref_layer(h, params[f"w{i}"], gamma=params[f"g{i}"],
                       bn_eps=bn_eps, relu=True)
    out = _ref_layer(h, params[f"w{depth - 1}"])
    return x_nchw[:, -1:, :, :] - jnp.transpose(out, (0, 3, 1, 2))


if __name__ == "__main__":
    # Small-but-consistent config: depth=6, n_channels=64, single-channel input.
    DEPTH, NCH, IN_CH, OUT_CH = 6, 64, 1, 1
    N, H, W = 2, 16, 16

    key = jax.random.PRNGKey(0)
    k_params, k_x = jax.random.split(key)
    params = init_e_step_z_params(k_params, depth=DEPTH, n_channels=NCH,
                                  in_chan=IN_CH, out_chan=OUT_CH)
    x = jax.random.normal(k_x, (N, IN_CH, H, W), jnp.float32)   # NCHW input

    y = jax.block_until_ready(e_step_z_forward(x, params, depth=DEPTH))
    assert y.shape == (N, OUT_CH, H, W), y.shape

    y_ref = jax.block_until_ready(e_step_z_reference(x, params, depth=DEPTH))
    max_err = float(jnp.max(jnp.abs(y - y_ref)))
    assert jnp.allclose(y, y_ref, atol=2e-3, rtol=2e-3), max_err

    print("KERNEL_OK")
</pallas_src>

<mosaic_0001>
module attributes {stable_mosaic.version = 11 : i64} {
  func.func @_dncnn_fused_kernel(%arg0: i32, %arg1: memref<2x16x16x1xf32, #tpu.memory_space<vmem>>, %arg2: memref<9x64xbf16, #tpu.memory_space<vmem>>, %arg3: memref<1x64xf32, #tpu.memory_space<vmem>>, %arg4: memref<1x3x192x64xbf16, #tpu.memory_space<vmem>>, %arg5: memref<1x1x64xf32, #tpu.memory_space<vmem>>, %arg6: memref<3x192x1xbf16, #tpu.memory_space<vmem>>, %arg7: memref<2x16x16x1xf32, #tpu.memory_space<vmem>>, %arg8: memref<2x18x18x64xf32, #tpu.memory_space<vmem>>, %arg9: memref<512x64xf32, #tpu.memory_space<vmem>>) attributes {dimension_semantics = [#tpu.dimension_semantics<arbitrary>], iteration_bounds = array<i64: 6>, scalar_prefetch = 0 : i64, scratch_operands = 2 : i64, tpu.core_type = #tpu.core_type<tc>, window_params = [{pipeline_mode = #tpu.pipeline_mode<synchronous>, transform_indices = @transform_0, window_bounds = array<i64: 2, 16, 16, 1>}, {pipeline_mode = #tpu.pipeline_mode<synchronous>, transform_indices = @transform_1, window_bounds = array<i64: 9, 64>}, {pipeline_mode = #tpu.pipeline_mode<synchronous>, transform_indices = @transform_2, window_bounds = array<i64: 1, 64>}, {transform_indices = @transform_3, window_bounds = array<i64: 1, 3, 192, 64>}, {transform_indices = @transform_4, window_bounds = array<i64: 1, 1, 64>}, {pipeline_mode = #tpu.pipeline_mode<synchronous>, transform_indices = @transform_5, window_bounds = array<i64: 3, 192, 1>}, {pipeline_mode = #tpu.pipeline_mode<synchronous>, transform_indices = @transform_6, window_bounds = array<i64: 2, 16, 16, 1>}]} {
    %c0_i32 = arith.constant 0 : i32
    %0 = arith.cmpi eq, %arg0, %c0_i32 : i32
    %1 = arith.extui %0 : i1 to i32
    %c0_i32_0 = arith.constant 0 : i32
    %2 = arith.cmpi ne, %1, %c0_i32_0 : i32
    scf.if %2 {
      %cst = arith.constant 0.000000e+00 : f32
      %11 = vector.broadcast %cst : f32 to vector<2x18x18x64xf32>
      %c0 = arith.constant 0 : index
      %c0_4 = arith.constant 0 : index
      %c0_5 = arith.constant 0 : index
      %c0_6 = arith.constant 0 : index
      %12 = vector.load %arg8[%c0, %c0_4, %c0_5, %c0_6] : memref<2x18x18x64xf32, #tpu.memory_space<vmem>>, vector<2x18x18x64xf32>
      tpu.vector_store %arg8[%c0, %c0_4, %c0_5, %c0_6], %11 {strides = array<i32>} : memref<2x18x18x64xf32, #tpu.memory_space<vmem>>, vector<2x18x18x64xf32>,
      %c0_7 = arith.constant 0 : index
      %c0_8 = arith.constant 0 : index
      %c0_9 = arith.constant 0 : index
      %c0_10 = arith.constant 0 : index
      %13 = vector.load %arg1[%c0_7, %c0_8, %c0_9, %c0_10] : memref<2x16x16x1xf32, #tpu.memory_space<vmem>>, vector<2x16x16x1xf32>
      %cst_11 = arith.constant 0.000000e+00 : f32
      %14 = vector.broadcast %cst_11 : f32 to vector<2x16x16x63xf32>
      %15 = tpu.concatenate %13, %14 in 3 : vector<2x16x16x1xf32>, vector<2x16x16x63xf32> -> vector<2x16x16x64xf32>
      %c0_12 = arith.constant 0 : index
      %c1 = arith.constant 1 : index
      %c1_13 = arith.constant 1 : index
      %c0_14 = arith.constant 0 : index
      %16 = vector.load %arg8[%c0_12, %c1, %c1_13, %c0_14] : memref<2x18x18x64xf32, #tpu.memory_space<vmem>>, vector<2x16x16x64xf32>
      tpu.vector_store %arg8[%c0_12, %c1, %c1_13, %c0_14], %15 {strides = array<i32>} : memref<2x18x18x64xf32, #tpu.memory_space<vmem>>, vector<2x16x16x64xf32>,
      %c0_15 = arith.constant 0 : index
      %c0_16 = arith.constant 0 : index
      %c0_17 = arith.constant 0 : index
      %c0_18 = arith.constant 0 : index
      %17 = vector.load %arg8[%c0_15, %c0_16, %c0_17, %c0_18] : memref<2x18x18x64xf32, #tpu.memory_space<vmem>>, vector<2x18x16x1xf32>
      %18 = arith.truncf %17 : vector<2x18x16x1xf32> to vector<2x18x16x1xbf16>
      %c0_19 = arith.constant 0 : index
      %c0_20 = arith.constant 0 : index
      %c1_21 = arith.constant 1 : index
      %c0_22 = arith.constant 0 : index
      %19 = vector.load %arg8[%c0_19, %c0_20, %c1_21, %c0_22] : memref<2x18x18x64xf32, #tpu.memory_space<vmem>>, vector<2x18x16x1xf32>
      %20 = arith.truncf %19 : vector<2x18x16x1xf32> to vector<2x18x16x1xbf16>
      %c0_23 = arith.constant 0 : index
      %c0_24 = arith.constant 0 : index
      %c2 = arith.constant 2 : index
      %c0_25 = arith.constant 0 : index
      %21 = vector.load %arg8[%c0_23, %c0_24, %c2, %c0_25] : memref<2x18x18x64xf32, #tpu.memory_space<vmem>>, vector<2x18x16x1xf32>
      %22 = arith.truncf %21 : vector<2x18x16x1xf32> to vector<2x18x16x1xbf16>
      %23 = tpu.concatenate %18, %20, %22 in 3 : vector<2x18x16x1xbf16>, vector<2x18x16x1xbf16>, vector<2x18x16x1xbf16> -> vector<2x18x16x3xbf16>
      %24 = vector.extract_strided_slice %23 {offsets = [0, 0, 0, 0], sizes = [2, 16, 16, 3], strides = [1, 1, 1, 1]} : vector<2x18x16x3xbf16> to vector<2x16x16x3xbf16>
      %25 = vector.extract_strided_slice %23 {offsets = [0, 1, 0, 0], sizes = [2, 16, 16, 3], strides = [1, 1, 1, 1]} : vector<2x18x16x3xbf16> to vector<2x16x16x3xbf16>
      %26 = vector.extract_strided_slice %23 {offsets = [0, 2, 0, 0], sizes = [2, 16, 16, 3], strides = [1, 1, 1, 1]} : vector<2x18x16x3xbf16> to vector<2x16x16x3xbf16>
      %27 = tpu.concatenate %24, %25, %26 in 3 : vector<2x16x16x3xbf16>, vector<2x16x16x3xbf16>, vector<2x16x16x3xbf16> -> vector<2x16x16x9xbf16>
      %28 = vector.shape_cast %27 : vector<2x16x16x9xbf16> to vector<512x9xbf16>
      %c0_26 = arith.constant 0 : index
      %c0_27 = arith.constant 0 : index
      %29 = vector.load %arg2[%c0_26, %c0_27] : memref<9x64xbf16, #tpu.memory_space<vmem>>, vector<9x64xbf16>
      %cst_28 = arith.constant dense<0.000000e+00> : vector<512x64xf32>
      %30 = tpu.matmul %28, %29, %cst_28 {dimension_numbers = #tpu.dot_dimension_numbers<[1], [0], [0], [1], [0, 0, 1, 1], [], []>} : vector<512x9xbf16>, vector<9x64xbf16>, vector<512x64xf32> -> vector<512x64xf32>
      %c0_29 = arith.constant 0 : index
      %c0_30 = arith.constant 0 : index
      %31 = vector.load %arg9[%c0_29, %c0_30] : memref<512x64xf32, #tpu.memory_space<vmem>>, vector<512x64xf32>
      tpu.vector_store %arg9[%c0_29, %c0_30], %30 {strides = array<i32>} : memref<512x64xf32, #tpu.memory_space<vmem>>, vector<512x64xf32>,
      %c0_31 = arith.constant 0 : index
      %c0_32 = arith.constant 0 : index
      %32 = vector.load %arg9[%c0_31, %c0_32] : memref<512x64xf32, #tpu.memory_space<vmem>>, vector<512x64xf32>
      %c0_33 = arith.constant 0 : index
      %c0_34 = arith.constant 0 : index
      %33 = vector.load %arg3[%c0_33, %c0_34] : memref<1x64xf32, #tpu.memory_space<vmem>>, vector<1x64xf32>
      %34 = vector.broadcast %33 : vector<1x64xf32> to vector<512x64xf32>
      %35 = arith.addf %32, %34 : vector<512x64xf32>
      %cst_35 = arith.constant 0.000000e+00 : f32
      %36 = vector.broadcast %cst_35 : f32 to vector<512x64xf32>
      %37 = arith.maximumf %35, %36 : vector<512x64xf32>
      %38 = vector.shape_cast %37 : vector<512x64xf32> to vector<2x16x16x64xf32>
      %c0_36 = arith.constant 0 : index
      %c1_37 = arith.constant 1 : index
      %c1_38 = arith.constant 1 : index
      %c0_39 = arith.constant 0 : index
      %39 = vector.load %arg8[%c0_36, %c1_37, %c1_38, %c0_39] : memref<2x18x18x64xf32, #tpu.memory_space<vmem>>, vector<2x16x16x64xf32>
      tpu.vector_store %arg8[%c0_36, %c1_37, %c1_38, %c0_39], %38 {strides = array<i32>} : memref<2x18x18x64xf32, #tpu.memory_space<vmem>>, vector<2x16x16x64xf32>,
    } else {
    }
    %c1_i32 = arith.constant 1 : i32
    %3 = arith.cmpi sge, %arg0, %c1_i32 : i32
    %c5_i32 = arith.constant 5 : i32
    %4 = arith.cmpi slt, %arg0, %c5_i32 : i32
    %5 = arith.andi %3, %4 : i1
    %6 = arith.extui %5 : i1 to i32
    %c0_i32_1 = arith.constant 0 : i32
    %7 = arith.cmpi ne, %6, %c0_i32_1 : i32
    scf.if %7 {
      %c0 = arith.constant 0 : index
      %c0_4 = arith.constant 0 : index
      %c0_5 = arith.constant 0 : index
      %c0_6 = arith.constant 0 : index
      %11 = vector.load %arg8[%c0, %c0_4, %c0_5, %c0_6] : memref<2x18x18x64xf32, #tpu.memory_space<vmem>>, vector<2x18x16x64xf32>
      %12 = arith.truncf %11 : vector<2x18x16x64xf32> to vector<2x18x16x64xbf16>
      %c0_7 = arith.constant 0 : index
      %c0_8 = arith.constant 0 : index
      %c1 = arith.constant 1 : index
      %c0_9 = arith.constant 0 : index
      %13 = vector.load %arg8[%c0_7, %c0_8, %c1, %c0_9] : memref<2x18x18x64xf32, #tpu.memory_space<vmem>>, vector<2x18x16x64xf32>
      %14 = arith.truncf %13 : vector<2x18x16x64xf32> to vector<2x18x16x64xbf16>
      %c0_10 = arith.constant 0 : index
      %c0_11 = arith.constant 0 : index
      %c2 = arith.constant 2 : index
      %c0_12 = arith.constant 0 : index
      %15 = vector.load %arg8[%c0_10, %c0_11, %c2, %c0_12] : memref<2x18x18x64xf32, #tpu.memory_space<vmem>>, vector<2x18x16x64xf32>
      %16 = arith.truncf %15 : vector<2x18x16x64xf32> to vector<2x18x16x64xbf16>
      %17 = tpu.concatenate %12, %14, %16 in 3 : vector<2x18x16x64xbf16>, vector<2x18x16x64xbf16>, vector<2x18x16x64xbf16> -> vector<2x18x16x192xbf16>
      %18 = vector.extract_strided_slice %17 {offsets = [0, 0, 0, 0], sizes = [2, 16, 16, 192], strides = [1, 1, 1, 1]} : vector<2x18x16x192xbf16> to vector<2x16x16x192xbf16>
      %19 = vector.shape_cast %18 : vector<2x16x16x192xbf16> to vector<512x192xbf16>
      %c0_13 = arith.constant 0 : index
      %c0_14 = arith.constant 0 : index
      %c0_15 = arith.constant 0 : index
      %c0_16 = arith.constant 0 : index
      %20 = vector.load %arg4[%c0_13, %c0_14, %c0_15, %c0_16] : memref<1x3x192x64xbf16, #tpu.memory_space<vmem>>, vector<1x1x192x64xbf16>
      %21 = vector.shape_cast %20 : vector<1x1x192x64xbf16> to vector<192x64xbf16>
      %cst = arith.constant dense<0.000000e+00> : vector<512x64xf32>
      %22 = tpu.matmul %19, %21, %cst {dimension_numbers = #tpu.dot_dimension_numbers<[1], [0], [0], [1], [0, 0, 1, 1], [], []>} : vector<512x192xbf16>, vector<192x64xbf16>, vector<512x64xf32> -> vector<512x64xf32>
      %c0_17 = arith.constant 0 : index
      %c0_18 = arith.constant 0 : index
      %23 = vector.load %arg9[%c0_17, %c0_18] : memref<512x64xf32, #tpu.memory_space<vmem>>, vector<512x64xf32>
      tpu.vector_store %arg9[%c0_17, %c0_18], %22 {strides = array<i32>} : memref<512x64xf32, #tpu.memory_space<vmem>>, vector<512x64xf32>,
      %c0_19 = arith.constant 0 : index
      %c0_20 = arith.constant 0 : index
      %24 = vector.load %arg9[%c0_19, %c0_20] : memref<512x64xf32, #tpu.memory_space<vmem>>, vector<512x64xf32>
      %25 = vector.extract_strided_slice %17 {offsets = [0, 1, 0, 0], sizes = [2, 16, 16, 192], strides = [1, 1, 1, 1]} : vector<2x18x16x192xbf16> to vector<2x16x16x192xbf16>
      %26 = vector.shape_cast %25 : vector<2x16x16x192xbf16> to vector<512x192xbf16>
      %c0_21 = arith.constant 0 : index
      %c1_22 = arith.constant 1 : index
      %c0_23 = arith.constant 0 : index
      %c0_24 = arith.constant 0 : index
      %27 = vector.load %arg4[%c0_21, %c1_22, %c0_23, %c0_24] : memref<1x3x192x64xbf16, #tpu.memory_space<vmem>>, vector<1x1x192x64xbf16>
      %28 = vector.shape_cast %27 : vector<1x1x192x64xbf16> to vector<192x64xbf16>
      %cst_25 = arith.constant dense<0.000000e+00> : vector<512x64xf32>
      %29 = tpu.matmul %26, %28, %cst_25 {dimension_numbers = #tpu.dot_dimension_numbers<[1], [0], [0], [1], [0, 0, 1, 1], [], []>} : vector<512x192xbf16>, vector<192x64xbf16>, vector<512x64xf32> -> vector<512x64xf32>
      %30 = arith.addf %24, %29 : vector<512x64xf32>
      %c0_26 = arith.constant 0 : index
      %c0_27 = arith.constant 0 : index
      %31 = vector.load %arg9[%c0_26, %c0_27] : memref<512x64xf32, #tpu.memory_space<vmem>>, vector<512x64xf32>
      tpu.vector_store %arg9[%c0_26, %c0_27], %30 {strides = array<i32>} : memref<512x64xf32, #tpu.memory_space<vmem>>, vector<512x64xf32>,
      %c0_28 = arith.constant 0 : index
      %c0_29 = arith.constant 0 : index
      %32 = vector.load %arg9[%c0_28, %c0_29] : memref<512x64xf32, #tpu.memory_space<vmem>>, vector<512x64xf32>
      %33 = vector.extract_strided_slice %17 {offsets = [0, 2, 0, 0], sizes = [2, 16, 16, 192], strides = [1, 1, 1, 1]} : vector<2x18x16x192xbf16> to vector<2x16x16x192xbf16>
      %34 = vector.shape_cast %33 : vector<2x16x16x192xbf16> to vector<512x192xbf16>
      %c0_30 = arith.constant 0 : index
      %c2_31 = arith.constant 2 : index
      %c0_32 = arith.constant 0 : index
      %c0_33 = arith.constant 0 : index
      %35 = vector.load %arg4[%c0_30, %c2_31, %c0_32, %c0_33] : memref<1x3x192x64xbf16, #tpu.memory_space<vmem>>, vector<1x1x192x64xbf16>
      %36 = vector.shape_cast %35 : vector<1x1x192x64xbf16> to vector<192x64xbf16>
      %cst_34 = arith.constant dense<0.000000e+00> : vector<512x64xf32>
      %37 = tpu.matmul %34, %36, %cst_34 {dimension_numbers = #tpu.dot_dimension_numbers<[1], [0], [0], [1], [0, 0, 1, 1], [], []>} : vector<512x192xbf16>, vector<192x64xbf16>, vector<512x64xf32> -> vector<512x64xf32>
      %38 = arith.addf %32, %37 : vector<512x64xf32>
      %c0_35 = arith.constant 0 : index
      %c0_36 = arith.constant 0 : index
      %39 = vector.load %arg9[%c0_35, %c0_36] : memref<512x64xf32, #tpu.memory_space<vmem>>, vector<512x64xf32>
      tpu.vector_store %arg9[%c0_35, %c0_36], %38 {strides = array<i32>} : memref<512x64xf32, #tpu.memory_space<vmem>>, vector<512x64xf32>,
      %c0_37 = arith.constant 0 : index
      %c0_38 = arith.constant 0 : index
      %40 = vector.load %arg9[%c0_37, %c0_38] : memref<512x64xf32, #tpu.memory_space<vmem>>, vector<512x64xf32>
      %cst_39 = arith.constant dense<0.000000e+00> : vector<64xf32>
      %41 = vector.multi_reduction <add>, %40, %cst_39 [0] : vector<512x64xf32> to vector<64xf32>
      %42 = vector.shape_cast %41 : vector<64xf32> to vector<1x64xf32>
      %43 = arith.mulf %40, %40 : vector<512x64xf32>
      %cst_40 = arith.constant dense<0.000000e+00> : vector<64xf32>
      %44 = vector.multi_reduction <add>, %43, %cst_40 [0] : vector<512x64xf32> to vector<64xf32>
      %45 = vector.shape_cast %44 : vector<64xf32> to vector<1x64xf32>
      %cst_41 = arith.constant 0.001953125 : f32
      %46 = vector.broadcast %cst_41 : f32 to vector<1x64xf32>
      %47 = arith.mulf %42, %46 : vector<1x64xf32>
      %48 = arith.mulf %47, %42 : vector<1x64xf32>
      %49 = arith.subf %45, %48 : vector<1x64xf32>
      %cst_42 = arith.constant 5.110000e+02 : f32
      %50 = vector.broadcast %cst_42 : f32 to vector<1x64xf32>
      %51 = arith.divf %49, %50 : vector<1x64xf32>
      %c0_43 = arith.constant 0 : index
      %c0_44 = arith.constant 0 : index
      %c0_45 = arith.constant 0 : index
      %52 = vector.load %arg5[%c0_43, %c0_44, %c0_45] : memref<1x1x64xf32, #tpu.memory_space<vmem>>, vector<1x1x64xf32>
      %53 = vector.shape_cast %52 : vector<1x1x64xf32> to vector<1x64xf32>
      %54 = math.sqrt %51 : vector<1x64xf32>
      %cst_46 = arith.constant 9.99999974E-5 : f32
      %55 = vector.broadcast %cst_46 : f32 to vector<1x64xf32>
      %56 = arith.addf %54, %55 : vector<1x64xf32>
      %57 = arith.divf %53, %56 : vector<1x64xf32>
      %58 = vector.broadcast %57 : vector<1x64xf32> to vector<512x64xf32>
      %59 = arith.mulf %40, %58 : vector<512x64xf32>
      %cst_47 = arith.constant 0.000000e+00 : f32
      %60 = vector.broadcast %cst_47 : f32 to vector<512x64xf32>
      %61 = arith.maximumf %59, %60 : vector<512x64xf32>
      %62 = vector.shape_cast %61 : vector<512x64xf32> to vector<2x16x16x64xf32>
      %c0_48 = arith.constant 0 : index
      %c1_49 = arith.constant 1 : index
      %c1_50 = arith.constant 1 : index
      %c0_51 = arith.constant 0 : index
      %63 = vector.load %arg8[%c0_48, %c1_49, %c1_50, %c0_51] : memref<2x18x18x64xf32, #tpu.memory_space<vmem>>, vector<2x16x16x64xf32>
      tpu.vector_store %arg8[%c0_48, %c1_49, %c1_50, %c0_51], %62 {strides = array<i32>} : memref<2x18x18x64xf32, #tpu.memory_space<vmem>>, vector<2x16x16x64xf32>,
    } else {
    }
    %c5_i32_2 = arith.constant 5 : i32
    %8 = arith.cmpi eq, %arg0, %c5_i32_2 : i32
    %9 = arith.extui %8 : i1 to i32
    %c0_i32_3 = arith.constant 0 : i32
    %10 = arith.cmpi ne, %9, %c0_i32_3 : i32
    scf.if %10 {
      %c0 = arith.constant 0 : index
      %c0_4 = arith.constant 0 : index
      %c0_5 = arith.constant 0 : index
      %c0_6 = arith.constant 0 : index
      %11 = vector.load %arg8[%c0, %c0_4, %c0_5, %c0_6] : memref<2x18x18x64xf32, #tpu.memory_space<vmem>>, vector<2x18x16x64xf32>
      %12 = arith.truncf %11 : vector<2x18x16x64xf32> to vector<2x18x16x64xbf16>
      %c0_7 = arith.constant 0 : index
      %c0_8 = arith.constant 0 : index
      %c1 = arith.constant 1 : index
      %c0_9 = arith.constant 0 : index
      %13 = vector.load %arg8[%c0_7, %c0_8, %c1, %c0_9] : memref<2x18x18x64xf32, #tpu.memory_space<vmem>>, vector<2x18x16x64xf32>
      %14 = arith.truncf %13 : vector<2x18x16x64xf32> to vector<2x18x16x64xbf16>
      %c0_10 = arith.constant 0 : index
      %c0_11 = arith.constant 0 : index
      %c2 = arith.constant 2 : index
      %c0_12 = arith.constant 0 : index
      %15 = vector.load %arg8[%c0_10, %c0_11, %c2, %c0_12] : memref<2x18x18x64xf32, #tpu.memory_space<vmem>>, vector<2x18x16x64xf32>
      %16 = arith.truncf %15 : vector<2x18x16x64xf32> to vector<2x18x16x64xbf16>
      %17 = tpu.concatenate %12, %14, %16 in 3 : vector<2x18x16x64xbf16>, vector<2x18x16x64xbf16>, vector<2x18x16x64xbf16> -> vector<2x18x16x192xbf16>
      %18 = vector.extract_strided_slice %17 {offsets = [0, 0, 0, 0], sizes = [2, 16, 16, 192], strides = [1, 1, 1, 1]} : vector<2x18x16x192xbf16> to vector<2x16x16x192xbf16>
      %19 = vector.shape_cast %18 : vector<2x16x16x192xbf16> to vector<512x192xbf16>
      %c0_13 = arith.constant 0 : index
      %c0_14 = arith.constant 0 : index
      %c0_15 = arith.constant 0 : index
      %20 = vector.load %arg6[%c0_13, %c0_14, %c0_15] : memref<3x192x1xbf16, #tpu.memory_space<vmem>>, vector<1x192x1xbf16>
      %21 = vector.shape_cast %20 : vector<1x192x1xbf16> to vector<192x1xbf16>
      %cst = arith.constant dense<0.000000e+00> : vector<512x1xf32>
      %22 = tpu.matmul %19, %21, %cst {dimension_numbers = #tpu.dot_dimension_numbers<[1], [0], [0], [1], [0, 0, 1, 1], [], []>} : vector<512x192xbf16>, vector<192x1xbf16>, vector<512x1xf32> -> vector<512x1xf32>
      %23 = vector.extract_strided_slice %17 {offsets = [0, 1, 0, 0], sizes = [2, 16, 16, 192], strides = [1, 1, 1, 1]} : vector<2x18x16x192xbf16> to vector<2x16x16x192xbf16>
      %24 = vector.shape_cast %23 : vector<2x16x16x192xbf16> to vector<512x192xbf16>
      %c1_16 = arith.constant 1 : index
      %c0_17 = arith.constant 0 : index
      %c0_18 = arith.constant 0 : index
      %25 = vector.load %arg6[%c1_16, %c0_17, %c0_18] : memref<3x192x1xbf16, #tpu.memory_space<vmem>>, vector<1x192x1xbf16>
      %26 = vector.shape_cast %25 : vector<1x192x1xbf16> to vector<192x1xbf16>
      %cst_19 = arith.constant dense<0.000000e+00> : vector<512x1xf32>
      %27 = tpu.matmul %24, %26, %cst_19 {dimension_numbers = #tpu.dot_dimension_numbers<[1], [0], [0], [1], [0, 0, 1, 1], [], []>} : vector<512x192xbf16>, vector<192x1xbf16>, vector<512x1xf32> -> vector<512x1xf32>
      %28 = arith.addf %22, %27 : vector<512x1xf32>
      %29 = vector.extract_strided_slice %17 {offsets = [0, 2, 0, 0], sizes = [2, 16, 16, 192], strides = [1, 1, 1, 1]} : vector<2x18x16x192xbf16> to vector<2x16x16x192xbf16>
      %30 = vector.shape_cast %29 : vector<2x16x16x192xbf16> to vector<512x192xbf16>
      %c2_20 = arith.constant 2 : index
      %c0_21 = arith.constant 0 : index
      %c0_22 = arith.constant 0 : index
      %31 = vector.load %arg6[%c2_20, %c0_21, %c0_22] : memref<3x192x1xbf16, #tpu.memory_space<vmem>>, vector<1x192x1xbf16>
      %32 = vector.shape_cast %31 : vector<1x192x1xbf16> to vector<192x1xbf16>
      %cst_23 = arith.constant dense<0.000000e+00> : vector<512x1xf32>
      %33 = tpu.matmul %30, %32, %cst_23 {dimension_numbers = #tpu.dot_dimension_numbers<[1], [0], [0], [1], [0, 0, 1, 1], [], []>} : vector<512x192xbf16>, vector<192x1xbf16>, vector<512x1xf32> -> vector<512x1xf32>
      %34 = arith.addf %28, %33 : vector<512x1xf32>
      %c0_24 = arith.constant 0 : index
      %c0_25 = arith.constant 0 : index
      %c0_26 = arith.constant 0 : index
      %c0_27 = arith.constant 0 : index
      %35 = vector.load %arg1[%c0_24, %c0_25, %c0_26, %c0_27] : memref<2x16x16x1xf32, #tpu.memory_space<vmem>>, vector<2x16x16x1xf32>
      %36 = vector.shape_cast %35 : vector<2x16x16x1xf32> to vector<512x1xf32>
      %37 = arith.subf %36, %34 : vector<512x1xf32>
      %38 = vector.shape_cast %37 : vector<512x1xf32> to vector<2x16x16x1xf32>
      %c0_28 = arith.constant 0 : index
      %c0_29 = arith.constant 0 : index
      %c0_30 = arith.constant 0 : index
      %c0_31 = arith.constant 0 : index
      %39 = vector.load %arg7[%c0_28, %c0_29, %c0_30, %c0_31] : memref<2x16x16x1xf32, #tpu.memory_space<vmem>>, vector<2x16x16x1xf32>
      tpu.vector_store %arg7[%c0_28, %c0_29, %c0_30, %c0_31], %38 {strides = array<i32>} : memref<2x16x16x1xf32, #tpu.memory_space<vmem>>, vector<2x16x16x1xf32>,
    } else {
    }
    return
  }
  func.func @transform_0(%arg0: i32) -> (i32, i32, i32, i32) {
    %c0_i32 = arith.constant 0 : i32
    %c0_i32_0 = arith.constant 0 : i32
    %c0_i32_1 = arith.constant 0 : i32
    %c0_i32_2 = arith.constant 0 : i32
    %c0_i32_3 = arith.constant 0 : i32
    return %c0_i32, %c0_i32_0, %c0_i32_1, %c0_i32_2 : i32, i32, i32, i32
  }
  func.func @transform_1(%arg0: i32) -> (i32, i32) {
    %c0_i32 = arith.constant 0 : i32
    %c0_i32_0 = arith.constant 0 : i32
    %c0_i32_1 = arith.constant 0 : i32
    return %c0_i32, %c0_i32_0 : i32, i32
  }
  func.func @transform_2(%arg0: i32) -> (i32, i32) {
    %c0_i32 = arith.constant 0 : i32
    %c0_i32_0 = arith.constant 0 : i32
    %c0_i32_1 = arith.constant 0 : i32
    return %c0_i32, %c0_i32_0 : i32, i32
  }
  func.func @transform_3(%arg0: i32) -> (i32, i32, i32, i32) {
    %c1_i32 = arith.constant 1 : i32
    %0 = arith.subi %arg0, %c1_i32 : i32
    %c0_i32 = arith.constant 0 : i32
    %c3_i32 = arith.constant 3 : i32
    %1 = arith.maxsi %c0_i32, %0 : i32
    %2 = arith.minsi %c3_i32, %1 : i32
    %c0_i32_0 = arith.constant 0 : i32
    %c0_i32_1 = arith.constant 0 : i32
    %c0_i32_2 = arith.constant 0 : i32
    %c0_i32_3 = arith.constant 0 : i32
    return %2, %c0_i32_0, %c0_i32_1, %c0_i32_2 : i32, i32, i32, i32
  }
  func.func @transform_4(%arg0: i32) -> (i32, i32, i32) {
    %c1_i32 = arith.constant 1 : i32
    %0 = arith.subi %arg0, %c1_i32 : i32
    %c0_i32 = arith.constant 0 : i32
    %c3_i32 = arith.constant 3 : i32
    %1 = arith.maxsi %c0_i32, %0 : i32
    %2 = arith.minsi %c3_i32, %1 : i32
    %c0_i32_0 = arith.constant 0 : i32
    %c0_i32_1 = arith.constant 0 : i32
    %c0_i32_2 = arith.constant 0 : i32
    return %2, %c0_i32_0, %c0_i32_1 : i32, i32, i32
  }
  func.func @transform_5(%arg0: i32) -> (i32, i32, i32) {
    %c0_i32 = arith.constant 0 : i32
    %c0_i32_0 = arith.constant 0 : i32
    %c0_i32_1 = arith.constant 0 : i32
    %c0_i32_2 = arith.constant 0 : i32
    return %c0_i32, %c0_i32_0, %c0_i32_1 : i32, i32, i32
  }
  func.func @transform_6(%arg0: i32) -> (i32, i32, i32, i32) {
    %c0_i32 = arith.constant 0 : i32
    %c0_i32_0 = arith.constant 0 : i32
    %c0_i32_1 = arith.constant 0 : i32
    %c0_i32_2 = arith.constant 0 : i32
    %c0_i32_3 = arith.constant 0 : i32
    return %c0_i32, %c0_i32_0, %c0_i32_1, %c0_i32_2 : i32, i32, i32, i32
  }
}

</mosaic_0001>

<bundles_post_ra>
// kernel: tpu_custom_call.1
= control target key start
LH: loop header
LB: loop body
LE: loop exit
PB: predicated region body
PF: predicated region fallthrough
CT: control target
= control target key end

     0   :  { %s8154_s21 = smov 0   ;;  %s12167_s0 = inlined_call_operand.vmem [shape: f32[2,16,16,1], index: 0, kind: input, shape index: {}]   ;;  %s12168_s1 = inlined_call_operand.vmem [shape: bf16[9,64], index: 1, kind: input, shape index: {}]   ;;  %s12169_s2 = inlined_call_operand.vmem [shape: f32[1,64], index: 2, kind: input, shape index: {}]   ;;  %s12170_s3 = inlined_call_operand.vmem [shape: bf16[4,3,192,64], index: 3, kind: input, shape index: {}]   ;;  %s12171_s4 = inlined_call_operand.vmem [shape: f32[4,1,64], index: 4, kind: input, shape index: {}]   ;;  %s12172_s5 = inlined_call_operand.vmem [shape: bf16[3,192,1], index: 5, kind: input, shape index: {}]   ;;  %s12173_s6 = inlined_call_operand.vmem [shape: f32[2,16,16,1], index: 6, kind: output, shape index: {}]  }
   0x1 LB: > { %s8160_s22 = sadd.s32 4294967295, %s8107_s21   ;;  %p7410_p0 = scmp.ge.s32.totalorder %s8107_s21, 1  ;;  %s8107_s21 = sphi %s8154_s21, %s16_s21  }
   0x2   : > { %p255_p1 = scmp.lt.s32.totalorder %s8107_s21, 7 }
   0x4   : > { %p256_p2 = pnand %p7410_p0, %p255_p1 }
   0x5   : > { %s7411_s23 = sadd.s32 (!%p256_p2), 4294967295, %s8160_s22  ;;  %p7424_p6 = scmp.ne.s32.totalorder (!%p256_p2), %s8160_s22, 0 }
   0x6   : > { %259 = sbr.rel (%p256_p2) target bundleno = 2223 (0x8af), region = 44  ;;  %p294_p3 = scmp.gt.s32.totalorder (!%p256_p2), %s7411_s23, 0 }
   0x7   : > { %p7412_p4 = scmp.lt.s32.totalorder (!%p256_p2), %s7411_s23, 3 }
   0xb   : > { %s12315_s23 = smov (!%p294_p3, %s7411_s23), 0  ;;  %s8110_s19 = smov (!%p7424_p6), 1  }
   0xc   : > { %s12317_s23 = smov (!%p7412_p4, %s12315_s23), 3  ;;  %s8111_s20 = smov (!%p7424_p6), 2  }
   0xd   : > { %p298_p5 = scmp.lt.s32.totalorder %s12317_s23, 3  ;;  %s8114_s13 = smov (!%p7424_p6), 6  }
   0xe   : > { %325 = sbr.rel (%p7424_p6) target bundleno = 681 (0x2a9), region = 48 }
   0xf   : > { %s12319_s23 = smov (!%p298_p5, %s12317_s23), 3 }
  0x10   : > { %s7983_s24 = smul.u32 288, %s12319_s23  ;;  %s315_s27 = scalar_lea.vmem %s12171_s4, %s12319_s23 }
  0x12   : > { %s8175_s30 = scalar_lea.vmem %s12170_s3, %s7983_s24 }
  0x13   : > { %vm326_vm0 = vcmask 523264   ;;  %vm329_vm1 = vcmask 517120   ;;  %v438_v0 = vld [vmem:[%s12167_s0 + $0x10] sm:$0xff]  ;;  %v439_v1 = vld [vmem:[%s12167_s0 + $0x18] sm:$0xff]  ;;  %vm500_vm2 = vcmask 7168   ;;  %v8109_v2 = vmov 0.0  }
  0x14   : > { %334 = vst.msk [vmem:[#allocation2 + $0x30] sm:$0xff] %vm326_vm0, %v8109_v2  ;;  %335 = vst.msk [vmem:[#allocation2 + $0x38] sm:$0xff] %vm326_vm0, %v8109_v2  ;;  %v8191_v3 = vsel %vm500_vm2, %v438_v0, 0.0  ;;  %v8194_v4 = vsel %vm500_vm2, %v439_v1, 0.0  ;;  %v436_v5 = vld [vmem:[%s12167_s0] sm:$0xff]  ;;  %v437_v6 = vld [vmem:[%s12167_s0 + $0x8] sm:$0xff] }
  0x15   : > { %336 = vst.msk [vmem:[#allocation2 + $0x40] sm:$0x3] %vm329_vm1, %v8109_v2  ;;  %330 = vst.msk [vmem:[#allocation2 + $0x10] sm:$0x3] %vm329_vm1, %v8109_v2  ;;  %v470_v7 = vld [vmem:[%s12167_s0 + $0x110] sm:$0xff]  ;;  %v501_v8 = vsel %vm500_vm2, %v436_v5, 0.0 }
  0x16   : > { %327 = vst.msk [vmem:[#allocation2] sm:$0xff] %vm326_vm0, %v8109_v2  ;;  %328 = vst.msk [vmem:[#allocation2 + $0x8] sm:$0xff] %vm326_vm0, %v8109_v2  ;;  %v502_v9 = vsel %vm500_vm2, %v437_v6, 0.0  ;;  %v471_v10 = vld [vmem:[%s12167_s0 + $0x118] sm:$0xff]  ;;  %v535_v11 = vsel %vm500_vm2, %v470_v7, 0.0  ;;  %v468_v12 = vld [vmem:[%s12167_s0 + $0x100] sm:$0xff] }
  0x17   : > { %331 = vst.msk [vmem:[#allocation2 + $0x18] sm:$0xff] %vm326_vm0, %v8109_v2  ;;  %332 = vst.msk [vmem:[#allocation2 + $0x20] sm:$0xff] %vm326_vm0, %v8109_v2  ;;  %v469_v13 = vld [vmem:[%s12167_s0 + $0x108] sm:$0xff]  ;;  %v536_v14 = vsel %vm500_vm2, %v471_v10, 0.0  ;;  %v533_v15 = vsel %vm500_vm2, %v468_v12, 0.0  ;;  %v472_v17 = vld [vmem:[%s12167_s0 + $0x120] sm:$0xff] }
  0x18   : > { %333 = vst.msk [vmem:[#allocation2 + $0x28] sm:$0x3] %vm329_vm1, %v8109_v2  ;;  %339 = vst.msk [vmem:[#allocation2 + $0x58] sm:$0x3] %vm329_vm1, %v8109_v2  ;;  %v534_v16 = vsel %vm500_vm2, %v469_v13, 0.0  ;;  %v473_v18 = vld [vmem:[%s12167_s0 + $0x128] sm:$0xff] }
  0x19   : > { %337 = vst.msk [vmem:[#allocation2 + $0x48] sm:$0xff] %vm326_vm0, %v8109_v2  ;;  %338 = vst.msk [vmem:[#allocation2 + $0x50] sm:$0xff] %vm326_vm0, %v8109_v2  ;;  %v537_v19 = vsel %vm500_vm2, %v472_v17, 0.0  ;;  %v538_v20 = vsel %vm500_vm2, %v473_v18, 0.0  ;;  %v440_v21 = vld [vmem:[%s12167_s0 + $0x20] sm:$0xff]  ;;  %v441_v22 = vld [vmem:[%s12167_s0 + $0x28] sm:$0xff] }
  0x1a   : > { %340 = vst.msk [vmem:[#allocation2 + $0x60] sm:$0xff] %vm326_vm0, %v8109_v2  ;;  %341 = vst.msk [vmem:[#allocation2 + $0x68] sm:$0xff] %vm326_vm0, %v8109_v2  ;;  %v474_v23 = vld [vmem:[%s12167_s0 + $0x130] sm:$0xff]  ;;  %v505_v24 = vsel %vm500_vm2, %v440_v21, 0.0  ;;  %v506_v25 = vsel %vm500_vm2, %v441_v22, 0.0  ;;  %v475_v26 = vld [vmem:[%s12167_s0 + $0x138] sm:$0xff] }
  0x1b   : > { %342 = vst.msk [vmem:[#allocation2 + $0x70] sm:$0x3] %vm329_vm1, %v8109_v2  ;;  %345 = vst.msk [vmem:[#allocation2 + $0x88] sm:$0x3] %vm329_vm1, %v8109_v2  ;;  %v539_v27 = vsel %vm500_vm2, %v474_v23, 0.0  ;;  %v442_v28 = vld [vmem:[%s12167_s0 + $0x30] sm:$0xff] }
  0x1c   : > { %343 = vst.msk [vmem:[#allocation2 + $0x78] sm:$0xff] %vm326_vm0, %v8109_v2  ;;  %344 = vst.msk [vmem:[#allocation2 + $0x80] sm:$0xff] %vm326_vm0, %v8109_v2  ;;  %v443_v29 = vld [vmem:[%s12167_s0 + $0x38] sm:$0xff]  ;;  %v540_v30 = vsel %vm500_vm2, %v475_v26, 0.0  ;;  %v507_v31 = vsel %vm500_vm2, %v442_v28, 0.0  ;;  %v476_v33 = vld [vmem:[%s12167_s0 + $0x140] sm:$0xff] }
  0x1d   : > { %346 = vst.msk [vmem:[#allocation2 + $0x90] sm:$0xff] %vm326_vm0, %v8109_v2  ;;  %347 = vst.msk [vmem:[#allocation2 + $0x98] sm:$0xff] %vm326_vm0, %v8109_v2  ;;  %v508_v32 = vsel %vm500_vm2, %v443_v29, 0.0  ;;  %v477_v34 = vld [vmem:[%s12167_s0 + $0x148] sm:$0xff]  ;;  %v444_v35 = vld [vmem:[%s12167_s0 + $0x40] sm:$0xff]  ;;  %v541_v36 = vsel %vm500_vm2, %v476_v33, 0.0 }
  0x1e   : > { %348 = vst.msk [vmem:[#allocation2 + $0xa0] sm:$0x3] %vm329_vm1, %v8109_v2  ;;  %351 = vst.msk [vmem:[#allocation2 + $0xb8] sm:$0x3] %vm329_vm1, %v8109_v2  ;;  %v542_v37 = vsel %vm500_vm2, %v477_v34, 0.0  ;;  %v445_v38 = vld [vmem:[%s12167_s0 + $0x48] sm:$0xff] }
  0x1f   : > { %349 = vst.msk [vmem:[#allocation2 + $0xa8] sm:$0xff] %vm326_vm0, %v8109_v2  ;;  %350 = vst.msk [vmem:[#allocation2 + $0xb0] sm:$0xff] %vm326_vm0, %v8109_v2  ;;  %v509_v39 = vsel %vm500_vm2, %v444_v35, 0.0  ;;  %v478_v40 = vld [vmem:[%s12167_s0 + $0x150] sm:$0xff]  ;;  %v479_v41 = vld [vmem:[%s12167_s0 + $0x158] sm:$0xff]  ;;  %v510_v42 = vsel %vm500_vm2, %v445_v38, 0.0 }
  0x20   : > { %352 = vst.msk [vmem:[#allocation2 + $0xc0] sm:$0xff] %vm326_vm0, %v8109_v2  ;;  %353 = vst.msk [vmem:[#allocation2 + $0xc8] sm:$0xff] %vm326_vm0, %v8109_v2  ;;  %v543_v43 = vsel %vm500_vm2, %v478_v40, 0.0  ;;  %v544_v44 = vsel %vm500_vm2, %v479_v41, 0.0  ;;  %v446_v45 = vld [vmem:[%s12167_s0 + $0x50] sm:$0xff]  ;;  %v447_v46 = vld [vmem:[%s12167_s0 + $0x58] sm:$0xff] }
  0x21   : > { %354 = vst.msk [vmem:[#allocation2 + $0xd0] sm:$0x3] %vm329_vm1, %v8109_v2  ;;  %357 = vst.msk [vmem:[#allocation2 + $0xe8] sm:$0x3] %vm329_vm1, %v8109_v2  ;;  %v480_v47 = vld [vmem:[%s12167_s0 + $0x160] sm:$0xff]  ;;  %v511_v50 = vsel %vm500_vm2, %v446_v45, 0.0 }
  0x22   : > { %355 = vst.msk [vmem:[#allocation2 + $0xd8] sm:$0xff] %vm326_vm0, %v8109_v2  ;;  %356 = vst.msk [vmem:[#allocation2 + $0xe0] sm:$0xff] %vm326_vm0, %v8109_v2  ;;  %v512_v51 = vsel %vm500_vm2, %v447_v46, 0.0  ;;  %v545_v52 = vsel %vm500_vm2, %v480_v47, 0.0  ;;  %v448_v18 = vld [vmem:[%s12167_s0 + $0x60] sm:$0xff]  ;;  %v483_v28 = vld [vmem:[%s12167_s0 + $0x178] sm:$0xff] }
  0x23   : > { %358 = vst.msk [vmem:[#allocation2 + $0xf0] sm:$0xff] %vm326_vm0, %v8109_v2  ;;  %359 = vst.msk [vmem:[#allocation2 + $0xf8] sm:$0xff] %vm326_vm0, %v8109_v2  ;;  %v450_v33 = vld [vmem:[%s12167_s0 + $0x70] sm:$0xff]  ;;  %v451_v34 = vld [vmem:[%s12167_s0 + $0x78] sm:$0xff]  ;;  %vm1715_vm3 = vcmask 1043456   ;;  %vm1716_vm4 = vcmask 1044480  }
  0x24   : > { %360 = vst.msk [vmem:[#allocation2 + $0x100] sm:$0x3] %vm329_vm1, %v8109_v2  ;;  %363 = vst.msk [vmem:[#allocation2 + $0x118] sm:$0x3] %vm329_vm1, %v8109_v2  ;;  %v484_v35 = vld [vmem:[%s12167_s0 + $0x180] sm:$0xff]  ;;  %v516_v40 = vsel %vm500_vm2, %v451_v34, 0.0 }
  0x25   : > { %361 = vst.msk [vmem:[#allocation2 + $0x108] sm:$0xff] %vm326_vm0, %v8109_v2  ;;  %362 = vst.msk [vmem:[#allocation2 + $0x110] sm:$0xff] %vm326_vm0, %v8109_v2  ;;  %v485_v41 = vld [vmem:[%s12167_s0 + $0x188] sm:$0xff]  ;;  %vm1278_vm5 = vcmask 15360   ;;  %vm1513_vm6 = vcmask 23552   ;;  %vm1578_vm7 = vcmask 48128  }
  0x26   : > { %364 = vst.msk [vmem:[#allocation2 + $0x120] sm:$0xff] %vm326_vm0, %v8109_v2  ;;  %365 = vst.msk [vmem:[#allocation2 + $0x128] sm:$0xff] %vm326_vm0, %v8109_v2  ;;  %v550_v46 = vsel %vm500_vm2, %v485_v41, 0.0  ;;  %vm1650_vm8 = vcmask 72704  }
  0x27   : > { %366 = vst.msk [vmem:[#allocation2 + $0x130] sm:$0x3] %vm329_vm1, %v8109_v2  ;;  %369 = vst.msk [vmem:[#allocation2 + $0x148] sm:$0x3] %vm329_vm1, %v8109_v2 }
  0x28   : > { %367 = vst.msk [vmem:[#allocation2 + $0x138] sm:$0xff] %vm326_vm0, %v8109_v2  ;;  %368 = vst.msk [vmem:[#allocation2 + $0x140] sm:$0xff] %vm326_vm0, %v8109_v2 }
  0x29   : > { %370 = vst.msk [vmem:[#allocation2 + $0x150] sm:$0xff] %vm326_vm0, %v8109_v2  ;;  %371 = vst.msk [vmem:[#allocation2 + $0x158] sm:$0xff] %vm326_vm0, %v8109_v2 }
  0x2a   : > { %372 = vst.msk [vmem:[#allocation2 + $0x160] sm:$0x3] %vm329_vm1, %v8109_v2  ;;  %375 = vst.msk [vmem:[#allocation2 + $0x178] sm:$0x3] %vm329_vm1, %v8109_v2 }
  0x2b   : > { %373 = vst.msk [vmem:[#allocation2 + $0x168] sm:$0xff] %vm326_vm0, %v8109_v2  ;;  %374 = vst.msk [vmem:[#allocation2 + $0x170] sm:$0xff] %vm326_vm0, %v8109_v2 }
  0x2c   : > { %376 = vst.msk [vmem:[#allocation2 + $0x180] sm:$0xff] %vm326_vm0, %v8109_v2  ;;  %377 = vst.msk [vmem:[#allocation2 + $0x188] sm:$0xff] %vm326_vm0, %v8109_v2 }
  0x2d   : > { %378 = vst.msk [vmem:[#allocation2 + $0x190] sm:$0x3] %vm329_vm1, %v8109_v2  ;;  %381 = vst.msk [vmem:[#allocation2 + $0x1a8] sm:$0x3] %vm329_vm1, %v8109_v2 }
  0x2e   : > { %379 = vst.msk [vmem:[#allocation2 + $0x198] sm:$0xff] %vm326_vm0, %v8109_v2  ;;  %380 = vst.msk [vmem:[#allocation2 + $0x1a0] sm:$0xff] %vm326_vm0, %v8109_v2 }
  0x2f   : > { %382 = vst.msk [vmem:[#allocation2 + $0x1b0] sm:$0xff] %vm326_vm0, %v8109_v2  ;;  %383 = vst.msk [vmem:[#allocation2 + $0x1b8] sm:$0xff] %vm326_vm0, %v8109_v2 }
  0x30   : > { %384 = vst.msk [vmem:[#allocation2 + $0x1c0] sm:$0x3] %vm329_vm1, %v8109_v2  ;;  %387 = vst.msk [vmem:[#allocation2 + $0x1d8] sm:$0x3] %vm329_vm1, %v8109_v2 }
  0x31   : > { %385 = vst.msk [vmem:[#allocation2 + $0x1c8] sm:$0xff] %vm326_vm0, %v8109_v2  ;;  %386 = vst.msk [vmem:[#allocation2 + $0x1d0] sm:$0xff] %vm326_vm0, %v8109_v2 }
  0x32   : > { %388 = vst.msk [vmem:[#allocation2 + $0x1e0] sm:$0xff] %vm326_vm0, %v8109_v2  ;;  %389 = vst.msk [vmem:[#allocation2 + $0x1e8] sm:$0xff] %vm326_vm0, %v8109_v2 }
  0x33   : > { %390 = vst.msk [vmem:[#allocation2 + $0x1f0] sm:$0x3] %vm329_vm1, %v8109_v2  ;;  %393 = vst.msk [vmem:[#allocation2 + $0x208] sm:$0x3] %vm329_vm1, %v8109_v2 }
  0x34   : > { %391 = vst.msk [vmem:[#allocation2 + $0x1f8] sm:$0xff] %vm326_vm0, %v8109_v2  ;;  %392 = vst.msk [vmem:[#allocation2 + $0x200] sm:$0xff] %vm326_vm0, %v8109_v2 }
  0x35   : > { %394 = vst.msk [vmem:[#allocation2 + $0x210] sm:$0xff] %vm326_vm0, %v8109_v2  ;;  %395 = vst.msk [vmem:[#allocation2 + $0x218] sm:$0xff] %vm326_vm0, %v8109_v2 }
  0x36   : > { %396 = vst.msk [vmem:[#allocation2 + $0x220] sm:$0x3] %vm329_vm1, %v8109_v2  ;;  %399 = vst.msk [vmem:[#allocation2 + $0x238] sm:$0x3] %vm329_vm1, %v8109_v2 }
  0x37   : > { %397 = vst.msk [vmem:[#allocation2 + $0x228] sm:$0xff] %vm326_vm0, %v8109_v2  ;;  %398 = vst.msk [vmem:[#allocation2 + $0x230] sm:$0xff] %vm326_vm0, %v8109_v2 }
  0x38   : > { %400 = vst.msk [vmem:[#allocation2 + $0x240] sm:$0xff] %vm326_vm0, %v8109_v2  ;;  %401 = vst.msk [vmem:[#allocation2 + $0x248] sm:$0xff] %vm326_vm0, %v8109_v2 }
  0x39   : > { %402 = vst.msk [vmem:[#allocation2 + $0x250] sm:$0x3] %vm329_vm1, %v8109_v2  ;;  %405 = vst.msk [vmem:[#allocation2 + $0x268] sm:$0x3] %vm329_vm1, %v8109_v2 }
  0x3a   : > { %403 = vst.msk [vmem:[#allocation2 + $0x258] sm:$0xff] %vm326_vm0, %v8109_v2  ;;  %404 = vst.msk [vmem:[#allocation2 + $0x260] sm:$0xff] %vm326_vm0, %v8109_v2 }
  0x3b   : > { %406 = vst.msk [vmem:[#allocation2 + $0x270] sm:$0xff] %vm326_vm0, %v8109_v2  ;;  %407 = vst.msk [vmem:[#allocation2 + $0x278] sm:$0xff] %vm326_vm0, %v8109_v2 }
  0x3c   : > { %408 = vst.msk [vmem:[#allocation2 + $0x280] sm:$0x3] %vm329_vm1, %v8109_v2  ;;  %411 = vst.msk [vmem:[#allocation2 + $0x298] sm:$0x3] %vm329_vm1, %v8109_v2 }
  0x3d   : > { %409 = vst.msk [vmem:[#allocation2 + $0x288] sm:$0xff] %vm326_vm0, %v8109_v2  ;;  %410 = vst.msk [vmem:[#allocation2 + $0x290] sm:$0xff] %vm326_vm0, %v8109_v2 }
  0x3e   : > { %412 = vst.msk [vmem:[#allocation2 + $0x2a0] sm:$0xff] %vm326_vm0, %v8109_v2  ;;  %413 = vst.msk [vmem:[#allocation2 + $0x2a8] sm:$0xff] %vm326_vm0, %v8109_v2 }
  0x3f   : > { %414 = vst.msk [vmem:[#allocation2 + $0x2b0] sm:$0x3] %vm329_vm1, %v8109_v2  ;;  %417 = vst.msk [vmem:[#allocation2 + $0x2c8] sm:$0x3] %vm329_vm1, %v8109_v2 }
  0x40   : > { %415 = vst.msk [vmem:[#allocation2 + $0x2b8] sm:$0xff] %vm326_vm0, %v8109_v2  ;;  %416 = vst.msk [vmem:[#allocation2 + $0x2c0] sm:$0xff] %vm326_vm0, %v8109_v2 }
  0x41   : > { %418 = vst.msk [vmem:[#allocation2 + $0x2d0] sm:$0xff] %vm326_vm0, %v8109_v2  ;;  %419 = vst.msk [vmem:[#allocation2 + $0x2d8] sm:$0xff] %vm326_vm0, %v8109_v2 }
  0x42   : > { %420 = vst.msk [vmem:[#allocation2 + $0x2e0] sm:$0x3] %vm329_vm1, %v8109_v2  ;;  %423 = vst.msk [vmem:[#allocation2 + $0x2f8] sm:$0x3] %vm329_vm1, %v8109_v2 }
  0x43   : > { %421 = vst.msk [vmem:[#allocation2 + $0x2e8] sm:$0xff] %vm326_vm0, %v8109_v2  ;;  %422 = vst.msk [vmem:[#allocation2 + $0x2f0] sm:$0xff] %vm326_vm0, %v8109_v2 }
  0x44   : > { %424 = vst.msk [vmem:[#allocation2 + $0x300] sm:$0xff] %vm326_vm0, %v8109_v2  ;;  %425 = vst.msk [vmem:[#allocation2 + $0x308] sm:$0xff] %vm326_vm0, %v8109_v2 }
  0x45   : > { %426 = vst.msk [vmem:[#allocation2 + $0x310] sm:$0x3] %vm329_vm1, %v8109_v2  ;;  %429 = vst.msk [vmem:[#allocation2 + $0x328] sm:$0x3] %vm329_vm1, %v8109_v2 }
  0x46   : > { %427 = vst.msk [vmem:[#allocation2 + $0x318] sm:$0xff] %vm326_vm0, %v8109_v2  ;;  %428 = vst.msk [vmem:[#allocation2 + $0x320] sm:$0xff] %vm326_vm0, %v8109_v2 }
  0x47   : > { %430 = vst.msk [vmem:[#allocation2 + $0x330] sm:$0xff] %vm326_vm0, %v8109_v2  ;;  %431 = vst.msk [vmem:[#allocation2 + $0x338] sm:$0xff] %vm326_vm0, %v8109_v2 }
  0x48   : > { %432 = vst.msk [vmem:[#allocation2 + $0x340] sm:$0x3] %vm329_vm1, %v8109_v2  ;;  %435 = vst.msk [vmem:[#allocation2 + $0x358] sm:$0x3] %vm329_vm1, %v8109_v2 }
  0x49   : > { %433 = vst.msk [vmem:[#allocation2 + $0x348] sm:$0xff] %vm326_vm0, %v8109_v2  ;;  %434 = vst.msk [vmem:[#allocation2 + $0x350] sm:$0xff] %vm326_vm0, %v8109_v2 }
  0x4a   : > { %568 = vst.msk [vmem:[#allocation2 + $0x31] sm:$0xff] %vm326_vm0, %v8191_v3  ;;  %569 = vst.msk [vmem:[#allocation2 + $0x39] sm:$0xff] %vm326_vm0, %v8194_v4 }
  0x4b   : > { %566 = vst.msk [vmem:[#allocation2 + $0x19] sm:$0xff] %vm326_vm0, %v501_v8  ;;  %567 = vst.msk [vmem:[#allocation2 + $0x21] sm:$0xff] %vm326_vm0, %v502_v9 }
  0x4c   : > { %600 = vst.msk [vmem:[#allocation2 + $0x1e1] sm:$0xff] %vm326_vm0, %v535_v11  ;;  %601 = vst.msk [vmem:[#allocation2 + $0x1e9] sm:$0xff] %vm326_vm0, %v536_v14 }
  0x4d   : > { %598 = vst.msk [vmem:[#allocation2 + $0x1c9] sm:$0xff] %vm326_vm0, %v533_v15  ;;  %599 = vst.msk [vmem:[#allocation2 + $0x1d1] sm:$0xff] %vm326_vm0, %v534_v16  ;;  %v481_v15 = vld [vmem:[%s12167_s0 + $0x168] sm:$0xff] }
  0x4e   : > { %602 = vst.msk [vmem:[#allocation2 + $0x1f9] sm:$0xff] %vm326_vm0, %v537_v19  ;;  %603 = vst.msk [vmem:[#allocation2 + $0x201] sm:$0xff] %vm326_vm0, %v538_v20  ;;  %v546_v17 = vsel %vm500_vm2, %v481_v15, 0.0  ;;  %v449_v19 = vld [vmem:[%s12167_s0 + $0x68] sm:$0xff] }
  0x4f   : > { %570 = vst.msk [vmem:[#allocation2 + $0x49] sm:$0xff] %vm326_vm0, %v505_v24  ;;  %571 = vst.msk [vmem:[#allocation2 + $0x51] sm:$0xff] %vm326_vm0, %v506_v25  ;;  %v513_v24 = vsel %vm500_vm2, %v448_v18, 0.0  ;;  %v514_v25 = vsel %vm500_vm2, %v449_v19, 0.0 }
  0x50   : > { %604 = vst.msk [vmem:[#allocation2 + $0x211] sm:$0xff] %vm326_vm0, %v539_v27  ;;  %605 = vst.msk [vmem:[#allocation2 + $0x219] sm:$0xff] %vm326_vm0, %v540_v30  ;;  %v482_v27 = vld [vmem:[%s12167_s0 + $0x170] sm:$0xff] }
  0x51   : > { %572 = vst.msk [vmem:[#allocation2 + $0x61] sm:$0xff] %vm326_vm0, %v507_v31  ;;  %573 = vst.msk [vmem:[#allocation2 + $0x69] sm:$0xff] %vm326_vm0, %v508_v32  ;;  %v742_v48 = vld [vmem:[#allocation2 + $0x31] sm:$0xff]  ;;  %v743_v49 = vld [vmem:[#allocation2 + $0x39] sm:$0xff]  ;;  %v547_v31 = vsel %vm500_vm2, %v482_v27, 0.0  ;;  %v548_v32 = vsel %vm500_vm2, %v483_v28, 0.0 }
  0x52   : > { %606 = vst.msk [vmem:[#allocation2 + $0x229] sm:$0xff] %vm326_vm0, %v541_v36  ;;  %607 = vst.msk [vmem:[#allocation2 + $0x231] sm:$0xff] %vm326_vm0, %v542_v37  ;;  %v812_v53 = vpack.c.bf16 %v743_v49, %v742_v48  ;;  %v740_v54 = vld [vmem:[#allocation2 + $0x19] sm:$0xff]  ;;  %v741_v55 = vld [vmem:[#allocation2 + $0x21] sm:$0xff] }
  0x53   : > { %574 = vst.msk [vmem:[#allocation2 + $0x79] sm:$0xff] %vm326_vm0, %v509_v39  ;;  %575 = vst.msk [vmem:[#allocation2 + $0x81] sm:$0xff] %vm326_vm0, %v510_v42  ;;  %v778_v56 = vld [vmem:[#allocation2 + $0x1e1] sm:$0xff]  ;;  %v811_v57 = vpack.c.bf16 %v741_v55, %v740_v54  ;;  %v779_v58 = vld [vmem:[#allocation2 + $0x1e9] sm:$0xff]  ;;  %v515_v39 = vsel %vm500_vm2, %v450_v33, 0.0  ;;  %v549_v42 = vsel %vm500_vm2, %v484_v35, 0.0 }
  0x54   : > { %608 = vst.msk [vmem:[#allocation2 + $0x241] sm:$0xff] %vm326_vm0, %v543_v43  ;;  %609 = vst.msk [vmem:[#allocation2 + $0x249] sm:$0xff] %vm326_vm0, %v544_v44  ;;  %v776_v59 = vld [vmem:[#allocation2 + $0x1c9] sm:$0xff]  ;;  %v777_v60 = vld [vmem:[#allocation2 + $0x1d1] sm:$0xff]  ;;  %994 = vrot.lane.b32.xlu1 %v812_v53, %s8110_s19  ;;  %v830_v61 = vpack.c.bf16 %v779_v58, %v778_v56 }
  0x55   : > { %576 = vst.msk [vmem:[#allocation2 + $0x91] sm:$0xff] %vm326_vm0, %v511_v50  ;;  %577 = vst.msk [vmem:[#allocation2 + $0x99] sm:$0xff] %vm326_vm0, %v512_v51  ;;  %992 = vrot.lane.b32.xlu0 %v811_v57, %s8110_s19  ;;  %v829_v62 = vpack.c.bf16 %v777_v60, %v776_v59  ;;  %v884_v63 = vld [vmem:[#allocation2 + $0x1ca] sm:$0xff]  ;;  %v885_v0 = vld [vmem:[#allocation2 + $0x1d2] sm:$0xff] }
  0x56   : > { %610 = vst.msk [vmem:[#allocation2 + $0x259] sm:$0xff] %vm326_vm0, %v545_v52  ;;  %v848_v1 = vld [vmem:[#allocation2 + $0x1a] sm:$0xff]  ;;  %v849_v2 = vld [vmem:[#allocation2 + $0x22] sm:$0xff]  ;;  %v937_v3 = vpack.c.bf16 %v885_v0, %v884_v63  ;;  %v745_v8 = vld [vmem:[#allocation2 + $0x51] sm:$0xff] }
  0x57   : > { %v919_v4 = vpack.c.bf16 %v849_v2, %v848_v1  ;;  %v780_v5 = vld [vmem:[#allocation2 + $0x1f9] sm:$0xff]  ;;  %v781_v6 = vld [vmem:[#allocation2 + $0x201] sm:$0xff]  ;;  %v744_v7 = vld [vmem:[#allocation2 + $0x49] sm:$0xff]  ;;  %611 = vst.msk [vmem:[#allocation2 + $0x261] sm:$0xff] %vm326_vm0, %v546_v17 }
  0x58   : > { %1030 = vrot.lane.b32.xlu1 %v830_v61, %s8110_s19  ;;  %v831_v9 = vpack.c.bf16 %v781_v6, %v780_v5  ;;  %v813_v10 = vpack.c.bf16 %v745_v8, %v744_v7  ;;  %v886_v11 = vld [vmem:[#allocation2 + $0x1e2] sm:$0xff]  ;;  %v887_v12 = vld [vmem:[#allocation2 + $0x1ea] sm:$0xff]  ;;  %v850_v13 = vld [vmem:[#allocation2 + $0x32] sm:$0xff]  ;;  %578 = vst.msk [vmem:[#allocation2 + $0xa9] sm:$0xff] %vm326_vm0, %v513_v24 }
  0x59   : > { %1028 = vrot.lane.b32.xlu0 %v829_v62, %s8110_s19  ;;  %v851_v14 = vld [vmem:[#allocation2 + $0x3a] sm:$0xff]  ;;  %v938_v16 = vpack.c.bf16 %v887_v12, %v886_v11  ;;  %v889_v22 = vld [vmem:[#allocation2 + $0x202] sm:$0xff]  ;;  %v8543_v23 = vld [vmem:[#allocation2 + $0x4a] sm:$0xff]  ;;  %579 = vst.msk [vmem:[#allocation2 + $0xb1] sm:$0xff] %vm326_vm0, %v514_v25 }
  0x5a   : > { %v920_v20 = vpack.c.bf16 %v851_v14, %v850_v13  ;;  %v888_v21 = vld [vmem:[#allocation2 + $0x1fa] sm:$0xff]  ;;  %v853_v26 = vld [vmem:[#allocation2 + $0x52] sm:$0xff]  ;;  %v8574_v38 = vld [vmem:[#allocation2 + $0x69] sm:$0xff]  ;;  %612 = vst.msk [vmem:[#allocation2 + $0x271] sm:$0xff] %vm326_vm0, %v547_v31 }
  0x5b   : > { %v8556_v29 = vld [vmem:[#allocation2 + $0x211] sm:$0xff]  ;;  %v8558_v30 = vld [vmem:[#allocation2 + $0x219] sm:$0xff]  ;;  %v939_v36 = vpack.c.bf16 %v889_v22, %v888_v21  ;;  %v8572_v37 = vld [vmem:[#allocation2 + $0x61] sm:$0xff]  ;;  %613 = vst.msk [vmem:[#allocation2 + $0x279] sm:$0xff] %vm326_vm0, %v548_v32  ;;  %v921_v45 = vpack.c.bf16 %v853_v26, %v8543_v23 }
  0x5c   : > { %1136 = vrot.lane.b32.xlu1 %v937_v3, %s8111_s20  ;;  %v452_v43 = vld [vmem:[%s12167_s0 + $0x80] sm:$0xff]  ;;  %v453_v44 = vld [vmem:[%s12167_s0 + $0x88] sm:$0xff]  ;;  %580 = vst.msk [vmem:[#allocation2 + $0xc1] sm:$0xff] %vm326_vm0, %v515_v39  ;;  %581 = vst.msk [vmem:[#allocation2 + $0xc9] sm:$0xff] %vm326_vm0, %v516_v40  ;;  %v832_v0 = vpack.c.bf16 %v8558_v30, %v8556_v29 }
  0x5d   : > { %1100 = vrot.lane.b32.xlu0 %v919_v4, %s8111_s20  ;;  %614 = vst.msk [vmem:[#allocation2 + $0x289] sm:$0xff] %vm326_vm0, %v549_v42  ;;  %v517_v47 = vsel %vm500_vm2, %v452_v43, 0.0  ;;  %v518_v48 = vsel %vm500_vm2, %v453_v44, 0.0  ;;  %v486_v49 = vld [vmem:[%s12167_s0 + $0x190] sm:$0xff]  ;;  %v487_v50 = vld [vmem:[%s12167_s0 + $0x198] sm:$0xff]  ;;  %615 = vst.msk [vmem:[#allocation2 + $0x291] sm:$0xff] %vm326_vm0, %v550_v46  ;;  %v814_v4 = vpack.c.bf16 %v8574_v38, %v8572_v37 }
  0x5e   : > { %v454_v51 = vld [vmem:[%s12167_s0 + $0x90] sm:$0xff]  ;;  %582 = vst.msk [vmem:[#allocation2 + $0xd9] sm:$0xff] %vm326_vm0, %v517_v47  ;;  %583 = vst.msk [vmem:[#allocation2 + $0xe1] sm:$0xff] %vm326_vm0, %v518_v48  ;;  %v551_v52 = vsel %vm500_vm2, %v486_v49, 0.0  ;;  %v552_v53 = vsel %vm500_vm2, %v487_v50, 0.0  ;;  %v455_v54 = vld [vmem:[%s12167_s0 + $0x98] sm:$0xff] }
  0x5f   : > { %v519_v55 = vsel %vm500_vm2, %v454_v51, 0.0  ;;  %v488_v56 = vld [vmem:[%s12167_s0 + $0x1a0] sm:$0xff]  ;;  %v489_v57 = vld [vmem:[%s12167_s0 + $0x1a8] sm:$0xff]  ;;  %616 = vst.msk [vmem:[#allocation2 + $0x2a1] sm:$0xff] %vm326_vm0, %v551_v52  ;;  %617 = vst.msk [vmem:[#allocation2 + $0x2a9] sm:$0xff] %vm326_vm0, %v552_v53  ;;  %v520_v58 = vsel %vm500_vm2, %v455_v54, 0.0 }
  0x60   : > { %1032 = vrot.lane.b32.xlu1 %v831_v9, %s8110_s19  ;;  %584 = vst.msk [vmem:[#allocation2 + $0xf1] sm:$0xff] %vm326_vm0, %v519_v55  ;;  %v553_v59 = vsel %vm500_vm2, %v488_v56, 0.0  ;;  %v554_v60 = vsel %vm500_vm2, %v489_v57, 0.0  ;;  %v456_v61 = vld [vmem:[%s12167_s0 + $0xa0] sm:$0xff]  ;;  %v457_v62 = vld [vmem:[%s12167_s0 + $0xa8] sm:$0xff]  ;;  %v490_v63 = vld [vmem:[%s12167_s0 + $0x1b0] sm:$0xff] }
  0x61   : > { %996 = vrot.lane.b32.xlu0 %v813_v10, %s8110_s19  ;;  %585 = vst.msk [vmem:[#allocation2 + $0xf9] sm:$0xff] %vm326_vm0, %v520_v58  ;;  %618 = vst.msk [vmem:[#allocation2 + $0x2b9] sm:$0xff] %vm326_vm0, %v553_v59  ;;  %v521_v1 = vsel %vm500_vm2, %v456_v61, 0.0  ;;  %v522_v2 = vsel %vm500_vm2, %v457_v62, 0.0  ;;  %v555_v3 = vsel %vm500_vm2, %v490_v63, 0.0  ;;  %v784_v5 = vld [vmem:[#allocation2 + $0x229] sm:$0xff] }
  0x62   : > { %619 = vst.msk [vmem:[#allocation2 + $0x2c1] sm:$0xff] %vm326_vm0, %v554_v60  ;;  %v785_v6 = vld [vmem:[#allocation2 + $0x231] sm:$0xff]  ;;  %v748_v7 = vld [vmem:[#allocation2 + $0x79] sm:$0xff]  ;;  %586 = vst.msk [vmem:[#allocation2 + $0x109] sm:$0xff] %vm326_vm0, %v521_v1 }
  0x63   : > { %587 = vst.msk [vmem:[#allocation2 + $0x111] sm:$0xff] %vm326_vm0, %v522_v2  ;;  %620 = vst.msk [vmem:[#allocation2 + $0x2d1] sm:$0xff] %vm326_vm0, %v555_v3  ;;  %v749_v8 = vld [vmem:[#allocation2 + $0x81] sm:$0xff]  ;;  %v491_v9 = vld [vmem:[%s12167_s0 + $0x1b8] sm:$0xff]  ;;  %v833_v13 = vpack.c.bf16 %v785_v6, %v784_v5 }
  0x64   : > { %1138 = vrot.lane.b32.xlu1 %v938_v16, %s8111_s20  ;;  %v458_v10 = vld [vmem:[%s12167_s0 + $0xb0] sm:$0xff]  ;;  %v556_v11 = vsel %vm500_vm2, %v491_v9, 0.0  ;;  %v815_v14 = vpack.c.bf16 %v749_v8, %v748_v7  ;;  %v891_v16 = vld [vmem:[#allocation2 + $0x21a] sm:$0xff]  ;;  %v854_v17 = vld [vmem:[#allocation2 + $0x62] sm:$0xff] }
  0x65   : > { %1102 = vrot.lane.b32.xlu0 %v920_v20, %s8111_s20  ;;  %v523_v12 = vsel %vm500_vm2, %v458_v10, 0.0  ;;  %621 = vst.msk [vmem:[#allocation2 + $0x2d9] sm:$0xff] %vm326_vm0, %v556_v11  ;;  %v890_v15 = vld [vmem:[#allocation2 + $0x212] sm:$0xff]  ;;  %v855_v18 = vld [vmem:[#allocation2 + $0x6a] sm:$0xff]  ;;  %v856_v23 = vld [vmem:[#allocation2 + $0x7a] sm:$0xff] }
  0x66   : > { %588 = vst.msk [vmem:[#allocation2 + $0x121] sm:$0xff] %vm326_vm0, %v523_v12  ;;  %v940_v19 = vpack.c.bf16 %v891_v16, %v890_v15  ;;  %v922_v20 = vpack.c.bf16 %v855_v18, %v854_v17  ;;  %v892_v21 = vld [vmem:[#allocation2 + $0x22a] sm:$0xff]  ;;  %v893_v22 = vld [vmem:[#allocation2 + $0x232] sm:$0xff]  ;;  %v857_v24 = vld [vmem:[#allocation2 + $0x82] sm:$0xff] }
  0x67   : > { %v941_v25 = vpack.c.bf16 %v893_v22, %v892_v21  ;;  %v923_v26 = vpack.c.bf16 %v857_v24, %v856_v23  ;;  %v786_v27 = vld [vmem:[#allocation2 + $0x241] sm:$0xff]  ;;  %v787_v28 = vld [vmem:[#allocation2 + $0x249] sm:$0xff]  ;;  %v750_v29 = vld [vmem:[#allocation2 + $0x91] sm:$0xff] }
  0x68   : > { %1140 = vrot.lane.b32.xlu1 %v939_v36, %s8111_s20  ;;  %v751_v30 = vld [vmem:[#allocation2 + $0x99] sm:$0xff]  ;;  %v789_v33 = vld [vmem:[#allocation2 + $0x261] sm:$0xff]  ;;  %v834_v38 = vpack.c.bf16 %v787_v28, %v786_v27  ;;  %v752_v39 = vld [vmem:[#allocation2 + $0xa9] sm:$0xff] }
  0x69   : > { %1104 = vrot.lane.b32.xlu0 %v921_v45, %s8111_s20  ;;  %v459_v31 = vld [vmem:[%s12167_s0 + $0xb8] sm:$0xff]  ;;  %v492_v35 = vld [vmem:[%s12167_s0 + $0x1c0] sm:$0xff]  ;;  %v493_v36 = vld [vmem:[%s12167_s0 + $0x1c8] sm:$0xff]  ;;  %v816_v45 = vpack.c.bf16 %v751_v30, %v750_v29 }
  0x6a   : > { %v788_v32 = vld [vmem:[#allocation2 + $0x259] sm:$0xff]  ;;  %v524_v34 = vsel %vm500_vm2, %v459_v31, 0.0  ;;  %v753_v40 = vld [vmem:[#allocation2 + $0xb1] sm:$0xff]  ;;  %v557_v41 = vsel %vm500_vm2, %v492_v35, 0.0  ;;  %v558_v42 = vsel %vm500_vm2, %v493_v36, 0.0  ;;  %v461_v43 = vld [vmem:[%s12167_s0 + $0xc8] sm:$0xff] }
  0x6b   : > { %v460_v37 = vld [vmem:[%s12167_s0 + $0xc0] sm:$0xff]  ;;  %589 = vst.msk [vmem:[#allocation2 + $0x129] sm:$0xff] %vm326_vm0, %v524_v34  ;;  %622 = vst.msk [vmem:[#allocation2 + $0x2e9] sm:$0xff] %vm326_vm0, %v557_v41  ;;  %v526_v46 = vsel %vm500_vm2, %v461_v43, 0.0  ;;  %v494_v47 = vld [vmem:[%s12167_s0 + $0x1d0] sm:$0xff]  ;;  %v835_v61 = vpack.c.bf16 %v789_v33, %v788_v32 }
  0x6c   : > { %1034 = vrot.lane.b32.xlu1 %v832_v0, %s8110_s19  ;;  %v525_v44 = vsel %vm500_vm2, %v460_v37, 0.0  ;;  %623 = vst.msk [vmem:[#allocation2 + $0x2f1] sm:$0xff] %vm326_vm0, %v558_v42  ;;  %v495_v48 = vld [vmem:[%s12167_s0 + $0x1d8] sm:$0xff]  ;;  %v462_v49 = vld [vmem:[%s12167_s0 + $0xd0] sm:$0xff]  ;;  %591 = vst.msk [vmem:[#allocation2 + $0x141] sm:$0xff] %vm326_vm0, %v526_v46  ;;  %v559_v50 = vsel %vm500_vm2, %v494_v47, 0.0  ;;  %v817_v0 = vpack.c.bf16 %v753_v40, %v752_v39 }
  0x6d   : > { %998 = vrot.lane.b32.xlu0 %v814_v4, %s8110_s19  ;;  %590 = vst.msk [vmem:[#allocation2 + $0x139] sm:$0xff] %vm326_vm0, %v525_v44  ;;  %v560_v51 = vsel %vm500_vm2, %v495_v48, 0.0  ;;  %v463_v52 = vld [vmem:[%s12167_s0 + $0xd8] sm:$0xff]  ;;  %v527_v53 = vsel %vm500_vm2, %v462_v49, 0.0  ;;  %v496_v54 = vld [vmem:[%s12167_s0 + $0x1e0] sm:$0xff]  ;;  %v497_v55 = vld [vmem:[%s12167_s0 + $0x1e8] sm:$0xff] }
  0x6e   : > { %624 = vst.msk [vmem:[#allocation2 + $0x301] sm:$0xff] %vm326_vm0, %v559_v50  ;;  %625 = vst.msk [vmem:[#allocation2 + $0x309] sm:$0xff] %vm326_vm0, %v560_v51  ;;  %v528_v56 = vsel %vm500_vm2, %v463_v52, 0.0  ;;  %v561_v57 = vsel %vm500_vm2, %v496_v54, 0.0  ;;  %v562_v58 = vsel %vm500_vm2, %v497_v55, 0.0  ;;  %v464_v59 = vld [vmem:[%s12167_s0 + $0xe0] sm:$0xff] }
  0x6f   : > { %592 = vst.msk [vmem:[#allocation2 + $0x151] sm:$0xff] %vm326_vm0, %v527_v53  ;;  %v465_v60 = vld [vmem:[%s12167_s0 + $0xe8] sm:$0xff]  ;;  %593 = vst.msk [vmem:[#allocation2 + $0x159] sm:$0xff] %vm326_vm0, %v528_v56  ;;  %v529_v62 = vsel %vm500_vm2, %v464_v59, 0.0  ;;  %v858_v3 = vld [vmem:[#allocation2 + $0x92] sm:$0xff] }
  0x70   : > { %1036 = vrot.lane.b32.xlu1 %v833_v13, %s8110_s19  ;;  %626 = vst.msk [vmem:[#allocation2 + $0x319] sm:$0xff] %vm326_vm0, %v561_v57  ;;  %627 = vst.msk [vmem:[#allocation2 + $0x321] sm:$0xff] %vm326_vm0, %v562_v58  ;;  %v530_v63 = vsel %vm500_vm2, %v465_v60, 0.0  ;;  %v894_v1 = vld [vmem:[#allocation2 + $0x242] sm:$0xff]  ;;  %v895_v2 = vld [vmem:[#allocation2 + $0x24a] sm:$0xff] }
  0x71   : > { %1000 = vrot.lane.b32.xlu0 %v815_v14, %s8110_s19  ;;  %594 = vst.msk [vmem:[#allocation2 + $0x169] sm:$0xff] %vm326_vm0, %v529_v62  ;;  %595 = vst.msk [vmem:[#allocation2 + $0x171] sm:$0xff] %vm326_vm0, %v530_v63  ;;  %v859_v4 = vld [vmem:[#allocation2 + $0x9a] sm:$0xff]  ;;  %v498_v5 = vld [vmem:[%s12167_s0 + $0x1f0] sm:$0xff]  ;;  %v942_v9 = vpack.c.bf16 %v895_v2, %v894_v1 }
  0x72   : > { %v499_v6 = vld [vmem:[%s12167_s0 + $0x1f8] sm:$0xff]  ;;  %v563_v7 = vsel %vm500_vm2, %v498_v5, 0.0  ;;  %v924_v10 = vpack.c.bf16 %v859_v4, %v858_v3  ;;  %v897_v12 = vld [vmem:[#allocation2 + $0x262] sm:$0xff]  ;;  %v860_v13 = vld [vmem:[#allocation2 + $0xaa] sm:$0xff] }
  0x73   : > { %v564_v8 = vsel %vm500_vm2, %v499_v6, 0.0  ;;  %628 = vst.msk [vmem:[#allocation2 + $0x331] sm:$0xff] %vm326_vm0, %v563_v7  ;;  %v896_v11 = vld [vmem:[#allocation2 + $0x25a] sm:$0xff]  ;;  %v861_v14 = vld [vmem:[#allocation2 + $0xb2] sm:$0xff]  ;;  %v792_v24 = vld [vmem:[#allocation2 + $0x289] sm:$0xff] }
  0x74   : > { %1142 = vrot.lane.b32.xlu1 %v940_v19, %s8111_s20  ;;  %629 = vst.msk [vmem:[#allocation2 + $0x339] sm:$0xff] %vm326_vm0, %v564_v8  ;;  %v943_v15 = vpack.c.bf16 %v897_v12, %v896_v11  ;;  %v925_v16 = vpack.c.bf16 %v861_v14, %v860_v13  ;;  %v790_v17 = vld [vmem:[#allocation2 + $0x271] sm:$0xff]  ;;  %v791_v18 = vld [vmem:[#allocation2 + $0x279] sm:$0xff]  ;;  %v754_v19 = vld [vmem:[#allocation2 + $0xc1] sm:$0xff] }
  0x75   : > { %1106 = vrot.lane.b32.xlu0 %v922_v20, %s8111_s20  ;;  %v755_v20 = vld [vmem:[#allocation2 + $0xc9] sm:$0xff]  ;;  %v836_v21 = vpack.c.bf16 %v791_v18, %v790_v17  ;;  %v756_v28 = vld [vmem:[#allocation2 + $0xd9] sm:$0xff]  ;;  %v757_v29 = vld [vmem:[#allocation2 + $0xe1] sm:$0xff] }
  0x76   : > { %v466_v22 = vld [vmem:[%s12167_s0 + $0xf0] sm:$0xff]  ;;  %v818_v23 = vpack.c.bf16 %v755_v20, %v754_v19  ;;  %v819_v32 = vpack.c.bf16 %v757_v29, %v756_v28  ;;  %v899_v34 = vld [vmem:[#allocation2 + $0x27a] sm:$0xff]  ;;  %v862_v35 = vld [vmem:[#allocation2 + $0xc2] sm:$0xff] }
  0x77   : > { %v531_v27 = vsel %vm500_vm2, %v466_v22, 0.0  ;;  %v898_v33 = vld [vmem:[#allocation2 + $0x272] sm:$0xff]  ;;  %v863_v36 = vld [vmem:[#allocation2 + $0xca] sm:$0xff]  ;;  %v864_v41 = vld [vmem:[#allocation2 + $0xda] sm:$0xff] }
  0x78   : > { %1144 = vrot.lane.b32.xlu1 %v941_v25, %s8111_s20  ;;  %v793_v25 = vld [vmem:[#allocation2 + $0x291] sm:$0xff]  ;;  %596 = vst.msk [vmem:[#allocation2 + $0x181] sm:$0xff] %vm326_vm0, %v531_v27  ;;  %v944_v37 = vpack.c.bf16 %v899_v34, %v898_v33  ;;  %v865_v42 = vld [vmem:[#allocation2 + $0xe2] sm:$0xff]  ;;  %v759_v48 = vld [vmem:[#allocation2 + $0xf9] sm:$0xff] }
  0x79   : > { %1108 = vrot.lane.b32.xlu0 %v923_v26, %s8111_s20  ;;  %v467_v26 = vld [vmem:[%s12167_s0 + $0xf8] sm:$0xff]  ;;  %v837_v31 = vpack.c.bf16 %v793_v25, %v792_v24  ;;  %v900_v39 = vld [vmem:[#allocation2 + $0x28a] sm:$0xff]  ;;  %v927_v44 = vpack.c.bf16 %v865_v42, %v864_v41  ;;  %v797_v52 = vld [vmem:[#allocation2 + $0x2c1] sm:$0xff] }
  0x7a   : > { %v532_v30 = vsel %vm500_vm2, %v467_v26, 0.0  ;;  %v901_v40 = vld [vmem:[#allocation2 + $0x292] sm:$0xff]  ;;  %v795_v46 = vld [vmem:[#allocation2 + $0x2a9] sm:$0xff]  ;;  %v867_v60 = vld [vmem:[#allocation2 + $0xfa] sm:$0xff] }
  0x7b   : > { %597 = vst.msk [vmem:[#allocation2 + $0x189] sm:$0xff] %vm326_vm0, %v532_v30  ;;  %v945_v43 = vpack.c.bf16 %v901_v40, %v900_v39  ;;  %v758_v47 = vld [vmem:[#allocation2 + $0xf1] sm:$0xff]  ;;  %v796_v51 = vld [vmem:[#allocation2 + $0x2b9] sm:$0xff]  ;;  %v760_v53 = vld [vmem:[#allocation2 + $0x109] sm:$0xff] }
  0x7c   : > { %1038 = vrot.lane.b32.xlu1 %v834_v38, %s8110_s19  ;;  %v926_v38 = vpack.c.bf16 %v863_v36, %v862_v35  ;;  %v820_v50 = vpack.c.bf16 %v759_v48, %v758_v47  ;;  %v761_v54 = vld [vmem:[#allocation2 + $0x111] sm:$0xff]  ;;  %v839_v55 = vpack.c.bf16 %v797_v52, %v796_v51  ;;  %v902_v57 = vld [vmem:[#allocation2 + $0x2a2] sm:$0xff]  ;;  %v904_v63 = vld [vmem:[#allocation2 + $0x2ba] sm:$0xff] }
  0x7d   : > { %1002 = vrot.lane.b32.xlu0 %v816_v45, %s8110_s19  ;;  %v794_v45 = vld [vmem:[#allocation2 + $0x2a1] sm:$0xff]  ;;  %v821_v56 = vpack.c.bf16 %v761_v54, %v760_v53  ;;  %v903_v58 = vld [vmem:[#allocation2 + $0x2aa] sm:$0xff]  ;;  %v866_v59 = vld [vmem:[#allocation2 + $0xf2] sm:$0xff] }
  0x7e   : > { %v838_v49 = vpack.c.bf16 %v795_v46, %v794_v45  ;;  %v928_v62 = vpack.c.bf16 %v867_v60, %v866_v59  ;;  %v868_v1 = vld [vmem:[#allocation2 + $0x10a] sm:$0xff]  ;;  %v869_v2 = vld [vmem:[#allocation2 + $0x112] sm:$0xff]  ;;  %v762_v7 = vld [vmem:[#allocation2 + $0x121] sm:$0xff] }
  0x7f   : > { %v929_v4 = vpack.c.bf16 %v869_v2, %v868_v1  ;;  %v798_v5 = vld [vmem:[#allocation2 + $0x2d1] sm:$0xff]  ;;  %v799_v6 = vld [vmem:[#allocation2 + $0x2d9] sm:$0xff]  ;;  %v763_v8 = vld [vmem:[#allocation2 + $0x129] sm:$0xff] }
  0x80   : > { %1040 = vrot.lane.b32.xlu1 %v835_v61, %s8110_s19  ;;  %v946_v61 = vpack.c.bf16 %v903_v58, %v902_v57  ;;  %v800_v11 = vld [vmem:[#allocation2 + $0x2e9] sm:$0xff]  ;;  %v801_v12 = vld [vmem:[#allocation2 + $0x2f1] sm:$0xff]  ;;  %v764_v13 = vld [vmem:[#allocation2 + $0x139] sm:$0xff] }
  0x81   : > { %1004 = vrot.lane.b32.xlu0 %v817_v0, %s8110_s19  ;;  %v905_v0 = vld [vmem:[#allocation2 + $0x2c2] sm:$0xff]  ;;  %v906_v17 = vld [vmem:[#allocation2 + $0x2d2] sm:$0xff]  ;;  %v907_v18 = vld [vmem:[#allocation2 + $0x2da] sm:$0xff] }
  0x82   : > { %v947_v3 = vpack.c.bf16 %v905_v0, %v904_v63  ;;  %v765_v14 = vld [vmem:[#allocation2 + $0x141] sm:$0xff]  ;;  %v871_v20 = vld [vmem:[#allocation2 + $0x12a] sm:$0xff]  ;;  %v909_v24 = vld [vmem:[#allocation2 + $0x2f2] sm:$0xff] }
  0x83   : > { %v870_v19 = vld [vmem:[#allocation2 + $0x122] sm:$0xff]  ;;  %v872_v25 = vld [vmem:[#allocation2 + $0x13a] sm:$0xff]  ;;  %v911_v42 = vld [vmem:[#allocation2 + $0x30a] sm:$0xff] }
  0x84   : > { %1146 = vrot.lane.b32.xlu1 %v942_v9, %s8111_s20  ;;  %v840_v9 = vpack.c.bf16 %v799_v6, %v798_v5  ;;  %v930_v22 = vpack.c.bf16 %v871_v20, %v870_v19  ;;  %v873_v26 = vld [vmem:[#allocation2 + $0x142] sm:$0xff]  ;;  %v804_v35 = vld [vmem:[#allocation2 + $0x319] sm:$0xff]  ;;  %v806_v53 = vld [vmem:[#allocation2 + $0x331] sm:$0xff] }
  0x85   : > { %1110 = vrot.lane.b32.xlu0 %v924_v10, %s8111_s20  ;;  %v822_v10 = vpack.c.bf16 %v763_v8, %v762_v7  ;;  %v931_v28 = vpack.c.bf16 %v873_v26, %v872_v25  ;;  %v802_v29 = vld [vmem:[#allocation2 + $0x301] sm:$0xff]  ;;  %v803_v30 = vld [vmem:[#allocation2 + $0x309] sm:$0xff]  ;;  %v807_v54 = vld [vmem:[#allocation2 + $0x339] sm:$0xff] }
  0x86   : > { %v842_v33 = vpack.c.bf16 %v803_v30, %v802_v29  ;;  %v805_v36 = vld [vmem:[#allocation2 + $0x321] sm:$0xff]  ;;  %v771_v57 = vld [vmem:[#allocation2 + $0x189] sm:$0xff]  ;;  %v844_v59 = vpack.c.bf16 %v807_v54, %v806_v53  ;;  %v809_v6 = vld [vmem:[#allocation2 + $0x351] sm:$0xff] }
  0x87   : > { %v843_v39 = vpack.c.bf16 %v805_v36, %v804_v35  ;;  %v910_v41 = vld [vmem:[#allocation2 + $0x302] sm:$0xff]  ;;  %v912_v47 = vld [vmem:[#allocation2 + $0x31a] sm:$0xff]  ;;  %v774_v8 = vld [vmem:[#allocation2 + $0x1b1] sm:$0xff] }
  0x88   : > { %1148 = vrot.lane.b32.xlu1 %v943_v15, %s8111_s20  ;;  %v841_v15 = vpack.c.bf16 %v801_v12, %v800_v11  ;;  %v950_v45 = vpack.c.bf16 %v911_v42, %v910_v41  ;;  %v913_v48 = vld [vmem:[#allocation2 + $0x322] sm:$0xff]  ;;  %v847_v25 = vld [vmem:[#allocation2 + $0xa] sm:$0xff]  ;;  %v917_v30 = vld [vmem:[#allocation2 + $0x352] sm:$0xff]  ;;  %v8112_v42 = vmov 65535  }
  0x89   : > { %1112 = vrot.lane.b32.xlu0 %v925_v16, %s8111_s20  ;;  %v823_v16 = vpack.c.bf16 %v765_v14, %v764_v13  ;;  %v951_v51 = vpack.c.bf16 %v913_v48, %v912_v47  ;;  %v738_v0 = vld [vmem:[#allocation2 + $0x1] sm:$0xff]  ;;  %v739_v1 = vld [vmem:[#allocation2 + $0x9] sm:$0xff]  ;;  %v914_v13 = vld [vmem:[#allocation2 + $0x332] sm:$0xff] }
  0x8a   : > { %v808_v5 = vld [vmem:[#allocation2 + $0x349] sm:$0xff]  ;;  %v915_v14 = vld [vmem:[#allocation2 + $0x33a] sm:$0xff] }
  0x8b   : > { %v845_v11 = vpack.c.bf16 %v809_v6, %v808_v5  ;;  %v952_v19 = vpack.c.bf16 %v915_v14, %v914_v13  ;;  %v916_v29 = vld [vmem:[#allocation2 + $0x34a] sm:$0xff]  ;;  %v8002_v41 = vld [vmem:[%s12168_s1] sm:$0x1f]   ;;  %v635_v53 = vld [vmem:[#allocation2 + $0x38] sm:$0xff] }
  0x8c   : > { %1042 = vrot.lane.b32.xlu1 %v836_v21, %s8110_s19  ;;  %v948_v21 = vpack.c.bf16 %v907_v18, %v906_v17  ;;  %v879_v17 = vld [vmem:[#allocation2 + $0x18a] sm:$0xff]  ;;  %v670_v48 = vld [vmem:[#allocation2 + $0x1e0] sm:$0xff] }
  0x8d   : > { %1006 = vrot.lane.b32.xlu0 %v818_v23, %s8110_s19  ;;  %v908_v23 = vld [vmem:[#allocation2 + $0x2ea] sm:$0xff] }
  0x8e   : > { %v949_v27 = vpack.c.bf16 %v909_v24, %v908_v23  ;;  %v846_v24 = vld [vmem:[#allocation2 + $0x2] sm:$0xff]  ;;  %v669_v35 = vld [vmem:[#allocation2 + $0x1d0] sm:$0xff] }
  0x90   : > { %1044 = vrot.lane.b32.xlu1 %v837_v31, %s8110_s19  ;;  %v766_v31 = vld [vmem:[#allocation2 + $0x151] sm:$0xff] }
  0x91   : > { %1008 = vrot.lane.b32.xlu0 %v819_v32, %s8110_s19  ;;  %v767_v32 = vld [vmem:[#allocation2 + $0x159] sm:$0xff] }
  0x92   : > { %v824_v34 = vpack.c.bf16 %v767_v32, %v766_v31  ;;  %v882_v32 = vld [vmem:[#allocation2 + $0x1b2] sm:$0xff] }
  0x94   : > { %1150 = vrot.lane.b32.xlu1 %v944_v37, %s8111_s20  ;;  %v768_v37 = vld [vmem:[#allocation2 + $0x169] sm:$0xff] }
  0x95   : > { %1114 = vrot.lane.b32.xlu0 %v926_v38, %s8111_s20  ;;  %v769_v38 = vld [vmem:[#allocation2 + $0x171] sm:$0xff] }
  0x96   : > { %v825_v40 = vpack.c.bf16 %v769_v38, %v768_v37  ;;  %v632_v37 = vld [vmem:[#allocation2 + $0x18] sm:$0xff]  ;;  %v633_v38 = vld [vmem:[#allocation2 + $0x20] sm:$0xff] }
  0x97   : > { %v703_v47 = vpack.c.bf16 %v633_v38, %v632_v37 }
  0x98   : > { %1152 = vrot.lane.b32.xlu1 %v945_v43, %s8111_s20  ;;  %v874_v43 = vld [vmem:[#allocation2 + $0x152] sm:$0xff] }
  0x99   : > { %1116 = vrot.lane.b32.xlu0 %v927_v44, %s8111_s20  ;;  %v875_v44 = vld [vmem:[#allocation2 + $0x15a] sm:$0xff] }
  0x9a   : > { %v932_v46 = vpack.c.bf16 %v875_v44, %v874_v43  ;;  %v1717_v43 = vsel %vm1715_vm3, 4294967295, %v8112_v42 }
  0x9c   : > { %1046 = vrot.lane.b32.xlu1 %v838_v49, %s8110_s19  ;;  %v876_v49 = vld [vmem:[#allocation2 + $0x16a] sm:$0xff] }
  0x9d   : > { %1010 = vrot.lane.b32.xlu0 %v820_v50, %s8110_s19  ;;  %v877_v50 = vld [vmem:[#allocation2 + $0x172] sm:$0xff] }
  0x9e   : > { %v933_v52 = vpack.c.bf16 %v877_v50, %v876_v49  ;;  %v671_v49 = vld [vmem:[#allocation2 + $0x1e8] sm:$0xff] }
  0x9f   : > { %v722_v54 = vpack.c.bf16 %v671_v49, %v670_v48  ;;  %v643_v48 = vld [vmem:[#allocation2 + $0x98] sm:$0xff] }
  0xa0   : > { %1048 = vrot.lane.b32.xlu1 %v839_v55, %s8110_s19 }
  0xa1   : > { %1012 = vrot.lane.b32.xlu0 %v821_v56, %s8110_s19  ;;  %v770_v56 = vld [vmem:[#allocation2 + $0x181] sm:$0xff] }
  0xa2   : > { %v826_v60 = vpack.c.bf16 %v771_v57, %v770_v56 }
  0xa4   : > { %1154 = vrot.lane.b32.xlu1 %v946_v61, %s8111_s20  ;;  %v772_v61 = vld [vmem:[#allocation2 + $0x199] sm:$0xff] }
  0xa5   : > { %1118 = vrot.lane.b32.xlu0 %v928_v62, %s8111_s20  ;;  %v773_v62 = vld [vmem:[#allocation2 + $0x1a1] sm:$0xff] }
  0xa8   : > { %1156 = vrot.lane.b32.xlu1 %v947_v3, %s8111_s20  ;;  %v827_v3 = vpack.c.bf16 %v773_v62, %v772_v61 }
  0xa9   : > { %1120 = vrot.lane.b32.xlu0 %v929_v4, %s8111_s20  ;;  %v810_v4 = vpack.c.bf16 %v739_v1, %v738_v0 }
  0xac   : > { %1050 = vrot.lane.b32.xlu1 %v840_v9, %s8110_s19  ;;  %v775_v9 = vld [vmem:[#allocation2 + $0x1b9] sm:$0xff] }
  0xad   : > { %1014 = vrot.lane.b32.xlu0 %v822_v10, %s8110_s19  ;;  %v828_v12 = vpack.c.bf16 %v775_v9, %v774_v8  ;;  %v637_v8 = vld [vmem:[#allocation2 + $0x50] sm:$0xff] }
  0xb0   : > { %1052 = vrot.lane.b32.xlu1 %v841_v15, %s8110_s19 }
  0xb1   : > { %1016 = vrot.lane.b32.xlu0 %v823_v16, %s8110_s19  ;;  %v878_v16 = vld [vmem:[#allocation2 + $0x182] sm:$0xff] }
  0xb2   : > { %v934_v20 = vpack.c.bf16 %v879_v17, %v878_v16  ;;  %v674_v16 = vld [vmem:[#allocation2 + $0x210] sm:$0xff]  ;;  %v675_v17 = vld [vmem:[#allocation2 + $0x218] sm:$0xff] }
  0xb4   : > { %1158 = vrot.lane.b32.xlu1 %v948_v21, %s8111_s20  ;;  %v880_v21 = vld [vmem:[#allocation2 + $0x19a] sm:$0xff] }
  0xb5   : > { %1122 = vrot.lane.b32.xlu0 %v930_v22, %s8111_s20  ;;  %v881_v22 = vld [vmem:[#allocation2 + $0x1a2] sm:$0xff] }
  0xb8   : > { %1160 = vrot.lane.b32.xlu1 %v949_v27, %s8111_s20  ;;  %v935_v27 = vpack.c.bf16 %v881_v22, %v880_v21  ;;  %v638_v21 = vld [vmem:[#allocation2 + $0x60] sm:$0xff]  ;;  %v639_v22 = vld [vmem:[#allocation2 + $0x68] sm:$0xff] }
  0xb9   : > { %1124 = vrot.lane.b32.xlu0 %v931_v28, %s8111_s20  ;;  %v918_v28 = vpack.c.bf16 %v847_v25, %v846_v24  ;;  %v706_v24 = vpack.c.bf16 %v639_v22, %v638_v21 }
  0xbc   : > { %1054 = vrot.lane.b32.xlu1 %v842_v33, %s8110_s19  ;;  %v883_v33 = vld [vmem:[#allocation2 + $0x1ba] sm:$0xff] }
  0xbd   : > { %1018 = vrot.lane.b32.xlu0 %v824_v34, %s8110_s19  ;;  %v668_v34 = vld [vmem:[#allocation2 + $0x1c8] sm:$0xff] }
  0xbe   : > { %v721_v44 = vpack.c.bf16 %v669_v35, %v668_v34  ;;  %v641_v34 = vld [vmem:[#allocation2 + $0x80] sm:$0xff] }
  0xc0   : > { %1056 = vrot.lane.b32.xlu1 %v843_v39, %s8110_s19  ;;  %v953_v39 = vpack.c.bf16 %v917_v30, %v916_v29  ;;  %v676_v29 = vld [vmem:[#allocation2 + $0x228] sm:$0xff]  ;;  %v677_v30 = vld [vmem:[#allocation2 + $0x230] sm:$0xff] }
  0xc1   : > { %1020 = vrot.lane.b32.xlu0 %v825_v40, %s8110_s19  ;;  %v936_v40 = vpack.c.bf16 %v883_v33, %v882_v32  ;;  %v640_v33 = vld [vmem:[#allocation2 + $0x78] sm:$0xff] }
  0xc2   : > { %v707_v38 = vpack.c.bf16 %v641_v34, %v640_v33  ;;  %v649_v33 = vld [vmem:[#allocation2 + $0xe0] sm:$0xff] }
  0xc4   : > { %1162 = vrot.lane.b32.xlu1 %v950_v45, %s8111_s20 }
  0xc5   : > { %1126 = vrot.lane.b32.xlu0 %v932_v46, %s8111_s20  ;;  %v1718_v46 = vsel %vm1716_vm4, %v1717_v43, 0  ;;  %v678_v43 = vld [vmem:[#allocation2 + $0x240] sm:$0xff] }
  0xc6   : > { %v8793_v55 = vpop.permute.xlu1 %994 }
  0xc7   : > { %v8795_v58 = vpop.permute.xlu0 %992 }
  0xc8   : > { %1164 = vrot.lane.b32.xlu1 %v951_v51, %s8111_s20  ;;  %v1720_v51 = vand.u32 %v8002_v41, %v1718_v46 }
  0xc9   : > { %1128 = vrot.lane.b32.xlu0 %v933_v52, %s8111_s20  ;;  %v634_v52 = vld [vmem:[#allocation2 + $0x30] sm:$0xff] }
  0xca   : > { %v8799_v63 = vpop.permute.xlu1 %1030  ;;  %7867 = vmatprep.subr.bf16.mxu0 %v1720_v51  ;;  %7933 = vmatprep.subr.bf16.mxu1 %v1720_v51 }
  0xcb   : > { %v8801_v2 = vpop.permute.xlu0 %1028  ;;  %7868 = vmatpush3.bf16.msra.mxu0 %v1720_v51  ;;  %7934 = vmatpush3.bf16.msra.mxu1 %v1720_v51 }
  0xcc   : > { %1058 = vrot.lane.b32.xlu1 %v844_v59, %s8110_s19  ;;  %v1229_v56 = vsel %vm500_vm2, %v721_v44, %v8801_v2  ;;  %v704_v59 = vpack.c.bf16 %v635_v53, %v634_v52  ;;  %v679_v44 = vld [vmem:[#allocation2 + $0x248] sm:$0xff] }
  0xcd   : > { %1022 = vrot.lane.b32.xlu0 %v826_v60, %s8110_s19  ;;  %v1175_v60 = vsel %vm500_vm2, %v703_v47, %v8795_v58  ;;  %v1232_v58 = vsel %vm500_vm2, %v722_v54, %v8799_v63  ;;  %v642_v47 = vld [vmem:[#allocation2 + $0x90] sm:$0xff] }
  0xce   : > { %v8805_v7 = vpop.permute.xlu1 %1136  ;;  %v1178_v2 = vsel %vm500_vm2, %v704_v59, %v8793_v55  ;;  %v708_v52 = vpack.c.bf16 %v643_v48, %v642_v47  ;;  %v680_v59 = vld [vmem:[#allocation2 + $0x258] sm:$0xff] }
  0xcf   : > { %v8807_v10 = vpop.permute.xlu0 %1100  ;;  %v8844_v62 = vsel %vm1278_vm5, %v1229_v56, %v8805_v7  ;;  %v636_v7 = vld [vmem:[#allocation2 + $0x48] sm:$0xff] }
  0xd0   : > { %1024 = vrot.lane.b32.xlu1 %v827_v3, %s8110_s19  ;;  %v8850_v0 = vsel %vm1278_vm5, %v1175_v60, %v8807_v10  ;;  %v672_v3 = vld [vmem:[#allocation2 + $0x1f8] sm:$0xff]  ;;  %v705_v10 = vpack.c.bf16 %v637_v8, %v636_v7  ;;  %v681_v60 = vld [vmem:[#allocation2 + $0x260] sm:$0xff] }
  0xd1   : > { %990 = vrot.lane.b32.xlu0 %v810_v4, %s8110_s19  ;;  %v673_v4 = vld [vmem:[#allocation2 + $0x200] sm:$0xff] }
  0xd2   : > { %v8811_v15 = vpop.permute.xlu1 %1032  ;;  %v723_v63 = vpack.c.bf16 %v673_v4, %v672_v3  ;;  %v727_v4 = vpack.c.bf16 %v681_v60, %v680_v59 }
  0xd3   : > { %v8813_v18 = vpop.permute.xlu0 %996 }
  0xd4   : > { %1060 = vrot.lane.b32.xlu1 %v845_v11, %s8110_s19  ;;  %v1181_v14 = vsel %vm500_vm2, %v705_v10, %v8813_v18 }
  0xd5   : > { %1026 = vrot.lane.b32.xlu0 %v828_v12, %s8110_s19  ;;  %v1235_v12 = vsel %vm500_vm2, %v723_v63, %v8811_v15  ;;  %v724_v15 = vpack.c.bf16 %v675_v17, %v674_v16  ;;  %v646_v16 = vld [vmem:[#allocation2 + $0xc0] sm:$0xff]  ;;  %v647_v17 = vld [vmem:[#allocation2 + $0xc8] sm:$0xff] }
  0xd6   : > { %v1139_v23 = vpop.permute.xlu1 %1138 }
  0xd7   : > { %v8817_v26 = vpop.permute.xlu0 %1102  ;;  %v8859_v6 = vsel %vm1278_vm5, %v1232_v58, %v1139_v23 }
  0xd8   : > { %1166 = vrot.lane.b32.xlu1 %v952_v19, %s8111_s20  ;;  %v8865_v9 = vsel %vm1278_vm5, %v1178_v2, %v8817_v26  ;;  %v645_v2 = vld [vmem:[#allocation2 + $0xb0] sm:$0xff] }
  0xd9   : > { %1130 = vrot.lane.b32.xlu0 %v934_v20, %s8111_s20 }
  0xda   : > { %v8821_v31 = vpop.permute.xlu1 %1140 }
  0xdb   : > { %v8823_v36 = vpop.permute.xlu0 %1104  ;;  %v8879_v20 = vsel %vm1278_vm5, %v1235_v12, %v8821_v31  ;;  %v683_v12 = vld [vmem:[#allocation2 + $0x278] sm:$0xff] }
  0xdc   : > { %1132 = vrot.lane.b32.xlu1 %v935_v27, %s8111_s20  ;;  %v8885_v23 = vsel %vm1278_vm5, %v1181_v14, %v8823_v36  ;;  %v725_v36 = vpack.c.bf16 %v677_v30, %v676_v29 }
  0xdd   : > { %1098 = vrot.lane.b32.xlu0 %v918_v28, %s8111_s20 }
  0xde   : > { %v8830_v45 = vpop.permute.xlu1 %1034 }
  0xdf   : > { %v999_v50 = vpop.permute.xlu0 %998  ;;  %v1238_v26 = vsel %vm500_vm2, %v724_v15, %v8830_v45  ;;  %v710_v15 = vpack.c.bf16 %v647_v17, %v646_v16 }
  0xe0   : > { %1168 = vrot.lane.b32.xlu1 %v953_v39, %s8111_s20  ;;  %v1184_v28 = vsel %vm500_vm2, %v706_v24, %v999_v50  ;;  %v726_v50 = vpack.c.bf16 %v679_v44, %v678_v43  ;;  %v686_v44 = vld [vmem:[#allocation2 + $0x2a0] sm:$0xff] }
  0xe1   : > { %1134 = vrot.lane.b32.xlu0 %v936_v40, %s8111_s20  ;;  %s8113_s20 = smov 3  }
  0xe2   : > { %v8836_v57 = vpop.permute.xlu1 %1036 }
  0xe3   : > { %v8840_v61 = vpop.permute.xlu0 %1000  ;;  %v1241_v40 = vsel %vm500_vm2, %v725_v36, %v8836_v57 }
  0xe4   : > { %1415 = vrot.lane.b32.xlu1 %v8844_v62, %s8113_s20  ;;  %v1187_v42 = vsel %vm500_vm2, %v707_v38, %v8840_v61 }
  0xe5   : > { %1383 = vrot.lane.b32.xlu0 %v8850_v0, %s8113_s20 }
  0xe6   : > { %v1143_v1 = vpop.permute.xlu1 %1142 }
  0xe7   : > { %v1107_v5 = vpop.permute.xlu0 %1106  ;;  %v8897_v32 = vsel %vm1278_vm5, %v1238_v26, %v1143_v1  ;;  %v644_v1 = vld [vmem:[#allocation2 + $0xa8] sm:$0xff] }
  0xe8   : > { %1417 = vrot.lane.b32.xlu1 %v8859_v6, %s8113_s20  ;;  %v8902_v35 = vsel %vm1278_vm5, %v1184_v28, %v1107_v5  ;;  %v709_v7 = vpack.c.bf16 %v645_v2, %v644_v1  ;;  %v685_v28 = vld [vmem:[#allocation2 + $0x290] sm:$0xff]  ;;  %v689_v1 = vld [vmem:[#allocation2 + $0x2c0] sm:$0xff] }
  0xe9   : > { %1385 = vrot.lane.b32.xlu0 %v8865_v9, %s8113_s20 }
  0xea   : > { %v1145_v55 = vpop.permute.xlu1 %1144 }
  0xeb   : > { %v1109_v11 = vpop.permute.xlu0 %1108  ;;  %v8915_v46 = vsel %vm1278_vm5, %v1241_v40, %v1145_v55 }
  0xec   : > { %1481 = vrot.lane.b32.xlu1 %v8859_v6, %s8114_s13  ;;  %v8920_v49 = vsel %vm1278_vm5, %v1187_v42, %v1109_v11  ;;  %v682_v11 = vld [vmem:[#allocation2 + $0x270] sm:$0xff] }
  0xed   : > { %1449 = vrot.lane.b32.xlu0 %v8865_v9, %s8114_s13  ;;  %v728_v21 = vpack.c.bf16 %v683_v12, %v682_v11 }
  0xee   : > { %v1039_v13 = vpop.permute.xlu1 %1038 }
  0xef   : > { %v1003_v19 = vpop.permute.xlu0 %1002  ;;  %v1244_v54 = vsel %vm500_vm2, %v726_v50, %v1039_v13  ;;  %v650_v50 = vld [vmem:[#allocation2 + $0xf0] sm:$0xff] }
  0xf0   : > { %1483 = vrot.lane.b32.xlu1 %v8879_v20, %s8114_s13  ;;  %v1190_v57 = vsel %vm500_vm2, %v708_v52, %v1003_v19  ;;  %v651_v52 = vld [vmem:[#allocation2 + $0xf8] sm:$0xff] }
  0xf1   : > { %1451 = vrot.lane.b32.xlu0 %v8885_v23, %s8114_s13 }
  0xf2   : > { %v1041_v18 = vpop.permute.xlu1 %1040 }
  0xf3   : > { %v1005_v25 = vpop.permute.xlu0 %1004  ;;  %v1247_v63 = vsel %vm500_vm2, %v727_v4, %v1041_v18 }
  0xf4   : > { %1419 = vrot.lane.b32.xlu1 %v8879_v20, %s8113_s20  ;;  %v1193_v10 = vsel %vm500_vm2, %v709_v7, %v1005_v25  ;;  %v653_v7 = vld [vmem:[#allocation2 + $0x110] sm:$0xff] }
  0xf5   : > { %1387 = vrot.lane.b32.xlu0 %v8885_v23, %s8113_s20 }
  0xf6   : > { %v1147_v27 = vpop.permute.xlu1 %1146 }
  0xf7   : > { %v1111_v31 = vpop.permute.xlu0 %1110  ;;  %v8931_v58 = vsel %vm1278_vm5, %v1244_v54, %v1147_v27  ;;  %v684_v27 = vld [vmem:[#allocation2 + $0x288] sm:$0xff] }
  0xf8   : > { %1421 = vrot.lane.b32.xlu1 %v8897_v32, %s8113_s20  ;;  %v8936_v3 = vsel %vm1278_vm5, %v1190_v57, %v1111_v31  ;;  %v648_v31 = vld [vmem:[#allocation2 + $0xd8] sm:$0xff]  ;;  %v729_v36 = vpack.c.bf16 %v685_v28, %v684_v27  ;;  %v655_v27 = vld [vmem:[#allocation2 + $0x128] sm:$0xff] }
  0xf9   : > { %1389 = vrot.lane.b32.xlu0 %v8902_v35, %s8113_s20  ;;  %v711_v38 = vpack.c.bf16 %v649_v33, %v648_v31 }
  0xfa   : > { %v1149_v37 = vpop.permute.xlu1 %1148 }
  0xfb   : > { %v1113_v39 = vpop.permute.xlu0 %1112  ;;  %v8947_v14 = vsel %vm1278_vm5, %v1247_v63, %v1149_v37 }
  0xfc   : > { %1485 = vrot.lane.b32.xlu1 %v8897_v32, %s8114_s13  ;;  %v8952_v19 = vsel %vm1278_vm5, %v1193_v10, %v1113_v39 }
  0xfd   : > { %1453 = vrot.lane.b32.xlu0 %v8902_v35, %s8114_s13 }
  0xfe   : > { %v1043_v41 = vpop.permute.xlu1 %1042 }
  0xff   : > { %v1007_v45 = vpop.permute.xlu0 %1006  ;;  %v1250_v24 = vsel %vm500_vm2, %v728_v21, %v1043_v41  ;;  %v690_v21 = vld [vmem:[#allocation2 + $0x2d0] sm:$0xff] }
 0x100   : > { %1487 = vrot.lane.b32.xlu1 %v8915_v46, %s8114_s13  ;;  %v1196_v26 = vsel %vm500_vm2, %v710_v15, %v1007_v45  ;;  %v687_v45 = vld [vmem:[#allocation2 + $0x2a8] sm:$0xff]  ;;  %v691_v15 = vld [vmem:[#allocation2 + $0x2d8] sm:$0xff] }
 0x101   : > { %1455 = vrot.lane.b32.xlu0 %v8920_v49, %s8114_s13 }
 0x102   : > { %v1045_v51 = vpop.permute.xlu1 %1044 }
 0x103   : > { %v1009_v53 = vpop.permute.xlu0 %1008  ;;  %v1253_v40 = vsel %vm500_vm2, %v729_v36, %v1045_v51  ;;  %v730_v51 = vpack.c.bf16 %v687_v45, %v686_v44  ;;  %v657_v44 = vld [vmem:[#allocation2 + $0x140] sm:$0xff] }
 0x104   : > { %1423 = vrot.lane.b32.xlu1 %v8915_v46, %s8113_s20  ;;  %v1199_v42 = vsel %vm500_vm2, %v711_v38, %v1009_v53  ;;  %v712_v53 = vpack.c.bf16 %v651_v52, %v650_v50  ;;  %v693_v38 = vld [vmem:[#allocation2 + $0x2f0] sm:$0xff] }
 0x105   : > { %1391 = vrot.lane.b32.xlu0 %v8920_v49, %s8113_s20 }
 0x106   : > { %v1151_v56 = vpop.permute.xlu1 %1150 }
 0x107   : > { %v1115_v61 = vpop.permute.xlu0 %1114  ;;  %v8963_v29 = vsel %vm1278_vm5, %v1250_v24, %v1151_v56 }
 0x108   : > { %1425 = vrot.lane.b32.xlu1 %v8931_v58, %s8113_s20  ;;  %v8966_v34 = vsel %vm1278_vm5, %v1196_v26, %v1115_v61  ;;  %v688_v61 = vld [vmem:[#allocation2 + $0x2b8] sm:$0xff]  ;;  %v654_v26 = vld [vmem:[#allocation2 + $0x120] sm:$0xff] }
 0x109   : > { %1393 = vrot.lane.b32.xlu0 %v8936_v3, %s8113_s20  ;;  %v731_v63 = vpack.c.bf16 %v689_v1, %v688_v61  ;;  %v695_v61 = vld [vmem:[#allocation2 + $0x308] sm:$0xff] }
 0x10a   : > { %v1153_v5 = vpop.permute.xlu1 %1152 }
 0x10b   : > { %v1117_v8 = vpop.permute.xlu0 %1116  ;;  %v8979_v43 = vsel %vm1278_vm5, %v1253_v40, %v1153_v5  ;;  %v652_v5 = vld [vmem:[#allocation2 + $0x108] sm:$0xff] }
 0x10c   : > { %1489 = vrot.lane.b32.xlu1 %v8931_v58, %s8114_s13  ;;  %v8982_v48 = vsel %vm1278_vm5, %v1199_v42, %v1117_v8  ;;  %v713_v10 = vpack.c.bf16 %v653_v7, %v652_v5  ;;  %v656_v42 = vld [vmem:[#allocation2 + $0x138] sm:$0xff]  ;;  %v658_v5 = vld [vmem:[#allocation2 + $0x150] sm:$0xff] }
 0x10d   : > { %1457 = vrot.lane.b32.xlu0 %v8936_v3, %s8114_s13  ;;  %v659_v7 = vld [vmem:[#allocation2 + $0x158] sm:$0xff] }
 0x10e   : > { %v1047_v55 = vpop.permute.xlu1 %1046 }
 0x10f   : > { %v1011_v13 = vpop.permute.xlu0 %1010  ;;  %v1256_v57 = vsel %vm500_vm2, %v730_v51, %v1047_v55 }
 0x110   : > { %1491 = vrot.lane.b32.xlu1 %v8947_v14, %s8114_s13  ;;  %v1202_v60 = vsel %vm500_vm2, %v712_v53, %v1011_v13 }
 0x111   : > { %1459 = vrot.lane.b32.xlu0 %v8952_v19, %s8114_s13 }
 0x112   : > { %v1049_v22 = vpop.permute.xlu1 %1048 }
 0x113   : > { %v1013_v18 = vpop.permute.xlu0 %1012  ;;  %v1259_v12 = vsel %vm500_vm2, %v731_v63, %v1049_v22  ;;  %v732_v22 = vpack.c.bf16 %v691_v15, %v690_v21  ;;  %v697_v21 = vld [vmem:[#allocation2 + $0x320] sm:$0xff] }
 0x114   : > { %1427 = vrot.lane.b32.xlu1 %v8947_v14, %s8113_s20  ;;  %v1205_v16 = vsel %vm500_vm2, %v713_v10, %v1013_v18  ;;  %v714_v18 = vpack.c.bf16 %v655_v27, %v654_v26  ;;  %v660_v27 = vld [vmem:[#allocation2 + $0x168] sm:$0xff] }
 0x115   : > { %1395 = vrot.lane.b32.xlu0 %v8952_v19, %s8113_s20 }
 0x116   : > { %v1155_v25 = vpop.permute.xlu1 %1154 }
 0x117   : > { %v1119_v30 = vpop.permute.xlu0 %1118  ;;  %v8995_v2 = vsel %vm1278_vm5, %v1256_v57, %v1155_v25 }
 0x118   : > { %1429 = vrot.lane.b32.xlu1 %v8963_v29, %s8113_s20  ;;  %v8998_v8 = vsel %vm1278_vm5, %v1202_v60, %v1119_v30  ;;  %v694_v60 = vld [vmem:[#allocation2 + $0x300] sm:$0xff] }
 0x119   : > { %1397 = vrot.lane.b32.xlu0 %v8966_v34, %s8113_s20 }
 0x11a   : > { %v1157_v37 = vpop.permute.xlu1 %1156 }
 0x11b   : > { %v1121_v39 = vpop.permute.xlu0 %1120  ;;  %v9011_v17 = vsel %vm1278_vm5, %v1259_v12, %v1157_v37  ;;  %v692_v37 = vld [vmem:[#allocation2 + $0x2e8] sm:$0xff] }
 0x11c   : > { %1493 = vrot.lane.b32.xlu1 %v8963_v29, %s8114_s13  ;;  %v9014_v25 = vsel %vm1278_vm5, %v1205_v16, %v1121_v39  ;;  %v696_v16 = vld [vmem:[#allocation2 + $0x318] sm:$0xff] }
 0x11d   : > { %1461 = vrot.lane.b32.xlu0 %v8966_v34, %s8114_s13 }
 0x11e   : > { %v1051_v41 = vpop.permute.xlu1 %1050 }
 0x11f   : > { %v1015_v47 = vpop.permute.xlu0 %1014  ;;  %v1262_v31 = vsel %vm500_vm2, %v732_v22, %v1051_v41  ;;  %v733_v41 = vpack.c.bf16 %v693_v38, %v692_v37  ;;  %v661_v22 = vld [vmem:[#allocation2 + $0x170] sm:$0xff] }
 0x120   : > { %1495 = vrot.lane.b32.xlu1 %v8979_v43, %s8114_s13  ;;  %v1208_v36 = vsel %vm500_vm2, %v714_v18, %v1015_v47  ;;  %v715_v47 = vpack.c.bf16 %v657_v44, %v656_v42  ;;  %v698_v42 = vld [vmem:[#allocation2 + $0x330] sm:$0xff]  ;;  %v699_v44 = vld [vmem:[#allocation2 + $0x338] sm:$0xff] }
 0x121   : > { %1463 = vrot.lane.b32.xlu0 %v8982_v48, %s8114_s13 }
 0x122   : > { %v1053_v54 = vpop.permute.xlu1 %1052 }
 0x123   : > { %v1017_v56 = vpop.permute.xlu0 %1016  ;;  %v1265_v51 = vsel %vm500_vm2, %v733_v41, %v1053_v54  ;;  %v734_v54 = vpack.c.bf16 %v695_v61, %v694_v60 }
 0x124   : > { %1431 = vrot.lane.b32.xlu1 %v8979_v43, %s8113_s20  ;;  %v1211_v57 = vsel %vm500_vm2, %v715_v47, %v1017_v56  ;;  %v716_v56 = vpack.c.bf16 %v659_v7, %v658_v5  ;;  %v667_v5 = vld [vmem:[#allocation2 + $0x1b8] sm:$0xff]  ;;  %v631_v7 = vld [vmem:[#allocation2 + $0x8] sm:$0xff] }
 0x125   : > { %1399 = vrot.lane.b32.xlu0 %v8982_v48, %s8113_s20 }
 0x126   : > { %v1159_v59 = vpop.permute.xlu1 %1158 }
 0x127   : > { %v1123_v4 = vpop.permute.xlu0 %1122  ;;  %v9027_v39 = vsel %vm1278_vm5, %v1262_v31, %v1159_v59 }
 0x128   : > { %1433 = vrot.lane.b32.xlu1 %v8995_v2, %s8113_s20  ;;  %v9030_v45 = vsel %vm1278_vm5, %v1208_v36, %v1123_v4 }
 0x129   : > { %1401 = vrot.lane.b32.xlu0 %v8998_v8, %s8113_s20 }
 0x12a   : > { %v1161_v55 = vpop.permute.xlu1 %1160 }
 0x12b   : > { %v1125_v11 = vpop.permute.xlu0 %1124  ;;  %v9043_v59 = vsel %vm1278_vm5, %v1265_v51, %v1161_v55  ;;  %v662_v51 = vld [vmem:[#allocation2 + $0x180] sm:$0xff] }
 0x12c   : > { %1497 = vrot.lane.b32.xlu1 %v8995_v2, %s8114_s13  ;;  %v9046_v4 = vsel %vm1278_vm5, %v1211_v57, %v1125_v11  ;;  %v663_v57 = vld [vmem:[#allocation2 + $0x188] sm:$0xff] }
 0x12d   : > { %1465 = vrot.lane.b32.xlu0 %v8998_v8, %s8114_s13 }
 0x12e   : > { %v1055_v13 = vpop.permute.xlu1 %1054 }
 0x12f   : > { %v1019_v24 = vpop.permute.xlu0 %1018  ;;  %v1268_v10 = vsel %vm500_vm2, %v734_v54, %v1055_v13  ;;  %v735_v13 = vpack.c.bf16 %v697_v21, %v696_v16  ;;  %v630_v54 = vld [vmem:[#allocation2] sm:$0xff]  ;;  %v701_v16 = vld [vmem:[#allocation2 + $0x350] sm:$0xff] }
 0x130   : > { %1499 = vrot.lane.b32.xlu1 %v9011_v17, %s8114_s13  ;;  %v1214_v12 = vsel %vm500_vm2, %v716_v56, %v1019_v24  ;;  %v717_v24 = vpack.c.bf16 %v661_v22, %v660_v27  ;;  %v664_v22 = vld [vmem:[#allocation2 + $0x198] sm:$0xff] }
 0x131   : > { %1467 = vrot.lane.b32.xlu0 %v9014_v25, %s8114_s13 }
 0x132   : > { %v1057_v28 = vpop.permute.xlu1 %1056 }
 0x133   : > { %v1021_v30 = vpop.permute.xlu0 %1020 }
 0x134   : > { %1435 = vrot.lane.b32.xlu1 %v9011_v17, %s8113_s20  ;;  %v1217_v38 = vsel %vm500_vm2, %v717_v24, %v1021_v30  ;;  %v718_v30 = vpack.c.bf16 %v663_v57, %v662_v51 }
 0x135   : > { %1403 = vrot.lane.b32.xlu0 %v9014_v25, %s8113_s20 }
 0x136   : > { %v1163_v33 = vpop.permute.xlu1 %1162 }
 0x137   : > { %v1127_v40 = vpop.permute.xlu0 %1126  ;;  %v9065_v15 = vsel %vm1278_vm5, %v1268_v10, %v1163_v33  ;;  %v1271_v33 = vsel %vm500_vm2, %v735_v13, %v1057_v28  ;;  %v736_v28 = vpack.c.bf16 %v699_v44, %v698_v42  ;;  %v665_v13 = vld [vmem:[#allocation2 + $0x1a0] sm:$0xff] }
 0x138   : > { %1437 = vrot.lane.b32.xlu1 %v9027_v39, %s8113_s20  ;;  %v9068_v18 = vsel %vm1278_vm5, %v1214_v12, %v1127_v40  ;;  %v700_v12 = vld [vmem:[#allocation2 + $0x348] sm:$0xff]  ;;  %v719_v44 = vpack.c.bf16 %v665_v13, %v664_v22 }
 0x139   : > { %1405 = vrot.lane.b32.xlu0 %v9030_v45, %s8113_s20 }
 0x13a   : > { %v1165_v50 = vpop.permute.xlu1 %1164 }
 0x13b   : > { %v1129_v52 = vpop.permute.xlu0 %1128  ;;  %v9081_v40 = vsel %vm1278_vm5, %v1271_v33, %v1165_v50  ;;  %v666_v50 = vld [vmem:[#allocation2 + $0x1b0] sm:$0xff] }
 0x13c   : > { %1501 = vrot.lane.b32.xlu1 %v9027_v39, %s8114_s13  ;;  %v9084_v47 = vsel %vm1278_vm5, %v1217_v38, %v1129_v52  ;;  %v720_v24 = vpack.c.bf16 %v667_v5, %v666_v50  ;;  %v702_v38 = vpack.c.bf16 %v631_v7, %v630_v54 }
 0x13d   : > { %1469 = vrot.lane.b32.xlu0 %v9030_v45, %s8114_s13 }
 0x13e   : > { %v1059_v53 = vpop.permute.xlu1 %1058 }
 0x13f   : > { %v1023_v1 = vpop.permute.xlu0 %1022  ;;  %v1274_v52 = vsel %vm500_vm2, %v736_v28, %v1059_v53  ;;  %v737_v53 = vpack.c.bf16 %v701_v16, %v700_v12 }
 0x140   : > { %1503 = vrot.lane.b32.xlu1 %v9043_v59, %s8114_s13  ;;  %v1220_v10 = vsel %vm500_vm2, %v718_v30, %v1023_v1 }
 0x141   : > { %1471 = vrot.lane.b32.xlu0 %v9046_v4, %s8114_s13 }
 0x142   : > { %v9052_v63 = vpop.permute.xlu1 %1024 }
 0x143   : > { %v9054_v55 = vpop.permute.xlu0 %990 }
 0x144   : > { %1439 = vrot.lane.b32.xlu1 %v9043_v59, %s8113_s20 }
 0x145   : > { %1407 = vrot.lane.b32.xlu0 %v9046_v4, %s8113_s20 }
 0x146   : > { %v9061_v11 = vpop.permute.xlu1 %1060 }
 0x147   : > { %v1027_v26 = vpop.permute.xlu0 %1026  ;;  %v1277_v57 = vsel %vm500_vm2, %v737_v53, %v9061_v11 }
 0x148   : > { %1441 = vrot.lane.b32.xlu1 %v9065_v15, %s8113_s20  ;;  %v1226_v51 = vsel %vm500_vm2, %v720_v24, %v1027_v26  ;;  %v1223_v26 = vsel %vm500_vm2, %v719_v44, %v9052_v63 }
 0x149   : > { %1409 = vrot.lane.b32.xlu0 %v9068_v18, %s8113_s20 }
 0x14a   : > { %v1167_v31 = vpop.permute.xlu1 %1166 }
 0x14b   : > { %v1131_v36 = vpop.permute.xlu0 %1130  ;;  %v1348_v21 = vsel %vm1278_vm5, %v1274_v52, %v1167_v31  ;;  %v1172_v31 = vsel %vm500_vm2, %v702_v38, %v9054_v55 }
 0x14c   : > { %1505 = vrot.lane.b32.xlu1 %v9065_v15, %s8114_s13  ;;  %v1312_v33 = vsel %vm1278_vm5, %v1220_v10, %v1131_v36 }
 0x14d   : > { %1473 = vrot.lane.b32.xlu0 %v9068_v18, %s8114_s13 }
 0x14e   : > { %v1133_v37 = vpop.permute.xlu1 %1132 }
 0x14f   : > { %v1099_v41 = vpop.permute.xlu0 %1098  ;;  %v1314_v7 = vsel %vm1278_vm5, %v1223_v26, %v1133_v37 }
 0x150   : > { %1507 = vrot.lane.b32.xlu1 %v9081_v40, %s8114_s13  ;;  %v1280_v28 = vsel %vm1278_vm5, %v1172_v31, %v1099_v41 }
 0x151   : > { %1475 = vrot.lane.b32.xlu0 %v9084_v47, %s8114_s13 }
 0x152   : > { %v1169_v60 = vpop.permute.xlu1 %1168 }
 0x153   : > { %v1135_v61 = vpop.permute.xlu0 %1134  ;;  %v1350_v5 = vsel %vm1278_vm5, %v1277_v57, %v1169_v60 }
 0x154   : > { %1443 = vrot.lane.b32.xlu1 %v9081_v40, %s8113_s20  ;;  %v1316_v36 = vsel %vm1278_vm5, %v1226_v51, %v1135_v61 }
 0x155   : > { %1411 = vrot.lane.b32.xlu0 %v9084_v47, %s8113_s20 }
 0x156   : > { %v1416_v56 = vpop.permute.xlu1 %1415 }
 0x157   : > { %v1384_v27 = vpop.permute.xlu0 %1383  ;;  %v1547_v30 = vsel %vm1513_vm6, %v1316_v36, %v1416_v56 }
 0x158   : > { %1445 = vrot.lane.b32.xlu1 %v1348_v21, %s8113_s20  ;;  %v1515_v55 = vsel %vm1513_vm6, %v1280_v28, %v1384_v27 }
 0x159   : > { %1413 = vrot.lane.b32.xlu0 %v1312_v33, %s8113_s20 }
 0x15a   : > { %v1418_v42 = vpop.permute.xlu1 %1417 }
 0x15b   : > { %v1386_v1 = vpop.permute.xlu0 %1385  ;;  %v1549_v63 = vsel %vm1513_vm6, %v8844_v62, %v1418_v42 }
 0x15c   : > { %1509 = vrot.lane.b32.xlu1 %v1348_v21, %s8114_s13  ;;  %v1517_v60 = vsel %vm1513_vm6, %v8850_v0, %v1386_v1 }
 0x15d   : > { %1477 = vrot.lane.b32.xlu0 %v1312_v33, %s8114_s13 }
 0x15e   : > { %v1482_v50 = vpop.permute.xlu1 %1481 }
 0x15f   : > { %v1450_v52 = vpop.permute.xlu0 %1449  ;;  %v1612_v61 = vsel %vm1578_vm7, %v1547_v30, %v1482_v50 }
 0x160   : > { %1511 = vrot.lane.b32.xlu1 %v1350_v5, %s8114_s13  ;;  %v1580_v11 = vsel %vm1578_vm7, %v1515_v55, %v1450_v52  ;;  %7901 = vmatprep.mubr.msk.bf16.mxu1 %vm1650_vm8, %v1612_v61 }
 0x161   : > { %1479 = vrot.lane.b32.xlu0 %v1314_v7, %s8114_s13  ;;  %7869 = vmatprep.mubr.msk.bf16.mxu0 %vm1650_vm8, %v1580_v11 }
 0x162   : > { %v1484_v41 = vpop.permute.xlu1 %1483 }
 0x163   : > { %v1614_v54 = vsel %vm1578_vm7, %v1549_v63, %v1484_v41  ;;  %v1452_v37 = vpop.permute.xlu0 %1451 }
 0x164   : > { %v1582_v56 = vsel %vm1578_vm7, %v1517_v60, %v1452_v37  ;;  %7902 = vmatmul.mubr.msk.bf16.vlgmr.msra.gmra.mxu1 %vm1650_vm8, %v1614_v54 }
 0x165   : > { %7870 = vmatmul.mubr.msk.bf16.vlgmr.msra.gmra.mxu0 %vm1650_vm8, %v1582_v56 }
 0x166   : > { %v1420_v10 = vpop.permute.xlu1 %1419 }
 0x167   : > { %v1388_v12 = vpop.permute.xlu0 %1387  ;;  %v1551_v62 = vsel %vm1513_vm6, %v8859_v6, %v1420_v10 }
 0x168   : > { %v1519_v0 = vsel %vm1513_vm6, %v8865_v9, %v1388_v12 }
 0x16a   : > { %v1422_v16 = vpop.permute.xlu1 %1421 }
 0x16b   : > { %v1390_v21 = vpop.permute.xlu0 %1389  ;;  %v1553_v33 = vsel %vm1513_vm6, %v8879_v20, %v1422_v16 }
 0x16c   : > { %v1521_v6 = vsel %vm1513_vm6, %v8885_v23, %v1390_v21 }
 0x16e   : > { %v1486_v27 = vpop.permute.xlu1 %1485 }
 0x16f   : > { %v1616_v22 = vsel %vm1578_vm7, %v1551_v62, %v1486_v27  ;;  %v1454_v13 = vpop.permute.xlu0 %1453 }
 0x170   : > { %v1584_v24 = vsel %vm1578_vm7, %v1519_v0, %v1454_v13  ;;  %7905 = vmatprep.mubr.msk.bf16.mxu1 %vm1650_vm8, %v1616_v22 }
 0x171   : > { %7873 = vmatprep.mubr.msk.bf16.mxu0 %vm1650_vm8, %v1584_v24 }
 0x172   : > { %v1488_v38 = vpop.permute.xlu1 %1487 }
 0x173   : > { %v1618_v53 = vsel %vm1578_vm7, %v1553_v33, %v1488_v38  ;;  %v1456_v42 = vpop.permute.xlu0 %1455 }
 0x174   : > { %v1586_v9 = vsel %vm1578_vm7, %v1521_v6, %v1456_v42  ;;  %7906 = vmatmul.mubr.msk.bf16.gmra.mxu1 %vm1650_vm8, %v1618_v53 }
 0x175   : > { %7874 = vmatmul.mubr.msk.bf16.gmra.mxu0 %vm1650_vm8, %v1586_v9 }
 0x176   : > { %v1424_v44 = vpop.permute.xlu1 %1423 }
 0x177   : > { %v1392_v1 = vpop.permute.xlu0 %1391  ;;  %v1555_v20 = vsel %vm1513_vm6, %v8897_v32, %v1424_v44 }
 0x178   : > { %v1523_v23 = vsel %vm1513_vm6, %v8902_v35, %v1392_v1 }
 0x17a   : > { %v1426_v51 = vpop.permute.xlu1 %1425 }
 0x17b   : > { %v1394_v31 = vpop.permute.xlu0 %1393  ;;  %v1557_v50 = vsel %vm1513_vm6, %v8915_v46, %v1426_v51 }
 0x17c   : > { %v1525_v32 = vsel %vm1513_vm6, %v8920_v49, %v1394_v31 }
 0x17e   : > { %v1490_v36 = vpop.permute.xlu1 %1489 }
 0x17f   : > { %v1620_v57 = vsel %vm1578_vm7, %v1555_v20, %v1490_v36  ;;  %v1458_v28 = vpop.permute.xlu0 %1457 }
 0x180   : > { %v1588_v30 = vsel %vm1578_vm7, %v1523_v23, %v1458_v28  ;;  %7909 = vmatprep.mubr.msk.bf16.mxu1 %vm1650_vm8, %v1620_v57 }
 0x181   : > { %7877 = vmatprep.mubr.msk.bf16.mxu0 %vm1650_vm8, %v1588_v30 }
 0x182   : > { %v1492_v26 = vpop.permute.xlu1 %1491 }
 0x183   : > { %v1622_v5 = vsel %vm1578_vm7, %v1557_v50, %v1492_v26  ;;  %v1460_v55 = vpop.permute.xlu0 %1459 }
 0x184   : > { %v1590_v35 = vsel %vm1578_vm7, %v1525_v32, %v1460_v55  ;;  %7910 = vmatmul.mubr.msk.bf16.gmra.mxu1 %vm1650_vm8, %v1622_v5 }
 0x185   : > { %7878 = vmatmul.mubr.msk.bf16.gmra.mxu0 %vm1650_vm8, %v1590_v35 }
 0x186   : > { %v1428_v52 = vpop.permute.xlu1 %1427 }
 0x187   : > { %v1396_v61 = vpop.permute.xlu0 %1395  ;;  %v1559_v46 = vsel %vm1513_vm6, %v8931_v58, %v1428_v52 }
 0x188   : > { %v1527_v49 = vsel %vm1513_vm6, %v8936_v3, %v1396_v61 }
 0x18a   : > { %v1430_v7 = vpop.permute.xlu1 %1429 }
 0x18b   : > { %v1398_v11 = vpop.permute.xlu0 %1397  ;;  %v1561_v37 = vsel %vm1513_vm6, %v8947_v14, %v1430_v7 }
 0x18c   : > { %v1529_v58 = vsel %vm1513_vm6, %v8952_v19, %v1398_v11 }
 0x18e   : > { %v1494_v63 = vpop.permute.xlu1 %1493 }
 0x18f   : > { %v1624_v41 = vsel %vm1578_vm7, %v1559_v46, %v1494_v63  ;;  %v1462_v60 = vpop.permute.xlu0 %1461 }
 0x190   : > { %v1592_v54 = vsel %vm1578_vm7, %v1527_v49, %v1462_v60  ;;  %7913 = vmatprep.mubr.msk.bf16.mxu1 %vm1650_vm8, %v1624_v41 }
 0x191   : > { %7881 = vmatprep.mubr.msk.bf16.mxu0 %vm1650_vm8, %v1592_v54 }
 0x192   : > { %v1496_v56 = vpop.permute.xlu1 %1495 }
 0x193   : > { %v1626_v10 = vsel %vm1578_vm7, %v1561_v37, %v1496_v56  ;;  %v1464_v12 = vpop.permute.xlu0 %1463 }
 0x194   : > { %v1594_v3 = vsel %vm1578_vm7, %v1529_v58, %v1464_v12  ;;  %7914 = vmatmul.mubr.msk.bf16.gmra.mxu1 %vm1650_vm8, %v1626_v10 }
 0x195   : > { %7882 = vmatmul.mubr.msk.bf16.gmra.mxu0 %vm1650_vm8, %v1594_v3 }
 0x196   : > { %v1432_v16 = vpop.permute.xlu1 %1431 }
 0x197   : > { %v1400_v21 = vpop.permute.xlu0 %1399  ;;  %v1563_v14 = vsel %vm1513_vm6, %v8963_v29, %v1432_v16 }
 0x198   : > { %v1531_v19 = vsel %vm1513_vm6, %v8966_v34, %v1400_v21 }
 0x19a   : > { %v1434_v62 = vpop.permute.xlu1 %1433 }
 0x19b   : > { %v1402_v27 = vpop.permute.xlu0 %1401  ;;  %v1565_v33 = vsel %vm1513_vm6, %v8979_v43, %v1434_v62 }
 0x19c   : > { %v1533_v29 = vsel %vm1513_vm6, %v8982_v48, %v1402_v27 }
 0x19e   : > { %v1498_v0 = vpop.permute.xlu1 %1497 }
 0x19f   : > { %v1628_v22 = vsel %vm1578_vm7, %v1563_v14, %v1498_v0  ;;  %v1466_v13 = vpop.permute.xlu0 %1465 }
 0x1a0   : > { %v1596_v24 = vsel %vm1578_vm7, %v1531_v19, %v1466_v13  ;;  %7917 = vmatprep.mubr.msk.bf16.mxu1 %vm1650_vm8, %v1628_v22  ;;  %v9249_v19 = vld [vmem:[%s12169_s2] ss:$0 sm:$0xff] }
 0x1a1   : > { %7885 = vmatprep.mubr.msk.bf16.mxu0 %vm1650_vm8, %v1596_v24 }
 0x1a2   : > { %v1500_v38 = vpop.permute.xlu1 %1499 }
 0x1a3   : > { %v1630_v6 = vsel %vm1578_vm7, %v1565_v33, %v1500_v38  ;;  %v1468_v53 = vpop.permute.xlu0 %1467 }
 0x1a4   : > { %v1598_v34 = vsel %vm1578_vm7, %v1533_v29, %v1468_v53  ;;  %7918 = vmatmul.mubr.msk.bf16.gmra.mxu1 %vm1650_vm8, %v1630_v6 }
 0x1a5   : > { %7886 = vmatmul.mubr.msk.bf16.gmra.mxu0 %vm1650_vm8, %v1598_v34 }
 0x1a6   : > { %v1436_v42 = vpop.permute.xlu1 %1435 }
 0x1a7   : > { %v1404_v9 = vpop.permute.xlu0 %1403  ;;  %v1567_v43 = vsel %vm1513_vm6, %v8995_v2, %v1436_v42 }
 0x1a8   : > { %v1535_v48 = vsel %vm1513_vm6, %v8998_v8, %v1404_v9 }
 0x1aa   : > { %v1438_v44 = vpop.permute.xlu1 %1437 }
 0x1ab   : > { %v1406_v1 = vpop.permute.xlu0 %1405  ;;  %v1569_v23 = vsel %vm1513_vm6, %v9011_v17, %v1438_v44 }
 0x1ac   : > { %v1537_v2 = vsel %vm1513_vm6, %v9014_v25, %v1406_v1 }
 0x1ae   : > { %v1502_v51 = vpop.permute.xlu1 %1501 }
 0x1af   : > { %v1632_v31 = vsel %vm1578_vm7, %v1567_v43, %v1502_v51  ;;  %v1470_v20 = vpop.permute.xlu0 %1469 }
 0x1b0   : > { %v1600_v36 = vsel %vm1578_vm7, %v1535_v48, %v1470_v20  ;;  %7921 = vmatprep.mubr.msk.bf16.mxu1 %vm1650_vm8, %v1632_v31 }
 0x1b1   : > { %7889 = vmatprep.mubr.msk.bf16.mxu0 %vm1650_vm8, %v1600_v36 }
 0x1b2   : > { %v1504_v57 = vpop.permute.xlu1 %1503 }
 0x1b3   : > { %v1634_v28 = vsel %vm1578_vm7, %v1569_v23, %v1504_v57  ;;  %v1472_v30 = vpop.permute.xlu0 %1471 }
 0x1b4   : > { %v1602_v8 = vsel %vm1578_vm7, %v1537_v2, %v1472_v30  ;;  %7922 = vmatmul.mubr.msk.bf16.gmra.mxu1 %vm1650_vm8, %v1634_v28 }
 0x1b5   : > { %7890 = vmatmul.mubr.msk.bf16.gmra.mxu0 %vm1650_vm8, %v1602_v8 }
 0x1b6   : > { %v1440_v50 = vpop.permute.xlu1 %1439 }
 0x1b7   : > { %v1408_v26 = vpop.permute.xlu0 %1407  ;;  %v1571_v17 = vsel %vm1513_vm6, %v9027_v39, %v1440_v50 }
 0x1b8   : > { %v1539_v25 = vsel %vm1513_vm6, %v9030_v45, %v1408_v26 }
 0x1ba   : > { %v1442_v32 = vpop.permute.xlu1 %1441 }
 0x1bb   : > { %v1410_v5 = vpop.permute.xlu0 %1409  ;;  %v1573_v7 = vsel %vm1513_vm6, %v9043_v59, %v1442_v32 }
 0x1bc   : > { %v1541_v39 = vsel %vm1513_vm6, %v9046_v4, %v1410_v5 }
 0x1be   : > { %v1506_v55 = vpop.permute.xlu1 %1505 }
 0x1bf   : > { %v1636_v35 = vsel %vm1578_vm7, %v1571_v17, %v1506_v55  ;;  %v1474_v52 = vpop.permute.xlu0 %1473 }
 0x1c0   : > { %v1604_v61 = vsel %vm1578_vm7, %v1539_v25, %v1474_v52  ;;  %7925 = vmatprep.mubr.msk.bf16.mxu1 %vm1650_vm8, %v1636_v35 }
 0x1c1   : > { %7893 = vmatprep.mubr.msk.bf16.mxu0 %vm1650_vm8, %v1604_v61 }
 0x1c2   : > { %v1508_v11 = vpop.permute.xlu1 %1507 }
 0x1c3   : > { %v1638_v46 = vsel %vm1578_vm7, %v1573_v7, %v1508_v11  ;;  %v1476_v63 = vpop.permute.xlu0 %1475 }
 0x1c4   : > { %v1606_v45 = vsel %vm1578_vm7, %v1541_v39, %v1476_v63  ;;  %7926 = vmatmul.mubr.msk.bf16.gmra.mxu1 %vm1650_vm8, %v1638_v46 }
 0x1c5   : > { %7894 = vmatmul.mubr.msk.bf16.gmra.mxu0 %vm1650_vm8, %v1606_v45 }
 0x1c6   : > { %v1444_v49 = vpop.permute.xlu1 %1443 }
 0x1c7   : > { %v1412_v41 = vpop.permute.xlu0 %1411  ;;  %v1575_v59 = vsel %vm1513_vm6, %v9065_v15, %v1444_v49 }
 0x1c8   : > { %v1543_v4 = vsel %vm1513_vm6, %v9068_v18, %v1412_v41 }
 0x1ca   : > { %v1446_v60 = vpop.permute.xlu1 %1445 }
 0x1cb   : > { %v1414_v54 = vpop.permute.xlu0 %1413  ;;  %v1577_v12 = vsel %vm1513_vm6, %v9081_v40, %v1446_v60 }
 0x1cc   : > { %v1545_v15 = vsel %vm1513_vm6, %v9084_v47, %v1414_v54 }
 0x1ce   : > { %v1510_v37 = vpop.permute.xlu1 %1509 }
 0x1cf   : > { %v1640_v56 = vsel %vm1578_vm7, %v1575_v59, %v1510_v37  ;;  %v1478_v58 = vpop.permute.xlu0 %1477 }
 0x1d0   : > { %v1608_v10 = vsel %vm1578_vm7, %v1543_v4, %v1478_v58  ;;  %7929 = vmatprep.mubr.msk.bf16.mxu1 %vm1650_vm8, %v1640_v56 }
 0x1d1   : > { %7897 = vmatprep.mubr.msk.bf16.mxu0 %vm1650_vm8, %v1608_v10 }
 0x1d2   : > { %v1512_v3 = vpop.permute.xlu1 %1511 }
 0x1d3   : > { %v1642_v16 = vsel %vm1578_vm7, %v1577_v12, %v1512_v3  ;;  %v1480_v21 = vpop.permute.xlu0 %1479 }
 0x1d4   : > { %v1610_v18 = vsel %vm1578_vm7, %v1545_v15, %v1480_v21  ;;  %7930 = vmatmul.mubr.msk.bf16.gmra.mxu1 %vm1650_vm8, %v1642_v16 }
 0x1d5   : > { %7898 = vmatmul.mubr.msk.bf16.gmra.mxu0 %vm1650_vm8, %v1610_v18 }
 0x224   : > { %v7903_v62 = vpop.f32.mrf.mxu1 }
 0x225   : > { %v7871_v27 = vpop.f32.mrf.mxu0  ;;  %2045 = vst.msk [vmem:[#allocation3 + $0x110] sm:$0xff] %vm326_vm0, %v7903_v62 }
 0x226   : > { %2013 = vst.msk [vmem:[#allocation3 + $0x10] sm:$0xff] %vm326_vm0, %v7871_v27  ;;  %v1884_v40 = vpop.f32.mrf.mxu1 }
 0x227   : > { %v1756_v14 = vpop.f32.mrf.mxu0  ;;  %2043 = vst.msk [vmem:[#allocation3 + $0x100] sm:$0xff] %vm326_vm0, %v1884_v40 }
 0x228   : > { %2011 = vst.msk [vmem:[#allocation3] sm:$0xff] %vm326_vm0, %v1756_v14  ;;  %v7904_v47 = vpop.f32.mrf.mxu1 }
 0x229   : > { %v7872_v0 = vpop.f32.mrf.mxu0  ;;  %2046 = vst.msk [vmem:[#allocation3 + $0x118] sm:$0xff] %vm326_vm0, %v7904_v47 }
 0x22a   : > { %2014 = vst.msk [vmem:[#allocation3 + $0x18] sm:$0xff] %vm326_vm0, %v7872_v0  ;;  %v1887_v22 = vpop.f32.mrf.mxu1 }
 0x22b   : > { %v1759_v13 = vpop.f32.mrf.mxu0  ;;  %2044 = vst.msk [vmem:[#allocation3 + $0x108] sm:$0xff] %vm326_vm0, %v1887_v22 }
 0x22c   : > { %v2109_v24 = vld [vmem:[#allocation3 + $0x110] sm:$0xff]  ;;  %2012 = vst.msk [vmem:[#allocation3 + $0x8] sm:$0xff] %vm326_vm0, %v1759_v13 }
 0x22d   : > { %v2077_v33 = vld [vmem:[#allocation3 + $0x10] sm:$0xff]  ;;  %v2180_v38 = vadd.f32 %v9249_v19, %v2109_v24 }
 0x22e   : > { %v2148_v29 = vadd.f32 %v9249_v19, %v2077_v33  ;;  %v2107_v6 = vld [vmem:[#allocation3 + $0x100] sm:$0xff] }
 0x22f   : > { %v2244_v53 = vmax.f32 %v2180_v38, 0.0  ;;  %v2075_v34 = vld [vmem:[#allocation3] sm:$0xff]  ;;  %v2178_v42 = vadd.f32 %v9249_v19, %v2107_v6 }
 0x230   : > { %v2212_v9 = vmax.f32 %v2148_v29, 0.0  ;;  %v2146_v44 = vadd.f32 %v9249_v19, %v2075_v34  ;;  %v2110_v1 = vld [vmem:[#allocation3 + $0x118] sm:$0xff] }
 0x231   : > { %2308 = vst.msk [vmem:[#allocation2 + $0x1e1] sm:$0xff] %vm326_vm0, %v2244_v53  ;;  %v2242_v43 = vmax.f32 %v2178_v42, 0.0  ;;  %v2078_v51 = vld [vmem:[#allocation3 + $0x18] sm:$0xff]  ;;  %v2181_v48 = vadd.f32 %v9249_v19, %v2110_v1 }
 0x232   : > { %2276 = vst.msk [vmem:[#allocation2 + $0x31] sm:$0xff] %vm326_vm0, %v2212_v9  ;;  %v2210_v31 = vmax.f32 %v2146_v44, 0.0  ;;  %v2149_v20 = vadd.f32 %v9249_v19, %v2078_v51  ;;  %v2108_v36 = vld [vmem:[#allocation3 + $0x108] sm:$0xff] }
 0x233   : > { %2306 = vst.msk [vmem:[#allocation2 + $0x1c9] sm:$0xff] %vm326_vm0, %v2242_v43  ;;  %v2245_v23 = vmax.f32 %v2181_v48, 0.0  ;;  %v2076_v57 = vld [vmem:[#allocation3 + $0x8] sm:$0xff]  ;;  %v2179_v2 = vadd.f32 %v9249_v19, %v2108_v36 }
 0x234   : > { %2274 = vst.msk [vmem:[#allocation2 + $0x19] sm:$0xff] %vm326_vm0, %v2210_v31  ;;  %v2213_v28 = vmax.f32 %v2149_v20, 0.0  ;;  %v2147_v30 = vadd.f32 %v9249_v19, %v2076_v57  ;;  %v7907_v8 = vpop.f32.mrf.mxu1 }
 0x235   : > { %2309 = vst.msk [vmem:[#allocation2 + $0x1e9] sm:$0xff] %vm326_vm0, %v2245_v23  ;;  %v2243_v50 = vmax.f32 %v2179_v2, 0.0  ;;  %v7875_v26 = vpop.f32.mrf.mxu0  ;;  %2049 = vst.msk [vmem:[#allocation3 + $0x130] sm:$0xff] %vm326_vm0, %v7907_v8 }
 0x236   : > { %2277 = vst.msk [vmem:[#allocation2 + $0x39] sm:$0xff] %vm326_vm0, %v2213_v28  ;;  %v2211_v32 = vmax.f32 %v2147_v30, 0.0  ;;  %2017 = vst.msk [vmem:[#allocation3 + $0x30] sm:$0xff] %vm326_vm0, %v7875_v26  ;;  %v1900_v5 = vpop.f32.mrf.mxu1 }
 0x237   : > { %2307 = vst.msk [vmem:[#allocation2 + $0x1d1] sm:$0xff] %vm326_vm0, %v2243_v50  ;;  %v1772_v17 = vpop.f32.mrf.mxu0  ;;  %2047 = vst.msk [vmem:[#allocation3 + $0x120] sm:$0xff] %vm326_vm0, %v1900_v5 }
 0x238   : > { %2275 = vst.msk [vmem:[#allocation2 + $0x21] sm:$0xff] %vm326_vm0, %v2211_v32  ;;  %2015 = vst.msk [vmem:[#allocation3 + $0x20] sm:$0xff] %vm326_vm0, %v1772_v17  ;;  %v7908_v55 = vpop.f32.mrf.mxu1 }
 0x239   : > { %v7876_v25 = vpop.f32.mrf.mxu0  ;;  %2050 = vst.msk [vmem:[#allocation3 + $0x138] sm:$0xff] %vm326_vm0, %v7908_v55 }
 0x23a   : > { %2018 = vst.msk [vmem:[#allocation3 + $0x38] sm:$0xff] %vm326_vm0, %v7876_v25  ;;  %v1903_v35 = vpop.f32.mrf.mxu1 }
 0x23b   : > { %v1775_v52 = vpop.f32.mrf.mxu0  ;;  %2048 = vst.msk [vmem:[#allocation3 + $0x128] sm:$0xff] %vm326_vm0, %v1903_v35 }
 0x23c   : > { %v2113_v61 = vld [vmem:[#allocation3 + $0x130] sm:$0xff]  ;;  %2016 = vst.msk [vmem:[#allocation3 + $0x28] sm:$0xff] %vm326_vm0, %v1775_v52 }
 0x23d   : > { %v2081_v7 = vld [vmem:[#allocation3 + $0x30] sm:$0xff]  ;;  %v2184_v11 = vadd.f32 %v9249_v19, %v2113_v61 }
 0x23e   : > { %v2152_v39 = vadd.f32 %v9249_v19, %v2081_v7  ;;  %v2111_v46 = vld [vmem:[#allocation3 + $0x120] sm:$0xff] }
 0x23f   : > { %v2248_v63 = vmax.f32 %v2184_v11, 0.0  ;;  %v2079_v45 = vld [vmem:[#allocation3 + $0x20] sm:$0xff]  ;;  %v2182_v49 = vadd.f32 %v9249_v19, %v2111_v46 }
 0x240   : > { %v2216_v41 = vmax.f32 %v2152_v39, 0.0  ;;  %v2150_v60 = vadd.f32 %v9249_v19, %v2079_v45  ;;  %v2114_v54 = vld [vmem:[#allocation3 + $0x138] sm:$0xff] }
 0x241   : > { %2312 = vst.msk [vmem:[#allocation2 + $0x211] sm:$0xff] %vm326_vm0, %v2248_v63  ;;  %v2246_v59 = vmax.f32 %v2182_v49, 0.0  ;;  %v2082_v37 = vld [vmem:[#allocation3 + $0x38] sm:$0xff]  ;;  %v2185_v4 = vadd.f32 %v9249_v19, %v2114_v54 }
 0x242   : > { %2280 = vst.msk [vmem:[#allocation2 + $0x61] sm:$0xff] %vm326_vm0, %v2216_v41  ;;  %v2214_v56 = vmax.f32 %v2150_v60, 0.0  ;;  %v2153_v58 = vadd.f32 %v9249_v19, %v2082_v37  ;;  %v2112_v10 = vld [vmem:[#allocation3 + $0x128] sm:$0xff] }
 0x243   : > { %2310 = vst.msk [vmem:[#allocation2 + $0x1f9] sm:$0xff] %vm326_vm0, %v2246_v59  ;;  %v2249_v12 = vmax.f32 %v2185_v4, 0.0  ;;  %v2080_v3 = vld [vmem:[#allocation3 + $0x28] sm:$0xff]  ;;  %v2183_v15 = vadd.f32 %v9249_v19, %v2112_v10 }
 0x244   : > { %2278 = vst.msk [vmem:[#allocation2 + $0x49] sm:$0xff] %vm326_vm0, %v2214_v56  ;;  %v2217_v16 = vmax.f32 %v2153_v58, 0.0  ;;  %v2151_v21 = vadd.f32 %v9249_v19, %v2080_v3  ;;  %v7911_v18 = vpop.f32.mrf.mxu1 }
 0x245   : > { %2313 = vst.msk [vmem:[#allocation2 + $0x219] sm:$0xff] %vm326_vm0, %v2249_v12  ;;  %v2247_v62 = vmax.f32 %v2183_v15, 0.0  ;;  %v7879_v27 = vpop.f32.mrf.mxu0  ;;  %2053 = vst.msk [vmem:[#allocation3 + $0x150] sm:$0xff] %vm326_vm0, %v7911_v18 }
 0x246   : > { %2281 = vst.msk [vmem:[#allocation2 + $0x69] sm:$0xff] %vm326_vm0, %v2217_v16  ;;  %v2215_v40 = vmax.f32 %v2151_v21, 0.0  ;;  %2021 = vst.msk [vmem:[#allocation3 + $0x50] sm:$0xff] %vm326_vm0, %v7879_v27  ;;  %v1916_v14 = vpop.f32.mrf.mxu1 }
 0x247   : > { %2311 = vst.msk [vmem:[#allocation2 + $0x201] sm:$0xff] %vm326_vm0, %v2247_v62  ;;  %v1788_v47 = vpop.f32.mrf.mxu0  ;;  %2051 = vst.msk [vmem:[#allocation3 + $0x140] sm:$0xff] %vm326_vm0, %v1916_v14 }
 0x248   : > { %2279 = vst.msk [vmem:[#allocation2 + $0x51] sm:$0xff] %vm326_vm0, %v2215_v40  ;;  %2019 = vst.msk [vmem:[#allocation3 + $0x40] sm:$0xff] %vm326_vm0, %v1788_v47  ;;  %v7912_v0 = vpop.f32.mrf.mxu1 }
 0x249   : > { %v7880_v22 = vpop.f32.mrf.mxu0  ;;  %2054 = vst.msk [vmem:[#allocation3 + $0x158] sm:$0xff] %vm326_vm0, %v7912_v0 }
 0x24a   : > { %2022 = vst.msk [vmem:[#allocation3 + $0x58] sm:$0xff] %vm326_vm0, %v7880_v22  ;;  %v1919_v13 = vpop.f32.mrf.mxu1 }
 0x24b   : > { %v1791_v24 = vpop.f32.mrf.mxu0  ;;  %2052 = vst.msk [vmem:[#allocation3 + $0x148] sm:$0xff] %vm326_vm0, %v1919_v13 }
 0x24c   : > { %v2117_v33 = vld [vmem:[#allocation3 + $0x150] sm:$0xff]  ;;  %2020 = vst.msk [vmem:[#allocation3 + $0x48] sm:$0xff] %vm326_vm0, %v1791_v24 }
 0x24d   : > { %v2085_v38 = vld [vmem:[#allocation3 + $0x50] sm:$0xff]  ;;  %v2188_v29 = vadd.f32 %v9249_v19, %v2117_v33 }
 0x24e   : > { %v2156_v6 = vadd.f32 %v9249_v19, %v2085_v38  ;;  %v2115_v53 = vld [vmem:[#allocation3 + $0x140] sm:$0xff] }
 0x24f   : > { %v2252_v34 = vmax.f32 %v2188_v29, 0.0  ;;  %v2083_v42 = vld [vmem:[#allocation3 + $0x40] sm:$0xff]  ;;  %v2186_v9 = vadd.f32 %v9249_v19, %v2115_v53 }
 0x250   : > { %v2220_v44 = vmax.f32 %v2156_v6, 0.0  ;;  %v2154_v1 = vadd.f32 %v9249_v19, %v2083_v42  ;;  %v2118_v43 = vld [vmem:[#allocation3 + $0x158] sm:$0xff] }
 0x251   : > { %2316 = vst.msk [vmem:[#allocation2 + $0x241] sm:$0xff] %vm326_vm0, %v2252_v34  ;;  %v2250_v51 = vmax.f32 %v2186_v9, 0.0  ;;  %v2086_v48 = vld [vmem:[#allocation3 + $0x58] sm:$0xff]  ;;  %v2189_v31 = vadd.f32 %v9249_v19, %v2118_v43 }
 0x252   : > { %2284 = vst.msk [vmem:[#allocation2 + $0x91] sm:$0xff] %vm326_vm0, %v2220_v44  ;;  %v2218_v20 = vmax.f32 %v2154_v1, 0.0  ;;  %v2157_v36 = vadd.f32 %v9249_v19, %v2086_v48  ;;  %v2116_v23 = vld [vmem:[#allocation3 + $0x148] sm:$0xff] }
 0x253   : > { %2314 = vst.msk [vmem:[#allocation2 + $0x229] sm:$0xff] %vm326_vm0, %v2250_v51  ;;  %v2253_v57 = vmax.f32 %v2189_v31, 0.0  ;;  %v2084_v2 = vld [vmem:[#allocation3 + $0x48] sm:$0xff]  ;;  %v2187_v28 = vadd.f32 %v9249_v19, %v2116_v23 }
 0x254   : > { %2282 = vst.msk [vmem:[#allocation2 + $0x79] sm:$0xff] %vm326_vm0, %v2218_v20  ;;  %v2221_v30 = vmax.f32 %v2157_v36, 0.0  ;;  %v2155_v8 = vadd.f32 %v9249_v19, %v2084_v2  ;;  %v7915_v50 = vpop.f32.mrf.mxu1 }
 0x255   : > { %2317 = vst.msk [vmem:[#allocation2 + $0x249] sm:$0xff] %vm326_vm0, %v2253_v57  ;;  %v2251_v26 = vmax.f32 %v2187_v28, 0.0  ;;  %v7883_v32 = vpop.f32.mrf.mxu0  ;;  %2057 = vst.msk [vmem:[#allocation3 + $0x170] sm:$0xff] %vm326_vm0, %v7915_v50 }
 0x256   : > { %2285 = vst.msk [vmem:[#allocation2 + $0x99] sm:$0xff] %vm326_vm0, %v2221_v30  ;;  %v2219_v5 = vmax.f32 %v2155_v8, 0.0  ;;  %2025 = vst.msk [vmem:[#allocation3 + $0x70] sm:$0xff] %vm326_vm0, %v7883_v32  ;;  %v1932_v17 = vpop.f32.mrf.mxu1 }
 0x257   : > { %2315 = vst.msk [vmem:[#allocation2 + $0x231] sm:$0xff] %vm326_vm0, %v2251_v26  ;;  %v1804_v55 = vpop.f32.mrf.mxu0  ;;  %2055 = vst.msk [vmem:[#allocation3 + $0x160] sm:$0xff] %vm326_vm0, %v1932_v17 }
 0x258   : > { %2283 = vst.msk [vmem:[#allocation2 + $0x81] sm:$0xff] %vm326_vm0, %v2219_v5  ;;  %2023 = vst.msk [vmem:[#allocation3 + $0x60] sm:$0xff] %vm326_vm0, %v1804_v55  ;;  %v7916_v25 = vpop.f32.mrf.mxu1 }
 0x259   : > { %v7884_v35 = vpop.f32.mrf.mxu0  ;;  %2058 = vst.msk [vmem:[#allocation3 + $0x178] sm:$0xff] %vm326_vm0, %v7916_v25 }
 0x25a   : > { %2026 = vst.msk [vmem:[#allocation3 + $0x78] sm:$0xff] %vm326_vm0, %v7884_v35  ;;  %v1935_v52 = vpop.f32.mrf.mxu1 }
 0x25b   : > { %v1807_v61 = vpop.f32.mrf.mxu0  ;;  %2056 = vst.msk [vmem:[#allocation3 + $0x168] sm:$0xff] %vm326_vm0, %v1935_v52 }
 0x25c   : > { %v2121_v7 = vld [vmem:[#allocation3 + $0x170] sm:$0xff]  ;;  %2024 = vst.msk [vmem:[#allocation3 + $0x68] sm:$0xff] %vm326_vm0, %v1807_v61 }
 0x25d   : > { %v2089_v11 = vld [vmem:[#allocation3 + $0x70] sm:$0xff]  ;;  %v2192_v39 = vadd.f32 %v9249_v19, %v2121_v7 }
 0x25e   : > { %v2160_v46 = vadd.f32 %v9249_v19, %v2089_v11  ;;  %v2119_v63 = vld [vmem:[#allocation3 + $0x160] sm:$0xff] }
 0x25f   : > { %v2256_v45 = vmax.f32 %v2192_v39, 0.0  ;;  %v2087_v49 = vld [vmem:[#allocation3 + $0x60] sm:$0xff]  ;;  %v2190_v41 = vadd.f32 %v9249_v19, %v2119_v63 }
 0x260   : > { %v2224_v60 = vmax.f32 %v2160_v46, 0.0  ;;  %v2158_v54 = vadd.f32 %v9249_v19, %v2087_v49  ;;  %v2122_v59 = vld [vmem:[#allocation3 + $0x178] sm:$0xff] }
 0x261   : > { %2320 = vst.msk [vmem:[#allocation2 + $0x271] sm:$0xff] %vm326_vm0, %v2256_v45  ;;  %v2254_v37 = vmax.f32 %v2190_v41, 0.0  ;;  %v2090_v4 = vld [vmem:[#allocation3 + $0x78] sm:$0xff]  ;;  %v2193_v56 = vadd.f32 %v9249_v19, %v2122_v59 }
 0x262   : > { %2288 = vst.msk [vmem:[#allocation2 + $0xc1] sm:$0xff] %vm326_vm0, %v2224_v60  ;;  %v2222_v58 = vmax.f32 %v2158_v54, 0.0  ;;  %v2161_v10 = vadd.f32 %v9249_v19, %v2090_v4  ;;  %v2120_v12 = vld [vmem:[#allocation3 + $0x168] sm:$0xff] }
 0x263   : > { %2318 = vst.msk [vmem:[#allocation2 + $0x259] sm:$0xff] %vm326_vm0, %v2254_v37  ;;  %v2257_v3 = vmax.f32 %v2193_v56, 0.0  ;;  %v2088_v15 = vld [vmem:[#allocation3 + $0x68] sm:$0xff]  ;;  %v2191_v16 = vadd.f32 %v9249_v19, %v2120_v12 }
 0x264   : > { %2286 = vst.msk [vmem:[#allocation2 + $0xa9] sm:$0xff] %vm326_vm0, %v2222_v58  ;;  %v2225_v21 = vmax.f32 %v2161_v10, 0.0  ;;  %v2159_v18 = vadd.f32 %v9249_v19, %v2088_v15  ;;  %v7919_v62 = vpop.f32.mrf.mxu1 }
 0x265   : > { %2321 = vst.msk [vmem:[#allocation2 + $0x279] sm:$0xff] %vm326_vm0, %v2257_v3  ;;  %v2255_v27 = vmax.f32 %v2191_v16, 0.0  ;;  %v7887_v40 = vpop.f32.mrf.mxu0  ;;  %2061 = vst.msk [vmem:[#allocation3 + $0x190] sm:$0xff] %vm326_vm0, %v7919_v62 }
 0x266   : > { %2289 = vst.msk [vmem:[#allocation2 + $0xc9] sm:$0xff] %vm326_vm0, %v2225_v21  ;;  %v2223_v14 = vmax.f32 %v2159_v18, 0.0  ;;  %2029 = vst.msk [vmem:[#allocation3 + $0x90] sm:$0xff] %vm326_vm0, %v7887_v40  ;;  %v1948_v47 = vpop.f32.mrf.mxu1 }
 0x267   : > { %2319 = vst.msk [vmem:[#allocation2 + $0x261] sm:$0xff] %vm326_vm0, %v2255_v27  ;;  %v1820_v0 = vpop.f32.mrf.mxu0  ;;  %2059 = vst.msk [vmem:[#allocation3 + $0x180] sm:$0xff] %vm326_vm0, %v1948_v47 }
 0x268   : > { %2287 = vst.msk [vmem:[#allocation2 + $0xb1] sm:$0xff] %vm326_vm0, %v2223_v14  ;;  %2027 = vst.msk [vmem:[#allocation3 + $0x80] sm:$0xff] %vm326_vm0, %v1820_v0  ;;  %v7920_v22 = vpop.f32.mrf.mxu1 }
 0x269   : > { %v7888_v13 = vpop.f32.mrf.mxu0  ;;  %2062 = vst.msk [vmem:[#allocation3 + $0x198] sm:$0xff] %vm326_vm0, %v7920_v22 }
 0x26a   : > { %2030 = vst.msk [vmem:[#allocation3 + $0x98] sm:$0xff] %vm326_vm0, %v7888_v13  ;;  %v1951_v24 = vpop.f32.mrf.mxu1 }
 0x26b   : > { %v1823_v33 = vpop.f32.mrf.mxu0  ;;  %2060 = vst.msk [vmem:[#allocation3 + $0x188] sm:$0xff] %vm326_vm0, %v1951_v24 }
 0x26c   : > { %v2125_v38 = vld [vmem:[#allocation3 + $0x190] sm:$0xff]  ;;  %2028 = vst.msk [vmem:[#allocation3 + $0x88] sm:$0xff] %vm326_vm0, %v1823_v33 }
 0x26d   : > { %v2093_v29 = vld [vmem:[#allocation3 + $0x90] sm:$0xff]  ;;  %v2196_v6 = vadd.f32 %v9249_v19, %v2125_v38 }
 0x26e   : > { %v2164_v53 = vadd.f32 %v9249_v19, %v2093_v29  ;;  %v2123_v34 = vld [vmem:[#allocation3 + $0x180] sm:$0xff] }
 0x26f   : > { %v2260_v42 = vmax.f32 %v2196_v6, 0.0  ;;  %v2091_v9 = vld [vmem:[#allocation3 + $0x80] sm:$0xff]  ;;  %v2194_v44 = vadd.f32 %v9249_v19, %v2123_v34 }
 0x270   : > { %v2228_v1 = vmax.f32 %v2164_v53, 0.0  ;;  %v2162_v43 = vadd.f32 %v9249_v19, %v2091_v9  ;;  %v2126_v51 = vld [vmem:[#allocation3 + $0x198] sm:$0xff] }
 0x271   : > { %2324 = vst.msk [vmem:[#allocation2 + $0x2a1] sm:$0xff] %vm326_vm0, %v2260_v42  ;;  %v2258_v48 = vmax.f32 %v2194_v44, 0.0  ;;  %v2094_v31 = vld [vmem:[#allocation3 + $0x98] sm:$0xff]  ;;  %v2197_v20 = vadd.f32 %v9249_v19, %v2126_v51 }
 0x272   : > { %2292 = vst.msk [vmem:[#allocation2 + $0xf1] sm:$0xff] %vm326_vm0, %v2228_v1  ;;  %v2226_v36 = vmax.f32 %v2162_v43, 0.0  ;;  %v2165_v23 = vadd.f32 %v9249_v19, %v2094_v31  ;;  %v2124_v57 = vld [vmem:[#allocation3 + $0x188] sm:$0xff] }
 0x273   : > { %2322 = vst.msk [vmem:[#allocation2 + $0x289] sm:$0xff] %vm326_vm0, %v2258_v48  ;;  %v2261_v2 = vmax.f32 %v2197_v20, 0.0  ;;  %v2092_v28 = vld [vmem:[#allocation3 + $0x88] sm:$0xff]  ;;  %v2195_v30 = vadd.f32 %v9249_v19, %v2124_v57 }
 0x274   : > { %2290 = vst.msk [vmem:[#allocation2 + $0xd9] sm:$0xff] %vm326_vm0, %v2226_v36  ;;  %v2229_v8 = vmax.f32 %v2165_v23, 0.0  ;;  %v2163_v50 = vadd.f32 %v9249_v19, %v2092_v28  ;;  %v7923_v26 = vpop.f32.mrf.mxu1 }
 0x275   : > { %2325 = vst.msk [vmem:[#allocation2 + $0x2a9] sm:$0xff] %vm326_vm0, %v2261_v2  ;;  %v2259_v32 = vmax.f32 %v2195_v30, 0.0  ;;  %v7891_v5 = vpop.f32.mrf.mxu0  ;;  %2065 = vst.msk [vmem:[#allocation3 + $0x1b0] sm:$0xff] %vm326_vm0, %v7923_v26 }
 0x276   : > { %2293 = vst.msk [vmem:[#allocation2 + $0xf9] sm:$0xff] %vm326_vm0, %v2229_v8  ;;  %v2227_v17 = vmax.f32 %v2163_v50, 0.0  ;;  %2033 = vst.msk [vmem:[#allocation3 + $0xb0] sm:$0xff] %vm326_vm0, %v7891_v5  ;;  %v1964_v55 = vpop.f32.mrf.mxu1 }
 0x277   : > { %2323 = vst.msk [vmem:[#allocation2 + $0x291] sm:$0xff] %vm326_vm0, %v2259_v32  ;;  %v1836_v25 = vpop.f32.mrf.mxu0  ;;  %2063 = vst.msk [vmem:[#allocation3 + $0x1a0] sm:$0xff] %vm326_vm0, %v1964_v55 }
 0x278   : > { %2291 = vst.msk [vmem:[#allocation2 + $0xe1] sm:$0xff] %vm326_vm0, %v2227_v17  ;;  %2031 = vst.msk [vmem:[#allocation3 + $0xa0] sm:$0xff] %vm326_vm0, %v1836_v25  ;;  %v7924_v35 = vpop.f32.mrf.mxu1 }
 0x279   : > { %v7892_v52 = vpop.f32.mrf.mxu0  ;;  %2066 = vst.msk [vmem:[#allocation3 + $0x1b8] sm:$0xff] %vm326_vm0, %v7924_v35 }
 0x27a   : > { %2034 = vst.msk [vmem:[#allocation3 + $0xb8] sm:$0xff] %vm326_vm0, %v7892_v52  ;;  %v1967_v61 = vpop.f32.mrf.mxu1 }
 0x27b   : > { %v1839_v7 = vpop.f32.mrf.mxu0  ;;  %2064 = vst.msk [vmem:[#allocation3 + $0x1a8] sm:$0xff] %vm326_vm0, %v1967_v61 }
 0x27c   : > { %v2129_v11 = vld [vmem:[#allocation3 + $0x1b0] sm:$0xff]  ;;  %2032 = vst.msk [vmem:[#allocation3 + $0xa8] sm:$0xff] %vm326_vm0, %v1839_v7 }
 0x27d   : > { %v2097_v39 = vld [vmem:[#allocation3 + $0xb0] sm:$0xff]  ;;  %v2200_v46 = vadd.f32 %v9249_v19, %v2129_v11 }
 0x27e   : > { %v2168_v63 = vadd.f32 %v9249_v19, %v2097_v39  ;;  %v2127_v45 = vld [vmem:[#allocation3 + $0x1a0] sm:$0xff] }
 0x27f   : > { %v2264_v49 = vmax.f32 %v2200_v46, 0.0  ;;  %v2095_v41 = vld [vmem:[#allocation3 + $0xa0] sm:$0xff]  ;;  %v2198_v60 = vadd.f32 %v9249_v19, %v2127_v45 }
 0x280   : > { %v2232_v54 = vmax.f32 %v2168_v63, 0.0  ;;  %v2166_v59 = vadd.f32 %v9249_v19, %v2095_v41  ;;  %v2130_v37 = vld [vmem:[#allocation3 + $0x1b8] sm:$0xff] }
 0x281   : > { %2328 = vst.msk [vmem:[#allocation2 + $0x2d1] sm:$0xff] %vm326_vm0, %v2264_v49  ;;  %v2262_v4 = vmax.f32 %v2198_v60, 0.0  ;;  %v2098_v56 = vld [vmem:[#allocation3 + $0xb8] sm:$0xff]  ;;  %v2201_v58 = vadd.f32 %v9249_v19, %v2130_v37 }
 0x282   : > { %2296 = vst.msk [vmem:[#allocation2 + $0x121] sm:$0xff] %vm326_vm0, %v2232_v54  ;;  %v2230_v10 = vmax.f32 %v2166_v59, 0.0  ;;  %v2169_v12 = vadd.f32 %v9249_v19, %v2098_v56  ;;  %v2128_v3 = vld [vmem:[#allocation3 + $0x1a8] sm:$0xff] }
 0x283   : > { %2326 = vst.msk [vmem:[#allocation2 + $0x2b9] sm:$0xff] %vm326_vm0, %v2262_v4  ;;  %v2265_v15 = vmax.f32 %v2201_v58, 0.0  ;;  %v2096_v16 = vld [vmem:[#allocation3 + $0xa8] sm:$0xff]  ;;  %v2199_v21 = vadd.f32 %v9249_v19, %v2128_v3 }
 0x284   : > { %2294 = vst.msk [vmem:[#allocation2 + $0x109] sm:$0xff] %vm326_vm0, %v2230_v10  ;;  %v2233_v18 = vmax.f32 %v2169_v12, 0.0  ;;  %v2167_v62 = vadd.f32 %v9249_v19, %v2096_v16  ;;  %v7927_v27 = vpop.f32.mrf.mxu1 }
 0x285   : > { %2329 = vst.msk [vmem:[#allocation2 + $0x2d9] sm:$0xff] %vm326_vm0, %v2265_v15  ;;  %v2263_v40 = vmax.f32 %v2199_v21, 0.0  ;;  %v7895_v14 = vpop.f32.mrf.mxu0  ;;  %2069 = vst.msk [vmem:[#allocation3 + $0x1d0] sm:$0xff] %vm326_vm0, %v7927_v27 }
 0x286   : > { %2297 = vst.msk [vmem:[#allocation2 + $0x129] sm:$0xff] %vm326_vm0, %v2233_v18  ;;  %v2231_v47 = vmax.f32 %v2167_v62, 0.0  ;;  %2037 = vst.msk [vmem:[#allocation3 + $0xd0] sm:$0xff] %vm326_vm0, %v7895_v14  ;;  %v1980_v0 = vpop.f32.mrf.mxu1 }
 0x287   : > { %2327 = vst.msk [vmem:[#allocation2 + $0x2c1] sm:$0xff] %vm326_vm0, %v2263_v40  ;;  %v1852_v22 = vpop.f32.mrf.mxu0  ;;  %2067 = vst.msk [vmem:[#allocation3 + $0x1c0] sm:$0xff] %vm326_vm0, %v1980_v0 }
 0x288   : > { %2295 = vst.msk [vmem:[#allocation2 + $0x111] sm:$0xff] %vm326_vm0, %v2231_v47  ;;  %2035 = vst.msk [vmem:[#allocation3 + $0xc0] sm:$0xff] %vm326_vm0, %v1852_v22  ;;  %v7928_v13 = vpop.f32.mrf.mxu1 }
 0x289   : > { %v7896_v24 = vpop.f32.mrf.mxu0  ;;  %2070 = vst.msk [vmem:[#allocation3 + $0x1d8] sm:$0xff] %vm326_vm0, %v7928_v13 }
 0x28a   : > { %2038 = vst.msk [vmem:[#allocation3 + $0xd8] sm:$0xff] %vm326_vm0, %v7896_v24  ;;  %v1983_v33 = vpop.f32.mrf.mxu1 }
 0x28b   : > { %v1855_v38 = vpop.f32.mrf.mxu0  ;;  %2068 = vst.msk [vmem:[#allocation3 + $0x1c8] sm:$0xff] %vm326_vm0, %v1983_v33 }
 0x28c   : > { %v2133_v29 = vld [vmem:[#allocation3 + $0x1d0] sm:$0xff]  ;;  %2036 = vst.msk [vmem:[#allocation3 + $0xc8] sm:$0xff] %vm326_vm0, %v1855_v38 }
 0x28d   : > { %v2101_v6 = vld [vmem:[#allocation3 + $0xd0] sm:$0xff]  ;;  %v2204_v53 = vadd.f32 %v9249_v19, %v2133_v29 }
 0x28e   : > { %v2172_v34 = vadd.f32 %v9249_v19, %v2101_v6  ;;  %v2131_v42 = vld [vmem:[#allocation3 + $0x1c0] sm:$0xff] }
 0x28f   : > { %v2268_v9 = vmax.f32 %v2204_v53, 0.0  ;;  %v2099_v44 = vld [vmem:[#allocation3 + $0xc0] sm:$0xff]  ;;  %v2202_v1 = vadd.f32 %v9249_v19, %v2131_v42 }
 0x290   : > { %v2236_v43 = vmax.f32 %v2172_v34, 0.0  ;;  %v2170_v51 = vadd.f32 %v9249_v19, %v2099_v44  ;;  %v2134_v48 = vld [vmem:[#allocation3 + $0x1d8] sm:$0xff] }
 0x291   : > { %2332 = vst.msk [vmem:[#allocation2 + $0x301] sm:$0xff] %vm326_vm0, %v2268_v9  ;;  %v2266_v31 = vmax.f32 %v2202_v1, 0.0  ;;  %v2102_v20 = vld [vmem:[#allocation3 + $0xd8] sm:$0xff]  ;;  %v2205_v36 = vadd.f32 %v9249_v19, %v2134_v48 }
 0x292   : > { %2300 = vst.msk [vmem:[#allocation2 + $0x151] sm:$0xff] %vm326_vm0, %v2236_v43  ;;  %v2234_v23 = vmax.f32 %v2170_v51, 0.0  ;;  %v2173_v57 = vadd.f32 %v9249_v19, %v2102_v20  ;;  %v2132_v2 = vld [vmem:[#allocation3 + $0x1c8] sm:$0xff] }
 0x293   : > { %2330 = vst.msk [vmem:[#allocation2 + $0x2e9] sm:$0xff] %vm326_vm0, %v2266_v31  ;;  %v2269_v28 = vmax.f32 %v2205_v36, 0.0  ;;  %v2100_v30 = vld [vmem:[#allocation3 + $0xc8] sm:$0xff]  ;;  %v2203_v8 = vadd.f32 %v9249_v19, %v2132_v2 }
 0x294   : > { %2298 = vst.msk [vmem:[#allocation2 + $0x139] sm:$0xff] %vm326_vm0, %v2234_v23  ;;  %v2237_v50 = vmax.f32 %v2173_v57, 0.0  ;;  %v2171_v26 = vadd.f32 %v9249_v19, %v2100_v30  ;;  %v7931_v32 = vpop.f32.mrf.mxu1 }
 0x295   : > { %2333 = vst.msk [vmem:[#allocation2 + $0x309] sm:$0xff] %vm326_vm0, %v2269_v28  ;;  %v2267_v5 = vmax.f32 %v2203_v8, 0.0  ;;  %v7899_v17 = vpop.f32.mrf.mxu0  ;;  %2073 = vst.msk [vmem:[#allocation3 + $0x1f0] sm:$0xff] %vm326_vm0, %v7931_v32 }
 0x296   : > { %2301 = vst.msk [vmem:[#allocation2 + $0x159] sm:$0xff] %vm326_vm0, %v2237_v50  ;;  %v2235_v55 = vmax.f32 %v2171_v26, 0.0  ;;  %2041 = vst.msk [vmem:[#allocation3 + $0xf0] sm:$0xff] %vm326_vm0, %v7899_v17  ;;  %v1996_v25 = vpop.f32.mrf.mxu1 }
 0x297   : > { %2331 = vst.msk [vmem:[#allocation2 + $0x2f1] sm:$0xff] %vm326_vm0, %v2267_v5  ;;  %v1868_v35 = vpop.f32.mrf.mxu0  ;;  %2071 = vst.msk [vmem:[#allocation3 + $0x1e0] sm:$0xff] %vm326_vm0, %v1996_v25 }
 0x298   : > { %2299 = vst.msk [vmem:[#allocation2 + $0x141] sm:$0xff] %vm326_vm0, %v2235_v55  ;;  %2039 = vst.msk [vmem:[#allocation3 + $0xe0] sm:$0xff] %vm326_vm0, %v1868_v35  ;;  %v7932_v52 = vpop.f32.mrf.mxu1 }
 0x299   : > { %v7900_v61 = vpop.f32.mrf.mxu0  ;;  %2074 = vst.msk [vmem:[#allocation3 + $0x1f8] sm:$0xff] %vm326_vm0, %v7932_v52 }
 0x29a   : > { %2042 = vst.msk [vmem:[#allocation3 + $0xf8] sm:$0xff] %vm326_vm0, %v7900_v61  ;;  %v1999_v7 = vpop.f32.mrf.mxu1 }
 0x29b   : > { %v1871_v11 = vpop.f32.mrf.mxu0  ;;  %2072 = vst.msk [vmem:[#allocation3 + $0x1e8] sm:$0xff] %vm326_vm0, %v1999_v7 }
 0x29c   : > { %v2137_v39 = vld [vmem:[#allocation3 + $0x1f0] sm:$0xff]  ;;  %2040 = vst.msk [vmem:[#allocation3 + $0xe8] sm:$0xff] %vm326_vm0, %v1871_v11 }
 0x29d   : > { %v2105_v46 = vld [vmem:[#allocation3 + $0xf0] sm:$0xff]  ;;  %v2208_v63 = vadd.f32 %v9249_v19, %v2137_v39 }
 0x29e   : > { %v2176_v45 = vadd.f32 %v9249_v19, %v2105_v46  ;;  %v2135_v49 = vld [vmem:[#allocation3 + $0x1e0] sm:$0xff] }
 0x29f   : > { %v2272_v41 = vmax.f32 %v2208_v63, 0.0  ;;  %v2103_v60 = vld [vmem:[#allocation3 + $0xe0] sm:$0xff]  ;;  %v2206_v54 = vadd.f32 %v9249_v19, %v2135_v49 }
 0x2a0   : > { %v2240_v59 = vmax.f32 %v2176_v45, 0.0  ;;  %v2174_v37 = vadd.f32 %v9249_v19, %v2103_v60  ;;  %v2138_v4 = vld [vmem:[#allocation3 + $0x1f8] sm:$0xff] }
 0x2a1   : > { %2336 = vst.msk [vmem:[#allocation2 + $0x331] sm:$0xff] %vm326_vm0, %v2272_v41  ;;  %v2270_v56 = vmax.f32 %v2206_v54, 0.0  ;;  %v2106_v58 = vld [vmem:[#allocation3 + $0xf8] sm:$0xff]  ;;  %v2209_v10 = vadd.f32 %v9249_v19, %v2138_v4 }
 0x2a2   : > { %2304 = vst.msk [vmem:[#allocation2 + $0x181] sm:$0xff] %vm326_vm0, %v2240_v59  ;;  %v2238_v12 = vmax.f32 %v2174_v37, 0.0  ;;  %v2177_v3 = vadd.f32 %v9249_v19, %v2106_v58  ;;  %v2136_v15 = vld [vmem:[#allocation3 + $0x1e8] sm:$0xff] }
 0x2a3   : > { %2334 = vst.msk [vmem:[#allocation2 + $0x319] sm:$0xff] %vm326_vm0, %v2270_v56  ;;  %v2273_v16 = vmax.f32 %v2209_v10, 0.0  ;;  %v2104_v21 = vld [vmem:[#allocation3 + $0xe8] sm:$0xff]  ;;  %v2207_v18 = vadd.f32 %v9249_v19, %v2136_v15 }
 0x2a4   : > { %2302 = vst.msk [vmem:[#allocation2 + $0x169] sm:$0xff] %vm326_vm0, %v2238_v12  ;;  %v2241_v62 = vmax.f32 %v2177_v3, 0.0  ;;  %v2175_v27 = vadd.f32 %v9249_v19, %v2104_v21 }
 0x2a5   : > { %2337 = vst.msk [vmem:[#allocation2 + $0x339] sm:$0xff] %vm326_vm0, %v2273_v16  ;;  %v2271_v40 = vmax.f32 %v2207_v18, 0.0 }
 0x2a6   : > { %2305 = vst.msk [vmem:[#allocation2 + $0x189] sm:$0xff] %vm326_vm0, %v2241_v62  ;;  %v2239_v14 = vmax.f32 %v2175_v27, 0.0 }
 0x2a7   : > { %2335 = vst.msk [vmem:[#allocation2 + $0x321] sm:$0xff] %vm326_vm0, %v2271_v40 }
 0x2a8   : > { %2303 = vst.msk [vmem:[#allocation2 + $0x171] sm:$0xff] %vm326_vm0, %v2239_v14 }
 0x2a9 PF: > { %p2338_p7 = scmp.ge.s32.totalorder %s8160_s22, 1  ;;  %p2339_p8 = scmp.lt.s32.totalorder %s8160_s22, 5 }
 0x2ab   : > { %p2340_p9 = pnand %p2339_p8, %p2338_p7 }
 0x2ad   : > { %2343 = sbr.rel (%p2340_p9) target bundleno = 1515 (0x5eb), region = 52 }
 0x2b2   : > { %v2488_v47 = vld [vmem:[#allocation2 + $0x1b1] sm:$0xff]  ;;  %v2489_v0 = vld [vmem:[#allocation2 + $0x1b9] sm:$0xff]  ;;  %v2452_v19 = vld [vmem:[#allocation2 + $0x1] sm:$0xff]  ;;  %v8115_v38 = vmov 0   ;;  %s8116_s16 = smov 64   ;;  %vm2776_vm9 = vcmask 523264  }
 0x2b3   : > { %v2542_v22 = vpack.c.bf16 %v2489_v0, %v2488_v47  ;;  %v2453_v13 = vld [vmem:[#allocation2 + $0x9] sm:$0xff]  ;;  %v2491_v33 = vld [vmem:[#allocation2 + $0x1d1] sm:$0xff]  ;;  %7935 = vmatprep.subr.bf16.mxu1 %v8115_v38  ;;  %3113 = vmatprep.subr.bf16.mxu0 %v8115_v38  ;;  %v2492_v53 = vld [vmem:[#allocation2 + $0x1e1] sm:$0xff] }
 0x2b4   : > { %v2490_v24 = vld [vmem:[#allocation2 + $0x1c9] sm:$0xff]  ;;  %v2524_v29 = vpack.c.bf16 %v2453_v13, %v2452_v19  ;;  %v2454_v42 = vld [vmem:[#allocation2 + $0x19] sm:$0xff]  ;;  %v2455_v9 = vld [vmem:[#allocation2 + $0x21] sm:$0xff] }
 0x2b5   : > { %2740 = vrot.lane.b32.xlu0 %v2542_v22, %s8116_s16  ;;  %v2543_v6 = vpack.c.bf16 %v2491_v33, %v2490_v24  ;;  %v2493_v34 = vld [vmem:[#allocation2 + $0x1e9] sm:$0xff]  ;;  %v2494_v1 = vld [vmem:[#allocation2 + $0x1f9] sm:$0xff]  ;;  %v2495_v43 = vld [vmem:[#allocation2 + $0x201] sm:$0xff]  ;;  %v2525_v51 = vpack.c.bf16 %v2455_v9, %v2454_v42 }
 0x2b6   : > { %2704 = vrot.lane.b32.xlu1 %v2524_v29, %s8116_s16  ;;  %v2544_v44 = vpack.c.bf16 %v2493_v34, %v2492_v53  ;;  %v2456_v48 = vld [vmem:[#allocation2 + $0x31] sm:$0xff]  ;;  %v2457_v31 = vld [vmem:[#allocation2 + $0x39] sm:$0xff]  ;;  %v2545_v20 = vpack.c.bf16 %v2495_v43, %v2494_v1  ;;  %v2458_v2 = vld [vmem:[#allocation2 + $0x49] sm:$0xff] }
 0x2b7   : > { %v2496_v36 = vld [vmem:[#allocation2 + $0x211] sm:$0xff]  ;;  %v2497_v23 = vld [vmem:[#allocation2 + $0x219] sm:$0xff]  ;;  %v2526_v57 = vpack.c.bf16 %v2457_v31, %v2456_v48  ;;  %v2498_v30 = vld [vmem:[#allocation2 + $0x229] sm:$0xff] }
 0x2b8   : > { %v2459_v28 = vld [vmem:[#allocation2 + $0x51] sm:$0xff]  ;;  %v2546_v8 = vpack.c.bf16 %v2497_v23, %v2496_v36  ;;  %v2460_v17 = vld [vmem:[#allocation2 + $0x61] sm:$0xff]  ;;  %v2461_v55 = vld [vmem:[#allocation2 + $0x69] sm:$0xff] }
 0x2b9   : > { %2742 = vrot.lane.b32.xlu0 %v2543_v6, %s8116_s16  ;;  %v8003_v50 = vld [vmem:[%s8175_s30 + $0x38] sm:$0xff]   ;;  %v8004_v32 = vld [vmem:[%s8175_s30 + $0x30] sm:$0xff]   ;;  %v2527_v5 = vpack.c.bf16 %v2459_v28, %v2458_v2  ;;  %v2500_v35 = vld [vmem:[#allocation2 + $0x241] sm:$0xff]  ;;  %v2528_v7 = vpack.c.bf16 %v2461_v55, %v2460_v17 }
 0x2ba   : > { %2744 = vrot.lane.b32.xlu1 %v2544_v44, %s8116_s16  ;;  %v2499_v26 = vld [vmem:[#allocation2 + $0x231] sm:$0xff]  ;;  %7947 = vmatpush1.bf16.msra.mxu1 %v8003_v50  ;;  %v2501_v52 = vld [vmem:[#allocation2 + $0x249] sm:$0xff]  ;;  %v2462_v11 = vld [vmem:[#allocation2 + $0x79] sm:$0xff] }
 0x2bb   : > { %3114 = vmatpush1.bf16.msra.mxu0 %v8003_v50  ;;  %7936 = vmatprep.subr.bf16.mxu1 %v8115_v38  ;;  %v2547_v25 = vpack.c.bf16 %v2499_v26, %v2498_v30  ;;  %v8005_v61 = vld [vmem:[%s8175_s30 + $0x28] sm:$0xff]   ;;  %v2548_v46 = vpack.c.bf16 %v2501_v52, %v2500_v35  ;;  %v2502_v63 = vld [vmem:[#allocation2 + $0x259] sm:$0xff]  ;;  %v2464_v60 = vld [vmem:[#allocation2 + $0x91] sm:$0xff] }
 0x2bc   : > { %3115 = vmatprep.subr.bf16.mxu0 %v8115_v38  ;;  %v2463_v39 = vld [vmem:[#allocation2 + $0x81] sm:$0xff]  ;;  %v2465_v54 = vld [vmem:[#allocation2 + $0x99] sm:$0xff]  ;;  %v2504_v37 = vld [vmem:[#allocation2 + $0x271] sm:$0xff] }
 0x2bd   : > { %2706 = vrot.lane.b32.xlu0 %v2525_v51, %s8116_s16  ;;  %v2503_v45 = vld [vmem:[#allocation2 + $0x261] sm:$0xff]  ;;  %v2529_v41 = vpack.c.bf16 %v2463_v39, %v2462_v11  ;;  %v2505_v4 = vld [vmem:[#allocation2 + $0x279] sm:$0xff]  ;;  %v2530_v58 = vpack.c.bf16 %v2465_v54, %v2464_v60  ;;  %v2466_v10 = vld [vmem:[#allocation2 + $0xa9] sm:$0xff] }
 0x2be   : > { %2746 = vrot.lane.b32.xlu1 %v2545_v20, %s8116_s16  ;;  %7948 = vmatpush1.bf16.msra.mxu1 %v8004_v32  ;;  %v8006_v49 = vld [vmem:[%s8175_s30 + $0x20] sm:$0xff]   ;;  %v2549_v59 = vpack.c.bf16 %v2503_v45, %v2502_v63  ;;  %v8007_v56 = vld [vmem:[%s8175_s30 + $0x18] sm:$0xff]   ;;  %v2550_v3 = vpack.c.bf16 %v2505_v4, %v2504_v37  ;;  %v2506_v15 = vld [vmem:[#allocation2 + $0x289] sm:$0xff] }
 0x2bf   : > { %3116 = vmatpush1.bf16.msra.mxu0 %v8004_v32  ;;  %7937 = vmatprep.subr.bf16.mxu1 %v8115_v38  ;;  %v2467_v12 = vld [vmem:[#allocation2 + $0xb1] sm:$0xff]  ;;  %v2468_v62 = vld [vmem:[#allocation2 + $0xc1] sm:$0xff]  ;;  %v2469_v27 = vld [vmem:[#allocation2 + $0xc9] sm:$0xff] }
 0x2c0   : > { %3117 = vmatprep.subr.bf16.mxu0 %v8115_v38  ;;  %v2507_v16 = vld [vmem:[#allocation2 + $0x291] sm:$0xff]  ;;  %v2531_v18 = vpack.c.bf16 %v2467_v12, %v2466_v10  ;;  %v2560_v14 = vld [vmem:[#allocation2 + $0x2] sm:$0xff]  ;;  %v2597_v24 = vld [vmem:[#allocation2 + $0x1ba] sm:$0xff]  ;;  %v2532_v6 = vpack.c.bf16 %v2469_v27, %v2468_v62 }
 0x2c1   : > { %2708 = vrot.lane.b32.xlu0 %v2526_v57, %s8116_s16  ;;  %v8008_v21 = vld [vmem:[%s8175_s30 + $0x10] sm:$0xff]   ;;  %v2551_v40 = vpack.c.bf16 %v2507_v16, %v2506_v15  ;;  %v2508_v19 = vld [vmem:[#allocation2 + $0x2a1] sm:$0xff]  ;;  %v2470_v53 = vld [vmem:[#allocation2 + $0xd9] sm:$0xff] }
 0x2c2   : > { %2748 = vrot.lane.b32.xlu1 %v2546_v8, %s8116_s16  ;;  %7949 = vmatpush1.bf16.msra.mxu1 %v8005_v61  ;;  %v2561_v47 = vld [vmem:[#allocation2 + $0xa] sm:$0xff]  ;;  %v2596_v0 = vld [vmem:[#allocation2 + $0x1b2] sm:$0xff]  ;;  %v2471_v34 = vld [vmem:[#allocation2 + $0xe1] sm:$0xff] }
 0x2c3   : > { %3118 = vmatpush1.bf16.msra.mxu0 %v8005_v61  ;;  %7938 = vmatprep.subr.bf16.mxu1 %v8115_v38  ;;  %v2509_v22 = vld [vmem:[#allocation2 + $0x2a9] sm:$0xff]  ;;  %v2632_v13 = vpack.c.bf16 %v2561_v47, %v2560_v14  ;;  %v2650_v29 = vpack.c.bf16 %v2597_v24, %v2596_v0  ;;  %v2510_v9 = vld [vmem:[#allocation2 + $0x2b9] sm:$0xff]  ;;  %v2511_v44 = vld [vmem:[#allocation2 + $0x2c1] sm:$0xff]  ;;  %v2533_v43 = vpack.c.bf16 %v2471_v34, %v2470_v53 }
 0x2c4   : > { %3119 = vmatprep.subr.bf16.mxu0 %v8115_v38  ;;  %v8009_v33 = vld [vmem:[%s8175_s30 + $0x8] sm:$0xff]   ;;  %v2552_v42 = vpack.c.bf16 %v2509_v22, %v2508_v19  ;;  %v8010_v1 = vld [vmem:[%s8175_s30] sm:$0xff]   ;;  %v2472_v51 = vld [vmem:[#allocation2 + $0xf1] sm:$0xff]  ;;  %v2553_v31 = vpack.c.bf16 %v2511_v44, %v2510_v9 }
 0x2c5   : > { %2710 = vrot.lane.b32.xlu0 %v2527_v5, %s8116_s16  ;;  %7471 = vmatprep.mubr.msk.bf16.mxu0 %vm2776_vm9, %v2632_v13  ;;  %v2473_v48 = vld [vmem:[#allocation2 + $0xf9] sm:$0xff]  ;;  %v2512_v20 = vld [vmem:[#allocation2 + $0x2d1] sm:$0xff]  ;;  %v2474_v2 = vld [vmem:[#allocation2 + $0x109] sm:$0xff] }
 0x2c6   : > { %2750 = vrot.lane.b32.xlu1 %v2547_v25, %s8116_s16  ;;  %7950 = vmatpush1.bf16.msra.mxu1 %v8006_v49  ;;  %v2513_v36 = vld [vmem:[#allocation2 + $0x2d9] sm:$0xff]  ;;  %v2534_v57 = vpack.c.bf16 %v2473_v48, %v2472_v51  ;;  %v2475_v28 = vld [vmem:[#allocation2 + $0x111] sm:$0xff]  ;;  %v2514_v8 = vld [vmem:[#allocation2 + $0x2e9] sm:$0xff] }
 0x2c7   : > { %3120 = vmatpush1.bf16.msra.mxu0 %v8006_v49  ;;  %7939 = vmatprep.subr.bf16.mxu1 %v8115_v38  ;;  %v8011_v23 = vld [vmem:[%s8175_s30 + $0x58] sm:$0xff]   ;;  %v2554_v30 = vpack.c.bf16 %v2513_v36, %v2512_v20  ;;  %v8012_v26 = vld [vmem:[%s8175_s30 + $0x50] sm:$0xff]   ;;  %v2535_v32 = vpack.c.bf16 %v2475_v28, %v2474_v2  ;;  %v2476_v5 = vld [vmem:[#allocation2 + $0x121] sm:$0xff] }
 0x2c8   : > { %3121 = vmatprep.subr.bf16.mxu0 %v8115_v38  ;;  %7487 = vmatprep.mubr.msk.bf16.mxu1 %vm2776_vm9, %v2650_v29  ;;  %v2515_v50 = vld [vmem:[#allocation2 + $0x2f1] sm:$0xff]  ;;  %v2477_v17 = vld [vmem:[#allocation2 + $0x129] sm:$0xff]  ;;  %v2516_v25 = vld [vmem:[#allocation2 + $0x301] sm:$0xff] }
 0x2c9   : > { %2712 = vrot.lane.b32.xlu0 %v2528_v7, %s8116_s16  ;;  %v2555_v55 = vpack.c.bf16 %v2515_v50, %v2514_v8  ;;  %v2517_v35 = vld [vmem:[#allocation2 + $0x309] sm:$0xff]  ;;  %v2536_v61 = vpack.c.bf16 %v2477_v17, %v2476_v5  ;;  %v2478_v7 = vld [vmem:[#allocation2 + $0x139] sm:$0xff]  ;;  %v2479_v11 = vld [vmem:[#allocation2 + $0x141] sm:$0xff] }
 0x2ca   : > { %2752 = vrot.lane.b32.xlu1 %v2548_v46, %s8116_s16  ;;  %7951 = vmatpush1.bf16.msra.mxu1 %v8007_v56  ;;  %v8013_v52 = vld [vmem:[%s8175_s30 + $0x48] sm:$0xff]   ;;  %v2556_v39 = vpack.c.bf16 %v2517_v35, %v2516_v25  ;;  %v2518_v46 = vld [vmem:[#allocation2 + $0x319] sm:$0xff]  ;;  %v2537_v49 = vpack.c.bf16 %v2479_v11, %v2478_v7  ;;  %v2483_v37 = vld [vmem:[#allocation2 + $0x171] sm:$0xff] }
 0x2cb   : > { %3122 = vmatpush1.bf16.msra.mxu0 %v8007_v56  ;;  %7940 = vmatprep.subr.bf16.mxu1 %v8115_v38  ;;  %v2519_v63 = vld [vmem:[#allocation2 + $0x321] sm:$0xff]  ;;  %v2481_v60 = vld [vmem:[#allocation2 + $0x159] sm:$0xff]  ;;  %v2380_v10 = vld [vmem:[#allocation2 + $0x1b0] sm:$0xff] }
 0x2cc   : > { %3123 = vmatprep.subr.bf16.mxu0 %v8115_v38  ;;  %v8014_v45 = vld [vmem:[%s8175_s30 + $0x40] sm:$0xff]   ;;  %v2557_v54 = vpack.c.bf16 %v2519_v63, %v2518_v46  ;;  %v2381_v12 = vld [vmem:[#allocation2 + $0x1b8] sm:$0xff]  ;;  %v2485_v16 = vld [vmem:[#allocation2 + $0x189] sm:$0xff] }
 0x2cd   : > { %2714 = vrot.lane.b32.xlu0 %v2529_v41, %s8116_s16  ;;  %v2480_v41 = vld [vmem:[#allocation2 + $0x151] sm:$0xff]  ;;  %v2484_v15 = vld [vmem:[#allocation2 + $0x181] sm:$0xff]  ;;  %v2434_v62 = vpack.c.bf16 %v2381_v12, %v2380_v10 }
 0x2ce   : > { %2754 = vrot.lane.b32.xlu1 %v2549_v59, %s8116_s16  ;;  %7952 = vmatpush1.bf16.msra.mxu1 %v8008_v21  ;;  %v2482_v59 = vld [vmem:[#allocation2 + $0x169] sm:$0xff]  ;;  %v2538_v4 = vpack.c.bf16 %v2481_v60, %v2480_v41  ;;  %v2599_v14 = vld [vmem:[#allocation2 + $0x1d2] sm:$0xff]  ;;  %v2347_v9 = vld [vmem:[#allocation2 + $0x20] sm:$0xff] }
 0x2cf   : > { %3124 = vmatpush1.bf16.msra.mxu0 %v8008_v21  ;;  %7941 = vmatprep.subr.bf16.mxu1 %v8115_v38  ;;  %v2539_v56 = vpack.c.bf16 %v2483_v37, %v2482_v59  ;;  %v2562_v21 = vld [vmem:[#allocation2 + $0x1a] sm:$0xff]  ;;  %v2563_v27 = vld [vmem:[#allocation2 + $0x22] sm:$0xff]  ;;  %v2601_v20 = vld [vmem:[#allocation2 + $0x1ea] sm:$0xff] }
 0x2d0   : > { %3125 = vmatprep.subr.bf16.mxu0 %v8115_v38  ;;  %v8015_v0 = vld [vmem:[%s8175_s30 + $0x98] sm:$0xff]   ;;  %v9514_v22 = vpack.c.bf16 %v2563_v27, %v2562_v21  ;;  %v2382_v24 = vld [vmem:[#allocation2 + $0x1c8] sm:$0xff]  ;;  %v8018_v28 = vld [vmem:[%s8175_s30 + $0xf0] sm:$0xff]  }
 0x2d1   : > { %2716 = vrot.lane.b32.xlu0 %v2530_v58, %s8116_s16  ;;  %v2344_v58 = vld [vmem:[#allocation2] sm:$0xff]  ;;  %v8016_v53 = vld [vmem:[%s8175_s30 + $0xf8] sm:$0xff]   ;;  %v2385_v5 = vld [vmem:[#allocation2 + $0x1e8] sm:$0xff] }
 0x2d2   : > { %2756 = vrot.lane.b32.xlu1 %v2550_v3, %s8116_s16  ;;  %7953 = vmatpush1.bf16.msra.mxu1 %v8009_v33  ;;  %v2345_v3 = vld [vmem:[#allocation2 + $0x8] sm:$0xff]  ;;  %v2565_v2 = vld [vmem:[#allocation2 + $0x3a] sm:$0xff]  ;;  %v2348_v25 = vld [vmem:[#allocation2 + $0x30] sm:$0xff] }
 0x2d3   : > { %3126 = vmatpush1.bf16.msra.mxu0 %v8009_v33  ;;  %7942 = vmatprep.subr.bf16.mxu1 %v8115_v38  ;;  %v2416_v47 = vpack.c.bf16 %v2345_v3, %v2344_v58  ;;  %v2383_v33 = vld [vmem:[#allocation2 + $0x1d0] sm:$0xff]  ;;  %v2487_v51 = vld [vmem:[#allocation2 + $0x1a1] sm:$0xff]  ;;  %v2349_v35 = vld [vmem:[#allocation2 + $0x38] sm:$0xff] }
 0x2d4   : > { %3127 = vmatprep.subr.bf16.mxu0 %v8115_v38  ;;  %v2435_v44 = vpack.c.bf16 %v2383_v33, %v2382_v24  ;;  %v8019_v17 = vld [vmem:[%s8175_s30 + $0x88] sm:$0xff]   ;;  %v2418_v11 = vpack.c.bf16 %v2349_v35, %v2348_v25  ;;  %v8020_v63 = vld [vmem:[%s8175_s30 + $0x80] sm:$0xff]   ;;  %v2567_v41 = vld [vmem:[#allocation2 + $0x52] sm:$0xff] }
 0x2d5   : > { %2718 = vrot.lane.b32.xlu0 %v2531_v18, %s8116_s16  ;;  %v2540_v18 = vpack.c.bf16 %v2485_v16, %v2484_v15  ;;  %v2603_v46 = vld [vmem:[#allocation2 + $0x202] sm:$0xff]  ;;  %v8023_v10 = vld [vmem:[%s8175_s30 + $0x78] sm:$0xff]   ;;  %v2351_v3 = vld [vmem:[#allocation2 + $0x50] sm:$0xff] }
 0x2d6   : > { %2758 = vrot.lane.b32.xlu1 %v2551_v40, %s8116_s16  ;;  %7954 = vmatpush1.bf16.msra.mxu1 %v8010_v1  ;;  %v2598_v40 = vld [vmem:[#allocation2 + $0x1ca] sm:$0xff]  ;;  %v8022_v60 = vld [vmem:[%s8175_s30 + $0xe0] sm:$0xff]   ;;  %v8024_v15 = vld [vmem:[%s8175_s30 + $0xd8] sm:$0xff]  }
 0x2d7   : > { %3128 = vmatpush1.bf16.msra.mxu0 %v8010_v1  ;;  %7943 = vmatprep.subr.bf16.mxu1 %v8115_v38  ;;  %v9516_v13 = vpack.c.bf16 %v2599_v14, %v2598_v40  ;;  %v8017_v1 = vld [vmem:[%s8175_s30 + $0x90] sm:$0xff]   ;;  %v2387_v58 = vld [vmem:[#allocation2 + $0x200] sm:$0xff]  ;;  %v2350_v12 = vld [vmem:[#allocation2 + $0x48] sm:$0xff] }
 0x2d8   : > { %3137 = vmatprep.subr.bf16.mxu0 %v8115_v38  ;;  %v2605_v27 = vld [vmem:[#allocation2 + $0x21a] sm:$0xff]  ;;  %v8025_v40 = vld [vmem:[%s8175_s30 + $0x70] sm:$0xff]   ;;  %v2390_v25 = vld [vmem:[#allocation2 + $0x228] sm:$0xff] }
 0x2d9   : > { %2720 = vrot.lane.b32.xlu0 %v2532_v6, %s8116_s16  ;;  %v2391_v35 = vld [vmem:[#allocation2 + $0x230] sm:$0xff] }
 0x2da   : > { %2760 = vrot.lane.b32.xlu1 %v2552_v42, %s8116_s16  ;;  %7955 = vmatpush2.bf16.msra.mxu1 %v8011_v23  ;;  %v2346_v42 = vld [vmem:[#allocation2 + $0x18] sm:$0xff] }
 0x2db   : > { %3138 = vmatpush2.bf16.msra.mxu0 %v8011_v23  ;;  %7944 = vmatprep.subr.bf16.mxu1 %v8115_v38  ;;  %v2417_v23 = vpack.c.bf16 %v2347_v9, %v2346_v42  ;;  %v8026_v42 = vld [vmem:[%s8175_s30 + $0x68] sm:$0xff]   ;;  %v2352_v9 = vld [vmem:[#allocation2 + $0x60] sm:$0xff] }
 0x2dc   : > { %3139 = vmatprep.subr.bf16.mxu0 %v8115_v38 }
 0x2dd   : > { %2722 = vrot.lane.b32.xlu0 %v2533_v43, %s8116_s16  ;;  %v2486_v43 = vld [vmem:[#allocation2 + $0x199] sm:$0xff] }
 0x2de   : > { %2762 = vrot.lane.b32.xlu1 %v2553_v31, %s8116_s16  ;;  %7956 = vmatpush2.bf16.msra.mxu1 %v8012_v26  ;;  %v2600_v31 = vld [vmem:[#allocation2 + $0x1e2] sm:$0xff]  ;;  %v2541_v36 = vpack.c.bf16 %v2487_v51, %v2486_v43 }
 0x2df   : > { %3140 = vmatpush2.bf16.msra.mxu0 %v8012_v26  ;;  %7945 = vmatprep.subr.bf16.mxu1 %v8115_v38  ;;  %v9533_v8 = vpack.c.bf16 %v2601_v20, %v2600_v31  ;;  %v2606_v31 = vld [vmem:[#allocation2 + $0x22a] sm:$0xff]  ;;  %v2607_v20 = vld [vmem:[#allocation2 + $0x232] sm:$0xff] }
 0x2e0   : > { %3141 = vmatprep.subr.bf16.mxu0 %v8115_v38 }
 0x2e1   : > { %2724 = vrot.lane.b32.xlu0 %v2534_v57, %s8116_s16  ;;  %v2564_v57 = vld [vmem:[#allocation2 + $0x32] sm:$0xff] }
 0x2e2   : > { %2764 = vrot.lane.b32.xlu1 %v2554_v30, %s8116_s16  ;;  %7957 = vmatpush2.bf16.msra.mxu1 %v8013_v52  ;;  %v9535_v26 = vpack.c.bf16 %v2565_v2, %v2564_v57  ;;  %v2570_v57 = vld [vmem:[#allocation2 + $0x7a] sm:$0xff]  ;;  %v2571_v2 = vld [vmem:[#allocation2 + $0x82] sm:$0xff] }
 0x2e3   : > { %3142 = vmatpush2.bf16.msra.mxu0 %v8013_v52  ;;  %7946 = vmatprep.subr.bf16.mxu1 %v8115_v38  ;;  %v8021_v52 = vld [vmem:[%s8175_s30 + $0xe8] sm:$0xff]  }
 0x2e4   : > { %3143 = vmatprep.subr.bf16.mxu0 %v8115_v38 }
 0x2e5   : > { %2726 = vrot.lane.b32.xlu0 %v2535_v32, %s8116_s16  ;;  %v2384_v32 = vld [vmem:[#allocation2 + $0x1e0] sm:$0xff] }
 0x2e6   : > { %2766 = vrot.lane.b32.xlu1 %v2555_v55, %s8116_s16  ;;  %7958 = vmatpush2.bf16.msra.mxu1 %v8014_v45 }
 0x2e7   : > { %3144 = vmatpush2.bf16.msra.mxu0 %v8014_v45  ;;  %3633 = vmatprep.subr.bf16.mxu1 %v8115_v38 }
 0x2e8   : > { %4217 = vmatprep.subr.bf16.mxu0 %v8115_v38 }
 0x2e9   : > { %2728 = vrot.lane.b32.xlu0 %v2536_v61, %s8116_s16  ;;  %v2436_v61 = vpack.c.bf16 %v2385_v5, %v2384_v32  ;;  %v9605_v32 = vpack.c.bf16 %v2607_v20, %v2606_v31 }
 0x2ea   : > { %2768 = vrot.lane.b32.xlu1 %v2556_v39, %s8116_s16  ;;  %v2602_v39 = vld [vmem:[#allocation2 + $0x1fa] sm:$0xff] }
 0x2eb   : > { %v9557_v59 = vpack.c.bf16 %v2603_v46, %v2602_v39  ;;  %v2439_v39 = vpack.c.bf16 %v2391_v35, %v2390_v25  ;;  %v2612_v35 = vld [vmem:[#allocation2 + $0x272] sm:$0xff] }
 0x2ed   : > { %2730 = vrot.lane.b32.xlu0 %v2537_v49, %s8116_s16  ;;  %v2566_v49 = vld [vmem:[#allocation2 + $0x4a] sm:$0xff] }
 0x2ee   : > { %2770 = vrot.lane.b32.xlu1 %v2557_v54, %s8116_s16 }
 0x2f1   : > { %2732 = vrot.lane.b32.xlu0 %v2538_v4, %s8116_s16  ;;  %v9562_v4 = vpack.c.bf16 %v2567_v41, %v2566_v49  ;;  %v2609_v49 = vld [vmem:[#allocation2 + $0x24a] sm:$0xff] }
 0x2f2   : > { %2734 = vrot.lane.b32.xlu1 %v2539_v56, %s8116_s16  ;;  %v2386_v56 = vld [vmem:[#allocation2 + $0x1f8] sm:$0xff]  ;;  %v8032_v41 = vld [vmem:[%s8175_s30 + $0xb0] sm:$0xff]  }
 0x2f3   : > { %v2437_v16 = vpack.c.bf16 %v2387_v58, %v2386_v56  ;;  %v2572_v56 = vld [vmem:[#allocation2 + $0x92] sm:$0xff]  ;;  %v2573_v58 = vld [vmem:[#allocation2 + $0x9a] sm:$0xff] }
 0x2f5   : > { %2736 = vrot.lane.b32.xlu0 %v2540_v18, %s8116_s16  ;;  %v2419_v18 = vpack.c.bf16 %v2351_v3, %v2350_v12 }
 0x2f6   : > { %2738 = vrot.lane.b32.xlu1 %v2541_v36, %s8116_s16  ;;  %v8029_v36 = vld [vmem:[%s8175_s30 + $0x60] sm:$0xff]  }
 0x327   : > { %v2741_v19 = vpop.permute.xlu0 %2740 }
 0x328   : > { %v2705_v29 = vpop.permute.xlu1 %2704  ;;  %v2851_v6 = vsel %vm2776_vm9, %v2434_v62, %v2741_v19  ;;  %v2604_v62 = vld [vmem:[#allocation2 + $0x212] sm:$0xff] }
 0x329   : > { %v2779_v34 = vsel %vm2776_vm9, %v2416_v47, %v2705_v29  ;;  %3274 = vmatmul.mubr.bf16.vlgmr.msra.gmra.mxu1 %v2851_v6  ;;  %v2568_v47 = vld [vmem:[#allocation2 + $0x62] sm:$0xff]  ;;  %v8027_v19 = vld [vmem:[%s8175_s30 + $0xd0] sm:$0xff]   ;;  %v9581_v33 = vpack.c.bf16 %v2605_v27, %v2604_v62 }
 0x32a   : > { %3146 = vmatmul.mubr.bf16.vlgmr.msra.gmra.mxu0 %v2779_v34  ;;  %3634 = vmatpush1.bf16.msra.mxu1 %v8015_v0  ;;  %v2569_v0 = vld [vmem:[#allocation2 + $0x6a] sm:$0xff]  ;;  %v2389_v34 = vld [vmem:[#allocation2 + $0x218] sm:$0xff] }
 0x32b   : > { %v2743_v48 = vpop.permute.xlu0 %2742  ;;  %7472 = vmatprep.mubr.msk.bf16.mxu0 %vm2776_vm9, %v9514_v22  ;;  %7488 = vmatprep.mubr.msk.bf16.mxu1 %vm2776_vm9, %v9516_v13  ;;  %v9586_v6 = vpack.c.bf16 %v2569_v0, %v2568_v47  ;;  %v8035_v62 = vld [vmem:[%s8175_s30 + $0xa8] sm:$0xff]   ;;  %v2356_v27 = vld [vmem:[#allocation2 + $0x90] sm:$0xff] }
 0x32c   : > { %3635 = vmatprep.subr.bf16.mxu1 %v8115_v38  ;;  %4218 = vmatpush1.bf16.msra.mxu0 %v8016_v53  ;;  %v9531_v30 = vsel %vm2776_vm9, %v2435_v44, %v2743_v48  ;;  %v2745_v7 = vpop.permute.xlu1 %2744  ;;  %v2388_v53 = vld [vmem:[#allocation2 + $0x210] sm:$0xff]  ;;  %v2353_v44 = vld [vmem:[#allocation2 + $0x68] sm:$0xff] }
 0x32d   : > { %4219 = vmatprep.subr.bf16.mxu0 %v8115_v38  ;;  %v9555_v54 = vsel %vm2776_vm9, %v2436_v61, %v2745_v7  ;;  %v2438_v43 = vpack.c.bf16 %v2389_v34, %v2388_v53  ;;  %v2420_v48 = vpack.c.bf16 %v2353_v44, %v2352_v9  ;;  %v2354_v61 = vld [vmem:[#allocation2 + $0x78] sm:$0xff]  ;;  %v2355_v7 = vld [vmem:[#allocation2 + $0x80] sm:$0xff]  ;;  %v2574_v44 = vld [vmem:[#allocation2 + $0xaa] sm:$0xff] }
 0x32e   : > { %3636 = vmatpush1.bf16.msra.mxu1 %v8017_v1  ;;  %v8028_v1 = vld [vmem:[%s8175_s30 + $0xc8] sm:$0xff]   ;;  %v2610_v53 = vld [vmem:[#allocation2 + $0x25a] sm:$0xff] }
 0x32f   : > { %v2707_v50 = vpop.permute.xlu0 %2706  ;;  %3637 = vmatprep.subr.bf16.mxu1 %v8115_v38  ;;  %v2611_v34 = vld [vmem:[#allocation2 + $0x262] sm:$0xff] }
 0x330   : > { %v9540_v55 = vsel %vm2776_vm9, %v2417_v23, %v2707_v50  ;;  %4220 = vmatpush1.bf16.msra.mxu0 %v8018_v28  ;;  %v2747_v21 = vpop.permute.xlu1 %2746  ;;  %v8030_v28 = vld [vmem:[%s8175_s30 + $0xc0] sm:$0xff]  }
 0x331   : > { %3282 = vmatmul.mubr.bf16.gmra.mxu1 %v9531_v30  ;;  %4221 = vmatprep.subr.bf16.mxu0 %v8115_v38  ;;  %v9579_v24 = vsel %vm2776_vm9, %v2437_v16, %v2747_v21  ;;  %v9634_v16 = vpack.c.bf16 %v2573_v58, %v2572_v56  ;;  %v2392_v21 = vld [vmem:[#allocation2 + $0x240] sm:$0xff]  ;;  %v2361_v56 = vld [vmem:[#allocation2 + $0xc8] sm:$0xff] }
 0x332   : > { %3154 = vmatmul.mubr.bf16.gmra.mxu0 %v9540_v55  ;;  %7489 = vmatprep.mubr.msk.bf16.mxu1 %vm2776_vm9, %v9533_v8 }
 0x333   : > { %7473 = vmatprep.mubr.msk.bf16.mxu0 %vm2776_vm9, %v9535_v26  ;;  %3638 = vmatpush1.bf16.msra.mxu1 %v8019_v17  ;;  %v2709_v45 = vpop.permute.xlu0 %2708  ;;  %v9610_v17 = vpack.c.bf16 %v2571_v2, %v2570_v57  ;;  %v2358_v57 = vld [vmem:[#allocation2 + $0xa8] sm:$0xff]  ;;  %v2359_v2 = vld [vmem:[#allocation2 + $0xb0] sm:$0xff] }
 0x334   : > { %3639 = vmatprep.subr.bf16.mxu1 %v8115_v38  ;;  %4222 = vmatpush1.bf16.msra.mxu0 %v8021_v52  ;;  %v9560_v37 = vsel %vm2776_vm9, %v2418_v11, %v2709_v45  ;;  %v2749_v51 = vpop.permute.xlu1 %2748  ;;  %v8031_v52 = vld [vmem:[%s8175_s30 + $0xb8] sm:$0xff]   ;;  %v2608_v45 = vld [vmem:[#allocation2 + $0x242] sm:$0xff]  ;;  %v2423_v25 = vpack.c.bf16 %v2359_v2, %v2358_v57  ;;  %v2617_v57 = vld [vmem:[#allocation2 + $0x2aa] sm:$0xff] }
 0x335   : > { %4223 = vmatprep.subr.bf16.mxu0 %v8115_v38  ;;  %v9603_v50 = vsel %vm2776_vm9, %v2438_v43, %v2749_v51  ;;  %v8033_v11 = vld [vmem:[%s8175_s30 + $0x118] sm:$0xff]   ;;  %v9629_v3 = vpack.c.bf16 %v2609_v49, %v2608_v45  ;;  %v8038_v43 = vld [vmem:[%s8175_s30 + $0x100] sm:$0xff]   ;;  %v2396_v49 = vld [vmem:[#allocation2 + $0x270] sm:$0xff] }
 0x337   : > { %3640 = vmatpush1.bf16.msra.mxu1 %v8020_v63  ;;  %v2711_v14 = vpop.permute.xlu0 %2710  ;;  %v2421_v63 = vpack.c.bf16 %v2355_v7, %v2354_v61  ;;  %v2576_v7 = vld [vmem:[#allocation2 + $0xc2] sm:$0xff] }
 0x338   : > { %3641 = vmatprep.subr.bf16.mxu1 %v8115_v38  ;;  %4224 = vmatpush1.bf16.msra.mxu0 %v8022_v60  ;;  %v9584_v29 = vsel %vm2776_vm9, %v2419_v18, %v2711_v14  ;;  %v2751_v46 = vpop.permute.xlu1 %2750  ;;  %v2393_v18 = vld [vmem:[#allocation2 + $0x248] sm:$0xff] }
 0x339   : > { %3290 = vmatmul.mubr.bf16.gmra.mxu1 %v9555_v54  ;;  %4225 = vmatprep.subr.bf16.mxu0 %v8115_v38  ;;  %v9627_v12 = vsel %vm2776_vm9, %v2439_v39, %v2751_v46  ;;  %v8036_v14 = vld [vmem:[%s8175_s30 + $0x108] sm:$0xff]   ;;  %v2440_v47 = vpack.c.bf16 %v2393_v18, %v2392_v21 }
 0x33a   : > { %3162 = vmatmul.mubr.bf16.gmra.mxu0 %v9560_v37  ;;  %7490 = vmatprep.mubr.msk.bf16.mxu1 %vm2776_vm9, %v9557_v59  ;;  %v2614_v18 = vld [vmem:[#allocation2 + $0x28a] sm:$0xff] }
 0x33b   : > { %7474 = vmatprep.mubr.msk.bf16.mxu0 %vm2776_vm9, %v9562_v4  ;;  %3642 = vmatpush1.bf16.msra.mxu1 %v8023_v10  ;;  %v2713_v23 = vpop.permute.xlu0 %2712  ;;  %v8034_v10 = vld [vmem:[%s8175_s30 + $0x110] sm:$0xff]  }
 0x33c   : > { %3643 = vmatprep.subr.bf16.mxu1 %v8115_v38  ;;  %4226 = vmatpush1.bf16.msra.mxu0 %v8024_v15  ;;  %v9608_v5 = vsel %vm2776_vm9, %v2420_v48, %v2713_v23  ;;  %v2753_v0 = vpop.permute.xlu1 %2752  ;;  %v9653_v48 = vpack.c.bf16 %v2611_v34, %v2610_v53  ;;  %v2395_v23 = vld [vmem:[#allocation2 + $0x260] sm:$0xff]  ;;  %v2398_v34 = vld [vmem:[#allocation2 + $0x288] sm:$0xff] }
 0x33d   : > { %4227 = vmatprep.subr.bf16.mxu0 %v8115_v38  ;;  %v9651_v51 = vsel %vm2776_vm9, %v2440_v47, %v2753_v0 }
 0x33f   : > { %3644 = vmatpush1.bf16.msra.mxu1 %v8025_v40  ;;  %v2715_v60 = vpop.permute.xlu0 %2714  ;;  %v2357_v40 = vld [vmem:[#allocation2 + $0x98] sm:$0xff] }
 0x340   : > { %3645 = vmatprep.subr.bf16.mxu1 %v8115_v38  ;;  %4228 = vmatpush1.bf16.msra.mxu0 %v8027_v19  ;;  %v9632_v15 = vsel %vm2776_vm9, %v2421_v63, %v2715_v60  ;;  %v2422_v19 = vpack.c.bf16 %v2357_v40, %v2356_v27  ;;  %v2360_v60 = vld [vmem:[#allocation2 + $0xc0] sm:$0xff] }
 0x341   : > { %3298 = vmatmul.mubr.bf16.gmra.mxu1 %v9579_v24  ;;  %4229 = vmatprep.subr.bf16.mxu0 %v8115_v38  ;;  %v2424_v21 = vpack.c.bf16 %v2361_v56, %v2360_v60  ;;  %v2578_v40 = vld [vmem:[#allocation2 + $0xda] sm:$0xff] }
 0x342   : > { %3170 = vmatmul.mubr.bf16.gmra.mxu0 %v9584_v29  ;;  %7491 = vmatprep.mubr.msk.bf16.mxu1 %vm2776_vm9, %v9581_v33 }
 0x343   : > { %7475 = vmatprep.mubr.msk.bf16.mxu0 %vm2776_vm9, %v9586_v6  ;;  %3646 = vmatpush1.bf16.msra.mxu1 %v8026_v42  ;;  %v8037_v42 = vld [vmem:[%s8175_s30 + $0xa0] sm:$0xff]   ;;  %v2717_v9 = vpop.permute.xlu0 %2716 }
 0x344   : > { %3647 = vmatprep.subr.bf16.mxu1 %v8115_v38  ;;  %4230 = vmatpush1.bf16.msra.mxu0 %v8028_v1  ;;  %v2575_v1 = vld [vmem:[#allocation2 + $0xb2] sm:$0xff]  ;;  %v9656_v31 = vsel %vm2776_vm9, %v2422_v19, %v2717_v9 }
 0x345   : > { %4231 = vmatprep.subr.bf16.mxu0 %v8115_v38  ;;  %v9658_v20 = vpack.c.bf16 %v2575_v1, %v2574_v44  ;;  %v2362_v9 = vld [vmem:[#allocation2 + $0xd8] sm:$0xff]  ;;  %v2363_v44 = vld [vmem:[#allocation2 + $0xe0] sm:$0xff] }
 0x347   : > { %3648 = vmatpush1.bf16.msra.mxu1 %v8029_v36  ;;  %v2394_v36 = vld [vmem:[#allocation2 + $0x258] sm:$0xff]  ;;  %v2719_v61 = vpop.permute.xlu0 %2718 }
 0x348   : > { %3657 = vmatprep.subr.bf16.mxu1 %v8115_v38  ;;  %4232 = vmatpush1.bf16.msra.mxu0 %v8030_v28  ;;  %v2755_v28 = vpop.permute.xlu1 %2754  ;;  %v9672_v63 = vsel %vm2776_vm9, %v2423_v25, %v2719_v61 }
 0x349   : > { %3306 = vmatmul.mubr.bf16.gmra.mxu1 %v9603_v50  ;;  %4241 = vmatprep.subr.bf16.mxu0 %v8115_v38 }
 0x34a   : > { %3178 = vmatmul.mubr.bf16.gmra.mxu0 %v9608_v5  ;;  %7492 = vmatprep.mubr.msk.bf16.mxu1 %vm2776_vm9, %v9605_v32 }
 0x34b   : > { %7476 = vmatprep.mubr.msk.bf16.mxu0 %vm2776_vm9, %v9610_v17  ;;  %3658 = vmatpush2.bf16.msra.mxu1 %v8031_v52  ;;  %v2613_v52 = vld [vmem:[#allocation2 + $0x27a] sm:$0xff]  ;;  %v2721_v27 = vpop.permute.xlu0 %2720 }
 0x34c   : > { %3659 = vmatprep.subr.bf16.mxu1 %v8115_v38  ;;  %4242 = vmatpush2.bf16.msra.mxu0 %v8033_v11  ;;  %v2577_v11 = vld [vmem:[#allocation2 + $0xca] sm:$0xff]  ;;  %v9669_v46 = vpack.c.bf16 %v2613_v52, %v2612_v35  ;;  %v9688_v19 = vsel %vm2776_vm9, %v2424_v21, %v2721_v27  ;;  %v2619_v21 = vld [vmem:[#allocation2 + $0x2c2] sm:$0xff]  ;;  %v2583_v27 = vld [vmem:[#allocation2 + $0x112] sm:$0xff] }
 0x34d   : > { %4243 = vmatprep.subr.bf16.mxu0 %v8115_v38  ;;  %v9674_v45 = vpack.c.bf16 %v2577_v11, %v2576_v7  ;;  %v2400_v7 = vld [vmem:[#allocation2 + $0x2a0] sm:$0xff]  ;;  %v2401_v11 = vld [vmem:[#allocation2 + $0x2a8] sm:$0xff] }
 0x34e   : > { %v2444_v60 = vpack.c.bf16 %v2401_v11, %v2400_v7  ;;  %v2584_v7 = vld [vmem:[#allocation2 + $0x122] sm:$0xff]  ;;  %v2585_v11 = vld [vmem:[#allocation2 + $0x12a] sm:$0xff] }
 0x34f   : > { %3660 = vmatpush2.bf16.msra.mxu1 %v8032_v41  ;;  %v2397_v41 = vld [vmem:[#allocation2 + $0x278] sm:$0xff]  ;;  %v2723_v2 = vpop.permute.xlu0 %2722 }
 0x350   : > { %3661 = vmatprep.subr.bf16.mxu1 %v8115_v38  ;;  %4244 = vmatpush2.bf16.msra.mxu0 %v8034_v10  ;;  %v2442_v58 = vpack.c.bf16 %v2397_v41, %v2396_v49  ;;  %v2757_v10 = vpop.permute.xlu1 %2756  ;;  %v2364_v49 = vld [vmem:[#allocation2 + $0xf0] sm:$0xff]  ;;  %v2365_v41 = vld [vmem:[#allocation2 + $0xf8] sm:$0xff] }
 0x351   : > { %3314 = vmatmul.mubr.bf16.gmra.mxu1 %v9627_v12  ;;  %4245 = vmatprep.subr.bf16.mxu0 %v8115_v38 }
 0x352   : > { %3186 = vmatmul.mubr.bf16.gmra.mxu0 %v9632_v15  ;;  %7493 = vmatprep.mubr.msk.bf16.mxu1 %vm2776_vm9, %v9629_v3  ;;  %v9683_v47 = vsel %vm2776_vm9, %v2442_v58, %v2757_v10  ;;  %v2426_v58 = vpack.c.bf16 %v2365_v41, %v2364_v49  ;;  %v2618_v10 = vld [vmem:[#allocation2 + $0x2ba] sm:$0xff] }
 0x353   : > { %7477 = vmatprep.mubr.msk.bf16.mxu0 %vm2776_vm9, %v9634_v16  ;;  %3662 = vmatpush2.bf16.msra.mxu1 %v8035_v62  ;;  %v2615_v62 = vld [vmem:[#allocation2 + $0x292] sm:$0xff] }
 0x354   : > { %3663 = vmatprep.subr.bf16.mxu1 %v8115_v38  ;;  %4246 = vmatpush2.bf16.msra.mxu0 %v8036_v14  ;;  %v2579_v14 = vld [vmem:[#allocation2 + $0xe2] sm:$0xff]  ;;  %v9685_v0 = vpack.c.bf16 %v2615_v62, %v2614_v18  ;;  %v2725_v18 = vpop.permute.xlu0 %2724  ;;  %v2582_v62 = vld [vmem:[#allocation2 + $0x10a] sm:$0xff] }
 0x355   : > { %4247 = vmatprep.subr.bf16.mxu0 %v8115_v38  ;;  %v2441_v38 = vpack.c.bf16 %v2395_v23, %v2394_v36  ;;  %v9690_v53 = vpack.c.bf16 %v2579_v14, %v2578_v40  ;;  %v2425_v36 = vpack.c.bf16 %v2363_v44, %v2362_v9  ;;  %v2616_v23 = vld [vmem:[#allocation2 + $0x2a2] sm:$0xff]  ;;  %v9717_v14 = vpack.c.bf16 %v2619_v21, %v2618_v10  ;;  %v2402_v9 = vld [vmem:[#allocation2 + $0x2b8] sm:$0xff] }
 0x356   : > { %v9701_v35 = vpack.c.bf16 %v2617_v57, %v2616_v23  ;;  %v2403_v44 = vld [vmem:[#allocation2 + $0x2c0] sm:$0xff]  ;;  %v2405_v10 = vld [vmem:[#allocation2 + $0x2d8] sm:$0xff] }
 0x357   : > { %3664 = vmatpush2.bf16.msra.mxu1 %v8037_v42  ;;  %v9667_v39 = vsel %vm2776_vm9, %v2441_v38, %v2755_v28  ;;  %v2399_v42 = vld [vmem:[#allocation2 + $0x290] sm:$0xff]  ;;  %v2581_v28 = vld [vmem:[#allocation2 + $0xfa] sm:$0xff]  ;;  %v9704_v52 = vsel %vm2776_vm9, %v2425_v36, %v2723_v2  ;;  %12217 = vst [vmem:[#allocation5_spill] sm:$0xff] %v9717_v14  ;;  %v2445_v36 = vpack.c.bf16 %v2403_v44, %v2402_v9 }
 0x358   : > { %4248 = vmatpush2.bf16.msra.mxu0 %v8038_v43  ;;  %v2443_v1 = vpack.c.bf16 %v2399_v42, %v2398_v34  ;;  %v2759_v43 = vpop.permute.xlu1 %2758  ;;  %v2580_v38 = vld [vmem:[#allocation2 + $0xf2] sm:$0xff]  ;;  %v9720_v34 = vsel %vm2776_vm9, %v2426_v58, %v2725_v18  ;;  %v9722_v42 = vpack.c.bf16 %v2583_v27, %v2582_v62  ;;  %v2368_v21 = vld [vmem:[#allocation2 + $0x120] sm:$0xff]  ;;  %v2369_v18 = vld [vmem:[#allocation2 + $0x128] sm:$0xff] }
 0x359   : > { %3322 = vmatmul.mubr.bf16.gmra.mxu1 %v9651_v51  ;;  %v9706_v61 = vpack.c.bf16 %v2581_v28, %v2580_v38  ;;  %v2620_v2 = vld [vmem:[#allocation2 + $0x2d2] sm:$0xff]  ;;  %v2621_v38 = vld [vmem:[#allocation2 + $0x2da] sm:$0xff]  ;;  %v2727_v28 = vpop.permute.xlu0 %2726  ;;  %v2428_v9 = vpack.c.bf16 %v2369_v18, %v2368_v21  ;;  %v2622_v44 = vld [vmem:[#allocation2 + $0x2ea] sm:$0xff] }
 0x35a   : > { %3194 = vmatmul.mubr.bf16.gmra.mxu0 %v9656_v31  ;;  %7494 = vmatprep.mubr.msk.bf16.mxu1 %vm2776_vm9, %v9653_v48  ;;  %v9699_v25 = vsel %vm2776_vm9, %v2443_v1, %v2759_v43  ;;  %v2366_v1 = vld [vmem:[#allocation2 + $0x108] sm:$0xff]  ;;  %v2367_v43 = vld [vmem:[#allocation2 + $0x110] sm:$0xff]  ;;  %v9733_v41 = vpack.c.bf16 %v2621_v38, %v2620_v2 }
 0x35b   : > { %7478 = vmatprep.mubr.msk.bf16.mxu0 %vm2776_vm9, %v9658_v20  ;;  %v2427_v57 = vpack.c.bf16 %v2367_v43, %v2366_v1  ;;  %v2404_v58 = vld [vmem:[#allocation2 + $0x2d0] sm:$0xff] }
 0x35c   : > { %v2761_v56 = vpop.permute.xlu1 %2760  ;;  %12219 = vst [vmem:[#allocation7_spill] sm:$0xff] %v9733_v41  ;;  %v2446_v62 = vpack.c.bf16 %v2405_v10, %v2404_v58  ;;  %v2623_v1 = vld [vmem:[#allocation2 + $0x2f2] sm:$0xff]  ;;  %v2371_v10 = vld [vmem:[#allocation2 + $0x140] sm:$0xff] }
 0x35d   : > { %v9715_v40 = vsel %vm2776_vm9, %v2444_v60, %v2761_v56  ;;  %v9736_v60 = vsel %vm2776_vm9, %v2427_v57, %v2727_v28  ;;  %v9738_v56 = vpack.c.bf16 %v2585_v11, %v2584_v7  ;;  %v2729_v43 = vpop.permute.xlu0 %2728  ;;  %v9749_v2 = vpack.c.bf16 %v2623_v1, %v2622_v44  ;;  %v2406_v7 = vld [vmem:[#allocation2 + $0x2e8] sm:$0xff]  ;;  %v2407_v11 = vld [vmem:[#allocation2 + $0x2f0] sm:$0xff]  ;;  %v2370_v58 = vld [vmem:[#allocation2 + $0x138] sm:$0xff] }
 0x35e   : > { %12216 = vst [vmem:[#allocation4_spill] sm:$0xff] %v9715_v40  ;;  %v9752_v38 = vsel %vm2776_vm9, %v2428_v9, %v2729_v43  ;;  %v2447_v21 = vpack.c.bf16 %v2407_v11, %v2406_v7  ;;  %v2625_v9 = vld [vmem:[#allocation2 + $0x30a] sm:$0xff]  ;;  %v2588_v1 = vld [vmem:[#allocation2 + $0x152] sm:$0xff]  ;;  %v2589_v43 = vld [vmem:[#allocation2 + $0x15a] sm:$0xff] }
 0x35f   : > { %12221 = vst [vmem:[#allocation9_spill] sm:$0xff] %v9749_v2  ;;  %v2408_v7 = vld [vmem:[#allocation2 + $0x300] sm:$0xff]  ;;  %v2409_v11 = vld [vmem:[#allocation2 + $0x308] sm:$0xff] }
 0x360   : > { %v2763_v23 = vpop.permute.xlu1 %2762 }
 0x361   : > { %3330 = vmatmul.mubr.bf16.gmra.mxu1 %v9667_v39  ;;  %v9731_v49 = vsel %vm2776_vm9, %v2445_v36, %v2763_v23  ;;  %v2586_v36 = vld [vmem:[#allocation2 + $0x13a] sm:$0xff]  ;;  %v2587_v23 = vld [vmem:[#allocation2 + $0x142] sm:$0xff]  ;;  %v2731_v44 = vpop.permute.xlu0 %2730 }
 0x362   : > { %3202 = vmatmul.mubr.bf16.gmra.mxu0 %v9672_v63  ;;  %7495 = vmatprep.mubr.msk.bf16.mxu1 %vm2776_vm9, %v9669_v46  ;;  %12218 = vst [vmem:[#allocation6_spill] sm:$0xff] %v9731_v49  ;;  %v9754_v28 = vpack.c.bf16 %v2587_v23, %v2586_v36 }
 0x363   : > { %7479 = vmatprep.mubr.msk.bf16.mxu0 %vm2776_vm9, %v9674_v45 }
 0x364   : > { %v2765_v27 = vpop.permute.xlu1 %2764 }
 0x365   : > { %v9747_v57 = vsel %vm2776_vm9, %v2446_v62, %v2765_v27  ;;  %v2429_v62 = vpack.c.bf16 %v2371_v10, %v2370_v58  ;;  %v2624_v27 = vld [vmem:[#allocation2 + $0x302] sm:$0xff]  ;;  %v2373_v58 = vld [vmem:[#allocation2 + $0x158] sm:$0xff]  ;;  %v2448_v10 = vpack.c.bf16 %v2409_v11, %v2408_v7 }
 0x366   : > { %12220 = vst [vmem:[#allocation8_spill] sm:$0xff] %v9747_v57  ;;  %v9765_v23 = vpack.c.bf16 %v2625_v9, %v2624_v27  ;;  %v2733_v27 = vpop.permute.xlu0 %2732  ;;  %v2590_v9 = vld [vmem:[#allocation2 + $0x16a] sm:$0xff]  ;;  %v2410_v7 = vld [vmem:[#allocation2 + $0x318] sm:$0xff]  ;;  %v2411_v11 = vld [vmem:[#allocation2 + $0x320] sm:$0xff] }
 0x368   : > { %v2767_v18 = vpop.permute.xlu1 %2766  ;;  %12223 = vst [vmem:[#allocation11_spill] sm:$0xff] %v9765_v23 }
 0x369   : > { %3338 = vmatmul.mubr.bf16.gmra.mxu1 %v9683_v47  ;;  %v9763_v36 = vsel %vm2776_vm9, %v2447_v21, %v2767_v18  ;;  %v2626_v18 = vld [vmem:[#allocation2 + $0x31a] sm:$0xff] }
 0x36a   : > { %3210 = vmatmul.mubr.bf16.gmra.mxu0 %v9688_v19  ;;  %7496 = vmatprep.mubr.msk.bf16.mxu1 %vm2776_vm9, %v9685_v0  ;;  %12222 = vst [vmem:[#allocation10_spill] sm:$0xff] %v9763_v36 }
 0x36b   : > { %7480 = vmatprep.mubr.msk.bf16.mxu0 %vm2776_vm9, %v9690_v53 }
 0x371   : > { %3346 = vmatmul.mubr.bf16.gmra.mxu1 %v9699_v25 }
 0x372   : > { %3218 = vmatmul.mubr.bf16.gmra.mxu0 %v9704_v52  ;;  %7497 = vmatprep.mubr.msk.bf16.mxu1 %vm2776_vm9, %v9701_v35 }
 0x373   : > { %7481 = vmatprep.mubr.msk.bf16.mxu0 %vm2776_vm9, %v9706_v61 }
 0x379   : > { %3354 = vmatmul.mubr.bf16.gmra.mxu1 %v9715_v40  ;;  %v2374_v40 = vld [vmem:[#allocation2 + $0x168] sm:$0xff] }
 0x37a   : > { %3226 = vmatmul.mubr.bf16.gmra.mxu0 %v9720_v34  ;;  %7498 = vmatprep.mubr.msk.bf16.mxu1 %vm2776_vm9, %v9717_v14 }
 0x37b   : > { %7482 = vmatprep.mubr.msk.bf16.mxu0 %vm2776_vm9, %v9722_v42 }
 0x381   : > { %3362 = vmatmul.mubr.bf16.gmra.mxu1 %v9731_v49  ;;  %v2372_v49 = vld [vmem:[#allocation2 + $0x150] sm:$0xff] }
 0x382   : > { %3234 = vmatmul.mubr.bf16.gmra.mxu0 %v9736_v60  ;;  %7499 = vmatprep.mubr.msk.bf16.mxu1 %vm2776_vm9, %v9733_v41  ;;  %v2769_v41 = vpop.permute.xlu1 %2768  ;;  %v2430_v21 = vpack.c.bf16 %v2373_v58, %v2372_v49  ;;  %v2375_v49 = vld [vmem:[#allocation2 + $0x170] sm:$0xff] }
 0x383   : > { %7483 = vmatprep.mubr.msk.bf16.mxu0 %vm2776_vm9, %v9738_v56  ;;  %v2431_v58 = vpack.c.bf16 %v2375_v49, %v2374_v40 }
 0x384   : > { %v9784_v14 = vsel %vm2776_vm9, %v2430_v21, %v2733_v27  ;;  %v2521_v27 = vld [vmem:[#allocation2 + $0x339] sm:$0xff] }
 0x389   : > { %3370 = vmatmul.mubr.bf16.gmra.mxu1 %v9747_v57  ;;  %v9768_v57 = vsel %vm2776_vm9, %v2429_v62, %v2731_v44  ;;  %v2627_v62 = vld [vmem:[#allocation2 + $0x322] sm:$0xff]  ;;  %v2591_v44 = vld [vmem:[#allocation2 + $0x172] sm:$0xff] }
 0x38a   : > { %3242 = vmatmul.mubr.bf16.gmra.mxu0 %v9752_v38  ;;  %7500 = vmatprep.mubr.msk.bf16.mxu1 %vm2776_vm9, %v9749_v2  ;;  %v9770_v2 = vpack.c.bf16 %v2589_v43, %v2588_v1  ;;  %v9779_v1 = vsel %vm2776_vm9, %v2448_v10, %v2769_v41  ;;  %v2771_v43 = vpop.permute.xlu1 %2770  ;;  %v2449_v41 = vpack.c.bf16 %v2411_v11, %v2410_v7 }
 0x38b   : > { %7484 = vmatprep.mubr.msk.bf16.mxu0 %vm2776_vm9, %v9754_v28 }
 0x38c   : > { %v9795_v21 = vsel %vm2776_vm9, %v2449_v41, %v2771_v43 }
 0x38e   : > { %v2735_v10 = vpop.permute.xlu1 %2734 }
 0x391   : > { %3378 = vmatmul.mubr.bf16.gmra.mxu1 %v9763_v36  ;;  %v9781_v36 = vpack.c.bf16 %v2627_v62, %v2626_v18  ;;  %v9798_v18 = vsel %vm2776_vm9, %v2431_v58, %v2735_v10  ;;  %v2520_v62 = vld [vmem:[#allocation2 + $0x331] sm:$0xff] }
 0x392   : > { %3250 = vmatmul.mubr.bf16.gmra.mxu0 %v9768_v57  ;;  %7501 = vmatprep.mubr.msk.bf16.mxu1 %vm2776_vm9, %v9765_v23  ;;  %v9786_v23 = vpack.c.bf16 %v2591_v44, %v2590_v9  ;;  %v2558_v40 = vpack.c.bf16 %v2521_v27, %v2520_v62  ;;  %v2522_v9 = vld [vmem:[#allocation2 + $0x349] sm:$0xff] }
 0x393   : > { %7485 = vmatprep.mubr.msk.bf16.mxu0 %vm2776_vm9, %v9770_v2 }
 0x394   : > { %2772 = vrot.lane.b32.xlu0 %v2558_v40, %s8116_s16 }
 0x399   : > { %3386 = vmatmul.mubr.bf16.gmra.mxu1 %v9779_v1 }
 0x39a   : > { %3258 = vmatmul.mubr.bf16.gmra.mxu0 %v9784_v14  ;;  %7502 = vmatprep.mubr.msk.bf16.mxu1 %vm2776_vm9, %v9781_v36 }
 0x39b   : > { %7486 = vmatprep.mubr.msk.bf16.mxu0 %vm2776_vm9, %v9786_v23 }
 0x3a1   : > { %3394 = vmatmul.mubr.bf16.gmra.mxu1 %v9795_v21 }
 0x3a2   : > { %3266 = vmatmul.mubr.bf16.gmra.mxu0 %v9798_v18  ;;  %7539 = vmatprep.mubr.msk.bf16.mxu1 %vm2776_vm9, %v9514_v22  ;;  %v2523_v22 = vld [vmem:[#allocation2 + $0x351] sm:$0xff] }
 0x3a3   : > { %7607 = vmatprep.mubr.msk.bf16.mxu0 %vm2776_vm9, %v9535_v26  ;;  %v2559_v44 = vpack.c.bf16 %v2523_v22, %v2522_v9 }
 0x3a5   : > { %2774 = vrot.lane.b32.xlu1 %v2559_v44, %s8116_s16  ;;  %v2592_v44 = vld [vmem:[#allocation2 + $0x182] sm:$0xff] }
 0x3a9   : > { %3666 = vmatmul.mubr.bf16.vlgmr.msra.gmra.mxu1 %v9540_v55 }
 0x3aa   : > { %4250 = vmatmul.mubr.bf16.vlgmr.msra.gmra.mxu0 %v9560_v37  ;;  %7540 = vmatprep.mubr.msk.bf16.mxu1 %vm2776_vm9, %v9535_v26 }
 0x3ab   : > { %7608 = vmatprep.mubr.msk.bf16.mxu0 %vm2776_vm9, %v9562_v4 }
 0x3b1   : > { %3674 = vmatmul.mubr.bf16.gmra.mxu1 %v9560_v37 }
 0x3b2   : > { %4258 = vmatmul.mubr.bf16.gmra.mxu0 %v9584_v29  ;;  %7541 = vmatprep.mubr.msk.bf16.mxu1 %vm2776_vm9, %v9562_v4 }
 0x3b3   : > { %7609 = vmatprep.mubr.msk.bf16.mxu0 %vm2776_vm9, %v9586_v6 }
 0x3b9   : > { %3682 = vmatmul.mubr.bf16.gmra.mxu1 %v9584_v29 }
 0x3ba   : > { %4266 = vmatmul.mubr.bf16.gmra.mxu0 %v9608_v5  ;;  %7542 = vmatprep.mubr.msk.bf16.mxu1 %vm2776_vm9, %v9586_v6 }
 0x3bb   : > { %7610 = vmatprep.mubr.msk.bf16.mxu0 %vm2776_vm9, %v9610_v17 }
 0x3c1   : > { %3690 = vmatmul.mubr.bf16.gmra.mxu1 %v9608_v5 }
 0x3c2   : > { %4274 = vmatmul.mubr.bf16.gmra.mxu0 %v9632_v15  ;;  %7543 = vmatprep.mubr.msk.bf16.mxu1 %vm2776_vm9, %v9610_v17 }
 0x3c3   : > { %7611 = vmatprep.mubr.msk.bf16.mxu0 %vm2776_vm9, %v9634_v16 }
 0x3c9   : > { %3698 = vmatmul.mubr.bf16.gmra.mxu1 %v9632_v15 }
 0x3ca   : > { %4282 = vmatmul.mubr.bf16.gmra.mxu0 %v9656_v31  ;;  %7544 = vmatprep.mubr.msk.bf16.mxu1 %vm2776_vm9, %v9634_v16 }
 0x3cb   : > { %7612 = vmatprep.mubr.msk.bf16.mxu0 %vm2776_vm9, %v9658_v20 }
 0x3d1   : > { %3706 = vmatmul.mubr.bf16.gmra.mxu1 %v9656_v31 }
 0x3d2   : > { %4290 = vmatmul.mubr.bf16.gmra.mxu0 %v9672_v63  ;;  %7545 = vmatprep.mubr.msk.bf16.mxu1 %vm2776_vm9, %v9658_v20 }
 0x3d3   : > { %7613 = vmatprep.mubr.msk.bf16.mxu0 %vm2776_vm9, %v9674_v45 }
 0x3d9   : > { %3714 = vmatmul.mubr.bf16.gmra.mxu1 %v9672_v63 }
 0x3da   : > { %4298 = vmatmul.mubr.bf16.gmra.mxu0 %v9688_v19  ;;  %7546 = vmatprep.mubr.msk.bf16.mxu1 %vm2776_vm9, %v9674_v45 }
 0x3db   : > { %7614 = vmatprep.mubr.msk.bf16.mxu0 %vm2776_vm9, %v9690_v53 }
 0x3e1   : > { %3722 = vmatmul.mubr.bf16.gmra.mxu1 %v9688_v19 }
 0x3e2   : > { %4306 = vmatmul.mubr.bf16.gmra.mxu0 %v9704_v52  ;;  %7547 = vmatprep.mubr.msk.bf16.mxu1 %vm2776_vm9, %v9690_v53 }
 0x3e3   : > { %7615 = vmatprep.mubr.msk.bf16.mxu0 %vm2776_vm9, %v9706_v61 }
 0x3e9   : > { %v3275_v26 = vpop.f32.mrf.mxu1  ;;  %3730 = vmatmul.mubr.bf16.gmra.mxu1 %v9704_v52 }
 0x3ea   : > { %v3147_v55 = vpop.f32.mrf.mxu0  ;;  %3434 = vst.msk [vmem:[#allocation3 + $0x100] sm:$0xff] %vm2776_vm9, %v3275_v26  ;;  %4314 = vmatmul.mubr.bf16.gmra.mxu0 %v9720_v34  ;;  %7548 = vmatprep.mubr.msk.bf16.mxu1 %vm2776_vm9, %v9706_v61  ;;  %v2593_v26 = vld [vmem:[#allocation2 + $0x18a] sm:$0xff] }
 0x3eb   : > { %3402 = vst.msk [vmem:[#allocation3] sm:$0xff] %vm2776_vm9, %v3147_v55  ;;  %v3277_v37 = vpop.f32.mrf.mxu1  ;;  %7616 = vmatprep.mubr.msk.bf16.mxu0 %vm2776_vm9, %v9722_v42 }
 0x3ec   : > { %v3149_v4 = vpop.f32.mrf.mxu0 }
 0x3ed   : > { %v3278_v29 = vpop.f32.mrf.mxu1  ;;  %v2648_v4 = vpack.c.bf16 %v2593_v26, %v2592_v44 }
 0x3ee   : > { %v3150_v6 = vpop.f32.mrf.mxu0  ;;  %3435 = vst.msk [vmem:[#allocation3 + $0x108] sm:$0xff] %vm2776_vm9, %v3278_v29 }
 0x3ef   : > { %3403 = vst.msk [vmem:[#allocation3 + $0x8] sm:$0xff] %vm2776_vm9, %v3150_v6  ;;  %v3280_v5 = vpop.f32.mrf.mxu1  ;;  %v2376_v6 = vld [vmem:[#allocation2 + $0x180] sm:$0xff] }
 0x3f0   : > { %v3152_v17 = vpop.f32.mrf.mxu0 }
 0x3f1   : > { %v3283_v15 = vpop.f32.mrf.mxu1  ;;  %3738 = vmatmul.mubr.bf16.gmra.mxu1 %v9720_v34 }
 0x3f2   : > { %v3155_v16 = vpop.f32.mrf.mxu0  ;;  %3436 = vst.msk [vmem:[#allocation3 + $0x110] sm:$0xff] %vm2776_vm9, %v3283_v15  ;;  %4322 = vmatmul.mubr.bf16.gmra.mxu0 %v9736_v60  ;;  %7549 = vmatprep.mubr.msk.bf16.mxu1 %vm2776_vm9, %v9722_v42 }
 0x3f3   : > { %3404 = vst.msk [vmem:[#allocation3 + $0x10] sm:$0xff] %vm2776_vm9, %v3155_v16  ;;  %v3285_v31 = vpop.f32.mrf.mxu1  ;;  %7617 = vmatprep.mubr.msk.bf16.mxu0 %vm2776_vm9, %v9738_v56 }
 0x3f4   : > { %v3157_v20 = vpop.f32.mrf.mxu0 }
 0x3f5   : > { %v3286_v63 = vpop.f32.mrf.mxu1  ;;  %v2737_v20 = vpop.permute.xlu0 %2736 }
 0x3f6   : > { %v3158_v45 = vpop.f32.mrf.mxu0  ;;  %3437 = vst.msk [vmem:[#allocation3 + $0x118] sm:$0xff] %vm2776_vm9, %v3286_v63  ;;  %v2594_v63 = vld [vmem:[#allocation2 + $0x19a] sm:$0xff] }
 0x3f7   : > { %3405 = vst.msk [vmem:[#allocation3 + $0x18] sm:$0xff] %vm2776_vm9, %v3158_v45  ;;  %v3288_v19 = vpop.f32.mrf.mxu1  ;;  %v2595_v45 = vld [vmem:[#allocation2 + $0x1a2] sm:$0xff] }
 0x3f8   : > { %v3160_v53 = vpop.f32.mrf.mxu0 }
 0x3f9   : > { %v3291_v52 = vpop.f32.mrf.mxu1  ;;  %3746 = vmatmul.mubr.bf16.gmra.mxu1 %v9736_v60 }
 0x3fa   : > { %v3163_v61 = vpop.f32.mrf.mxu0  ;;  %3438 = vst.msk [vmem:[#allocation3 + $0x120] sm:$0xff] %vm2776_vm9, %v3291_v52  ;;  %4330 = vmatmul.mubr.bf16.gmra.mxu0 %v9752_v38  ;;  %7550 = vmatprep.mubr.msk.bf16.mxu1 %vm2776_vm9, %v9738_v56 }
 0x3fb   : > { %3406 = vst.msk [vmem:[#allocation3 + $0x20] sm:$0xff] %vm2776_vm9, %v3163_v61  ;;  %v3293_v34 = vpop.f32.mrf.mxu1  ;;  %7618 = vmatprep.mubr.msk.bf16.mxu0 %vm2776_vm9, %v9754_v28 }
 0x3fc   : > { %v3165_v42 = vpop.f32.mrf.mxu0  ;;  %v2378_v34 = vld [vmem:[#allocation2 + $0x198] sm:$0xff] }
 0x3fd   : > { %v3294_v43 = vpop.f32.mrf.mxu1  ;;  %v2379_v42 = vld [vmem:[#allocation2 + $0x1a0] sm:$0xff] }
 0x3fe   : > { %v3166_v7 = vpop.f32.mrf.mxu0  ;;  %3439 = vst.msk [vmem:[#allocation3 + $0x128] sm:$0xff] %vm2776_vm9, %v3294_v43 }
 0x3ff   : > { %3407 = vst.msk [vmem:[#allocation3 + $0x28] sm:$0xff] %vm2776_vm9, %v3166_v7  ;;  %v3296_v60 = vpop.f32.mrf.mxu1 }
 0x400   : > { %v3168_v11 = vpop.f32.mrf.mxu0 }
 0x401   : > { %v3299_v49 = vpop.f32.mrf.mxu1  ;;  %3754 = vmatmul.mubr.bf16.gmra.mxu1 %v9752_v38  ;;  %v2433_v11 = vpack.c.bf16 %v2379_v42, %v2378_v34 }
 0x402   : > { %v3171_v41 = vpop.f32.mrf.mxu0  ;;  %3440 = vst.msk [vmem:[#allocation3 + $0x130] sm:$0xff] %vm2776_vm9, %v3299_v49  ;;  %4338 = vmatmul.mubr.bf16.gmra.mxu0 %v9768_v57  ;;  %7551 = vmatprep.mubr.msk.bf16.mxu1 %vm2776_vm9, %v9754_v28 }
 0x403   : > { %3408 = vst.msk [vmem:[#allocation3 + $0x30] sm:$0xff] %vm2776_vm9, %v3171_v41  ;;  %v3301_v56 = vpop.f32.mrf.mxu1  ;;  %7619 = vmatprep.mubr.msk.bf16.mxu0 %vm2776_vm9, %v9770_v2  ;;  %v2739_v41 = vpop.permute.xlu1 %2738 }
 0x404   : > { %v3173_v58 = vpop.f32.mrf.mxu0 }
 0x405   : > { %v3302_v10 = vpop.f32.mrf.mxu1 }
 0x406   : > { %v3174_v62 = vpop.f32.mrf.mxu0  ;;  %3441 = vst.msk [vmem:[#allocation3 + $0x138] sm:$0xff] %vm2776_vm9, %v3302_v10 }
 0x407   : > { %3409 = vst.msk [vmem:[#allocation3 + $0x38] sm:$0xff] %vm2776_vm9, %v3174_v62  ;;  %v3304_v38 = vpop.f32.mrf.mxu1 }
 0x408   : > { %v3176_v27 = vpop.f32.mrf.mxu0 }
 0x409   : > { %v3307_v40 = vpop.f32.mrf.mxu1  ;;  %3762 = vmatmul.mubr.bf16.gmra.mxu1 %v9768_v57 }
 0x40a   : > { %v3179_v9 = vpop.f32.mrf.mxu0  ;;  %3442 = vst.msk [vmem:[#allocation3 + $0x140] sm:$0xff] %vm2776_vm9, %v3307_v40  ;;  %4346 = vmatmul.mubr.bf16.gmra.mxu0 %v9784_v14  ;;  %7552 = vmatprep.mubr.msk.bf16.mxu1 %vm2776_vm9, %v9770_v2  ;;  %v2377_v2 = vld [vmem:[#allocation2 + $0x188] sm:$0xff] }
 0x40b   : > { %3410 = vst.msk [vmem:[#allocation3 + $0x40] sm:$0xff] %vm2776_vm9, %v3179_v9  ;;  %v3309_v28 = vpop.f32.mrf.mxu1  ;;  %7620 = vmatprep.mubr.msk.bf16.mxu0 %vm2776_vm9, %v9786_v23  ;;  %v2432_v16 = vpack.c.bf16 %v2377_v2, %v2376_v6 }
 0x40c   : > { %v3181_v22 = vpop.f32.mrf.mxu0 }
 0x40d   : > { %v3310_v55 = vpop.f32.mrf.mxu1  ;;  %v2843_v53 = vsel %vm2776_vm9, %v2432_v16, %v2737_v20 }
 0x40e   : > { %v3182_v37 = vpop.f32.mrf.mxu0  ;;  %3443 = vst.msk [vmem:[#allocation3 + $0x148] sm:$0xff] %vm2776_vm9, %v3310_v55 }
 0x40f   : > { %3411 = vst.msk [vmem:[#allocation3 + $0x48] sm:$0xff] %vm2776_vm9, %v3182_v37  ;;  %v3312_v57 = vpop.f32.mrf.mxu1 }
 0x410   : > { %v3184_v29 = vpop.f32.mrf.mxu0 }
 0x411   : > { %v3315_v5 = vpop.f32.mrf.mxu1  ;;  %3770 = vmatmul.mubr.bf16.gmra.mxu1 %v9784_v14 }
 0x412   : > { %v3187_v17 = vpop.f32.mrf.mxu0  ;;  %3444 = vst.msk [vmem:[#allocation3 + $0x150] sm:$0xff] %vm2776_vm9, %v3315_v5  ;;  %4354 = vmatmul.mubr.bf16.gmra.mxu0 %v9798_v18  ;;  %7553 = vmatprep.mubr.msk.bf16.mxu1 %vm2776_vm9, %v9786_v23  ;;  %v2649_v23 = vpack.c.bf16 %v2595_v45, %v2594_v63 }
 0x413   : > { %3412 = vst.msk [vmem:[#allocation3 + $0x50] sm:$0xff] %vm2776_vm9, %v3187_v17  ;;  %v3317_v15 = vpop.f32.mrf.mxu1  ;;  %7621 = vmatprep.mubr.msk.bf16.mxu0 %vm2776_vm9, %v2648_v4 }
 0x414   : > { %v3189_v31 = vpop.f32.mrf.mxu0 }
 0x415   : > { %v3318_v19 = vpop.f32.mrf.mxu1 }
 0x416   : > { %v3190_v14 = vpop.f32.mrf.mxu0  ;;  %3445 = vst.msk [vmem:[#allocation3 + $0x158] sm:$0xff] %vm2776_vm9, %v3318_v19 }
 0x417   : > { %3413 = vst.msk [vmem:[#allocation3 + $0x58] sm:$0xff] %vm2776_vm9, %v3190_v14  ;;  %v3320_v52 = vpop.f32.mrf.mxu1 }
 0x418   : > { %v3192_v61 = vpop.f32.mrf.mxu0 }
 0x419   : > { %v3323_v43 = vpop.f32.mrf.mxu1  ;;  %3778 = vmatmul.mubr.bf16.gmra.mxu1 %v9798_v18  ;;  %v2847_v18 = vsel %vm2776_vm9, %v2433_v11, %v2739_v41 }
 0x41a   : > { %v3195_v7 = vpop.f32.mrf.mxu0  ;;  %3446 = vst.msk [vmem:[#allocation3 + $0x160] sm:$0xff] %vm2776_vm9, %v3323_v43  ;;  %4362 = vmatmul.mubr.bf16.gmra.mxu0 %v2843_v53  ;;  %7554 = vmatprep.mubr.msk.bf16.mxu1 %vm2776_vm9, %v2648_v4 }
 0x41b   : > { %3414 = vst.msk [vmem:[#allocation3 + $0x60] sm:$0xff] %vm2776_vm9, %v3195_v7  ;;  %v3325_v60 = vpop.f32.mrf.mxu1  ;;  %7622 = vmatprep.mubr.msk.bf16.mxu0 %vm2776_vm9, %v2649_v23 }
 0x41c   : > { %v3197_v49 = vpop.f32.mrf.mxu0 }
 0x41d   : > { %v3326_v56 = vpop.f32.mrf.mxu1 }
 0x41e   : > { %v3198_v58 = vpop.f32.mrf.mxu0  ;;  %3447 = vst.msk [vmem:[#allocation3 + $0x168] sm:$0xff] %vm2776_vm9, %v3326_v56 }
 0x41f   : > { %3415 = vst.msk [vmem:[#allocation3 + $0x68] sm:$0xff] %vm2776_vm9, %v3198_v58  ;;  %v3328_v10 = vpop.f32.mrf.mxu1 }
 0x420   : > { %v3200_v62 = vpop.f32.mrf.mxu0 }
 0x421   : > { %v3331_v38 = vpop.f32.mrf.mxu1  ;;  %3786 = vmatmul.mubr.bf16.gmra.mxu1 %v2843_v53 }
 0x422   : > { %v3203_v27 = vpop.f32.mrf.mxu0  ;;  %3448 = vst.msk [vmem:[#allocation3 + $0x170] sm:$0xff] %vm2776_vm9, %v3331_v38  ;;  %4370 = vmatmul.mubr.bf16.gmra.mxu0 %v2847_v18  ;;  %7555 = vmatprep.mubr.msk.bf16.mxu1 %vm2776_vm9, %v9516_v13 }
 0x423   : > { %3416 = vst.msk [vmem:[#allocation3 + $0x70] sm:$0xff] %vm2776_vm9, %v3203_v27  ;;  %v3333_v40 = vpop.f32.mrf.mxu1  ;;  %7623 = vmatprep.mubr.msk.bf16.mxu0 %vm2776_vm9, %v9533_v8 }
 0x424   : > { %v3205_v9 = vpop.f32.mrf.mxu0 }
 0x425   : > { %v3334_v28 = vpop.f32.mrf.mxu1 }
 0x426   : > { %v3206_v22 = vpop.f32.mrf.mxu0  ;;  %3449 = vst.msk [vmem:[#allocation3 + $0x178] sm:$0xff] %vm2776_vm9, %v3334_v28 }
 0x427   : > { %3417 = vst.msk [vmem:[#allocation3 + $0x78] sm:$0xff] %vm2776_vm9, %v3206_v22  ;;  %v3336_v44 = vpop.f32.mrf.mxu1 }
 0x428   : > { %v3208_v26 = vpop.f32.mrf.mxu0 }
 0x429   : > { %v3339_v55 = vpop.f32.mrf.mxu1  ;;  %3794 = vmatmul.mubr.bf16.gmra.mxu1 %v9531_v30 }
 0x42a   : > { %v3211_v37 = vpop.f32.mrf.mxu0  ;;  %3450 = vst.msk [vmem:[#allocation3 + $0x180] sm:$0xff] %vm2776_vm9, %v3339_v55  ;;  %4378 = vmatmul.mubr.bf16.gmra.mxu0 %v9555_v54  ;;  %7556 = vmatprep.mubr.msk.bf16.mxu1 %vm2776_vm9, %v9533_v8 }
 0x42b   : > { %3418 = vst.msk [vmem:[#allocation3 + $0x80] sm:$0xff] %vm2776_vm9, %v3211_v37  ;;  %v3341_v13 = vpop.f32.mrf.mxu1  ;;  %7624 = vmatprep.mubr.msk.bf16.mxu0 %vm2776_vm9, %v9557_v59 }
 0x42c   : > { %v3213_v57 = vpop.f32.mrf.mxu0 }
 0x42d   : > { %v3342_v4 = vpop.f32.mrf.mxu1 }
 0x42e   : > { %v3214_v29 = vpop.f32.mrf.mxu0  ;;  %3451 = vst.msk [vmem:[#allocation3 + $0x188] sm:$0xff] %vm2776_vm9, %v3342_v4 }
 0x42f   : > { %3419 = vst.msk [vmem:[#allocation3 + $0x88] sm:$0xff] %vm2776_vm9, %v3214_v29  ;;  %v3344_v30 = vpop.f32.mrf.mxu1 }
 0x430   : > { %v3216_v6 = vpop.f32.mrf.mxu0  ;;  %v3466_v30 = vld [vmem:[#allocation3] sm:$0xff] }
 0x431   : > { %v3347_v2 = vpop.f32.mrf.mxu1  ;;  %3802 = vmatmul.mubr.bf16.gmra.mxu1 %v9555_v54 }
 0x432   : > { %v3219_v5 = vpop.f32.mrf.mxu0  ;;  %3452 = vst.msk [vmem:[#allocation3 + $0x190] sm:$0xff] %vm2776_vm9, %v3347_v2  ;;  %4386 = vmatmul.mubr.bf16.gmra.mxu0 %v9579_v24  ;;  %7557 = vmatprep.mubr.msk.bf16.mxu1 %vm2776_vm9, %v9557_v59 }
 0x433   : > { %3420 = vst.msk [vmem:[#allocation3 + $0x90] sm:$0xff] %vm2776_vm9, %v3219_v5  ;;  %v3349_v8 = vpop.f32.mrf.mxu1  ;;  %7625 = vmatprep.mubr.msk.bf16.mxu0 %vm2776_vm9, %v9581_v33  ;;  %v12224_v5 = vld [vmem:[#allocation4_spill] sm:$0xff] }
 0x434   : > { %v3221_v17 = vpop.f32.mrf.mxu0 }
 0x435   : > { %v3350_v15 = vpop.f32.mrf.mxu1  ;;  %v12225_v17 = vld [vmem:[#allocation5_spill] sm:$0xff] }
 0x436   : > { %v3222_v16 = vpop.f32.mrf.mxu0  ;;  %3453 = vst.msk [vmem:[#allocation3 + $0x198] sm:$0xff] %vm2776_vm9, %v3350_v15 }
 0x437   : > { %3421 = vst.msk [vmem:[#allocation3 + $0x98] sm:$0xff] %vm2776_vm9, %v3222_v16  ;;  %v3352_v54 = vpop.f32.mrf.mxu1  ;;  %v3467_v16 = vld [vmem:[#allocation3 + $0x8] sm:$0xff] }
 0x438   : > { %v3224_v31 = vpop.f32.mrf.mxu0 }
 0x439   : > { %v3355_v20 = vpop.f32.mrf.mxu1  ;;  %3810 = vmatmul.mubr.bf16.gmra.mxu1 %v9579_v24 }
 0x43a   : > { %v3227_v63 = vpop.f32.mrf.mxu0  ;;  %3454 = vst.msk [vmem:[#allocation3 + $0x1a0] sm:$0xff] %vm2776_vm9, %v3355_v20  ;;  %4394 = vmatmul.mubr.bf16.gmra.mxu0 %v9603_v50  ;;  %7558 = vmatprep.mubr.msk.bf16.mxu1 %vm2776_vm9, %v9581_v33 }
 0x43b   : > { %3422 = vst.msk [vmem:[#allocation3 + $0xa0] sm:$0xff] %vm2776_vm9, %v3227_v63  ;;  %v3357_v59 = vpop.f32.mrf.mxu1  ;;  %7626 = vmatprep.mubr.msk.bf16.mxu0 %vm2776_vm9, %v9605_v32 }
 0x43c   : > { %v3229_v45 = vpop.f32.mrf.mxu0  ;;  %v3468_v59 = vld [vmem:[#allocation3 + $0x10] sm:$0xff] }
 0x43d   : > { %v3358_v19 = vpop.f32.mrf.mxu1 }
 0x43e   : > { %v3230_v14 = vpop.f32.mrf.mxu0  ;;  %3455 = vst.msk [vmem:[#allocation3 + $0x1a8] sm:$0xff] %vm2776_vm9, %v3358_v19 }
 0x43f   : > { %3423 = vst.msk [vmem:[#allocation3 + $0xa8] sm:$0xff] %vm2776_vm9, %v3230_v14  ;;  %v3360_v24 = vpop.f32.mrf.mxu1  ;;  %v12226_v14 = vld [vmem:[#allocation6_spill] sm:$0xff] }
 0x440   : > { %v3232_v53 = vpop.f32.mrf.mxu0 }
 0x441   : > { %v3363_v52 = vpop.f32.mrf.mxu1  ;;  %3818 = vmatmul.mubr.bf16.gmra.mxu1 %v9603_v50 }
 0x442   : > { %v3235_v23 = vpop.f32.mrf.mxu0  ;;  %3456 = vst.msk [vmem:[#allocation3 + $0x1b0] sm:$0xff] %vm2776_vm9, %v3363_v52  ;;  %4402 = vmatmul.mubr.bf16.gmra.mxu0 %v9627_v12  ;;  %7559 = vmatprep.mubr.msk.bf16.mxu1 %vm2776_vm9, %v9605_v32  ;;  %v12227_v52 = vld [vmem:[#allocation7_spill] sm:$0xff] }
 0x443   : > { %3424 = vst.msk [vmem:[#allocation3 + $0xb0] sm:$0xff] %vm2776_vm9, %v3235_v23  ;;  %v3365_v33 = vpop.f32.mrf.mxu1  ;;  %7627 = vmatprep.mubr.msk.bf16.mxu0 %vm2776_vm9, %v9629_v3 }
 0x444   : > { %v3237_v61 = vpop.f32.mrf.mxu0 }
 0x445   : > { %v3366_v34 = vpop.f32.mrf.mxu1  ;;  %v3469_v61 = vld [vmem:[#allocation3 + $0x18] sm:$0xff] }
 0x446   : > { %v3238_v42 = vpop.f32.mrf.mxu0  ;;  %3457 = vst.msk [vmem:[#allocation3 + $0x1b8] sm:$0xff] %vm2776_vm9, %v3366_v34 }
 0x447   : > { %3425 = vst.msk [vmem:[#allocation3 + $0xb8] sm:$0xff] %vm2776_vm9, %v3238_v42  ;;  %v3368_v50 = vpop.f32.mrf.mxu1 }
 0x448   : > { %v3240_v43 = vpop.f32.mrf.mxu0 }
 0x449   : > { %v3371_v7 = vpop.f32.mrf.mxu1  ;;  %3826 = vmatmul.mubr.bf16.gmra.mxu1 %v9627_v12 }
 0x44a   : > { %v3243_v60 = vpop.f32.mrf.mxu0  ;;  %3458 = vst.msk [vmem:[#allocation3 + $0x1c0] sm:$0xff] %vm2776_vm9, %v3371_v7  ;;  %4410 = vmatmul.mubr.bf16.gmra.mxu0 %v9651_v51  ;;  %7560 = vmatprep.mubr.msk.bf16.mxu1 %vm2776_vm9, %v9629_v3 }
 0x44b   : > { %3426 = vst.msk [vmem:[#allocation3 + $0xc0] sm:$0xff] %vm2776_vm9, %v3243_v60  ;;  %v3373_v32 = vpop.f32.mrf.mxu1  ;;  %7628 = vmatprep.mubr.msk.bf16.mxu0 %vm2776_vm9, %v9653_v48 }
 0x44c   : > { %v3245_v11 = vpop.f32.mrf.mxu0 }
 0x44d   : > { %v3374_v49 = vpop.f32.mrf.mxu1  ;;  %v3470_v11 = vld [vmem:[#allocation3 + $0x20] sm:$0xff] }
 0x44e   : > { %v3246_v41 = vpop.f32.mrf.mxu0  ;;  %3459 = vst.msk [vmem:[#allocation3 + $0x1c8] sm:$0xff] %vm2776_vm9, %v3374_v49 }
 0x44f   : > { %3427 = vst.msk [vmem:[#allocation3 + $0xc8] sm:$0xff] %vm2776_vm9, %v3246_v41  ;;  %v3376_v12 = vpop.f32.mrf.mxu1 }
 0x450   : > { %v3248_v56 = vpop.f32.mrf.mxu0 }
 0x451   : > { %v3379_v58 = vpop.f32.mrf.mxu1  ;;  %3834 = vmatmul.mubr.bf16.gmra.mxu1 %v9651_v51  ;;  %v12228_v56 = vld [vmem:[#allocation8_spill] sm:$0xff] }
 0x452   : > { %v3251_v18 = vpop.f32.mrf.mxu0  ;;  %3460 = vst.msk [vmem:[#allocation3 + $0x1d0] sm:$0xff] %vm2776_vm9, %v3379_v58  ;;  %4418 = vmatmul.mubr.bf16.gmra.mxu0 %v9667_v39  ;;  %7561 = vmatprep.mubr.msk.bf16.mxu1 %vm2776_vm9, %v9653_v48 }
 0x453   : > { %3428 = vst.msk [vmem:[#allocation3 + $0xd0] sm:$0xff] %vm2776_vm9, %v3251_v18  ;;  %v3381_v3 = vpop.f32.mrf.mxu1  ;;  %7629 = vmatprep.mubr.msk.bf16.mxu0 %vm2776_vm9, %v9669_v46 }
 0x454   : > { %v3253_v10 = vpop.f32.mrf.mxu0  ;;  %v12229_v3 = vld [vmem:[#allocation9_spill] sm:$0xff] }
 0x455   : > { %v3382_v62 = vpop.f32.mrf.mxu1 }
 0x456   : > { %v3254_v38 = vpop.f32.mrf.mxu0  ;;  %3461 = vst.msk [vmem:[#allocation3 + $0x1d8] sm:$0xff] %vm2776_vm9, %v3382_v62 }
 0x457   : > { %3429 = vst.msk [vmem:[#allocation3 + $0xd8] sm:$0xff] %vm2776_vm9, %v3254_v38  ;;  %v3384_v51 = vpop.f32.mrf.mxu1  ;;  %v3471_v38 = vld [vmem:[#allocation3 + $0x28] sm:$0xff] }
 0x458   : > { %v3256_v27 = vpop.f32.mrf.mxu0 }
 0x459   : > { %v3387_v40 = vpop.f32.mrf.mxu1  ;;  %3842 = vmatmul.mubr.bf16.gmra.mxu1 %v9667_v39 }
 0x45a   : > { %v3259_v9 = vpop.f32.mrf.mxu0  ;;  %3462 = vst.msk [vmem:[#allocation3 + $0x1e0] sm:$0xff] %vm2776_vm9, %v3387_v40  ;;  %4426 = vmatmul.mubr.bf16.gmra.mxu0 %v9683_v47  ;;  %7562 = vmatprep.mubr.msk.bf16.mxu1 %vm2776_vm9, %v9669_v46 }
 0x45b   : > { %3430 = vst.msk [vmem:[#allocation3 + $0xe0] sm:$0xff] %vm2776_vm9, %v3259_v9  ;;  %v3389_v48 = vpop.f32.mrf.mxu1  ;;  %7630 = vmatprep.mubr.msk.bf16.mxu0 %vm2776_vm9, %v9685_v0 }
 0x45c   : > { %v3261_v28 = vpop.f32.mrf.mxu0 }
 0x45d   : > { %v3390_v22 = vpop.f32.mrf.mxu1 }
 0x45e   : > { %v3262_v44 = vpop.f32.mrf.mxu0  ;;  %3463 = vst.msk [vmem:[#allocation3 + $0x1e8] sm:$0xff] %vm2776_vm9, %v3390_v22 }
 0x45f   : > { %3431 = vst.msk [vmem:[#allocation3 + $0xe8] sm:$0xff] %vm2776_vm9, %v3262_v44  ;;  %v3392_v39 = vpop.f32.mrf.mxu1  ;;  %v3472_v44 = vld [vmem:[#allocation3 + $0x30] sm:$0xff] }
 0x460   : > { %v3264_v26 = vpop.f32.mrf.mxu0 }
 0x461   : > { %v3395_v55 = vpop.f32.mrf.mxu1  ;;  %3850 = vmatmul.mubr.bf16.gmra.mxu1 %v9683_v47 }
 0x462   : > { %v3267_v37 = vpop.f32.mrf.mxu0  ;;  %3464 = vst.msk [vmem:[#allocation3 + $0x1f0] sm:$0xff] %vm2776_vm9, %v3395_v55  ;;  %4434 = vmatmul.mubr.bf16.gmra.mxu0 %v9699_v25  ;;  %7563 = vmatprep.mubr.msk.bf16.mxu1 %vm2776_vm9, %v9685_v0 }
 0x463   : > { %3432 = vst.msk [vmem:[#allocation3 + $0xf0] sm:$0xff] %vm2776_vm9, %v3267_v37  ;;  %v3397_v46 = vpop.f32.mrf.mxu1  ;;  %7631 = vmatprep.mubr.msk.bf16.mxu0 %vm2776_vm9, %v9701_v35  ;;  %v12230_v37 = vld [vmem:[#allocation10_spill] sm:$0xff] }
 0x464   : > { %v3269_v13 = vpop.f32.mrf.mxu0 }
 0x465   : > { %v3398_v57 = vpop.f32.mrf.mxu1 }
 0x466   : > { %v3270_v4 = vpop.f32.mrf.mxu0  ;;  %3465 = vst.msk [vmem:[#allocation3 + $0x1f8] sm:$0xff] %vm2776_vm9, %v3398_v57  ;;  %v12231_v57 = vld [vmem:[#allocation11_spill] sm:$0xff] }
 0x467   : > { %3433 = vst.msk [vmem:[#allocation3 + $0xf8] sm:$0xff] %vm2776_vm9, %v3270_v4  ;;  %v3400_v47 = vpop.f32.mrf.mxu1 }
 0x468   : > { %v3272_v29 = vpop.f32.mrf.mxu0 }
 0x469   : > { %v3667_v6 = vpop.f32.mrf.mxu1  ;;  %3858 = vmatmul.mubr.bf16.gmra.mxu1 %v9699_v25  ;;  %v3473_v29 = vld [vmem:[#allocation3 + $0x38] sm:$0xff] }
 0x46a   : > { %v3922_v0 = vadd.f32 %v3667_v6, %v3466_v30  ;;  %v4251_v2 = vpop.f32.mrf.mxu0  ;;  %4442 = vmatmul.mubr.bf16.gmra.mxu0 %v12224_v5  ;;  %7564 = vmatprep.mubr.msk.bf16.mxu1 %vm2776_vm9, %v9701_v35 }
 0x46b   : > { %v3669_v8 = vpop.f32.mrf.mxu1  ;;  %7632 = vmatprep.mubr.msk.bf16.mxu0 %vm2776_vm9, %v12225_v17 }
 0x46c   : > { %3986 = vst.msk [vmem:[#allocation3] sm:$0xff] %vm2776_vm9, %v3922_v0  ;;  %v4253_v15 = vpop.f32.mrf.mxu0 }
 0x46d   : > { %v3670_v54 = vpop.f32.mrf.mxu1  ;;  %v3474_v15 = vld [vmem:[#allocation3 + $0x40] sm:$0xff] }
 0x46e   : > { %v3923_v31 = vadd.f32 %v3670_v54, %v3467_v16  ;;  %v4254_v20 = vpop.f32.mrf.mxu0 }
 0x46f   : > { %v3672_v63 = vpop.f32.mrf.mxu1 }
 0x470   : > { %3987 = vst.msk [vmem:[#allocation3 + $0x8] sm:$0xff] %vm2776_vm9, %v3923_v31  ;;  %v4256_v25 = vpop.f32.mrf.mxu0 }
 0x471   : > { %v3675_v45 = vpop.f32.mrf.mxu1  ;;  %3866 = vmatmul.mubr.bf16.gmra.mxu1 %v12224_v5 }
 0x472   : > { %v3924_v35 = vadd.f32 %v3675_v45, %v3468_v59  ;;  %v4259_v19 = vpop.f32.mrf.mxu0  ;;  %4450 = vmatmul.mubr.bf16.gmra.mxu0 %v12226_v14  ;;  %7565 = vmatprep.mubr.msk.bf16.mxu1 %vm2776_vm9, %v12225_v17  ;;  %v2628_v45 = vld [vmem:[#allocation2 + $0x332] sm:$0xff] }
 0x473   : > { %v4050_v24 = vld [vmem:[#allocation3] sm:$0xff]  ;;  %v3677_v53 = vpop.f32.mrf.mxu1  ;;  %7633 = vmatprep.mubr.msk.bf16.mxu0 %vm2776_vm9, %v12227_v52 }
 0x474   : > { %v4506_v23 = vadd.f32 %v4251_v2, %v4050_v24  ;;  %3988 = vst.msk [vmem:[#allocation3 + $0x10] sm:$0xff] %vm2776_vm9, %v3924_v35  ;;  %v4261_v33 = vpop.f32.mrf.mxu0  ;;  %v2629_v35 = vld [vmem:[#allocation2 + $0x33a] sm:$0xff] }
 0x475   : > { %v3678_v34 = vpop.f32.mrf.mxu1  ;;  %v2666_v33 = vpack.c.bf16 %v2629_v35, %v2628_v45  ;;  %v3481_v45 = vld [vmem:[#allocation3 + $0x78] sm:$0xff] }
 0x476   : > { %4570 = vst.msk [vmem:[#allocation3] sm:$0xff] %vm2776_vm9, %v4506_v23  ;;  %v3925_v42 = vadd.f32 %v3678_v34, %v3469_v61  ;;  %v4262_v50 = vpop.f32.mrf.mxu0 }
 0x477   : > { %v4051_v43 = vld [vmem:[#allocation3 + $0x8] sm:$0xff]  ;;  %v3680_v7 = vpop.f32.mrf.mxu1 }
 0x478   : > { %v4507_v60 = vadd.f32 %v4254_v20, %v4051_v43  ;;  %3989 = vst.msk [vmem:[#allocation3 + $0x18] sm:$0xff] %vm2776_vm9, %v3925_v42  ;;  %v4264_v32 = vpop.f32.mrf.mxu0  ;;  %v2412_v42 = vld [vmem:[#allocation2 + $0x330] sm:$0xff] }
 0x479   : > { %v3683_v49 = vpop.f32.mrf.mxu1  ;;  %3874 = vmatmul.mubr.bf16.gmra.mxu1 %v12226_v14  ;;  %v3476_v43 = vld [vmem:[#allocation3 + $0x50] sm:$0xff] }
 0x47a   : > { %4571 = vst.msk [vmem:[#allocation3 + $0x8] sm:$0xff] %vm2776_vm9, %v4507_v60  ;;  %v3926_v41 = vadd.f32 %v3683_v49, %v3470_v11  ;;  %v4267_v12 = vpop.f32.mrf.mxu0  ;;  %4458 = vmatmul.mubr.bf16.gmra.mxu0 %v12228_v56  ;;  %7566 = vmatprep.mubr.msk.bf16.mxu1 %vm2776_vm9, %v12227_v52 }
 0x47b   : > { %v4052_v58 = vld [vmem:[#allocation3 + $0x10] sm:$0xff]  ;;  %v3685_v18 = vpop.f32.mrf.mxu1  ;;  %7634 = vmatprep.mubr.msk.bf16.mxu0 %vm2776_vm9, %v12229_v3 }
 0x47c   : > { %v4508_v10 = vadd.f32 %v4259_v19, %v4052_v58  ;;  %3990 = vst.msk [vmem:[#allocation3 + $0x20] sm:$0xff] %vm2776_vm9, %v3926_v41  ;;  %v4269_v62 = vpop.f32.mrf.mxu0  ;;  %v3475_v19 = vld [vmem:[#allocation3 + $0x48] sm:$0xff]  ;;  %v2773_v58 = vpop.permute.xlu0 %2772  ;;  %v2631_v18 = vld [vmem:[#allocation2 + $0x352] sm:$0xff] }
 0x47d   : > { %v3686_v51 = vpop.f32.mrf.mxu1 }
 0x47e   : > { %4572 = vst.msk [vmem:[#allocation3 + $0x10] sm:$0xff] %vm2776_vm9, %v4508_v10  ;;  %v3927_v27 = vadd.f32 %v3686_v51, %v3471_v38  ;;  %v4270_v40 = vpop.f32.mrf.mxu0 }
 0x47f   : > { %v4053_v9 = vld [vmem:[#allocation3 + $0x18] sm:$0xff]  ;;  %v3688_v48 = vpop.f32.mrf.mxu1 }
 0x480   : > { %v4509_v28 = vadd.f32 %v4262_v50, %v4053_v9  ;;  %3991 = vst.msk [vmem:[#allocation3 + $0x28] sm:$0xff] %vm2776_vm9, %v3927_v27  ;;  %v4272_v22 = vpop.f32.mrf.mxu0  ;;  %v2413_v50 = vld [vmem:[#allocation2 + $0x338] sm:$0xff] }
 0x481   : > { %v3691_v39 = vpop.f32.mrf.mxu1  ;;  %3882 = vmatmul.mubr.bf16.gmra.mxu1 %v12228_v56  ;;  %v2450_v41 = vpack.c.bf16 %v2413_v50, %v2412_v42  ;;  %v2415_v22 = vld [vmem:[#allocation2 + $0x350] sm:$0xff] }
 0x482   : > { %4573 = vst.msk [vmem:[#allocation3 + $0x18] sm:$0xff] %vm2776_vm9, %v4509_v28  ;;  %v3928_v26 = vadd.f32 %v3691_v39, %v3472_v44  ;;  %v4275_v55 = vpop.f32.mrf.mxu0  ;;  %4466 = vmatmul.mubr.bf16.gmra.mxu0 %v12230_v37  ;;  %7567 = vmatprep.mubr.msk.bf16.mxu1 %vm2776_vm9, %v12229_v3  ;;  %v3477_v3 = vld [vmem:[#allocation3 + $0x58] sm:$0xff]  ;;  %v2414_v28 = vld [vmem:[#allocation2 + $0x348] sm:$0xff]  ;;  %v3478_v44 = vld [vmem:[#allocation3 + $0x60] sm:$0xff] }
 0x483   : > { %v4054_v46 = vld [vmem:[#allocation3 + $0x20] sm:$0xff]  ;;  %v3693_v13 = vpop.f32.mrf.mxu1  ;;  %7635 = vmatprep.mubr.msk.bf16.mxu0 %vm2776_vm9, %v12231_v57  ;;  %v2915_v27 = vsel %vm2776_vm9, %v2450_v41, %v2773_v58 }
 0x484   : > { %v4510_v4 = vadd.f32 %v4267_v12, %v4054_v46  ;;  %3992 = vst.msk [vmem:[#allocation3 + $0x30] sm:$0xff] %vm2776_vm9, %v3928_v26  ;;  %v4277_v47 = vpop.f32.mrf.mxu0  ;;  %v2451_v13 = vpack.c.bf16 %v2415_v22, %v2414_v28 }
 0x485   : > { %v3694_v30 = vpop.f32.mrf.mxu1  ;;  %v2775_v47 = vpop.permute.xlu1 %2774 }
 0x486   : > { %4574 = vst.msk [vmem:[#allocation3 + $0x20] sm:$0xff] %vm2776_vm9, %v4510_v4  ;;  %v3929_v6 = vadd.f32 %v3694_v30, %v3473_v29  ;;  %v4278_v0 = vpop.f32.mrf.mxu0  ;;  %v3479_v29 = vld [vmem:[#allocation3 + $0x68] sm:$0xff] }
 0x487   : > { %v4055_v2 = vld [vmem:[#allocation3 + $0x28] sm:$0xff]  ;;  %v3696_v5 = vpop.f32.mrf.mxu1 }
 0x488   : > { %v4511_v8 = vadd.f32 %v4270_v40, %v4055_v2  ;;  %3993 = vst.msk [vmem:[#allocation3 + $0x38] sm:$0xff] %vm2776_vm9, %v3929_v6  ;;  %v4280_v17 = vpop.f32.mrf.mxu0  ;;  %v2919_v5 = vsel %vm2776_vm9, %v2451_v13, %v2775_v47 }
 0x489   : > { %v3699_v16 = vpop.f32.mrf.mxu1  ;;  %3890 = vmatmul.mubr.bf16.gmra.mxu1 %v12230_v37 }
 0x48a   : > { %4575 = vst.msk [vmem:[#allocation3 + $0x28] sm:$0xff] %vm2776_vm9, %v4511_v8  ;;  %v3930_v54 = vadd.f32 %v3699_v16, %v3474_v15  ;;  %v4283_v31 = vpop.f32.mrf.mxu0  ;;  %4474 = vmatmul.mubr.bf16.gmra.mxu0 %v9779_v1  ;;  %7568 = vmatprep.mubr.msk.bf16.mxu1 %vm2776_vm9, %v12231_v57  ;;  %v3480_v15 = vld [vmem:[#allocation3 + $0x70] sm:$0xff] }
 0x48b   : > { %v4056_v20 = vld [vmem:[#allocation3 + $0x30] sm:$0xff]  ;;  %v3701_v63 = vpop.f32.mrf.mxu1  ;;  %7636 = vmatprep.mubr.msk.bf16.mxu0 %vm2776_vm9, %v9781_v36 }
 0x48c   : > { %v4512_v25 = vadd.f32 %v4275_v55, %v4056_v20  ;;  %3994 = vst.msk [vmem:[#allocation3 + $0x40] sm:$0xff] %vm2776_vm9, %v3930_v54  ;;  %v4285_v59 = vpop.f32.mrf.mxu0 }
 0x48d   : > { %v3702_v14 = vpop.f32.mrf.mxu1 }
 0x48e   : > { %4576 = vst.msk [vmem:[#allocation3 + $0x30] sm:$0xff] %vm2776_vm9, %v4512_v25  ;;  %v3931_v24 = vadd.f32 %v3702_v14, %v3475_v19  ;;  %v4286_v53 = vpop.f32.mrf.mxu0 }
 0x48f   : > { %v4057_v52 = vld [vmem:[#allocation3 + $0x38] sm:$0xff]  ;;  %v3704_v23 = vpop.f32.mrf.mxu1 }
 0x490   : > { %v4513_v61 = vadd.f32 %v4278_v0, %v4057_v52  ;;  %3995 = vst.msk [vmem:[#allocation3 + $0x48] sm:$0xff] %vm2776_vm9, %v3931_v24  ;;  %v4288_v34 = vpop.f32.mrf.mxu0 }
 0x491   : > { %v3707_v7 = vpop.f32.mrf.mxu1  ;;  %3898 = vmatmul.mubr.bf16.gmra.mxu1 %v9779_v1  ;;  %v2630_v1 = vld [vmem:[#allocation2 + $0x34a] sm:$0xff] }
 0x492   : > { %4577 = vst.msk [vmem:[#allocation3 + $0x38] sm:$0xff] %vm2776_vm9, %v4513_v61  ;;  %v3932_v60 = vadd.f32 %v3707_v7, %v3476_v43  ;;  %v4291_v32 = vpop.f32.mrf.mxu0  ;;  %4482 = vmatmul.mubr.bf16.gmra.mxu0 %v9795_v21  ;;  %7569 = vmatprep.mubr.msk.bf16.mxu1 %vm2776_vm9, %v9781_v36  ;;  %v2667_v40 = vpack.c.bf16 %v2631_v18, %v2630_v1  ;;  %v3484_v18 = vld [vmem:[#allocation3 + $0x90] sm:$0xff] }
 0x493   : > { %v4058_v11 = vld [vmem:[#allocation3 + $0x40] sm:$0xff]  ;;  %v3709_v49 = vpop.f32.mrf.mxu1  ;;  %7637 = vmatprep.mubr.msk.bf16.mxu0 %vm2776_vm9, %v2666_v33 }
 0x494   : > { %v4514_v12 = vadd.f32 %v4283_v31, %v4058_v11  ;;  %3996 = vst.msk [vmem:[#allocation3 + $0x50] sm:$0xff] %vm2776_vm9, %v3932_v60  ;;  %v4293_v56 = vpop.f32.mrf.mxu0 }
 0x495   : > { %v3710_v10 = vpop.f32.mrf.mxu1 }
 0x496   : > { %4578 = vst.msk [vmem:[#allocation3 + $0x40] sm:$0xff] %vm2776_vm9, %v4514_v12  ;;  %v3933_v62 = vadd.f32 %v3710_v10, %v3477_v3  ;;  %v4294_v38 = vpop.f32.mrf.mxu0 }
 0x497   : > { %v4059_v51 = vld [vmem:[#allocation3 + $0x48] sm:$0xff]  ;;  %v3712_v36 = vpop.f32.mrf.mxu1 }
 0x498   : > { %v4515_v9 = vadd.f32 %v4286_v53, %v4059_v51  ;;  %3997 = vst.msk [vmem:[#allocation3 + $0x58] sm:$0xff] %vm2776_vm9, %v3933_v62  ;;  %v4296_v48 = vpop.f32.mrf.mxu0 }
 0x499   : > { %v3715_v39 = vpop.f32.mrf.mxu1  ;;  %3906 = vmatmul.mubr.bf16.gmra.mxu1 %v9795_v21 }
 0x49a   : > { %4579 = vst.msk [vmem:[#allocation3 + $0x48] sm:$0xff] %vm2776_vm9, %v4515_v9  ;;  %v3934_v26 = vadd.f32 %v3715_v39, %v3478_v44  ;;  %v4299_v55 = vpop.f32.mrf.mxu0  ;;  %4490 = vmatmul.mubr.bf16.gmra.mxu0 %v2915_v27  ;;  %7570 = vmatprep.mubr.msk.bf16.mxu1 %vm2776_vm9, %v2666_v33  ;;  %v3482_v33 = vld [vmem:[#allocation3 + $0x80] sm:$0xff] }
 0x49b   : > { %v4060_v37 = vld [vmem:[#allocation3 + $0x50] sm:$0xff]  ;;  %v3717_v46 = vpop.f32.mrf.mxu1  ;;  %7638 = vmatprep.mubr.msk.bf16.mxu0 %vm2776_vm9, %v2667_v40  ;;  %v3485_v40 = vld [vmem:[#allocation3 + $0x98] sm:$0xff] }
 0x49c   : > { %v4516_v57 = vadd.f32 %v4291_v32, %v4060_v37  ;;  %3998 = vst.msk [vmem:[#allocation3 + $0x60] sm:$0xff] %vm2776_vm9, %v3934_v26  ;;  %v4301_v4 = vpop.f32.mrf.mxu0  ;;  %v3483_v32 = vld [vmem:[#allocation3 + $0x88] sm:$0xff] }
 0x49d   : > { %v3718_v30 = vpop.f32.mrf.mxu1 }
 0x49e   : > { %4580 = vst.msk [vmem:[#allocation3 + $0x50] sm:$0xff] %vm2776_vm9, %v4516_v57  ;;  %v3935_v21 = vadd.f32 %v3718_v30, %v3479_v29  ;;  %v4302_v6 = vpop.f32.mrf.mxu0  ;;  %v3487_v30 = vld [vmem:[#allocation3 + $0xa8] sm:$0xff] }
 0x49f   : > { %v4061_v0 = vld [vmem:[#allocation3 + $0x58] sm:$0xff]  ;;  %v3720_v2 = vpop.f32.mrf.mxu1 }
 0x4a0   : > { %v4517_v8 = vadd.f32 %v4294_v38, %v4061_v0  ;;  %3999 = vst.msk [vmem:[#allocation3 + $0x68] sm:$0xff] %vm2776_vm9, %v3935_v21  ;;  %v4304_v17 = vpop.f32.mrf.mxu0 }
 0x4a1   : > { %v3723_v16 = vpop.f32.mrf.mxu1  ;;  %3914 = vmatmul.mubr.bf16.gmra.mxu1 %v2915_v27 }
 0x4a2   : > { %4581 = vst.msk [vmem:[#allocation3 + $0x58] sm:$0xff] %vm2776_vm9, %v4517_v8  ;;  %v3936_v54 = vadd.f32 %v3723_v16, %v3480_v15  ;;  %v4307_v31 = vpop.f32.mrf.mxu0  ;;  %4498 = vmatmul.mubr.bf16.gmra.mxu0 %v2919_v5  ;;  %v3488_v15 = vld [vmem:[#allocation3 + $0xb0] sm:$0xff] }
 0x4a3   : > { %v4062_v20 = vld [vmem:[#allocation3 + $0x60] sm:$0xff]  ;;  %v3725_v63 = vpop.f32.mrf.mxu1 }
 0x4a4   : > { %v4518_v25 = vadd.f32 %v4299_v55, %v4062_v20  ;;  %4000 = vst.msk [vmem:[#allocation3 + $0x70] sm:$0xff] %vm2776_vm9, %v3936_v54  ;;  %v4309_v59 = vpop.f32.mrf.mxu0  ;;  %v3486_v55 = vld [vmem:[#allocation3 + $0xa0] sm:$0xff] }
 0x4a5   : > { %v3726_v35 = vpop.f32.mrf.mxu1 }
 0x4a6   : > { %4582 = vst.msk [vmem:[#allocation3 + $0x60] sm:$0xff] %vm2776_vm9, %v4518_v25  ;;  %v3937_v19 = vadd.f32 %v3726_v35, %v3481_v45  ;;  %v4310_v14 = vpop.f32.mrf.mxu0  ;;  %v3489_v45 = vld [vmem:[#allocation3 + $0xb8] sm:$0xff] }
 0x4a7   : > { %v4063_v24 = vld [vmem:[#allocation3 + $0x68] sm:$0xff]  ;;  %v3728_v53 = vpop.f32.mrf.mxu1 }
 0x4a8   : > { %v4519_v52 = vadd.f32 %v4302_v6, %v4063_v24  ;;  %4001 = vst.msk [vmem:[#allocation3 + $0x78] sm:$0xff] %vm2776_vm9, %v3937_v19  ;;  %v4312_v23 = vpop.f32.mrf.mxu0 }
 0x4a9   : > { %v3731_v61 = vpop.f32.mrf.mxu1 }
 0x4aa   : > { %4583 = vst.msk [vmem:[#allocation3 + $0x68] sm:$0xff] %vm2776_vm9, %v4519_v52  ;;  %v3938_v34 = vadd.f32 %v3731_v61, %v3482_v33  ;;  %v4315_v42 = vpop.f32.mrf.mxu0  ;;  %v3490_v33 = vld [vmem:[#allocation3 + $0xc0] sm:$0xff] }
 0x4ab   : > { %v4064_v50 = vld [vmem:[#allocation3 + $0x70] sm:$0xff]  ;;  %v3733_v43 = vpop.f32.mrf.mxu1 }
 0x4ac   : > { %v4520_v7 = vadd.f32 %v4307_v31, %v4064_v50  ;;  %4002 = vst.msk [vmem:[#allocation3 + $0x80] sm:$0xff] %vm2776_vm9, %v3938_v34  ;;  %v4317_v60 = vpop.f32.mrf.mxu0 }
 0x4ad   : > { %v3734_v11 = vpop.f32.mrf.mxu1 }
 0x4ae   : > { %4584 = vst.msk [vmem:[#allocation3 + $0x70] sm:$0xff] %vm2776_vm9, %v4520_v7  ;;  %v3939_v49 = vadd.f32 %v3734_v11, %v3483_v32  ;;  %v4318_v41 = vpop.f32.mrf.mxu0  ;;  %v3491_v32 = vld [vmem:[#allocation3 + $0xc8] sm:$0xff] }
 0x4af   : > { %v4065_v12 = vld [vmem:[#allocation3 + $0x78] sm:$0xff]  ;;  %v3736_v56 = vpop.f32.mrf.mxu1 }
 0x4b0   : > { %v4521_v58 = vadd.f32 %v4310_v14, %v4065_v12  ;;  %4003 = vst.msk [vmem:[#allocation3 + $0x88] sm:$0xff] %vm2776_vm9, %v3939_v49  ;;  %v4320_v1 = vpop.f32.mrf.mxu0 }
 0x4b1   : > { %v3739_v3 = vpop.f32.mrf.mxu1 }
 0x4b2   : > { %4585 = vst.msk [vmem:[#allocation3 + $0x78] sm:$0xff] %vm2776_vm9, %v4521_v58  ;;  %v3940_v10 = vadd.f32 %v3739_v3, %v3484_v18  ;;  %v4323_v62 = vpop.f32.mrf.mxu0  ;;  %v3492_v18 = vld [vmem:[#allocation3 + $0xd0] sm:$0xff] }
 0x4b3   : > { %v4066_v38 = vld [vmem:[#allocation3 + $0x80] sm:$0xff]  ;;  %v3741_v51 = vpop.f32.mrf.mxu1 }
 0x4b4   : > { %v4522_v36 = vadd.f32 %v4315_v42, %v4066_v38  ;;  %4004 = vst.msk [vmem:[#allocation3 + $0x90] sm:$0xff] %vm2776_vm9, %v3940_v10  ;;  %v4325_v27 = vpop.f32.mrf.mxu0 }
 0x4b5   : > { %v3742_v9 = vpop.f32.mrf.mxu1 }
 0x4b6   : > { %4586 = vst.msk [vmem:[#allocation3 + $0x80] sm:$0xff] %vm2776_vm9, %v4522_v36  ;;  %v3941_v48 = vadd.f32 %v3742_v9, %v3485_v40  ;;  %v4326_v28 = vpop.f32.mrf.mxu0  ;;  %v3493_v40 = vld [vmem:[#allocation3 + $0xd8] sm:$0xff] }
 0x4b7   : > { %v4067_v22 = vld [vmem:[#allocation3 + $0x88] sm:$0xff]  ;;  %v3744_v44 = vpop.f32.mrf.mxu1 }
 0x4b8   : > { %v4523_v39 = vadd.f32 %v4318_v41, %v4067_v22  ;;  %4005 = vst.msk [vmem:[#allocation3 + $0x98] sm:$0xff] %vm2776_vm9, %v3941_v48  ;;  %v4328_v26 = vpop.f32.mrf.mxu0 }
 0x4b9   : > { %v3747_v37 = vpop.f32.mrf.mxu1 }
 0x4ba   : > { %4587 = vst.msk [vmem:[#allocation3 + $0x88] sm:$0xff] %vm2776_vm9, %v4523_v39  ;;  %v3942_v46 = vadd.f32 %v3747_v37, %v3486_v55  ;;  %v4331_v13 = vpop.f32.mrf.mxu0  ;;  %v3494_v55 = vld [vmem:[#allocation3 + $0xe0] sm:$0xff] }
 0x4bb   : > { %v4068_v57 = vld [vmem:[#allocation3 + $0x90] sm:$0xff]  ;;  %v3749_v4 = vpop.f32.mrf.mxu1 }
 0x4bc   : > { %v4524_v47 = vadd.f32 %v4323_v62, %v4068_v57  ;;  %4006 = vst.msk [vmem:[#allocation3 + $0xa0] sm:$0xff] %vm2776_vm9, %v3942_v46  ;;  %v4333_v29 = vpop.f32.mrf.mxu0 }
 0x4bd   : > { %v3750_v21 = vpop.f32.mrf.mxu1 }
 0x4be   : > { %4588 = vst.msk [vmem:[#allocation3 + $0x90] sm:$0xff] %vm2776_vm9, %v4524_v47  ;;  %v3943_v6 = vadd.f32 %v3750_v21, %v3487_v30  ;;  %v4334_v0 = vpop.f32.mrf.mxu0  ;;  %v3495_v30 = vld [vmem:[#allocation3 + $0xe8] sm:$0xff] }
 0x4bf   : > { %v4069_v2 = vld [vmem:[#allocation3 + $0x98] sm:$0xff]  ;;  %v3752_v5 = vpop.f32.mrf.mxu1 }
 0x4c0   : > { %v4525_v8 = vadd.f32 %v4326_v28, %v4069_v2  ;;  %4007 = vst.msk [vmem:[#allocation3 + $0xa8] sm:$0xff] %vm2776_vm9, %v3943_v6  ;;  %v4336_v17 = vpop.f32.mrf.mxu0 }
 0x4c1   : > { %v3755_v16 = vpop.f32.mrf.mxu1 }
 0x4c2   : > { %4589 = vst.msk [vmem:[#allocation3 + $0x98] sm:$0xff] %vm2776_vm9, %v4525_v8  ;;  %v3944_v54 = vadd.f32 %v3755_v16, %v3488_v15  ;;  %v4339_v31 = vpop.f32.mrf.mxu0  ;;  %v3496_v15 = vld [vmem:[#allocation3 + $0xf0] sm:$0xff] }
 0x4c3   : > { %v4070_v20 = vld [vmem:[#allocation3 + $0xa0] sm:$0xff]  ;;  %v3757_v63 = vpop.f32.mrf.mxu1 }
 0x4c4   : > { %v4526_v25 = vadd.f32 %v4331_v13, %v4070_v20  ;;  %4008 = vst.msk [vmem:[#allocation3 + $0xb0] sm:$0xff] %vm2776_vm9, %v3944_v54  ;;  %v4341_v59 = vpop.f32.mrf.mxu0 }
 0x4c5   : > { %v3758_v35 = vpop.f32.mrf.mxu1 }
 0x4c6   : > { %4590 = vst.msk [vmem:[#allocation3 + $0xa0] sm:$0xff] %vm2776_vm9, %v4526_v25  ;;  %v3945_v19 = vadd.f32 %v3758_v35, %v3489_v45  ;;  %v4342_v14 = vpop.f32.mrf.mxu0  ;;  %v3497_v45 = vld [vmem:[#allocation3 + $0xf8] sm:$0xff] }
 0x4c7   : > { %v4071_v24 = vld [vmem:[#allocation3 + $0xa8] sm:$0xff]  ;;  %v3760_v53 = vpop.f32.mrf.mxu1 }
 0x4c8   : > { %v4527_v52 = vadd.f32 %v4334_v0, %v4071_v24  ;;  %4009 = vst.msk [vmem:[#allocation3 + $0xb8] sm:$0xff] %vm2776_vm9, %v3945_v19  ;;  %v4344_v23 = vpop.f32.mrf.mxu0 }
 0x4c9   : > { %v3763_v61 = vpop.f32.mrf.mxu1 }
 0x4ca   : > { %4591 = vst.msk [vmem:[#allocation3 + $0xa8] sm:$0xff] %vm2776_vm9, %v4527_v52  ;;  %v3946_v34 = vadd.f32 %v3763_v61, %v3490_v33  ;;  %v4347_v42 = vpop.f32.mrf.mxu0  ;;  %v3498_v33 = vld [vmem:[#allocation3 + $0x100] sm:$0xff] }
 0x4cb   : > { %v4072_v50 = vld [vmem:[#allocation3 + $0xb0] sm:$0xff]  ;;  %v3765_v43 = vpop.f32.mrf.mxu1 }
 0x4cc   : > { %v4528_v7 = vadd.f32 %v4339_v31, %v4072_v50  ;;  %4010 = vst.msk [vmem:[#allocation3 + $0xc0] sm:$0xff] %vm2776_vm9, %v3946_v34  ;;  %v4349_v60 = vpop.f32.mrf.mxu0 }
 0x4cd   : > { %v3766_v11 = vpop.f32.mrf.mxu1 }
 0x4ce   : > { %4592 = vst.msk [vmem:[#allocation3 + $0xb0] sm:$0xff] %vm2776_vm9, %v4528_v7  ;;  %v3947_v49 = vadd.f32 %v3766_v11, %v3491_v32  ;;  %v4350_v41 = vpop.f32.mrf.mxu0  ;;  %v3499_v32 = vld [vmem:[#allocation3 + $0x108] sm:$0xff] }
 0x4cf   : > { %v4073_v12 = vld [vmem:[#allocation3 + $0xb8] sm:$0xff]  ;;  %v3768_v56 = vpop.f32.mrf.mxu1 }
 0x4d0   : > { %v4529_v58 = vadd.f32 %v4342_v14, %v4073_v12  ;;  %4011 = vst.msk [vmem:[#allocation3 + $0xc8] sm:$0xff] %vm2776_vm9, %v3947_v49  ;;  %v4352_v1 = vpop.f32.mrf.mxu0 }
 0x4d1   : > { %v3771_v3 = vpop.f32.mrf.mxu1 }
 0x4d2   : > { %4593 = vst.msk [vmem:[#allocation3 + $0xb8] sm:$0xff] %vm2776_vm9, %v4529_v58  ;;  %v3948_v10 = vadd.f32 %v3771_v3, %v3492_v18  ;;  %v4355_v62 = vpop.f32.mrf.mxu0  ;;  %v3500_v18 = vld [vmem:[#allocation3 + $0x110] sm:$0xff] }
 0x4d3   : > { %v4074_v38 = vld [vmem:[#allocation3 + $0xc0] sm:$0xff]  ;;  %v3773_v51 = vpop.f32.mrf.mxu1 }
 0x4d4   : > { %v4530_v36 = vadd.f32 %v4347_v42, %v4074_v38  ;;  %4012 = vst.msk [vmem:[#allocation3 + $0xd0] sm:$0xff] %vm2776_vm9, %v3948_v10  ;;  %v4357_v27 = vpop.f32.mrf.mxu0 }
 0x4d5   : > { %v3774_v9 = vpop.f32.mrf.mxu1 }
 0x4d6   : > { %4594 = vst.msk [vmem:[#allocation3 + $0xc0] sm:$0xff] %vm2776_vm9, %v4530_v36  ;;  %v3949_v48 = vadd.f32 %v3774_v9, %v3493_v40  ;;  %v4358_v28 = vpop.f32.mrf.mxu0  ;;  %v3501_v40 = vld [vmem:[#allocation3 + $0x118] sm:$0xff] }
 0x4d7   : > { %v4075_v22 = vld [vmem:[#allocation3 + $0xc8] sm:$0xff]  ;;  %v3776_v44 = vpop.f32.mrf.mxu1 }
 0x4d8   : > { %v4531_v39 = vadd.f32 %v4350_v41, %v4075_v22  ;;  %4013 = vst.msk [vmem:[#allocation3 + $0xd8] sm:$0xff] %vm2776_vm9, %v3949_v48  ;;  %v4360_v26 = vpop.f32.mrf.mxu0  ;;  %v4635_v22 = vld [vmem:[#allocation3 + $0x8] sm:$0xff] }
 0x4d9   : > { %v3779_v37 = vpop.f32.mrf.mxu1  ;;  %v4634_v26 = vld [vmem:[#allocation3] sm:$0xff] }
 0x4da   : > { %4595 = vst.msk [vmem:[#allocation3 + $0xc8] sm:$0xff] %vm2776_vm9, %v4531_v39  ;;  %v3950_v46 = vadd.f32 %v3779_v37, %v3494_v55  ;;  %v4363_v13 = vpop.f32.mrf.mxu0 }
 0x4db   : > { %v4076_v57 = vld [vmem:[#allocation3 + $0xd0] sm:$0xff]  ;;  %v3781_v4 = vpop.f32.mrf.mxu1 }
 0x4dc   : > { %v4532_v47 = vadd.f32 %v4355_v62, %v4076_v57  ;;  %4014 = vst.msk [vmem:[#allocation3 + $0xe0] sm:$0xff] %vm2776_vm9, %v3950_v46  ;;  %v4365_v29 = vpop.f32.mrf.mxu0  ;;  %v4636_v46 = vld [vmem:[#allocation3 + $0x10] sm:$0xff]  ;;  %v4832_v4 = vmul.f32 %v4635_v22, %v4635_v22 }
 0x4dd   : > { %v3782_v21 = vpop.f32.mrf.mxu1 }
 0x4de   : > { %4596 = vst.msk [vmem:[#allocation3 + $0xd0] sm:$0xff] %vm2776_vm9, %v4532_v47  ;;  %v3951_v6 = vadd.f32 %v3782_v21, %v3495_v30  ;;  %v4366_v0 = vpop.f32.mrf.mxu0  ;;  %v4831_v30 = vmul.f32 %v4634_v26, %v4634_v26  ;;  %v4637_v21 = vld [vmem:[#allocation3 + $0x18] sm:$0xff] }
 0x4df   : > { %v4077_v2 = vld [vmem:[#allocation3 + $0xd8] sm:$0xff]  ;;  %v3784_v5 = vpop.f32.mrf.mxu1 }
 0x4e0   : > { %v4533_v8 = vadd.f32 %v4358_v28, %v4077_v2  ;;  %4015 = vst.msk [vmem:[#allocation3 + $0xe8] sm:$0xff] %vm2776_vm9, %v3951_v6  ;;  %v4368_v17 = vpop.f32.mrf.mxu0  ;;  %v4699_v2 = vsel %vm2776_vm9, %v4635_v22, 0.0  ;;  %v4833_v5 = vmul.f32 %v4636_v46, %v4636_v46 }
 0x4e1   : > { %v3787_v16 = vpop.f32.mrf.mxu1 }
 0x4e2   : > { %4597 = vst.msk [vmem:[#allocation3 + $0xd8] sm:$0xff] %vm2776_vm9, %v4533_v8  ;;  %v3952_v54 = vadd.f32 %v3787_v16, %v3496_v15  ;;  %v4371_v31 = vpop.f32.mrf.mxu0  ;;  %v4698_v15 = vsel %vm2776_vm9, %v4634_v26, 0.0  ;;  %v4638_v16 = vld [vmem:[#allocation3 + $0x20] sm:$0xff] }
 0x4e3   : > { %v4078_v20 = vld [vmem:[#allocation3 + $0xe0] sm:$0xff]  ;;  %v3789_v63 = vpop.f32.mrf.mxu1 }
 0x4e4   : > { %v4534_v25 = vadd.f32 %v4363_v13, %v4078_v20  ;;  %4016 = vst.msk [vmem:[#allocation3 + $0xf0] sm:$0xff] %vm2776_vm9, %v3952_v54  ;;  %v4373_v59 = vpop.f32.mrf.mxu0  ;;  %v3502_v13 = vld [vmem:[#allocation3 + $0x120] sm:$0xff]  ;;  %v3503_v54 = vld [vmem:[#allocation3 + $0x128] sm:$0xff]  ;;  %v4896_v20 = vsel %vm2776_vm9, %v4832_v4, 0.0  ;;  %v4701_v63 = vsel %vm2776_vm9, %v4636_v46, 0.0 }
 0x4e5   : > { %v3790_v35 = vpop.f32.mrf.mxu1 }
 0x4e6   : > { %4598 = vst.msk [vmem:[#allocation3 + $0xe0] sm:$0xff] %vm2776_vm9, %v4534_v25  ;;  %v3953_v19 = vadd.f32 %v3790_v35, %v3497_v45  ;;  %v4374_v14 = vpop.f32.mrf.mxu0  ;;  %v4834_v25 = vmul.f32 %v4637_v21, %v4637_v21  ;;  %v4895_v35 = vsel %vm2776_vm9, %v4831_v30, 0.0 }
 0x4e7   : > { %v4079_v24 = vld [vmem:[#allocation3 + $0xe8] sm:$0xff]  ;;  %v3792_v53 = vpop.f32.mrf.mxu1 }
 0x4e8   : > { %v4535_v52 = vadd.f32 %v4366_v0, %v4079_v24  ;;  %4017 = vst.msk [vmem:[#allocation3 + $0xf8] sm:$0xff] %vm2776_vm9, %v3953_v19  ;;  %v4376_v23 = vpop.f32.mrf.mxu0  ;;  %v4700_v19 = vadd.f32 %v4699_v2, %v4698_v15 }
 0x4e9   : > { %v3795_v61 = vpop.f32.mrf.mxu1  ;;  %v4703_v23 = vsel %vm2776_vm9, %v4637_v21, 0.0 }
 0x4ea   : > { %4599 = vst.msk [vmem:[#allocation3 + $0xe8] sm:$0xff] %vm2776_vm9, %v4535_v52  ;;  %v3954_v34 = vadd.f32 %v3795_v61, %v3498_v33  ;;  %v4379_v42 = vpop.f32.mrf.mxu0  ;;  %v4898_v52 = vsel %vm2776_vm9, %v4833_v5, 0.0  ;;  %v4835_v33 = vmul.f32 %v4638_v16, %v4638_v16  ;;  %v4644_v5 = vld [vmem:[#allocation3 + $0x50] sm:$0xff] }
 0x4eb   : > { %v4080_v50 = vld [vmem:[#allocation3 + $0xf0] sm:$0xff]  ;;  %v3797_v43 = vpop.f32.mrf.mxu1 }
 0x4ec   : > { %v4536_v7 = vadd.f32 %v4371_v31, %v4080_v50  ;;  %4018 = vst.msk [vmem:[#allocation3 + $0x100] sm:$0xff] %vm2776_vm9, %v3954_v34  ;;  %v4381_v60 = vpop.f32.mrf.mxu0  ;;  %v4702_v50 = vadd.f32 %v4701_v63, %v4700_v19  ;;  %v4640_v43 = vld [vmem:[#allocation3 + $0x30] sm:$0xff] }
 0x4ed   : > { %v3798_v11 = vpop.f32.mrf.mxu1 }
 0x4ee   : > { %4600 = vst.msk [vmem:[#allocation3 + $0xf0] sm:$0xff] %vm2776_vm9, %v4536_v7  ;;  %v3955_v49 = vadd.f32 %v3798_v11, %v3499_v32  ;;  %v4382_v41 = vpop.f32.mrf.mxu0  ;;  %v3504_v7 = vld [vmem:[#allocation3 + $0x130] sm:$0xff]  ;;  %v4900_v32 = vsel %vm2776_vm9, %v4834_v25, 0.0  ;;  %v4705_v11 = vsel %vm2776_vm9, %v4638_v16, 0.0 }
 0x4ef   : > { %v4081_v12 = vld [vmem:[#allocation3 + $0xf8] sm:$0xff]  ;;  %v3800_v56 = vpop.f32.mrf.mxu1 }
 0x4f0   : > { %v4537_v58 = vadd.f32 %v4374_v14, %v4081_v12  ;;  %4019 = vst.msk [vmem:[#allocation3 + $0x108] sm:$0xff] %vm2776_vm9, %v3955_v49  ;;  %v4384_v1 = vpop.f32.mrf.mxu0  ;;  %v4639_v14 = vld [vmem:[#allocation3 + $0x28] sm:$0xff] }
 0x4f1   : > { %v3803_v3 = vpop.f32.mrf.mxu1  ;;  %v4836_v49 = vmul.f32 %v4639_v14, %v4639_v14  ;;  %v4641_v1 = vld [vmem:[#allocation3 + $0x38] sm:$0xff] }
 0x4f2   : > { %4601 = vst.msk [vmem:[#allocation3 + $0xf8] sm:$0xff] %vm2776_vm9, %v4537_v58  ;;  %v3956_v10 = vadd.f32 %v3803_v3, %v3500_v18  ;;  %v4387_v62 = vpop.f32.mrf.mxu0  ;;  %v4704_v58 = vadd.f32 %v4703_v23, %v4702_v50 }
 0x4f3   : > { %v4082_v38 = vld [vmem:[#allocation3 + $0x100] sm:$0xff]  ;;  %v3805_v51 = vpop.f32.mrf.mxu1  ;;  %v4904_v22 = vsel %vm2776_vm9, %v4836_v49, 0.0 }
 0x4f4   : > { %v4538_v36 = vadd.f32 %v4379_v42, %v4082_v38  ;;  %4020 = vst.msk [vmem:[#allocation3 + $0x110] sm:$0xff] %vm2776_vm9, %v3956_v10  ;;  %v4389_v27 = vpop.f32.mrf.mxu0  ;;  %v4897_v42 = vadd.f32 %v4896_v20, %v4895_v35  ;;  %v4902_v10 = vsel %vm2776_vm9, %v4835_v33, 0.0  ;;  %v4837_v38 = vmul.f32 %v4640_v43, %v4640_v43 }
 0x4f5   : > { %v3806_v9 = vpop.f32.mrf.mxu1 }
 0x4f6   : > { %4602 = vst.msk [vmem:[#allocation3 + $0x100] sm:$0xff] %vm2776_vm9, %v4538_v36  ;;  %v3957_v48 = vadd.f32 %v3806_v9, %v3501_v40  ;;  %v4390_v28 = vpop.f32.mrf.mxu0  ;;  %v4899_v56 = vadd.f32 %v4898_v52, %v4897_v42  ;;  %v4706_v40 = vadd.f32 %v4705_v11, %v4704_v58  ;;  %v4642_v9 = vld [vmem:[#allocation3 + $0x40] sm:$0xff] }
 0x4f7   : > { %v4083_v44 = vld [vmem:[#allocation3 + $0x108] sm:$0xff]  ;;  %v3808_v39 = vpop.f32.mrf.mxu1  ;;  %v4839_v30 = vmul.f32 %v4642_v9, %v4642_v9  ;;  %v4713_v16 = vsel %vm2776_vm9, %v4642_v9, 0.0 }
 0x4f8   : > { %v4539_v55 = vadd.f32 %v4382_v41, %v4083_v44  ;;  %4021 = vst.msk [vmem:[#allocation3 + $0x118] sm:$0xff] %vm2776_vm9, %v3957_v48  ;;  %v4392_v37 = vpop.f32.mrf.mxu0  ;;  %v4901_v27 = vadd.f32 %v4900_v32, %v4899_v56  ;;  %v3505_v48 = vld [vmem:[#allocation3 + $0x138] sm:$0xff]  ;;  %v4709_v44 = vsel %vm2776_vm9, %v4640_v43, 0.0  ;;  %v4838_v39 = vmul.f32 %v4641_v1, %v4641_v1 }
 0x4f9   : > { %v3811_v57 = vpop.f32.mrf.mxu1  ;;  %v4910_v19 = vsel %vm2776_vm9, %v4839_v30, 0.0  ;;  %v4717_v43 = vsel %vm2776_vm9, %v4644_v5, 0.0 }
 0x4fa   : > { %4603 = vst.msk [vmem:[#allocation3 + $0x108] sm:$0xff] %vm2776_vm9, %v4539_v55  ;;  %v3958_v47 = vadd.f32 %v3811_v57, %v3502_v13  ;;  %v4395_v29 = vpop.f32.mrf.mxu0  ;;  %v4903_v37 = vadd.f32 %v4902_v10, %v4901_v27  ;;  %v4643_v13 = vld [vmem:[#allocation3 + $0x48] sm:$0xff]  ;;  %v4908_v15 = vsel %vm2776_vm9, %v4838_v39, 0.0 }
 0x4fb   : > { %v4084_v6 = vld [vmem:[#allocation3 + $0x110] sm:$0xff]  ;;  %v3813_v0 = vpop.f32.mrf.mxu1 }
 0x4fc   : > { %v4540_v8 = vadd.f32 %v4387_v62, %v4084_v6  ;;  %4022 = vst.msk [vmem:[#allocation3 + $0x120] sm:$0xff] %vm2776_vm9, %v3958_v47  ;;  %v4397_v17 = vpop.f32.mrf.mxu0  ;;  %v4707_v62 = vsel %vm2776_vm9, %v4639_v14, 0.0  ;;  %v4906_v47 = vsel %vm2776_vm9, %v4837_v38, 0.0  ;;  %v4905_v0 = vadd.f32 %v4904_v22, %v4903_v37 }
 0x4fd   : > { %v3814_v31 = vpop.f32.mrf.mxu1  ;;  %v4708_v46 = vadd.f32 %v4707_v62, %v4706_v40  ;;  %v4715_v14 = vsel %vm2776_vm9, %v4643_v13, 0.0 }
 0x4fe   : > { %4604 = vst.msk [vmem:[#allocation3 + $0x110] sm:$0xff] %vm2776_vm9, %v4540_v8  ;;  %v3959_v59 = vadd.f32 %v3814_v31, %v3503_v54  ;;  %v4398_v45 = vpop.f32.mrf.mxu0  ;;  %v3506_v8 = vld [vmem:[#allocation3 + $0x140] sm:$0xff]  ;;  %v4840_v54 = vmul.f32 %v4643_v13, %v4643_v13  ;;  %v4907_v63 = vadd.f32 %v4906_v47, %v4905_v0 }
 0x4ff   : > { %v4085_v24 = vld [vmem:[#allocation3 + $0x118] sm:$0xff]  ;;  %v3816_v53 = vpop.f32.mrf.mxu1  ;;  %v4710_v2 = vadd.f32 %v4709_v44, %v4708_v46 }
 0x500   : > { %v4541_v61 = vadd.f32 %v4390_v28, %v4085_v24  ;;  %4023 = vst.msk [vmem:[#allocation3 + $0x128] sm:$0xff] %vm2776_vm9, %v3959_v59  ;;  %v4400_v34 = vpop.f32.mrf.mxu0  ;;  %v4645_v59 = vld [vmem:[#allocation3 + $0x58] sm:$0xff]  ;;  %v4841_v24 = vmul.f32 %v4644_v5, %v4644_v5  ;;  %v4909_v23 = vadd.f32 %v4908_v15, %v4907_v63  ;;  %v4912_v50 = vsel %vm2776_vm9, %v4840_v54, 0.0 }
 0x501   : > { %v3819_v60 = vpop.f32.mrf.mxu1  ;;  %v3507_v34 = vld [vmem:[#allocation3 + $0x148] sm:$0xff] }
 0x502   : > { %4605 = vst.msk [vmem:[#allocation3 + $0x118] sm:$0xff] %vm2776_vm9, %v4541_v61  ;;  %v3960_v41 = vadd.f32 %v3819_v60, %v3504_v7  ;;  %v4403_v12 = vpop.f32.mrf.mxu0  ;;  %v4646_v61 = vld [vmem:[#allocation3 + $0x60] sm:$0xff]  ;;  %v4842_v7 = vmul.f32 %v4645_v59, %v4645_v59  ;;  %v4911_v11 = vadd.f32 %v4910_v19, %v4909_v23  ;;  %v4914_v58 = vsel %vm2776_vm9, %v4841_v24, 0.0 }
 0x503   : > { %v4086_v18 = vld [vmem:[#allocation3 + $0x120] sm:$0xff]  ;;  %v3821_v3 = vpop.f32.mrf.mxu1  ;;  %v4721_v9 = vsel %vm2776_vm9, %v4646_v61, 0.0 }
 0x504   : > { %v4542_v51 = vadd.f32 %v4395_v29, %v4086_v18  ;;  %4024 = vst.msk [vmem:[#allocation3 + $0x130] sm:$0xff] %vm2776_vm9, %v3960_v41  ;;  %v4405_v36 = vpop.f32.mrf.mxu0  ;;  %v4711_v29 = vsel %vm2776_vm9, %v4641_v1, 0.0  ;;  %v4647_v41 = vld [vmem:[#allocation3 + $0x68] sm:$0xff]  ;;  %v4719_v1 = vsel %vm2776_vm9, %v4645_v59, 0.0  ;;  %v4843_v18 = vmul.f32 %v4646_v61, %v4646_v61 }
 0x505   : > { %v3822_v28 = vpop.f32.mrf.mxu1  ;;  %v4712_v25 = vadd.f32 %v4711_v29, %v4710_v2  ;;  %v4913_v62 = vadd.f32 %v4912_v50, %v4911_v11  ;;  %v3508_v36 = vld [vmem:[#allocation3 + $0x150] sm:$0xff]  ;;  %v4916_v40 = vsel %vm2776_vm9, %v4842_v7, 0.0  ;;  %v4723_v13 = vsel %vm2776_vm9, %v4647_v41, 0.0 }
 0x506   : > { %4606 = vst.msk [vmem:[#allocation3 + $0x120] sm:$0xff] %vm2776_vm9, %v4542_v51  ;;  %v3961_v26 = vadd.f32 %v3822_v28, %v3505_v48  ;;  %v4406_v55 = vpop.f32.mrf.mxu0  ;;  %v4648_v51 = vld [vmem:[#allocation3 + $0x70] sm:$0xff]  ;;  %v4844_v48 = vmul.f32 %v4647_v41, %v4647_v41  ;;  %v4918_v46 = vsel %vm2776_vm9, %v4843_v18, 0.0 }
 0x507   : > { %v4087_v57 = vld [vmem:[#allocation3 + $0x128] sm:$0xff]  ;;  %v3824_v4 = vpop.f32.mrf.mxu1  ;;  %v4714_v33 = vadd.f32 %v4713_v16, %v4712_v25  ;;  %v4915_v44 = vadd.f32 %v4914_v58, %v4913_v62  ;;  %v4725_v5 = vsel %vm2776_vm9, %v4648_v51, 0.0 }
 0x508   : > { %v4543_v21 = vadd.f32 %v4398_v45, %v4087_v57  ;;  %4025 = vst.msk [vmem:[#allocation3 + $0x138] sm:$0xff] %vm2776_vm9, %v3961_v26  ;;  %v4408_v6 = vpop.f32.mrf.mxu0  ;;  %v4649_v26 = vld [vmem:[#allocation3 + $0x78] sm:$0xff]  ;;  %v4845_v57 = vmul.f32 %v4648_v51, %v4648_v51  ;;  %v4920_v2 = vsel %vm2776_vm9, %v4844_v48, 0.0 }
 0x509   : > { %v3827_v17 = vpop.f32.mrf.mxu1  ;;  %v4716_v49 = vadd.f32 %v4715_v14, %v4714_v33  ;;  %v4917_v29 = vadd.f32 %v4916_v40, %v4915_v44  ;;  %v3509_v6 = vld [vmem:[#allocation3 + $0x158] sm:$0xff]  ;;  %v4727_v59 = vsel %vm2776_vm9, %v4649_v26, 0.0 }
 0x50a   : > { %4607 = vst.msk [vmem:[#allocation3 + $0x128] sm:$0xff] %vm2776_vm9, %v4543_v21  ;;  %v3962_v31 = vadd.f32 %v3827_v17, %v3506_v8  ;;  %v4411_v20 = vpop.f32.mrf.mxu0  ;;  %v4650_v21 = vld [vmem:[#allocation3 + $0x80] sm:$0xff]  ;;  %v4846_v8 = vmul.f32 %v4649_v26, %v4649_v26  ;;  %v4922_v25 = vsel %vm2776_vm9, %v4845_v57, 0.0 }
 0x50b   : > { %v4088_v45 = vld [vmem:[#allocation3 + $0x130] sm:$0xff]  ;;  %v3829_v35 = vpop.f32.mrf.mxu1  ;;  %v4718_v38 = vadd.f32 %v4717_v43, %v4716_v49  ;;  %v4919_v16 = vadd.f32 %v4918_v46, %v4917_v29  ;;  %v4729_v61 = vsel %vm2776_vm9, %v4650_v21, 0.0 }
 0x50c   : > { %v4544_v53 = vadd.f32 %v4403_v12, %v4088_v45  ;;  %4026 = vst.msk [vmem:[#allocation3 + $0x140] sm:$0xff] %vm2776_vm9, %v3962_v31  ;;  %v4413_v52 = vpop.f32.mrf.mxu0  ;;  %v4651_v31 = vld [vmem:[#allocation3 + $0x88] sm:$0xff]  ;;  %v4847_v45 = vmul.f32 %v4650_v21, %v4650_v21  ;;  %v4924_v33 = vsel %vm2776_vm9, %v4846_v8, 0.0 }
 0x50d   : > { %v3830_v42 = vpop.f32.mrf.mxu1  ;;  %v4720_v39 = vadd.f32 %v4719_v1, %v4718_v38  ;;  %v4921_v14 = vadd.f32 %v4920_v2, %v4919_v16  ;;  %v3510_v52 = vld [vmem:[#allocation3 + $0x160] sm:$0xff]  ;;  %v4731_v41 = vsel %vm2776_vm9, %v4651_v31, 0.0 }
 0x50e   : > { %4608 = vst.msk [vmem:[#allocation3 + $0x130] sm:$0xff] %vm2776_vm9, %v4544_v53  ;;  %v3963_v60 = vadd.f32 %v3830_v42, %v3507_v34  ;;  %v4414_v32 = vpop.f32.mrf.mxu0  ;;  %v4652_v53 = vld [vmem:[#allocation3 + $0x90] sm:$0xff]  ;;  %v4848_v34 = vmul.f32 %v4651_v31, %v4651_v31  ;;  %v4926_v49 = vsel %vm2776_vm9, %v4847_v45, 0.0 }
 0x50f   : > { %v4089_v12 = vld [vmem:[#allocation3 + $0x138] sm:$0xff]  ;;  %v3832_v56 = vpop.f32.mrf.mxu1  ;;  %v4722_v30 = vadd.f32 %v4721_v9, %v4720_v39  ;;  %v4923_v43 = vadd.f32 %v4922_v25, %v4921_v14  ;;  %v4733_v51 = vsel %vm2776_vm9, %v4652_v53, 0.0 }
 0x510   : > { %v4545_v3 = vadd.f32 %v4406_v55, %v4089_v12  ;;  %4027 = vst.msk [vmem:[#allocation3 + $0x148] sm:$0xff] %vm2776_vm9, %v3963_v60  ;;  %v4416_v10 = vpop.f32.mrf.mxu0  ;;  %v4653_v60 = vld [vmem:[#allocation3 + $0x98] sm:$0xff]  ;;  %v4849_v12 = vmul.f32 %v4652_v53, %v4652_v53  ;;  %v4928_v38 = vsel %vm2776_vm9, %v4848_v34, 0.0 }
 0x511   : > { %v3835_v27 = vpop.f32.mrf.mxu1  ;;  %v4724_v54 = vadd.f32 %v4723_v13, %v4722_v30  ;;  %v4925_v1 = vadd.f32 %v4924_v33, %v4923_v43  ;;  %v3511_v10 = vld [vmem:[#allocation3 + $0x168] sm:$0xff]  ;;  %v4735_v26 = vsel %vm2776_vm9, %v4653_v60, 0.0 }
 0x512   : > { %4609 = vst.msk [vmem:[#allocation3 + $0x138] sm:$0xff] %vm2776_vm9, %v4545_v3  ;;  %v3964_v28 = vadd.f32 %v3835_v27, %v3508_v36  ;;  %v4419_v22 = vpop.f32.mrf.mxu0  ;;  %v4654_v3 = vld [vmem:[#allocation3 + $0xa0] sm:$0xff]  ;;  %v4850_v36 = vmul.f32 %v4653_v60, %v4653_v60  ;;  %v4930_v39 = vsel %vm2776_vm9, %v4849_v12, 0.0 }
 0x513   : > { %v4090_v55 = vld [vmem:[#allocation3 + $0x140] sm:$0xff]  ;;  %v3837_v37 = vpop.f32.mrf.mxu1  ;;  %v4726_v24 = vadd.f32 %v4725_v5, %v4724_v54  ;;  %v4927_v9 = vadd.f32 %v4926_v49, %v4925_v1  ;;  %v4737_v21 = vsel %vm2776_vm9, %v4654_v3, 0.0 }
 0x514   : > { %v4546_v4 = vadd.f32 %v4411_v20, %v4090_v55  ;;  %4028 = vst.msk [vmem:[#allocation3 + $0x150] sm:$0xff] %vm2776_vm9, %v3964_v28  ;;  %v4421_v47 = vpop.f32.mrf.mxu0  ;;  %v4655_v28 = vld [vmem:[#allocation3 + $0xa8] sm:$0xff]  ;;  %v4851_v55 = vmul.f32 %v4654_v3, %v4654_v3  ;;  %v4932_v30 = vsel %vm2776_vm9, %v4850_v36, 0.0 }
 0x515   : > { %v3838_v0 = vpop.f32.mrf.mxu1  ;;  %v4728_v7 = vadd.f32 %v4727_v59, %v4726_v24  ;;  %v4929_v13 = vadd.f32 %v4928_v38, %v4927_v9  ;;  %v3512_v47 = vld [vmem:[#allocation3 + $0x170] sm:$0xff]  ;;  %v4739_v31 = vsel %vm2776_vm9, %v4655_v28, 0.0 }
 0x516   : > { %4610 = vst.msk [vmem:[#allocation3 + $0x140] sm:$0xff] %vm2776_vm9, %v4546_v4  ;;  %v3965_v17 = vadd.f32 %v3838_v0, %v3509_v6  ;;  %v4422_v15 = vpop.f32.mrf.mxu0  ;;  %v10180_v4 = vld [vmem:[#allocation3 + $0xb0] sm:$0xff]  ;;  %v4852_v6 = vmul.f32 %v4655_v28, %v4655_v28  ;;  %v4934_v54 = vsel %vm2776_vm9, %v4851_v55, 0.0 }
 0x517   : > { %v4091_v20 = vld [vmem:[#allocation3 + $0x148] sm:$0xff]  ;;  %v3840_v63 = vpop.f32.mrf.mxu1  ;;  %v4730_v18 = vadd.f32 %v4729_v61, %v4728_v7  ;;  %v4931_v5 = vadd.f32 %v4930_v39, %v4929_v13  ;;  %v4741_v53 = vsel %vm2776_vm9, %v10180_v4, 0.0 }
 0x518   : > { %v4547_v35 = vadd.f32 %v4414_v32, %v4091_v20  ;;  %4029 = vst.msk [vmem:[#allocation3 + $0x158] sm:$0xff] %vm2776_vm9, %v3965_v17  ;;  %v4424_v19 = vpop.f32.mrf.mxu0  ;;  %v10185_v17 = vld [vmem:[#allocation3 + $0xb8] sm:$0xff]  ;;  %v4853_v20 = vmul.f32 %v10180_v4, %v10180_v4  ;;  %v4936_v24 = vsel %vm2776_vm9, %v4852_v6, 0.0 }
 0x519   : > { %v3843_v23 = vpop.f32.mrf.mxu1  ;;  %v4732_v48 = vadd.f32 %v4731_v41, %v4730_v18  ;;  %v4933_v59 = vadd.f32 %v4932_v30, %v4931_v5  ;;  %v3513_v19 = vld [vmem:[#allocation3 + $0x178] sm:$0xff]  ;;  %v4743_v60 = vsel %vm2776_vm9, %v10185_v17, 0.0 }
 0x51a   : > { %4611 = vst.msk [vmem:[#allocation3 + $0x148] sm:$0xff] %vm2776_vm9, %v4547_v35  ;;  %v3966_v42 = vadd.f32 %v3843_v23, %v3510_v52  ;;  %v4427_v50 = vpop.f32.mrf.mxu0  ;;  %v10192_v35 = vld [vmem:[#allocation3 + $0xc0] sm:$0xff]  ;;  %v4854_v52 = vmul.f32 %v10185_v17, %v10185_v17  ;;  %v4938_v7 = vsel %vm2776_vm9, %v4853_v20, 0.0 }
 0x51b   : > { %v4092_v32 = vld [vmem:[#allocation3 + $0x150] sm:$0xff]  ;;  %v3845_v11 = vpop.f32.mrf.mxu1  ;;  %v4734_v57 = vadd.f32 %v4733_v51, %v4732_v48  ;;  %v4935_v61 = vadd.f32 %v4934_v54, %v4933_v59  ;;  %v4745_v3 = vsel %vm2776_vm9, %v10192_v35, 0.0 }
 0x51c   : > { %v4548_v56 = vadd.f32 %v4419_v22, %v4092_v32  ;;  %4030 = vst.msk [vmem:[#allocation3 + $0x160] sm:$0xff] %vm2776_vm9, %v3966_v42  ;;  %v4429_v58 = vpop.f32.mrf.mxu0  ;;  %v10200_v42 = vld [vmem:[#allocation3 + $0xc8] sm:$0xff]  ;;  %v4855_v32 = vmul.f32 %v10192_v35, %v10192_v35  ;;  %v4940_v18 = vsel %vm2776_vm9, %v4854_v52, 0.0  ;;  %v10240_v59 = vld [vmem:[#allocation3 + $0xf0] sm:$0xff] }
 0x51d   : > { %v3846_v62 = vpop.f32.mrf.mxu1  ;;  %v4736_v8 = vadd.f32 %v4735_v26, %v4734_v57  ;;  %v4937_v41 = vadd.f32 %v4936_v24, %v4935_v61  ;;  %v3514_v58 = vld [vmem:[#allocation3 + $0x180] sm:$0xff]  ;;  %v4747_v28 = vsel %vm2776_vm9, %v10200_v42, 0.0 }
 0x51e   : > { %4612 = vst.msk [vmem:[#allocation3 + $0x150] sm:$0xff] %vm2776_vm9, %v4548_v56  ;;  %v3967_v27 = vadd.f32 %v3846_v62, %v3511_v10  ;;  %v4430_v40 = vpop.f32.mrf.mxu0  ;;  %v10208_v56 = vld [vmem:[#allocation3 + $0xd0] sm:$0xff]  ;;  %v4856_v10 = vmul.f32 %v10200_v42, %v10200_v42  ;;  %v4942_v48 = vsel %vm2776_vm9, %v4855_v32, 0.0  ;;  %v4861_v32 = vmul.f32 %v10240_v59, %v10240_v59 }
 0x51f   : > { %v4093_v22 = vld [vmem:[#allocation3 + $0x158] sm:$0xff]  ;;  %v3848_v44 = vpop.f32.mrf.mxu1  ;;  %v4738_v45 = vadd.f32 %v4737_v21, %v4736_v8  ;;  %v4939_v51 = vadd.f32 %v4938_v7, %v4937_v41 }
 0x520   : > { %v4549_v37 = vadd.f32 %v4422_v15, %v4093_v22  ;;  %4031 = vst.msk [vmem:[#allocation3 + $0x168] sm:$0xff] %vm2776_vm9, %v3967_v27  ;;  %v4432_v46 = vpop.f32.mrf.mxu0  ;;  %v10216_v27 = vld [vmem:[#allocation3 + $0xd8] sm:$0xff]  ;;  %v4857_v22 = vmul.f32 %v10208_v56, %v10208_v56  ;;  %v4944_v57 = vsel %vm2776_vm9, %v4856_v10, 0.0  ;;  %v4757_v10 = vsel %vm2776_vm9, %v10240_v59, 0.0 }
 0x521   : > { %v3851_v29 = vpop.f32.mrf.mxu1  ;;  %v4740_v34 = vadd.f32 %v4739_v31, %v4738_v45  ;;  %v4941_v26 = vadd.f32 %v4940_v18, %v4939_v51  ;;  %v3515_v46 = vld [vmem:[#allocation3 + $0x188] sm:$0xff]  ;;  %v3516_v45 = vld [vmem:[#allocation3 + $0x190] sm:$0xff] }
 0x522   : > { %4613 = vst.msk [vmem:[#allocation3 + $0x158] sm:$0xff] %vm2776_vm9, %v4549_v37  ;;  %v3968_v0 = vadd.f32 %v3851_v29, %v3512_v47  ;;  %v4435_v2 = vpop.f32.mrf.mxu0  ;;  %v10224_v37 = vld [vmem:[#allocation3 + $0xe0] sm:$0xff]  ;;  %v4749_v47 = vsel %vm2776_vm9, %v10208_v56, 0.0  ;;  %v4858_v29 = vmul.f32 %v10216_v27, %v10216_v27 }
 0x523   : > { %v4094_v15 = vld [vmem:[#allocation3 + $0x160] sm:$0xff]  ;;  %v3853_v16 = vpop.f32.mrf.mxu1  ;;  %v4742_v12 = vadd.f32 %v4741_v53, %v4740_v34  ;;  %v4943_v6 = vadd.f32 %v4942_v48, %v4941_v26  ;;  %v4859_v54 = vmul.f32 %v10224_v37, %v10224_v37  ;;  %v4753_v24 = vsel %vm2776_vm9, %v10224_v37, 0.0  ;;  %v10248_v34 = vld [vmem:[#allocation3 + $0xf8] sm:$0xff] }
 0x524   : > { %v4550_v63 = vadd.f32 %v4427_v50, %v4094_v15  ;;  %4032 = vst.msk [vmem:[#allocation3 + $0x170] sm:$0xff] %vm2776_vm9, %v3968_v0  ;;  %v4437_v25 = vpop.f32.mrf.mxu0  ;;  %v4946_v15 = vsel %vm2776_vm9, %v4857_v22, 0.0  ;;  %v4751_v16 = vsel %vm2776_vm9, %v10216_v27, 0.0  ;;  %v4954_v22 = vsel %vm2776_vm9, %v4861_v32, 0.0 }
 0x525   : > { %v3854_v14 = vpop.f32.mrf.mxu1  ;;  %v4744_v36 = vadd.f32 %v4743_v60, %v4742_v12  ;;  %v4950_v7 = vsel %vm2776_vm9, %v4859_v54, 0.0 }
 0x526   : > { %4614 = vst.msk [vmem:[#allocation3 + $0x160] sm:$0xff] %vm2776_vm9, %v4550_v63  ;;  %v3969_v23 = vadd.f32 %v3854_v14, %v3513_v19  ;;  %v4438_v33 = vpop.f32.mrf.mxu0  ;;  %v4945_v63 = vadd.f32 %v4944_v57, %v4943_v6  ;;  %v4948_v14 = vsel %vm2776_vm9, %v4858_v29, 0.0  ;;  %v10272_v57 = vld [vmem:[#allocation3 + $0x110] sm:$0xff] }
 0x527   : > { %v4095_v50 = vld [vmem:[#allocation3 + $0x168] sm:$0xff]  ;;  %v3856_v43 = vpop.f32.mrf.mxu1  ;;  %v4746_v55 = vadd.f32 %v4745_v3, %v4744_v36 }
 0x528   : > { %v4551_v11 = vadd.f32 %v4430_v40, %v4095_v50  ;;  %4033 = vst.msk [vmem:[#allocation3 + $0x178] sm:$0xff] %vm2776_vm9, %v3969_v23  ;;  %v4440_v49 = vpop.f32.mrf.mxu0 }
 0x529   : > { %v3859_v1 = vpop.f32.mrf.mxu1  ;;  %v4748_v0 = vadd.f32 %v4747_v28, %v4746_v55 }
 0x52a   : > { %4615 = vst.msk [vmem:[#allocation3 + $0x168] sm:$0xff] %vm2776_vm9, %v4551_v11  ;;  %v3970_v62 = vadd.f32 %v3859_v1, %v3514_v58  ;;  %v4443_v38 = vpop.f32.mrf.mxu0  ;;  %v10256_v58 = vld [vmem:[#allocation3 + $0x100] sm:$0xff]  ;;  %v3517_v1 = vld [vmem:[#allocation3 + $0x198] sm:$0xff] }
 0x52b   : > { %v4096_v40 = vld [vmem:[#allocation3 + $0x170] sm:$0xff]  ;;  %v3861_v9 = vpop.f32.mrf.mxu1  ;;  %v4750_v25 = vadd.f32 %v4749_v47, %v4748_v0  ;;  %v3518_v47 = vld [vmem:[#allocation3 + $0x1a0] sm:$0xff]  ;;  %v4761_v6 = vsel %vm2776_vm9, %v10256_v58, 0.0 }
 0x52c   : > { %v4552_v44 = vadd.f32 %v4435_v2, %v4096_v40  ;;  %4034 = vst.msk [vmem:[#allocation3 + $0x180] sm:$0xff] %vm2776_vm9, %v3970_v62  ;;  %v4445_v39 = vpop.f32.mrf.mxu0  ;;  %v10232_v2 = vld [vmem:[#allocation3 + $0xe8] sm:$0xff]  ;;  %v4862_v62 = vmul.f32 %v10248_v34, %v10248_v34 }
 0x52d   : > { %v3862_v13 = vpop.f32.mrf.mxu1  ;;  %v4860_v53 = vmul.f32 %v10232_v2, %v10232_v2  ;;  %v4752_v61 = vadd.f32 %v4751_v16, %v4750_v25  ;;  %v4755_v60 = vsel %vm2776_vm9, %v10232_v2, 0.0  ;;  %v10264_v9 = vld [vmem:[#allocation3 + $0x108] sm:$0xff]  ;;  %v4863_v39 = vmul.f32 %v10256_v58, %v10256_v58  ;;  %v10280_v16 = vld [vmem:[#allocation3 + $0x118] sm:$0xff] }
 0x52e   : > { %4616 = vst.msk [vmem:[#allocation3 + $0x170] sm:$0xff] %vm2776_vm9, %v4552_v44  ;;  %v3971_v30 = vadd.f32 %v3862_v13, %v3515_v46  ;;  %v4446_v21 = vpop.f32.mrf.mxu0  ;;  %v4759_v44 = vsel %vm2776_vm9, %v10248_v34, 0.0  ;;  %v4864_v0 = vmul.f32 %v10264_v9, %v10264_v9  ;;  %v4865_v25 = vmul.f32 %v10272_v57, %v10272_v57 }
 0x52f   : > { %v4097_v5 = vld [vmem:[#allocation3 + $0x178] sm:$0xff]  ;;  %v3864_v8 = vpop.f32.mrf.mxu1  ;;  %v4754_v12 = vadd.f32 %v4753_v24, %v4752_v61  ;;  %v4952_v3 = vsel %vm2776_vm9, %v4860_v53, 0.0  ;;  %v10288_v53 = vld [vmem:[#allocation3 + $0x120] sm:$0xff] }
 0x530   : > { %v4553_v31 = vadd.f32 %v4438_v33, %v4097_v5  ;;  %4035 = vst.msk [vmem:[#allocation3 + $0x188] sm:$0xff] %vm2776_vm9, %v3971_v30  ;;  %v4448_v20 = vpop.f32.mrf.mxu0  ;;  %v4947_v33 = vadd.f32 %v4946_v15, %v4945_v63  ;;  %v4956_v30 = vsel %vm2776_vm9, %v4862_v62, 0.0  ;;  %v4763_v63 = vsel %vm2776_vm9, %v10264_v9, 0.0 }
 0x531   : > { %v3867_v19 = vpop.f32.mrf.mxu1  ;;  %v4756_v40 = vadd.f32 %v4755_v60, %v4754_v12  ;;  %v4958_v20 = vsel %vm2776_vm9, %v4863_v39, 0.0  ;;  %v4960_v61 = vsel %vm2776_vm9, %v4864_v0, 0.0  ;;  %v4962_v12 = vsel %vm2776_vm9, %v4865_v25, 0.0 }
 0x532   : > { %4617 = vst.msk [vmem:[#allocation3 + $0x178] sm:$0xff] %vm2776_vm9, %v4553_v31  ;;  %v3972_v52 = vadd.f32 %v3867_v19, %v3516_v45  ;;  %v4451_v23 = vpop.f32.mrf.mxu0  ;;  %v4949_v41 = vadd.f32 %v4948_v14, %v4947_v33 }
 0x533   : > { %v4098_v50 = vld [vmem:[#allocation3 + $0x180] sm:$0xff]  ;;  %v3869_v43 = vpop.f32.mrf.mxu1  ;;  %v4758_v13 = vadd.f32 %v4757_v10, %v4756_v40  ;;  %v3520_v40 = vld [vmem:[#allocation3 + $0x1b0] sm:$0xff] }
 0x534   : > { %v4554_v11 = vadd.f32 %v4443_v38, %v4098_v50  ;;  %4036 = vst.msk [vmem:[#allocation3 + $0x190] sm:$0xff] %vm2776_vm9, %v3972_v52  ;;  %v4453_v49 = vpop.f32.mrf.mxu0  ;;  %v4951_v36 = vadd.f32 %v4950_v7, %v4949_v41  ;;  %v3519_v52 = vld [vmem:[#allocation3 + $0x1a8] sm:$0xff]  ;;  %v4765_v50 = vsel %vm2776_vm9, %v10272_v57, 0.0  ;;  %v4866_v43 = vmul.f32 %v10280_v16, %v10280_v16 }
 0x535   : > { %v3870_v18 = vpop.f32.mrf.mxu1  ;;  %v4760_v15 = vadd.f32 %v4759_v44, %v4758_v13 }
 0x536   : > { %4618 = vst.msk [vmem:[#allocation3 + $0x180] sm:$0xff] %vm2776_vm9, %v4554_v11  ;;  %v3973_v38 = vadd.f32 %v3870_v18, %v3517_v1  ;;  %v4454_v51 = vpop.f32.mrf.mxu0  ;;  %v4953_v46 = vadd.f32 %v4952_v3, %v4951_v36  ;;  %v10296_v11 = vld [vmem:[#allocation3 + $0x128] sm:$0xff]  ;;  %v4767_v1 = vsel %vm2776_vm9, %v10280_v16, 0.0  ;;  %v4867_v18 = vmul.f32 %v10288_v53, %v10288_v53  ;;  %v10304_v36 = vld [vmem:[#allocation3 + $0x130] sm:$0xff] }
 0x537   : > { %v4099_v48 = vld [vmem:[#allocation3 + $0x188] sm:$0xff]  ;;  %v3872_v28 = vpop.f32.mrf.mxu1  ;;  %v4762_v24 = vadd.f32 %v4761_v6, %v4760_v15  ;;  %v4868_v44 = vmul.f32 %v10296_v11, %v10296_v11  ;;  %v4869_v6 = vmul.f32 %v10304_v36, %v10304_v36  ;;  %v4773_v25 = vsel %vm2776_vm9, %v10304_v36, 0.0 }
 0x538   : > { %v4555_v26 = vadd.f32 %v4446_v21, %v4099_v48  ;;  %4037 = vst.msk [vmem:[#allocation3 + $0x198] sm:$0xff] %vm2776_vm9, %v3973_v38  ;;  %v4456_v55 = vpop.f32.mrf.mxu0  ;;  %v4955_v8 = vadd.f32 %v4954_v22, %v4953_v46  ;;  %v4964_v28 = vsel %vm2776_vm9, %v4866_v43, 0.0  ;;  %v4769_v22 = vsel %vm2776_vm9, %v10288_v53, 0.0  ;;  %v10312_v46 = vld [vmem:[#allocation3 + $0x138] sm:$0xff] }
 0x539   : > { %v3875_v29 = vpop.f32.mrf.mxu1  ;;  %v4764_v32 = vadd.f32 %v4763_v63, %v4762_v24  ;;  %v4968_v63 = vsel %vm2776_vm9, %v4868_v44, 0.0  ;;  %v4775_v43 = vsel %vm2776_vm9, %v10312_v46, 0.0 }
 0x53a   : > { %4619 = vst.msk [vmem:[#allocation3 + $0x188] sm:$0xff] %vm2776_vm9, %v4555_v26  ;;  %v3974_v21 = vadd.f32 %v3875_v29, %v3518_v47  ;;  %v4459_v5 = vpop.f32.mrf.mxu0  ;;  %v4957_v14 = vadd.f32 %v4956_v30, %v4955_v8  ;;  %v4966_v29 = vsel %vm2776_vm9, %v4867_v18, 0.0  ;;  %v4771_v30 = vsel %vm2776_vm9, %v10296_v11, 0.0 }
 0x53b   : > { %v4100_v54 = vld [vmem:[#allocation3 + $0x190] sm:$0xff]  ;;  %v3877_v31 = vpop.f32.mrf.mxu1  ;;  %v4766_v38 = vadd.f32 %v4765_v50, %v4764_v32  ;;  %v4970_v50 = vsel %vm2776_vm9, %v4869_v6, 0.0  ;;  %v10352_v6 = vld [vmem:[#allocation3 + $0x160] sm:$0xff] }
 0x53c   : > { %v4556_v45 = vadd.f32 %v4451_v23, %v4100_v54  ;;  %4038 = vst.msk [vmem:[#allocation3 + $0x1a0] sm:$0xff] %vm2776_vm9, %v3974_v21  ;;  %v4461_v19 = vpop.f32.mrf.mxu0  ;;  %v4959_v60 = vadd.f32 %v4958_v20, %v4957_v14  ;;  %v10320_v54 = vld [vmem:[#allocation3 + $0x140] sm:$0xff]  ;;  %v3521_v31 = vld [vmem:[#allocation3 + $0x1b8] sm:$0xff] }
 0x53d   : > { %v3878_v33 = vpop.f32.mrf.mxu1  ;;  %v4768_v55 = vadd.f32 %v4767_v1, %v4766_v38  ;;  %v3522_v1 = vld [vmem:[#allocation3 + $0x1c0] sm:$0xff] }
 0x53e   : > { %4620 = vst.msk [vmem:[#allocation3 + $0x190] sm:$0xff] %vm2776_vm9, %v4556_v45  ;;  %v3975_v23 = vadd.f32 %v3878_v33, %v3519_v52  ;;  %v4462_v7 = vpop.f32.mrf.mxu0  ;;  %v4961_v62 = vadd.f32 %v4960_v61, %v4959_v60  ;;  %v4870_v45 = vmul.f32 %v10312_v46, %v10312_v46  ;;  %v10328_v52 = vld [vmem:[#allocation3 + $0x148] sm:$0xff] }
 0x53f   : > { %v4101_v49 = vld [vmem:[#allocation3 + $0x198] sm:$0xff]  ;;  %v3880_v41 = vpop.f32.mrf.mxu1  ;;  %v4770_v15 = vadd.f32 %v4769_v22, %v4768_v55 }
 0x540   : > { %v4557_v3 = vadd.f32 %v4454_v51, %v4101_v49  ;;  %4039 = vst.msk [vmem:[#allocation3 + $0x1a8] sm:$0xff] %vm2776_vm9, %v3975_v23  ;;  %v4464_v10 = vpop.f32.mrf.mxu0  ;;  %v4963_v26 = vadd.f32 %v4962_v12, %v4961_v62  ;;  %v4871_v23 = vmul.f32 %v10320_v54, %v10320_v54  ;;  %v10336_v12 = vld [vmem:[#allocation3 + $0x150] sm:$0xff]  ;;  %v4872_v62 = vmul.f32 %v10328_v52, %v10328_v52 }
 0x541   : > { %v3883_v48 = vpop.f32.mrf.mxu1  ;;  %v4772_v24 = vadd.f32 %v4771_v30, %v4770_v15  ;;  %v4777_v10 = vsel %vm2776_vm9, %v10320_v54, 0.0  ;;  %v4873_v55 = vmul.f32 %v10336_v12, %v10336_v12  ;;  %v4781_v15 = vsel %vm2776_vm9, %v10336_v12, 0.0 }
 0x542   : > { %4621 = vst.msk [vmem:[#allocation3 + $0x198] sm:$0xff] %vm2776_vm9, %v4557_v3  ;;  %v3976_v51 = vadd.f32 %v3883_v48, %v3520_v40  ;;  %v4467_v39 = vpop.f32.mrf.mxu0  ;;  %v4965_v8 = vadd.f32 %v4964_v28, %v4963_v26  ;;  %v4972_v3 = vsel %vm2776_vm9, %v4870_v45, 0.0  ;;  %v10344_v28 = vld [vmem:[#allocation3 + $0x158] sm:$0xff]  ;;  %v4779_v26 = vsel %vm2776_vm9, %v10328_v52, 0.0  ;;  %v10360_v45 = vld [vmem:[#allocation3 + $0x168] sm:$0xff] }
 0x543   : > { %v4102_v13 = vld [vmem:[#allocation3 + $0x1a0] sm:$0xff]  ;;  %v3885_v47 = vpop.f32.mrf.mxu1  ;;  %v4774_v41 = vadd.f32 %v4773_v25, %v4772_v24  ;;  %v4978_v24 = vsel %vm2776_vm9, %v4873_v55, 0.0 }
 0x544   : > { %v4558_v0 = vadd.f32 %v4459_v5, %v4102_v13  ;;  %4040 = vst.msk [vmem:[#allocation3 + $0x1b0] sm:$0xff] %vm2776_vm9, %v3976_v51  ;;  %v4469_v21 = vpop.f32.mrf.mxu0  ;;  %v4967_v14 = vadd.f32 %v4966_v29, %v4965_v8  ;;  %v4974_v51 = vsel %vm2776_vm9, %v4871_v23, 0.0  ;;  %v4976_v8 = vsel %vm2776_vm9, %v4872_v62, 0.0 }
 0x545   : > { %v3886_v20 = vpop.f32.mrf.mxu1  ;;  %v4776_v48 = vadd.f32 %v4775_v43, %v4774_v41 }
 0x546   : > { %4622 = vst.msk [vmem:[#allocation3 + $0x1a0] sm:$0xff] %vm2776_vm9, %v4558_v0  ;;  %v3977_v5 = vadd.f32 %v3886_v20, %v3521_v31  ;;  %v4470_v19 = vpop.f32.mrf.mxu0  ;;  %v4969_v49 = vadd.f32 %v4968_v63, %v4967_v14  ;;  %v3523_v0 = vld [vmem:[#allocation3 + $0x1c8] sm:$0xff]  ;;  %v4874_v31 = vmul.f32 %v10344_v28, %v10344_v28 }
 0x547   : > { %v4103_v33 = vld [vmem:[#allocation3 + $0x1a8] sm:$0xff]  ;;  %v3888_v61 = vpop.f32.mrf.mxu1  ;;  %v4778_v30 = vadd.f32 %v4777_v10, %v4776_v48 }
 0x548   : > { %v4559_v60 = vadd.f32 %v4462_v7, %v4103_v33  ;;  %4041 = vst.msk [vmem:[#allocation3 + $0x1b8] sm:$0xff] %vm2776_vm9, %v3977_v5  ;;  %v4472_v32 = vpop.f32.mrf.mxu0  ;;  %v4971_v40 = vadd.f32 %v4970_v50, %v4969_v49  ;;  %v4783_v33 = vsel %vm2776_vm9, %v10344_v28, 0.0  ;;  %v4875_v61 = vmul.f32 %v10352_v6, %v10352_v6  ;;  %v3524_v49 = vld [vmem:[#allocation3 + $0x1d0] sm:$0xff] }
 0x549   : > { %v3891_v18 = vpop.f32.mrf.mxu1  ;;  %v4780_v25 = vadd.f32 %v4779_v26, %v4778_v30  ;;  %v10368_v32 = vld [vmem:[#allocation3 + $0x170] sm:$0xff]  ;;  %v10384_v30 = vld [vmem:[#allocation3 + $0x180] sm:$0xff] }
 0x54a   : > { %4623 = vst.msk [vmem:[#allocation3 + $0x1a8] sm:$0xff] %vm2776_vm9, %v4559_v60  ;;  %v3978_v7 = vadd.f32 %v3891_v18, %v3522_v1  ;;  %v4475_v38 = vpop.f32.mrf.mxu0  ;;  %v4973_v29 = vadd.f32 %v4972_v3, %v4971_v40  ;;  %v4980_v1 = vsel %vm2776_vm9, %v4874_v31, 0.0  ;;  %v4785_v18 = vsel %vm2776_vm9, %v10352_v6, 0.0  ;;  %v10376_v40 = vld [vmem:[#allocation3 + $0x178] sm:$0xff] }
 0x54b   : > { %v4104_v22 = vld [vmem:[#allocation3 + $0x1b0] sm:$0xff]  ;;  %v3893_v44 = vpop.f32.mrf.mxu1  ;;  %v4782_v60 = vadd.f32 %v4781_v15, %v4780_v25  ;;  %v4876_v3 = vmul.f32 %v10360_v45, %v10360_v45  ;;  %v4877_v26 = vmul.f32 %v10368_v32, %v10368_v32  ;;  %v4789_v15 = vsel %vm2776_vm9, %v10368_v32, 0.0 }
 0x54c   : > { %v4560_v13 = vadd.f32 %v4467_v39, %v4104_v22  ;;  %4042 = vst.msk [vmem:[#allocation3 + $0x1c0] sm:$0xff] %vm2776_vm9, %v3978_v7  ;;  %v4477_v47 = vpop.f32.mrf.mxu0  ;;  %v4975_v63 = vadd.f32 %v4974_v51, %v4973_v29  ;;  %v4982_v44 = vsel %vm2776_vm9, %v4875_v61, 0.0  ;;  %v4787_v51 = vsel %vm2776_vm9, %v10360_v45, 0.0 }
 0x54d   : > { %v3894_v21 = vpop.f32.mrf.mxu1  ;;  %v4784_v7 = vadd.f32 %v4783_v33, %v4782_v60  ;;  %v4878_v31 = vmul.f32 %v10376_v40, %v10376_v40  ;;  %v4986_v33 = vsel %vm2776_vm9, %v4877_v26, 0.0  ;;  %v4791_v61 = vsel %vm2776_vm9, %v10376_v40, 0.0 }
 0x54e   : > { %4624 = vst.msk [vmem:[#allocation3 + $0x1b0] sm:$0xff] %vm2776_vm9, %v4560_v13  ;;  %v3979_v39 = vadd.f32 %v3894_v21, %v3523_v0  ;;  %v4478_v20 = vpop.f32.mrf.mxu0  ;;  %v4977_v23 = vadd.f32 %v4976_v8, %v4975_v63  ;;  %v3525_v0 = vld [vmem:[#allocation3 + $0x1d8] sm:$0xff]  ;;  %v4984_v8 = vsel %vm2776_vm9, %v4876_v3, 0.0 }
 0x54f   : > { %v4105_v5 = vld [vmem:[#allocation3 + $0x1b8] sm:$0xff]  ;;  %v3896_v14 = vpop.f32.mrf.mxu1  ;;  %v4786_v29 = vadd.f32 %v4785_v18, %v4784_v7  ;;  %v4988_v3 = vsel %vm2776_vm9, %v4878_v31, 0.0  ;;  %v3527_v31 = vld [vmem:[#allocation3 + $0x1e8] sm:$0xff] }
 0x550   : > { %v4561_v50 = vadd.f32 %v4470_v19, %v4105_v5  ;;  %4043 = vst.msk [vmem:[#allocation3 + $0x1c8] sm:$0xff] %vm2776_vm9, %v3979_v39  ;;  %v4480_v43 = vpop.f32.mrf.mxu0  ;;  %v4979_v62 = vadd.f32 %v4978_v24, %v4977_v23  ;;  %v10392_v5 = vld [vmem:[#allocation3 + $0x188] sm:$0xff] }
 0x551   : > { %v3899_v41 = vpop.f32.mrf.mxu1  ;;  %v4788_v25 = vadd.f32 %v4787_v51, %v4786_v29 }
 0x552   : > { %4625 = vst.msk [vmem:[#allocation3 + $0x1b8] sm:$0xff] %vm2776_vm9, %v4561_v50  ;;  %v3980_v19 = vadd.f32 %v3899_v41, %v3524_v49  ;;  %v4483_v10 = vpop.f32.mrf.mxu0  ;;  %v4981_v47 = vadd.f32 %v4980_v1, %v4979_v62  ;;  %v4879_v50 = vmul.f32 %v10384_v30, %v10384_v30  ;;  %v10400_v41 = vld [vmem:[#allocation3 + $0x190] sm:$0xff]  ;;  %v3526_v1 = vld [vmem:[#allocation3 + $0x1e0] sm:$0xff]  ;;  %v4880_v62 = vmul.f32 %v10392_v5, %v10392_v5 }
 0x553   : > { %v4106_v48 = vld [vmem:[#allocation3 + $0x1c0] sm:$0xff]  ;;  %v3901_v22 = vpop.f32.mrf.mxu1  ;;  %v4790_v49 = vadd.f32 %v4789_v15, %v4788_v25  ;;  %v4797_v25 = vsel %vm2776_vm9, %v10400_v41, 0.0 }
 0x554   : > { %v4562_v55 = vadd.f32 %v4475_v38, %v4106_v48  ;;  %4044 = vst.msk [vmem:[#allocation3 + $0x1d0] sm:$0xff] %vm2776_vm9, %v3980_v19  ;;  %v4485_v13 = vpop.f32.mrf.mxu0  ;;  %v4983_v63 = vadd.f32 %v4982_v44, %v4981_v47  ;;  %v4793_v19 = vsel %vm2776_vm9, %v10384_v30, 0.0  ;;  %v10408_v44 = vld [vmem:[#allocation3 + $0x198] sm:$0xff]  ;;  %v4881_v47 = vmul.f32 %v10400_v41, %v10400_v41  ;;  %v10416_v15 = vld [vmem:[#allocation3 + $0x1a0] sm:$0xff] }
 0x555   : > { %v3902_v21 = vpop.f32.mrf.mxu1  ;;  %v4792_v22 = vadd.f32 %v4791_v61, %v4790_v49  ;;  %v4795_v13 = vsel %vm2776_vm9, %v10392_v5, 0.0  ;;  %v4799_v49 = vsel %vm2776_vm9, %v10408_v44, 0.0 }
 0x556   : > { %4626 = vst.msk [vmem:[#allocation3 + $0x1c0] sm:$0xff] %vm2776_vm9, %v4562_v55  ;;  %v3981_v38 = vadd.f32 %v3902_v21, %v3525_v0  ;;  %v4486_v39 = vpop.f32.mrf.mxu0  ;;  %v4985_v60 = vadd.f32 %v4984_v8, %v4983_v63  ;;  %v4990_v55 = vsel %vm2776_vm9, %v4879_v50, 0.0  ;;  %v4992_v63 = vsel %vm2776_vm9, %v4880_v62, 0.0  ;;  %v10424_v50 = vld [vmem:[#allocation3 + $0x1a8] sm:$0xff] }
 0x557   : > { %v4107_v14 = vld [vmem:[#allocation3 + $0x1c8] sm:$0xff]  ;;  %v3904_v24 = vpop.f32.mrf.mxu1  ;;  %v4794_v8 = vadd.f32 %v4793_v19, %v4792_v22 }
 0x558   : > { %v4563_v43 = vadd.f32 %v4478_v20, %v4107_v14  ;;  %4045 = vst.msk [vmem:[#allocation3 + $0x1d8] sm:$0xff] %vm2776_vm9, %v3981_v38  ;;  %v4488_v23 = vpop.f32.mrf.mxu0  ;;  %v4987_v48 = vadd.f32 %v4986_v33, %v4985_v60  ;;  %v4882_v14 = vmul.f32 %v10408_v44, %v10408_v44  ;;  %v4994_v60 = vsel %vm2776_vm9, %v4881_v47, 0.0 }
 0x559   : > { %v3907_v18 = vpop.f32.mrf.mxu1  ;;  %v4796_v61 = vadd.f32 %v4795_v13, %v4794_v8 }
 0x55a   : > { %4627 = vst.msk [vmem:[#allocation3 + $0x1c8] sm:$0xff] %vm2776_vm9, %v4563_v43  ;;  %v3982_v20 = vadd.f32 %v3907_v18, %v3526_v1  ;;  %v4491_v7 = vpop.f32.mrf.mxu0  ;;  %v4989_v21 = vadd.f32 %v4988_v3, %v4987_v48  ;;  %v4883_v1 = vmul.f32 %v10416_v15, %v10416_v15  ;;  %v3528_v48 = vld [vmem:[#allocation3 + $0x1f0] sm:$0xff] }
 0x55b   : > { %v4108_v51 = vld [vmem:[#allocation3 + $0x1d0] sm:$0xff]  ;;  %v3909_v26 = vpop.f32.mrf.mxu1  ;;  %v4798_v62 = vadd.f32 %v4797_v25, %v4796_v61 }
 0x55c   : > { %v4564_v29 = vadd.f32 %v4483_v10, %v4108_v51  ;;  %4046 = vst.msk [vmem:[#allocation3 + $0x1e0] sm:$0xff] %vm2776_vm9, %v3982_v20  ;;  %v4493_v0 = vpop.f32.mrf.mxu0  ;;  %v4991_v33 = vadd.f32 %v4990_v55, %v4989_v21  ;;  %v10432_v20 = vld [vmem:[#allocation3 + $0x1b0] sm:$0xff]  ;;  %v4996_v51 = vsel %vm2776_vm9, %v4882_v14, 0.0  ;;  %v4801_v26 = vsel %vm2776_vm9, %v10416_v15, 0.0 }
 0x55d   : > { %v3910_v38 = vpop.f32.mrf.mxu1  ;;  %v4884_v55 = vmul.f32 %v10424_v50, %v10424_v50  ;;  %v10440_v0 = vld [vmem:[#allocation3 + $0x1b8] sm:$0xff]  ;;  %v10448_v61 = vld [vmem:[#allocation3 + $0x1c0] sm:$0xff] }
 0x55e   : > { %4628 = vst.msk [vmem:[#allocation3 + $0x1d0] sm:$0xff] %vm2776_vm9, %v4564_v29  ;;  %v3983_v10 = vadd.f32 %v3910_v38, %v3527_v31  ;;  %v4494_v24 = vpop.f32.mrf.mxu0  ;;  %v4993_v19 = vadd.f32 %v4992_v63, %v4991_v33  ;;  %v4800_v29 = vadd.f32 %v4799_v49, %v4798_v62  ;;  %v4998_v31 = vsel %vm2776_vm9, %v4883_v1, 0.0 }
 0x55f   : > { %v4109_v43 = vld [vmem:[#allocation3 + $0x1d8] sm:$0xff]  ;;  %v3912_v23 = vpop.f32.mrf.mxu1  ;;  %v4803_v38 = vsel %vm2776_vm9, %v10424_v50, 0.0  ;;  %v4885_v63 = vmul.f32 %v10432_v20, %v10432_v20  ;;  %v4805_v49 = vsel %vm2776_vm9, %v10432_v20, 0.0  ;;  %v4886_v1 = vmul.f32 %v10440_v0, %v10440_v0 }
 0x560   : > { %v4565_v18 = vadd.f32 %v4486_v39, %v4109_v43  ;;  %4047 = vst.msk [vmem:[#allocation3 + $0x1e8] sm:$0xff] %vm2776_vm9, %v3983_v10  ;;  %v4496_v3 = vpop.f32.mrf.mxu0  ;;  %v4995_v47 = vadd.f32 %v4994_v60, %v4993_v19  ;;  %v4802_v33 = vadd.f32 %v4801_v26, %v4800_v29  ;;  %v3529_v43 = vld [vmem:[#allocation3 + $0x1f8] sm:$0xff]  ;;  %v5000_v60 = vsel %vm2776_vm9, %v4884_v55, 0.0 }
 0x561   : > { %v3915_v22 = vpop.f32.mrf.mxu1  ;;  %v10456_v62 = vld [vmem:[#allocation3 + $0x1c8] sm:$0xff]  ;;  %v4807_v26 = vsel %vm2776_vm9, %v10440_v0, 0.0  ;;  %v4887_v55 = vmul.f32 %v10448_v61, %v10448_v61 }
 0x562   : > { %4629 = vst.msk [vmem:[#allocation3 + $0x1d8] sm:$0xff] %vm2776_vm9, %v4565_v18  ;;  %v3984_v39 = vadd.f32 %v3915_v22, %v3528_v48  ;;  %v4499_v13 = vpop.f32.mrf.mxu0  ;;  %v4997_v10 = vadd.f32 %v4996_v51, %v4995_v47  ;;  %v4804_v19 = vadd.f32 %v4803_v38, %v4802_v33  ;;  %v5002_v51 = vsel %vm2776_vm9, %v4885_v63, 0.0 }
 0x563   : > { %v4110_v21 = vld [vmem:[#allocation3 + $0x1e0] sm:$0xff]  ;;  %v3917_v8 = vpop.f32.mrf.mxu1  ;;  %v4809_v38 = vsel %vm2776_vm9, %v10448_v61, 0.0  ;;  %v4888_v63 = vmul.f32 %v10456_v62, %v10456_v62  ;;  %v5006_v33 = vsel %vm2776_vm9, %v4887_v55, 0.0 }
 0x564   : > { %v4566_v25 = vadd.f32 %v4491_v7, %v4110_v21  ;;  %4048 = vst.msk [vmem:[#allocation3 + $0x1f0] sm:$0xff] %vm2776_vm9, %v3984_v39  ;;  %v4501_v14 = vpop.f32.mrf.mxu0  ;;  %v4999_v3 = vadd.f32 %v4998_v31, %v4997_v10  ;;  %v4806_v21 = vadd.f32 %v4805_v49, %v4804_v19  ;;  %v5004_v31 = vsel %vm2776_vm9, %v4886_v1, 0.0 }
 0x565   : > { %v3918_v23 = vpop.f32.mrf.mxu1  ;;  %v10464_v8 = vld [vmem:[#allocation3 + $0x1d0] sm:$0xff] }
 0x566   : > { %4630 = vst.msk [vmem:[#allocation3 + $0x1e0] sm:$0xff] %vm2776_vm9, %v4566_v25  ;;  %v3985_v7 = vadd.f32 %v3918_v23, %v3529_v43  ;;  %v4502_v18 = vpop.f32.mrf.mxu0  ;;  %v5001_v29 = vadd.f32 %v5000_v60, %v4999_v3  ;;  %v4808_v14 = vadd.f32 %v4807_v26, %v4806_v21  ;;  %v4811_v43 = vsel %vm2776_vm9, %v10456_v62, 0.0 }
 0x567   : > { %v4111_v48 = vld [vmem:[#allocation3 + $0x1e8] sm:$0xff]  ;;  %v3920_v22 = vpop.f32.mrf.mxu1  ;;  %v4889_v23 = vmul.f32 %v10464_v8, %v10464_v8  ;;  %v5008_v3 = vsel %vm2776_vm9, %v4888_v63, 0.0  ;;  %v4813_v19 = vsel %vm2776_vm9, %v10464_v8, 0.0 }
 0x568   : > { %v4567_v39 = vadd.f32 %v4494_v24, %v4111_v48  ;;  %4049 = vst.msk [vmem:[#allocation3 + $0x1f8] sm:$0xff] %vm2776_vm9, %v3985_v7  ;;  %v4504_v47 = vpop.f32.mrf.mxu0  ;;  %v5003_v25 = vadd.f32 %v5002_v51, %v5001_v29  ;;  %v4810_v1 = vadd.f32 %v4809_v38, %v4808_v14 }
 0x569   : > { %v10472_v24 = vld [vmem:[#allocation3 + $0x1d8] sm:$0xff]  ;;  %v5010_v55 = vsel %vm2776_vm9, %v4889_v23, 0.0 }
 0x56a   : > { %4631 = vst.msk [vmem:[#allocation3 + $0x1e8] sm:$0xff] %vm2776_vm9, %v4567_v39  ;;  %v5005_v49 = vadd.f32 %v5004_v31, %v5003_v25  ;;  %v4890_v48 = vmul.f32 %v10472_v24, %v10472_v24  ;;  %v4812_v51 = vadd.f32 %v4811_v43, %v4810_v1 }
 0x56b   : > { %v4112_v10 = vld [vmem:[#allocation3 + $0x1f0] sm:$0xff] }
 0x56c   : > { %v4568_v60 = vadd.f32 %v4499_v13, %v4112_v10  ;;  %v5007_v22 = vadd.f32 %v5006_v33, %v5005_v49  ;;  %v4815_v13 = vsel %vm2776_vm9, %v10472_v24, 0.0  ;;  %v4814_v21 = vadd.f32 %v4813_v19, %v4812_v51 }
 0x56d   : > { %v10479_v7 = vld [vmem:[#allocation3 + $0x1e0] sm:$0xff]  ;;  %v5012_v38 = vsel %vm2776_vm9, %v4890_v48, 0.0 }
 0x56e   : > { %4632 = vst.msk [vmem:[#allocation3 + $0x1f0] sm:$0xff] %vm2776_vm9, %v4568_v60  ;;  %v4891_v39 = vmul.f32 %v10479_v7, %v10479_v7  ;;  %v5009_v29 = vadd.f32 %v5008_v3, %v5007_v22  ;;  %v4817_v63 = vsel %vm2776_vm9, %v10479_v7, 0.0  ;;  %v4816_v10 = vadd.f32 %v4815_v13, %v4814_v21 }
 0x56f   : > { %v4113_v26 = vld [vmem:[#allocation3 + $0x1f8] sm:$0xff] }
 0x570   : > { %v4569_v47 = vadd.f32 %v4502_v18, %v4113_v26  ;;  %v5011_v14 = vadd.f32 %v5010_v55, %v5009_v29  ;;  %v5014_v33 = vsel %vm2776_vm9, %v4891_v39, 0.0  ;;  %v4818_v23 = vadd.f32 %v4817_v63, %v4816_v10 }
 0x571   : > { %v10492_v31 = vld [vmem:[#allocation3 + $0x1e8] sm:$0xff] }
 0x572   : > { %v4892_v25 = vmul.f32 %v10492_v31, %v10492_v31  ;;  %4633 = vst.msk [vmem:[#allocation3 + $0x1f8] sm:$0xff] %vm2776_vm9, %v4569_v47  ;;  %v4819_v18 = vsel %vm2776_vm9, %v10492_v31, 0.0  ;;  %v5013_v43 = vadd.f32 %v5012_v38, %v5011_v14 }
 0x573   : > { %v4820_v48 = vadd.f32 %v4819_v18, %v4818_v23 }
 0x574   : > { %v5016_v49 = vsel %vm2776_vm9, %v4892_v25, 0.0  ;;  %v5015_v19 = vadd.f32 %v5014_v33, %v5013_v43 }
 0x575   : > { %v10503_v60 = vld [vmem:[#allocation3 + $0x1f0] sm:$0xff] }
 0x576   : > { %v4821_v1 = vsel %vm2776_vm9, %v10503_v60, 0.0  ;;  %v4893_v3 = vmul.f32 %v10503_v60, %v10503_v60  ;;  %v5017_v51 = vadd.f32 %v5016_v49, %v5015_v19 }
 0x577   : > { %v4822_v26 = vadd.f32 %v4821_v1, %v4820_v48 }
 0x578   : > { %v5018_v22 = vsel %vm2776_vm9, %v4893_v3, 0.0 }
 0x579   : > { %v10511_v55 = vld [vmem:[#allocation3 + $0x1f8] sm:$0xff]  ;;  %v5019_v47 = vadd.f32 %v5018_v22, %v5017_v51 }
 0x57a   : > { %12232 = vst [vmem:[#allocation4_spill] sm:$0xff] %v10511_v55  ;;  %v4823_v13 = vsel %vm2776_vm9, %v10511_v55, 0.0  ;;  %v4894_v39 = vmul.f32 %v10511_v55, %v10511_v55 }
 0x57b   : > { %v4824_v29 = vadd.f32 %v4823_v13, %v4822_v26 }
 0x57c   : > { %v5020_v21 = vsel %vm2776_vm9, %v4894_v39, 0.0 }
 0x57d   : > { %v4825_v38 = vrot.slane %v4824_v29, 4  ;;  %v5021_v63 = vadd.f32 %v5020_v21, %v5019_v47 }
 0x57f   : > { %v4826_v25 = vadd.f32 %v4825_v38, %v4824_v29  ;;  %v5022_v14 = vrot.slane %v5021_v63, 4  ;;  %v5045_v38 = vlaneseq }
 0x581   : > { %v4827_v10 = vrot.slane %v4826_v25, 2  ;;  %v5023_v33 = vadd.f32 %v5022_v14, %v5021_v63  ;;  %v5046_v63 = vshrl.u32 %v5045_v38, 7  ;;  %v8051_v38 = vld [vmem:[#allocation3 + $0x40] sm:$0xff] }
 0x583   : > { %v4828_v18 = vadd.f32 %v4827_v10, %v4826_v25  ;;  %v5024_v43 = vrot.slane %v5023_v33, 2  ;;  %v5033_v25 = vld [vmem:[%s315_s27] sm:$0x1]  ;;  %v5047_v14 = vsub.s32 0, %v5046_v63 }
 0x585   : > { %v4829_v23 = vrot.slane %v4828_v18, 1  ;;  %v5025_v49 = vadd.f32 %v5024_v43, %v5023_v33 }
 0x587   : > { %v4830_v1 = vadd.f32 %v4829_v23, %v4828_v18  ;;  %v5026_v3 = vrot.slane %v5025_v49, 1  ;;  %v8043_v18 = vld [vmem:[#allocation3] sm:$0xff]  ;;  %v8044_v23 = vld [vmem:[#allocation3 + $0x8] sm:$0xff] }
 0x589   : > { %v5028_v19 = vmul.f32 0.001953125, %v4830_v1  ;;  %v5027_v48 = vadd.f32 %v5026_v3, %v5025_v49 }
 0x58b   : > { %v5029_v55 = vmul.f32 %v5028_v19, %v4830_v1  ;;  %v8045_v1 = vld [vmem:[#allocation3 + $0x10] sm:$0xff]  ;;  %v8046_v19 = vld [vmem:[#allocation3 + $0x18] sm:$0xff] }
 0x58d   : > { %v5030_v22 = vsub.f32 %v5027_v48, %v5029_v55 }
 0x58f   : > { %v5032_v51 = vmul.f32 0.0019569471, %v5030_v22  ;;  %v8047_v22 = vld [vmem:[#allocation3 + $0x20] sm:$0xff] }
 0x591   : > { %8039 = vrsqrt.f32 %v5032_v51  ;;  %vm5036_vm10 = vcmp.eq.f32.partialorder %v5032_v51, inf  ;;  %v5039_v39 = vand.u32 2147483648, %v5032_v51  ;;  %vm5038_vm11 = vcmp.eq.f32.partialorder %v5032_v51, 0.0 }
 0x59e   : > { %v8040_v26 = vpop.eup %8039 }
 0x59f   : > { %v5035_v13 = vmul.f32 %v8040_v26, %v5032_v51  ;;  %v8048_v26 = vld [vmem:[#allocation3 + $0x28] sm:$0xff] }
 0x5a1   : > { %v5037_v47 = vsel %vm5036_vm10, %v5032_v51, %v5035_v13 }
 0x5a2   : > { %v5040_v29 = vsel %vm5038_vm11, %v5039_v39, %v5037_v47  ;;  %v8049_v39 = vld [vmem:[#allocation3 + $0x30] sm:$0xff] }
 0x5a3   : > { %v5041_v21 = vadd.f32 0.0001, %v5040_v29  ;;  %v8050_v29 = vld [vmem:[#allocation3 + $0x38] sm:$0xff] }
 0x5a5   : > { %8041 = vrcp.f32 %v5041_v21 }
 0x5b2   : > { %v8042_v55 = vpop.eup %8041 }
 0x5b3   : > { %v5043_v10 = vmul.f32 %v8042_v55, %v5033_v25  ;;  %v8052_v25 = vld [vmem:[#allocation3 + $0x48] sm:$0xff]  ;;  %v8053_v55 = vld [vmem:[#allocation3 + $0x50] sm:$0xff] }
 0x5b5   : > { %v10523_v33 = vrot.slane %v5043_v10, %v5047_v14 }
 0x5b7   : > { %v10526_v43 = vmul.f32 %v8043_v18, %v10523_v33  ;;  %v10529_v49 = vmul.f32 %v8044_v23, %v10523_v33  ;;  %v10532_v3 = vmul.f32 %v8045_v1, %v10523_v33  ;;  %v10535_v48 = vmul.f32 %v8046_v19, %v10523_v33  ;;  %v8054_v18 = vld [vmem:[#allocation3 + $0x58] sm:$0xff]  ;;  %v8055_v1 = vld [vmem:[#allocation3 + $0x60] sm:$0xff] }
 0x5b8   : > { %v10538_v51 = vmul.f32 %v8047_v22, %v10523_v33  ;;  %v10541_v13 = vmul.f32 %v8048_v26, %v10523_v33  ;;  %v10544_v47 = vmul.f32 %v8049_v39, %v10523_v33  ;;  %v10547_v21 = vmul.f32 %v8050_v29, %v10523_v33  ;;  %v8056_v22 = vld [vmem:[#allocation3 + $0x68] sm:$0xff]  ;;  %v8057_v39 = vld [vmem:[#allocation3 + $0x70] sm:$0xff] }
 0x5b9   : > { %v10550_v63 = vmul.f32 %v8051_v38, %v10523_v33  ;;  %v10553_v14 = vmul.f32 %v8052_v25, %v10523_v33  ;;  %v10556_v10 = vmul.f32 %v8053_v55, %v10523_v33  ;;  %v10559_v23 = vmul.f32 %v8054_v18, %v10523_v33  ;;  %v8058_v38 = vld [vmem:[#allocation3 + $0x78] sm:$0xff]  ;;  %v8059_v55 = vld [vmem:[#allocation3 + $0x80] sm:$0xff] }
 0x5ba   : > { %v10562_v19 = vmul.f32 %v8055_v1, %v10523_v33  ;;  %v10565_v26 = vmul.f32 %v8056_v22, %v10523_v33  ;;  %v10568_v29 = vmul.f32 %v8057_v39, %v10523_v33  ;;  %v10571_v25 = vmul.f32 %v8058_v38, %v10523_v33 }
 0x5bb   : > { %12233 = vst [vmem:[#allocation5_spill] sm:$0xff] %v10559_v23  ;;  %v10574_v18 = vmul.f32 %v8059_v55, %v10523_v33  ;;  %v8060_v23 = vld [vmem:[#allocation3 + $0x88] sm:$0xff] }
 0x5bc   : > { %12234 = vst [vmem:[#allocation6_spill] sm:$0xff] %v10562_v19  ;;  %12235 = vst [vmem:[#allocation7_spill] sm:$0xff] %v10565_v26  ;;  %v10577_v1 = vmul.f32 %v8060_v23, %v10523_v33  ;;  %v8061_v19 = vld [vmem:[#allocation3 + $0x90] sm:$0xff]  ;;  %v8062_v26 = vld [vmem:[#allocation3 + $0x98] sm:$0xff]  ;;  %v10593_v23 = vmul.f32 %v10523_v33, %v10180_v4  ;;  %v10613_v4 = vmul.f32 %v10523_v33, %v10216_v27 }
 0x5bd   : > { %12236 = vst [vmem:[#allocation8_spill] sm:$0xff] %v10568_v29  ;;  %12237 = vst [vmem:[#allocation9_spill] sm:$0xff] %v10571_v25  ;;  %v10580_v22 = vmul.f32 %v8061_v19, %v10523_v33  ;;  %v10583_v39 = vmul.f32 %v8062_v26, %v10523_v33  ;;  %v8063_v29 = vld [vmem:[#allocation3 + $0xa0] sm:$0xff]  ;;  %v8064_v25 = vld [vmem:[#allocation3 + $0xa8] sm:$0xff]  ;;  %v10597_v19 = vmul.f32 %v10523_v33, %v10185_v17 }
 0x5be   : > { %v10586_v38 = vmul.f32 %v8063_v29, %v10523_v33  ;;  %v10589_v55 = vmul.f32 %v8064_v25, %v10523_v33  ;;  %v10601_v26 = vmul.f32 %v10523_v33, %v10192_v35  ;;  %v10605_v29 = vmul.f32 %v10523_v33, %v10200_v42 }
 0x5bf   : > { %v10609_v25 = vmul.f32 %v10523_v33, %v10208_v56  ;;  %v10617_v17 = vmul.f32 %v10523_v33, %v10224_v37  ;;  %v10621_v35 = vmul.f32 %v10523_v33, %v10232_v2  ;;  %v10625_v42 = vmul.f32 %v10523_v33, %v10240_v59 }
 0x5c0   : > { %v10629_v56 = vmul.f32 %v10523_v33, %v10248_v34  ;;  %v10633_v27 = vmul.f32 %v10523_v33, %v10256_v58  ;;  %v10637_v37 = vmul.f32 %v10523_v33, %v10264_v9  ;;  %v10641_v2 = vmul.f32 %v10523_v33, %v10272_v57 }
 0x5c1   : > { %v10645_v59 = vmul.f32 %v10523_v33, %v10280_v16  ;;  %v10649_v34 = vmul.f32 %v10523_v33, %v10288_v53  ;;  %v10653_v58 = vmul.f32 %v10523_v33, %v10296_v11  ;;  %v10657_v9 = vmul.f32 %v10523_v33, %v10304_v36 }
 0x5c2   : > { %v10661_v57 = vmul.f32 %v10523_v33, %v10312_v46  ;;  %v10665_v16 = vmul.f32 %v10523_v33, %v10320_v54  ;;  %v10669_v53 = vmul.f32 %v10523_v33, %v10328_v52  ;;  %v10673_v11 = vmul.f32 %v10523_v33, %v10336_v12 }
 0x5c3   : > { %v10677_v36 = vmul.f32 %v10523_v33, %v10344_v28  ;;  %v10681_v46 = vmul.f32 %v10523_v33, %v10352_v6  ;;  %v10685_v54 = vmul.f32 %v10523_v33, %v10360_v45  ;;  %v10689_v52 = vmul.f32 %v10523_v33, %v10368_v32 }
 0x5c4   : > { %v10693_v12 = vmul.f32 %v10523_v33, %v10376_v40  ;;  %v10697_v28 = vmul.f32 %v10523_v33, %v10384_v30  ;;  %v10701_v6 = vmul.f32 %v10523_v33, %v10392_v5  ;;  %v10705_v45 = vmul.f32 %v10523_v33, %v10400_v41 }
 0x5c5   : > { %v10709_v32 = vmul.f32 %v10523_v33, %v10408_v44  ;;  %v10713_v40 = vmul.f32 %v10523_v33, %v10416_v15  ;;  %v10717_v30 = vmul.f32 %v10523_v33, %v10424_v50  ;;  %v10721_v5 = vmul.f32 %v10523_v33, %v10432_v20 }
 0x5c6   : > { %v10725_v41 = vmul.f32 %v10523_v33, %v10440_v0  ;;  %v10729_v44 = vmul.f32 %v10523_v33, %v10448_v61  ;;  %v10733_v15 = vmul.f32 %v10523_v33, %v10456_v62  ;;  %v10737_v50 = vmul.f32 %v10523_v33, %v10464_v8 }
 0x5c7   : > { %v10741_v20 = vmul.f32 %v10523_v33, %v10472_v24  ;;  %v10745_v0 = vmul.f32 %v10523_v33, %v10479_v7  ;;  %v10749_v61 = vmul.f32 %v10523_v33, %v10492_v31  ;;  %v10753_v62 = vmul.f32 %v10523_v33, %v10503_v60 }
 0x5c8   : > { %12238 = vst [vmem:[#allocation10_spill] sm:$0xff] %v10733_v15  ;;  %12239 = vst [vmem:[#allocation11_spill] sm:$0xff] %v10737_v50  ;;  %v12244_v15 = vld [vmem:[#allocation4_spill] sm:$0xff]  ;;  %v5114_v50 = vmax.f32 %v10526_v43, 0.0  ;;  %v5115_v24 = vmax.f32 %v10529_v49, 0.0  ;;  %v5117_v7 = vmax.f32 %v10535_v48, 0.0 }
 0x5c9   : > { %12240 = vst [vmem:[#allocation12_spill] sm:$0xff] %v10741_v20  ;;  %12241 = vst [vmem:[#allocation13_spill] sm:$0xff] %v10745_v0  ;;  %v10757_v8 = vmul.f32 %v10523_v33, %v12244_v15  ;;  %v5116_v20 = vmax.f32 %v10532_v3, 0.0  ;;  %v5118_v0 = vmax.f32 %v10538_v51, 0.0  ;;  %v5119_v31 = vmax.f32 %v10541_v13, 0.0  ;;  %v12245_v15 = vld [vmem:[#allocation5_spill] sm:$0xff] }
 0x5ca   : > { %12242 = vst [vmem:[#allocation14_spill] sm:$0xff] %v10749_v61  ;;  %12243 = vst [vmem:[#allocation15_spill] sm:$0xff] %v10753_v62  ;;  %v5120_v61 = vmax.f32 %v10544_v47, 0.0  ;;  %v5121_v60 = vmax.f32 %v10547_v21, 0.0  ;;  %v5122_v62 = vmax.f32 %v10550_v63, 0.0  ;;  %v5123_v33 = vmax.f32 %v10553_v14, 0.0 }
 0x5cb   : > { %v5124_v43 = vmax.f32 %v10556_v10, 0.0  ;;  %v5125_v49 = vmax.f32 %v12245_v15, 0.0  ;;  %5179 = vst.msk [vmem:[#allocation2 + $0x19] sm:$0xff] %vm2776_vm9, %v5114_v50  ;;  %5180 = vst.msk [vmem:[#allocation2 + $0x21] sm:$0xff] %vm2776_vm9, %v5115_v24  ;;  %v12246_v3 = vld [vmem:[#allocation6_spill] sm:$0xff]  ;;  %v12247_v51 = vld [vmem:[#allocation7_spill] sm:$0xff] }
 0x5cc   : > { %5181 = vst.msk [vmem:[#allocation2 + $0x31] sm:$0xff] %vm2776_vm9, %v5116_v20  ;;  %5182 = vst.msk [vmem:[#allocation2 + $0x39] sm:$0xff] %vm2776_vm9, %v5117_v7  ;;  %v5126_v48 = vmax.f32 %v12246_v3, 0.0  ;;  %v5127_v13 = vmax.f32 %v12247_v51, 0.0  ;;  %v12248_v47 = vld [vmem:[#allocation8_spill] sm:$0xff]  ;;  %v12249_v63 = vld [vmem:[#allocation9_spill] sm:$0xff] }
 0x5cd   : > { %v5128_v21 = vmax.f32 %v12248_v47, 0.0  ;;  %v5129_v14 = vmax.f32 %v12249_v63, 0.0  ;;  %5183 = vst.msk [vmem:[#allocation2 + $0x49] sm:$0xff] %vm2776_vm9, %v5118_v0  ;;  %5184 = vst.msk [vmem:[#allocation2 + $0x51] sm:$0xff] %vm2776_vm9, %v5119_v31  ;;  %v5130_v10 = vmax.f32 %v10574_v18, 0.0  ;;  %v5131_v50 = vmax.f32 %v10577_v1, 0.0 }
 0x5ce   : > { %5185 = vst.msk [vmem:[#allocation2 + $0x61] sm:$0xff] %vm2776_vm9, %v5120_v61  ;;  %5186 = vst.msk [vmem:[#allocation2 + $0x69] sm:$0xff] %vm2776_vm9, %v5121_v60  ;;  %v5132_v20 = vmax.f32 %v10580_v22, 0.0  ;;  %v5133_v24 = vmax.f32 %v10583_v39, 0.0  ;;  %v5134_v0 = vmax.f32 %v10586_v38, 0.0  ;;  %v5135_v61 = vmax.f32 %v10589_v55, 0.0 }
 0x5cf   : > { %5187 = vst.msk [vmem:[#allocation2 + $0x79] sm:$0xff] %vm2776_vm9, %v5122_v62  ;;  %5188 = vst.msk [vmem:[#allocation2 + $0x81] sm:$0xff] %vm2776_vm9, %v5123_v33  ;;  %v5136_v18 = vmax.f32 %v10593_v23, 0.0  ;;  %v5137_v1 = vmax.f32 %v10597_v19, 0.0  ;;  %v5138_v22 = vmax.f32 %v10601_v26, 0.0  ;;  %v5139_v39 = vmax.f32 %v10605_v29, 0.0 }
 0x5d0   : > { %5189 = vst.msk [vmem:[#allocation2 + $0x91] sm:$0xff] %vm2776_vm9, %v5124_v43  ;;  %5190 = vst.msk [vmem:[#allocation2 + $0x99] sm:$0xff] %vm2776_vm9, %v5125_v49  ;;  %v5140_v38 = vmax.f32 %v10609_v25, 0.0  ;;  %v5141_v55 = vmax.f32 %v10613_v4, 0.0  ;;  %v5142_v23 = vmax.f32 %v10617_v17, 0.0  ;;  %v5143_v19 = vmax.f32 %v10621_v35, 0.0 }
 0x5d1   : > { %5191 = vst.msk [vmem:[#allocation2 + $0xa9] sm:$0xff] %vm2776_vm9, %v5126_v48  ;;  %5192 = vst.msk [vmem:[#allocation2 + $0xb1] sm:$0xff] %vm2776_vm9, %v5127_v13  ;;  %v5144_v26 = vmax.f32 %v10625_v42, 0.0  ;;  %v5145_v29 = vmax.f32 %v10629_v56, 0.0  ;;  %v5146_v25 = vmax.f32 %v10633_v27, 0.0  ;;  %v5147_v4 = vmax.f32 %v10637_v37, 0.0 }
 0x5d2   : > { %5193 = vst.msk [vmem:[#allocation2 + $0xc1] sm:$0xff] %vm2776_vm9, %v5128_v21  ;;  %5194 = vst.msk [vmem:[#allocation2 + $0xc9] sm:$0xff] %vm2776_vm9, %v5129_v14  ;;  %v5148_v17 = vmax.f32 %v10641_v2, 0.0  ;;  %v5149_v35 = vmax.f32 %v10645_v59, 0.0  ;;  %v5150_v42 = vmax.f32 %v10649_v34, 0.0  ;;  %v5151_v56 = vmax.f32 %v10653_v58, 0.0 }
 0x5d3   : > { %5195 = vst.msk [vmem:[#allocation2 + $0xd9] sm:$0xff] %vm2776_vm9, %v5130_v10  ;;  %5196 = vst.msk [vmem:[#allocation2 + $0xe1] sm:$0xff] %vm2776_vm9, %v5131_v50  ;;  %v5152_v27 = vmax.f32 %v10657_v9, 0.0  ;;  %v5153_v37 = vmax.f32 %v10661_v57, 0.0  ;;  %v5154_v2 = vmax.f32 %v10665_v16, 0.0  ;;  %v5155_v59 = vmax.f32 %v10669_v53, 0.0 }
 0x5d4   : > { %5197 = vst.msk [vmem:[#allocation2 + $0xf1] sm:$0xff] %vm2776_vm9, %v5132_v20  ;;  %5198 = vst.msk [vmem:[#allocation2 + $0xf9] sm:$0xff] %vm2776_vm9, %v5133_v24  ;;  %v5156_v34 = vmax.f32 %v10673_v11, 0.0  ;;  %v5157_v58 = vmax.f32 %v10677_v36, 0.0  ;;  %v5158_v9 = vmax.f32 %v10681_v46, 0.0  ;;  %v5159_v57 = vmax.f32 %v10685_v54, 0.0 }
 0x5d5   : > { %5199 = vst.msk [vmem:[#allocation2 + $0x109] sm:$0xff] %vm2776_vm9, %v5134_v0  ;;  %5200 = vst.msk [vmem:[#allocation2 + $0x111] sm:$0xff] %vm2776_vm9, %v5135_v61  ;;  %v5160_v16 = vmax.f32 %v10689_v52, 0.0  ;;  %v5161_v53 = vmax.f32 %v10693_v12, 0.0  ;;  %v5162_v11 = vmax.f32 %v10697_v28, 0.0  ;;  %v5163_v36 = vmax.f32 %v10701_v6, 0.0 }
 0x5d6   : > { %5201 = vst.msk [vmem:[#allocation2 + $0x121] sm:$0xff] %vm2776_vm9, %v5136_v18  ;;  %5202 = vst.msk [vmem:[#allocation2 + $0x129] sm:$0xff] %vm2776_vm9, %v5137_v1  ;;  %v5164_v46 = vmax.f32 %v10705_v45, 0.0  ;;  %v5165_v54 = vmax.f32 %v10709_v32, 0.0  ;;  %v5166_v52 = vmax.f32 %v10713_v40, 0.0  ;;  %v5167_v12 = vmax.f32 %v10717_v30, 0.0 }
 0x5d7   : > { %5203 = vst.msk [vmem:[#allocation2 + $0x139] sm:$0xff] %vm2776_vm9, %v5138_v22  ;;  %5204 = vst.msk [vmem:[#allocation2 + $0x141] sm:$0xff] %vm2776_vm9, %v5139_v39  ;;  %v5168_v28 = vmax.f32 %v10721_v5, 0.0  ;;  %v5169_v6 = vmax.f32 %v10725_v41, 0.0  ;;  %v5170_v45 = vmax.f32 %v10729_v44, 0.0  ;;  %v12250_v32 = vld [vmem:[#allocation10_spill] sm:$0xff] }
 0x5d8   : > { %5205 = vst.msk [vmem:[#allocation2 + $0x151] sm:$0xff] %vm2776_vm9, %v5140_v38  ;;  %5206 = vst.msk [vmem:[#allocation2 + $0x159] sm:$0xff] %vm2776_vm9, %v5141_v55  ;;  %v5171_v62 = vmax.f32 %v12250_v32, 0.0  ;;  %v12251_v7 = vld [vmem:[#allocation11_spill] sm:$0xff]  ;;  %v12252_v31 = vld [vmem:[#allocation12_spill] sm:$0xff]  ;;  %v5177_v15 = vmax.f32 %v10757_v8, 0.0 }
 0x5d9   : > { %5207 = vst.msk [vmem:[#allocation2 + $0x169] sm:$0xff] %vm2776_vm9, %v5142_v23  ;;  %5208 = vst.msk [vmem:[#allocation2 + $0x171] sm:$0xff] %vm2776_vm9, %v5143_v19  ;;  %v5172_v40 = vmax.f32 %v12251_v7, 0.0  ;;  %v5173_v30 = vmax.f32 %v12252_v31, 0.0  ;;  %v12253_v5 = vld [vmem:[#allocation13_spill] sm:$0xff]  ;;  %v12254_v60 = vld [vmem:[#allocation14_spill] sm:$0xff] }
 0x5da   : > { %5209 = vst.msk [vmem:[#allocation2 + $0x181] sm:$0xff] %vm2776_vm9, %v5144_v26  ;;  %5210 = vst.msk [vmem:[#allocation2 + $0x189] sm:$0xff] %vm2776_vm9, %v5145_v29  ;;  %v5174_v41 = vmax.f32 %v12253_v5, 0.0  ;;  %v5175_v33 = vmax.f32 %v12254_v60, 0.0  ;;  %v12255_v43 = vld [vmem:[#allocation15_spill] sm:$0xff] }
 0x5db   : > { %5211 = vst.msk [vmem:[#allocation2 + $0x1c9] sm:$0xff] %vm2776_vm9, %v5146_v25  ;;  %5212 = vst.msk [vmem:[#allocation2 + $0x1d1] sm:$0xff] %vm2776_vm9, %v5147_v4  ;;  %v5176_v44 = vmax.f32 %v12255_v43, 0.0 }
 0x5dc   : > { %5213 = vst.msk [vmem:[#allocation2 + $0x1e1] sm:$0xff] %vm2776_vm9, %v5148_v17  ;;  %5214 = vst.msk [vmem:[#allocation2 + $0x1e9] sm:$0xff] %vm2776_vm9, %v5149_v35 }
 0x5dd   : > { %5215 = vst.msk [vmem:[#allocation2 + $0x1f9] sm:$0xff] %vm2776_vm9, %v5150_v42  ;;  %5216 = vst.msk [vmem:[#allocation2 + $0x201] sm:$0xff] %vm2776_vm9, %v5151_v56 }
 0x5de   : > { %5217 = vst.msk [vmem:[#allocation2 + $0x211] sm:$0xff] %vm2776_vm9, %v5152_v27  ;;  %5218 = vst.msk [vmem:[#allocation2 + $0x219] sm:$0xff] %vm2776_vm9, %v5153_v37 }
 0x5df   : > { %5219 = vst.msk [vmem:[#allocation2 + $0x229] sm:$0xff] %vm2776_vm9, %v5154_v2  ;;  %5220 = vst.msk [vmem:[#allocation2 + $0x231] sm:$0xff] %vm2776_vm9, %v5155_v59 }
 0x5e0   : > { %5221 = vst.msk [vmem:[#allocation2 + $0x241] sm:$0xff] %vm2776_vm9, %v5156_v34  ;;  %5222 = vst.msk [vmem:[#allocation2 + $0x249] sm:$0xff] %vm2776_vm9, %v5157_v58 }
 0x5e1   : > { %5223 = vst.msk [vmem:[#allocation2 + $0x259] sm:$0xff] %vm2776_vm9, %v5158_v9  ;;  %5224 = vst.msk [vmem:[#allocation2 + $0x261] sm:$0xff] %vm2776_vm9, %v5159_v57 }
 0x5e2   : > { %5225 = vst.msk [vmem:[#allocation2 + $0x271] sm:$0xff] %vm2776_vm9, %v5160_v16  ;;  %5226 = vst.msk [vmem:[#allocation2 + $0x279] sm:$0xff] %vm2776_vm9, %v5161_v53 }
 0x5e3   : > { %5227 = vst.msk [vmem:[#allocation2 + $0x289] sm:$0xff] %vm2776_vm9, %v5162_v11  ;;  %5228 = vst.msk [vmem:[#allocation2 + $0x291] sm:$0xff] %vm2776_vm9, %v5163_v36 }
 0x5e4   : > { %5229 = vst.msk [vmem:[#allocation2 + $0x2a1] sm:$0xff] %vm2776_vm9, %v5164_v46  ;;  %5230 = vst.msk [vmem:[#allocation2 + $0x2a9] sm:$0xff] %vm2776_vm9, %v5165_v54 }
 0x5e5   : > { %5231 = vst.msk [vmem:[#allocation2 + $0x2b9] sm:$0xff] %vm2776_vm9, %v5166_v52  ;;  %5232 = vst.msk [vmem:[#allocation2 + $0x2c1] sm:$0xff] %vm2776_vm9, %v5167_v12 }
 0x5e6   : > { %5233 = vst.msk [vmem:[#allocation2 + $0x2d1] sm:$0xff] %vm2776_vm9, %v5168_v28  ;;  %5234 = vst.msk [vmem:[#allocation2 + $0x2d9] sm:$0xff] %vm2776_vm9, %v5169_v6 }
 0x5e7   : > { %5235 = vst.msk [vmem:[#allocation2 + $0x2e9] sm:$0xff] %vm2776_vm9, %v5170_v45  ;;  %5236 = vst.msk [vmem:[#allocation2 + $0x2f1] sm:$0xff] %vm2776_vm9, %v5171_v62 }
 0x5e8   : > { %5237 = vst.msk [vmem:[#allocation2 + $0x301] sm:$0xff] %vm2776_vm9, %v5172_v40  ;;  %5238 = vst.msk [vmem:[#allocation2 + $0x309] sm:$0xff] %vm2776_vm9, %v5173_v30 }
 0x5e9   : > { %5239 = vst.msk [vmem:[#allocation2 + $0x319] sm:$0xff] %vm2776_vm9, %v5174_v41  ;;  %5240 = vst.msk [vmem:[#allocation2 + $0x321] sm:$0xff] %vm2776_vm9, %v5175_v33 }
 0x5ea   : > { %5241 = vst.msk [vmem:[#allocation2 + $0x331] sm:$0xff] %vm2776_vm9, %v5176_v44  ;;  %5242 = vst.msk [vmem:[#allocation2 + $0x339] sm:$0xff] %vm2776_vm9, %v5177_v15 }
 0x5eb PF: > { %p7639_p10 = scmp.ne.s32.totalorder %s8160_s22, 5 }
 0x5ed   : > { %5246 = sbr.rel (%p7639_p10) target bundleno = 2223 (0x8af), region = 56 }
 0x5f2   : > { %v5393_v8 = vld [vmem:[#allocation2 + $0x1c9] sm:$0xff]  ;;  %v5394_v49 = vld [vmem:[#allocation2 + $0x1d1] sm:$0xff]  ;;  %v5357_v3 = vld [vmem:[#allocation2 + $0x19] sm:$0xff]  ;;  %v8117_v21 = vmov 0   ;;  %s8118_s23 = smov 64   ;;  %vm5679_vm12 = vcmask 523264  }
 0x5f3   : > { %v5446_v48 = vpack.c.bf16 %v5394_v49, %v5393_v8  ;;  %v5358_v51 = vld [vmem:[#allocation2 + $0x21] sm:$0xff]  ;;  %v5396_v47 = vld [vmem:[#allocation2 + $0x1e9] sm:$0xff]  ;;  %7959 = vmatprep.subr.bf16.mxu1 %v8117_v21  ;;  %6041 = vmatprep.subr.bf16.mxu0 %v8117_v21  ;;  %v5359_v14 = vld [vmem:[#allocation2 + $0x31] sm:$0xff]  ;;  %vm7281_vm13 = vcmask 7168  }
 0x5f4   : > { %v5395_v13 = vld [vmem:[#allocation2 + $0x1e1] sm:$0xff]  ;;  %v5360_v10 = vld [vmem:[#allocation2 + $0x39] sm:$0xff]  ;;  %v5428_v50 = vpack.c.bf16 %v5358_v51, %v5357_v3  ;;  %v5361_v61 = vld [vmem:[#allocation2 + $0x49] sm:$0xff] }
 0x5f5   : > { %v5447_v63 = vpack.c.bf16 %v5396_v47, %v5395_v13  ;;  %5645 = vrot.lane.b32.xlu0 %v5446_v48, %s8118_s23  ;;  %v5429_v20 = vpack.c.bf16 %v5360_v10, %v5359_v14  ;;  %v5397_v24 = vld [vmem:[#allocation2 + $0x1f9] sm:$0xff]  ;;  %v5398_v0 = vld [vmem:[#allocation2 + $0x201] sm:$0xff]  ;;  %v5362_v18 = vld [vmem:[#allocation2 + $0x51] sm:$0xff] }
 0x5f6   : > { %v5448_v1 = vpack.c.bf16 %v5398_v0, %v5397_v24  ;;  %v5430_v22 = vpack.c.bf16 %v5362_v18, %v5361_v61  ;;  %v5399_v39 = vld [vmem:[#allocation2 + $0x211] sm:$0xff]  ;;  %v5400_v38 = vld [vmem:[#allocation2 + $0x219] sm:$0xff]  ;;  %v5363_v55 = vld [vmem:[#allocation2 + $0x61] sm:$0xff] }
 0x5f7   : > { %5647 = vrot.lane.b32.xlu1 %v5447_v63, %s8118_s23  ;;  %v5364_v23 = vld [vmem:[#allocation2 + $0x69] sm:$0xff]  ;;  %v5449_v19 = vpack.c.bf16 %v5400_v38, %v5399_v39  ;;  %v5402_v29 = vld [vmem:[#allocation2 + $0x231] sm:$0xff]  ;;  %v5365_v17 = vld [vmem:[#allocation2 + $0x79] sm:$0xff] }
 0x5f8   : > { %v5401_v26 = vld [vmem:[#allocation2 + $0x229] sm:$0xff]  ;;  %v5431_v25 = vpack.c.bf16 %v5364_v23, %v5363_v55  ;;  %v8065_v4 = vld [vmem:[%s12172_s5 + $0x98] sm:$0xff]   ;;  %v5366_v35 = vld [vmem:[#allocation2 + $0x81] sm:$0xff] }
 0x5f9   : > { %5609 = vrot.lane.b32.xlu0 %v5428_v50, %s8118_s23  ;;  %7971 = vmatpush1.bf16.msra.mxu1 %v8065_v4  ;;  %v8066_v42 = vld [vmem:[%s12172_s5 + $0x90] sm:$0xff]   ;;  %v5450_v56 = vpack.c.bf16 %v5402_v29, %v5401_v26  ;;  %v5432_v27 = vpack.c.bf16 %v5366_v35, %v5365_v17  ;;  %v5403_v37 = vld [vmem:[#allocation2 + $0x241] sm:$0xff]  ;;  %v5368_v34 = vld [vmem:[#allocation2 + $0x99] sm:$0xff] }
 0x5fa   : > { %6042 = vmatpush1.bf16.msra.mxu0 %v8065_v4  ;;  %7960 = vmatprep.subr.bf16.mxu1 %v8117_v21  ;;  %v5404_v2 = vld [vmem:[#allocation2 + $0x249] sm:$0xff]  ;;  %v5367_v59 = vld [vmem:[#allocation2 + $0x91] sm:$0xff]  ;;  %v5405_v57 = vld [vmem:[#allocation2 + $0x259] sm:$0xff] }
 0x5fb   : > { %5611 = vrot.lane.b32.xlu1 %v5429_v20, %s8118_s23  ;;  %6043 = vmatprep.subr.bf16.mxu0 %v8117_v21  ;;  %v8067_v58 = vld [vmem:[%s12172_s5 + $0x88] sm:$0xff]   ;;  %v5451_v9 = vpack.c.bf16 %v5404_v2, %v5403_v37  ;;  %v5433_v16 = vpack.c.bf16 %v5368_v34, %v5367_v59  ;;  %v5370_v36 = vld [vmem:[#allocation2 + $0xb1] sm:$0xff]  ;;  %v8068_v46 = vld [vmem:[%s12172_s5 + $0x80] sm:$0xff]  }
 0x5fc   : > { %v5406_v53 = vld [vmem:[#allocation2 + $0x261] sm:$0xff]  ;;  %v5369_v11 = vld [vmem:[#allocation2 + $0xa9] sm:$0xff]  ;;  %v5407_v52 = vld [vmem:[#allocation2 + $0x271] sm:$0xff] }
 0x5fd   : > { %5649 = vrot.lane.b32.xlu0 %v5448_v1, %s8118_s23  ;;  %7972 = vmatpush1.bf16.msra.mxu1 %v8066_v42  ;;  %v5452_v54 = vpack.c.bf16 %v5406_v53, %v5405_v57  ;;  %v5434_v12 = vpack.c.bf16 %v5370_v36, %v5369_v11  ;;  %v5408_v28 = vld [vmem:[#allocation2 + $0x279] sm:$0xff]  ;;  %v5371_v6 = vld [vmem:[#allocation2 + $0xc1] sm:$0xff]  ;;  %v5372_v45 = vld [vmem:[#allocation2 + $0xc9] sm:$0xff] }
 0x5fe   : > { %6044 = vmatpush1.bf16.msra.mxu0 %v8066_v42  ;;  %7961 = vmatprep.subr.bf16.mxu1 %v8117_v21  ;;  %v8069_v32 = vld [vmem:[%s12172_s5 + $0x78] sm:$0xff]   ;;  %v5453_v62 = vpack.c.bf16 %v5408_v28, %v5407_v52  ;;  %v5435_v7 = vpack.c.bf16 %v5372_v45, %v5371_v6  ;;  %v5409_v40 = vld [vmem:[#allocation2 + $0x289] sm:$0xff]  ;;  %v5374_v5 = vld [vmem:[#allocation2 + $0xe1] sm:$0xff] }
 0x5ff   : > { %5613 = vrot.lane.b32.xlu1 %v5430_v22, %s8118_s23  ;;  %6045 = vmatprep.subr.bf16.mxu0 %v8117_v21  ;;  %v5410_v31 = vld [vmem:[#allocation2 + $0x291] sm:$0xff]  ;;  %v5373_v30 = vld [vmem:[#allocation2 + $0xd9] sm:$0xff]  ;;  %v5411_v15 = vld [vmem:[#allocation2 + $0x2a1] sm:$0xff] }
 0x600   : > { %v8070_v41 = vld [vmem:[%s12172_s5 + $0x70] sm:$0xff]   ;;  %v5454_v60 = vpack.c.bf16 %v5410_v31, %v5409_v40  ;;  %v5436_v44 = vpack.c.bf16 %v5374_v5, %v5373_v30  ;;  %v5376_v3 = vld [vmem:[#allocation2 + $0xf9] sm:$0xff]  ;;  %v8071_v51 = vld [vmem:[%s12172_s5 + $0x68] sm:$0xff]  }
 0x601   : > { %5651 = vrot.lane.b32.xlu0 %v5449_v19, %s8118_s23  ;;  %7973 = vmatpush1.bf16.msra.mxu1 %v8067_v58  ;;  %v5501_v33 = vld [vmem:[#allocation2 + $0x1ca] sm:$0xff]  ;;  %v5502_v43 = vld [vmem:[#allocation2 + $0x1d2] sm:$0xff]  ;;  %v5465_v13 = vld [vmem:[#allocation2 + $0x1a] sm:$0xff] }
 0x602   : > { %6046 = vmatpush1.bf16.msra.mxu0 %v8067_v58  ;;  %7962 = vmatprep.subr.bf16.mxu1 %v8117_v21  ;;  %v5412_v8 = vld [vmem:[#allocation2 + $0x2a9] sm:$0xff]  ;;  %v5375_v49 = vld [vmem:[#allocation2 + $0xf1] sm:$0xff]  ;;  %v10934_v48 = vpack.c.bf16 %v5502_v43, %v5501_v33  ;;  %v5413_v14 = vld [vmem:[#allocation2 + $0x2b9] sm:$0xff] }
 0x603   : > { %5615 = vrot.lane.b32.xlu1 %v5431_v25, %s8118_s23  ;;  %6047 = vmatprep.subr.bf16.mxu0 %v8117_v21  ;;  %v5466_v47 = vld [vmem:[#allocation2 + $0x22] sm:$0xff]  ;;  %v5455_v63 = vpack.c.bf16 %v5412_v8, %v5411_v15  ;;  %v5437_v50 = vpack.c.bf16 %v5376_v3, %v5375_v49  ;;  %v5378_v0 = vld [vmem:[#allocation2 + $0x111] sm:$0xff]  ;;  %v5416_v39 = vld [vmem:[#allocation2 + $0x2d9] sm:$0xff] }
 0x604   : > { %v10941_v10 = vpack.c.bf16 %v5466_v47, %v5465_v13  ;;  %v5414_v20 = vld [vmem:[#allocation2 + $0x2c1] sm:$0xff]  ;;  %v5377_v24 = vld [vmem:[#allocation2 + $0x109] sm:$0xff]  ;;  %7692 = vmatprep.mubr.msk.bf16.mxu1 %vm5679_vm12, %v10934_v48  ;;  %v5415_v22 = vld [vmem:[#allocation2 + $0x2d1] sm:$0xff] }
 0x605   : > { %5653 = vrot.lane.b32.xlu0 %v5450_v56, %s8118_s23  ;;  %7974 = vmatpush1.bf16.msra.mxu1 %v8068_v46  ;;  %v8072_v61 = vld [vmem:[%s12172_s5 + $0x60] sm:$0xff]   ;;  %v5456_v18 = vpack.c.bf16 %v5414_v20, %v5413_v14  ;;  %v5438_v1 = vpack.c.bf16 %v5378_v0, %v5377_v24  ;;  %v5380_v55 = vld [vmem:[#allocation2 + $0x129] sm:$0xff]  ;;  %v8073_v23 = vld [vmem:[%s12172_s5 + $0xb8] sm:$0xff]   ;;  %v5457_v19 = vpack.c.bf16 %v5416_v39, %v5415_v22 }
 0x606   : > { %6048 = vmatpush1.bf16.msra.mxu0 %v8068_v46  ;;  %7963 = vmatprep.subr.bf16.mxu1 %v8117_v21  ;;  %v5379_v38 = vld [vmem:[#allocation2 + $0x121] sm:$0xff]  ;;  %v5417_v29 = vld [vmem:[#allocation2 + $0x2e9] sm:$0xff]  ;;  %v5418_v25 = vld [vmem:[#allocation2 + $0x2f1] sm:$0xff] }
 0x607   : > { %5617 = vrot.lane.b32.xlu1 %v5432_v27, %s8118_s23  ;;  %6049 = vmatprep.subr.bf16.mxu0 %v8117_v21  ;;  %v5439_v26 = vpack.c.bf16 %v5380_v55, %v5379_v38  ;;  %v5381_v4 = vld [vmem:[#allocation2 + $0x139] sm:$0xff]  ;;  %v5382_v17 = vld [vmem:[#allocation2 + $0x141] sm:$0xff]  ;;  %v8074_v35 = vld [vmem:[%s12172_s5 + $0xb0] sm:$0xff]   ;;  %v5458_v42 = vpack.c.bf16 %v5418_v25, %v5417_v29 }
 0x608   : > { %7676 = vmatprep.mubr.msk.bf16.mxu0 %vm5679_vm12, %v10941_v10  ;;  %v5419_v56 = vld [vmem:[#allocation2 + $0x301] sm:$0xff]  ;;  %v5440_v27 = vpack.c.bf16 %v5382_v17, %v5381_v4  ;;  %v5420_v37 = vld [vmem:[#allocation2 + $0x309] sm:$0xff]  ;;  %v5383_v2 = vld [vmem:[#allocation2 + $0x151] sm:$0xff] }
 0x609   : > { %5655 = vrot.lane.b32.xlu0 %v5451_v9, %s8118_s23  ;;  %7975 = vmatpush1.bf16.msra.mxu1 %v8069_v32  ;;  %v5384_v59 = vld [vmem:[#allocation2 + $0x159] sm:$0xff]  ;;  %v8075_v34 = vld [vmem:[%s12172_s5 + $0xa8] sm:$0xff]   ;;  %v5459_v58 = vpack.c.bf16 %v5420_v37, %v5419_v56  ;;  %v5386_v11 = vld [vmem:[#allocation2 + $0x171] sm:$0xff] }
 0x60a   : > { %6050 = vmatpush1.bf16.msra.mxu0 %v8069_v32  ;;  %7964 = vmatprep.subr.bf16.mxu1 %v8117_v21  ;;  %v5421_v9 = vld [vmem:[#allocation2 + $0x319] sm:$0xff]  ;;  %v5441_v57 = vpack.c.bf16 %v5384_v59, %v5383_v2  ;;  %v5385_v53 = vld [vmem:[#allocation2 + $0x169] sm:$0xff]  ;;  %v5423_v52 = vld [vmem:[#allocation2 + $0x331] sm:$0xff] }
 0x60b   : > { %5619 = vrot.lane.b32.xlu1 %v5433_v16, %s8118_s23  ;;  %6051 = vmatprep.subr.bf16.mxu0 %v8117_v21  ;;  %v5422_v16 = vld [vmem:[#allocation2 + $0x321] sm:$0xff]  ;;  %v5388_v6 = vld [vmem:[#allocation2 + $0x189] sm:$0xff]  ;;  %v5249_v33 = vld [vmem:[#allocation2 + $0x18] sm:$0xff] }
 0x60c   : > { %v8076_v36 = vld [vmem:[%s12172_s5 + $0xa0] sm:$0xff]   ;;  %v5460_v46 = vpack.c.bf16 %v5422_v16, %v5421_v9  ;;  %v5285_v31 = vld [vmem:[#allocation2 + $0x1c8] sm:$0xff]  ;;  %v5286_v30 = vld [vmem:[#allocation2 + $0x1d0] sm:$0xff] }
 0x60d   : > { %5657 = vrot.lane.b32.xlu0 %v5452_v54, %s8118_s23  ;;  %7976 = vmatpush1.bf16.msra.mxu1 %v8070_v41  ;;  %v5442_v54 = vpack.c.bf16 %v5386_v11, %v5385_v53  ;;  %v5387_v28 = vld [vmem:[#allocation2 + $0x181] sm:$0xff]  ;;  %v5251_v0 = vld [vmem:[#allocation2 + $0x30] sm:$0xff]  ;;  %v5289_v4 = vld [vmem:[#allocation2 + $0x1f8] sm:$0xff] }
 0x60e   : > { %6052 = vmatpush1.bf16.msra.mxu0 %v8070_v41  ;;  %7965 = vmatprep.subr.bf16.mxu1 %v8117_v21  ;;  %v5443_v32 = vpack.c.bf16 %v5388_v6, %v5387_v28  ;;  %v5503_v5 = vld [vmem:[#allocation2 + $0x1e2] sm:$0xff]  ;;  %v5504_v41 = vld [vmem:[#allocation2 + $0x1ea] sm:$0xff]  ;;  %v5468_v13 = vld [vmem:[#allocation2 + $0x3a] sm:$0xff] }
 0x60f   : > { %5621 = vrot.lane.b32.xlu1 %v5434_v12, %s8118_s23  ;;  %6053 = vmatprep.subr.bf16.mxu0 %v8117_v21  ;;  %v5424_v12 = vld [vmem:[#allocation2 + $0x339] sm:$0xff]  ;;  %v10994_v15 = vpack.c.bf16 %v5504_v41, %v5503_v5  ;;  %v5288_v3 = vld [vmem:[#allocation2 + $0x1e8] sm:$0xff]  ;;  %v8080_v25 = vld [vmem:[%s12172_s5 + $0xf0] sm:$0xff]  }
 0x610   : > { %v5461_v45 = vpack.c.bf16 %v5424_v12, %v5423_v52  ;;  %v5250_v43 = vld [vmem:[#allocation2 + $0x20] sm:$0xff]  ;;  %v5469_v56 = vld [vmem:[#allocation2 + $0x4a] sm:$0xff] }
 0x611   : > { %5659 = vrot.lane.b32.xlu0 %v5453_v62, %s8118_s23  ;;  %7977 = vmatpush1.bf16.msra.mxu1 %v8071_v51  ;;  %v5355_v62 = vld [vmem:[#allocation2 + $0x1] sm:$0xff]  ;;  %v5391_v59 = vld [vmem:[#allocation2 + $0x1b1] sm:$0xff] }
 0x612   : > { %6054 = vmatpush1.bf16.msra.mxu0 %v8071_v51  ;;  %7966 = vmatprep.subr.bf16.mxu1 %v8117_v21  ;;  %v5287_v8 = vld [vmem:[#allocation2 + $0x1e0] sm:$0xff]  ;;  %v5467_v51 = vld [vmem:[#allocation2 + $0x32] sm:$0xff]  ;;  %v8081_v37 = vld [vmem:[%s12172_s5 + $0x28] sm:$0xff]  }
 0x613   : > { %5623 = vrot.lane.b32.xlu1 %v5435_v7, %s8118_s23  ;;  %6055 = vmatprep.subr.bf16.mxu0 %v8117_v21  ;;  %v5356_v7 = vld [vmem:[#allocation2 + $0x9] sm:$0xff]  ;;  %v5339_v20 = vpack.c.bf16 %v5288_v3, %v5287_v8  ;;  %v11005_v24 = vpack.c.bf16 %v5468_v13, %v5467_v51  ;;  %v5505_v22 = vld [vmem:[#allocation2 + $0x1fa] sm:$0xff]  ;;  %v5510_v3 = vld [vmem:[#allocation2 + $0x232] sm:$0xff] }
 0x614   : > { %v5427_v40 = vpack.c.bf16 %v5356_v7, %v5355_v62  ;;  %v5506_v39 = vld [vmem:[#allocation2 + $0x202] sm:$0xff]  ;;  %v5254_v16 = vld [vmem:[#allocation2 + $0x50] sm:$0xff] }
 0x615   : > { %5661 = vrot.lane.b32.xlu0 %v5454_v60, %s8118_s23  ;;  %7978 = vmatpush1.bf16.msra.mxu1 %v8072_v61  ;;  %v5338_v60 = vpack.c.bf16 %v5286_v30, %v5285_v31  ;;  %v11020_v29 = vpack.c.bf16 %v5506_v39, %v5505_v22  ;;  %v5290_v17 = vld [vmem:[#allocation2 + $0x200] sm:$0xff]  ;;  %v8082_v53 = vld [vmem:[%s12172_s5 + $0xe8] sm:$0xff]   ;;  %v8085_v30 = vld [vmem:[%s12172_s5 + $0x18] sm:$0xff]  }
 0x616   : > { %6056 = vmatpush1.bf16.msra.mxu0 %v8072_v61  ;;  %7967 = vmatprep.subr.bf16.mxu1 %v8117_v21  ;;  %v5252_v61 = vld [vmem:[#allocation2 + $0x38] sm:$0xff]  ;;  %v5340_v2 = vpack.c.bf16 %v5290_v17, %v5289_v4  ;;  %v8083_v52 = vld [vmem:[%s12172_s5 + $0x20] sm:$0xff]   ;;  %v5472_v31 = vld [vmem:[#allocation2 + $0x6a] sm:$0xff] }
 0x617   : > { %5625 = vrot.lane.b32.xlu1 %v5436_v44, %s8118_s23  ;;  %6065 = vmatprep.subr.bf16.mxu0 %v8117_v21  ;;  %v8077_v44 = vld [vmem:[%s12172_s5 + $0x38] sm:$0xff]   ;;  %v5321_v55 = vpack.c.bf16 %v5252_v61, %v5251_v0  ;;  %v8084_v62 = vld [vmem:[%s12172_s5 + $0xe0] sm:$0xff]   ;;  %v8087_v51 = vld [vmem:[%s12172_s5 + $0x10] sm:$0xff]  }
 0x618   : > { %v8088_v0 = vld [vmem:[%s12172_s5 + $0xd0] sm:$0xff]   ;;  %v8089_v22 = vld [vmem:[%s12172_s5 + $0x8] sm:$0xff]  }
 0x619   : > { %5663 = vrot.lane.b32.xlu0 %v5455_v63, %s8118_s23  ;;  %7979 = vmatpush2.bf16.msra.mxu1 %v8073_v23  ;;  %v5320_v63 = vpack.c.bf16 %v5250_v43, %v5249_v33  ;;  %v5255_v33 = vld [vmem:[#allocation2 + $0x60] sm:$0xff]  ;;  %v5256_v43 = vld [vmem:[#allocation2 + $0x68] sm:$0xff] }
 0x61a   : > { %6066 = vmatpush2.bf16.msra.mxu0 %v8073_v23  ;;  %7968 = vmatprep.subr.bf16.mxu1 %v8117_v21  ;;  %v5389_v23 = vld [vmem:[#allocation2 + $0x199] sm:$0xff]  ;;  %v8090_v4 = vld [vmem:[%s12172_s5 + $0xc8] sm:$0xff]  }
 0x61b   : > { %5627 = vrot.lane.b32.xlu1 %v5437_v50, %s8118_s23  ;;  %6067 = vmatprep.subr.bf16.mxu0 %v8117_v21  ;;  %v8078_v50 = vld [vmem:[%s12172_s5 + $0xf8] sm:$0xff]  }
 0x61d   : > { %5665 = vrot.lane.b32.xlu0 %v5456_v18, %s8118_s23  ;;  %7980 = vmatpush2.bf16.msra.mxu1 %v8074_v35 }
 0x61e   : > { %6068 = vmatpush2.bf16.msra.mxu0 %v8074_v35  ;;  %7969 = vmatprep.subr.bf16.mxu1 %v8117_v21 }
 0x61f   : > { %5629 = vrot.lane.b32.xlu1 %v5438_v1, %s8118_s23  ;;  %6069 = vmatprep.subr.bf16.mxu0 %v8117_v21  ;;  %v8079_v1 = vld [vmem:[%s12172_s5 + $0x30] sm:$0xff]  }
 0x621   : > { %5667 = vrot.lane.b32.xlu0 %v5457_v19, %s8118_s23  ;;  %7981 = vmatpush2.bf16.msra.mxu1 %v8075_v34  ;;  %v5390_v19 = vld [vmem:[#allocation2 + $0x1a1] sm:$0xff] }
 0x622   : > { %6070 = vmatpush2.bf16.msra.mxu0 %v8075_v34  ;;  %7970 = vmatprep.subr.bf16.mxu1 %v8117_v21  ;;  %v5444_v35 = vpack.c.bf16 %v5390_v19, %v5389_v23  ;;  %v5392_v34 = vld [vmem:[#allocation2 + $0x1b9] sm:$0xff] }
 0x623   : > { %5631 = vrot.lane.b32.xlu1 %v5439_v26, %s8118_s23  ;;  %6071 = vmatprep.subr.bf16.mxu0 %v8117_v21  ;;  %v5445_v11 = vpack.c.bf16 %v5392_v34, %v5391_v59  ;;  %v5257_v19 = vld [vmem:[#allocation2 + $0x78] sm:$0xff]  ;;  %v5295_v59 = vld [vmem:[#allocation2 + $0x240] sm:$0xff]  ;;  %v5296_v34 = vld [vmem:[#allocation2 + $0x248] sm:$0xff] }
 0x625   : > { %5669 = vrot.lane.b32.xlu0 %v5458_v42, %s8118_s23  ;;  %7982 = vmatpush2.bf16.msra.mxu1 %v8076_v36 }
 0x626   : > { %6072 = vmatpush2.bf16.msra.mxu0 %v8076_v36  ;;  %6408 = vmatprep.subr.bf16.mxu1 %v8117_v21 }
 0x627   : > { %5633 = vrot.lane.b32.xlu1 %v5440_v27, %s8118_s23  ;;  %6800 = vmatprep.subr.bf16.mxu0 %v8117_v21  ;;  %v5470_v27 = vld [vmem:[#allocation2 + $0x52] sm:$0xff] }
 0x628   : > { %v11037_v9 = vpack.c.bf16 %v5470_v27, %v5469_v56  ;;  %v8091_v56 = vld [vmem:[%s12172_s5] sm:$0xff]  }
 0x629   : > { %5671 = vrot.lane.b32.xlu0 %v5459_v58, %s8118_s23 }
 0x62b   : > { %5635 = vrot.lane.b32.xlu1 %v5441_v57, %s8118_s23  ;;  %v5253_v57 = vld [vmem:[#allocation2 + $0x48] sm:$0xff] }
 0x62c   : > { %v5322_v28 = vpack.c.bf16 %v5254_v16, %v5253_v57  ;;  %v8092_v57 = vld [vmem:[%s12172_s5 + $0xc0] sm:$0xff]  }
 0x62d   : > { %5673 = vrot.lane.b32.xlu0 %v5460_v46, %s8118_s23  ;;  %v5507_v46 = vld [vmem:[#allocation2 + $0x212] sm:$0xff] }
 0x62f   : > { %5637 = vrot.lane.b32.xlu1 %v5442_v54, %s8118_s23  ;;  %v5508_v54 = vld [vmem:[#allocation2 + $0x21a] sm:$0xff] }
 0x630   : > { %v11054_v6 = vpack.c.bf16 %v5508_v54, %v5507_v46  ;;  %v5343_v54 = vpack.c.bf16 %v5296_v34, %v5295_v59  ;;  %v5300_v59 = vld [vmem:[#allocation2 + $0x278] sm:$0xff]  ;;  %v5479_v34 = vld [vmem:[#allocation2 + $0xc2] sm:$0xff] }
 0x631   : > { %5675 = vrot.lane.b32.xlu0 %v5461_v45, %s8118_s23  ;;  %v5291_v45 = vld [vmem:[#allocation2 + $0x210] sm:$0xff] }
 0x633   : > { %5639 = vrot.lane.b32.xlu1 %v5443_v32, %s8118_s23  ;;  %v5292_v32 = vld [vmem:[#allocation2 + $0x218] sm:$0xff] }
 0x634   : > { %v5341_v41 = vpack.c.bf16 %v5292_v32, %v5291_v45  ;;  %v5260_v45 = vld [vmem:[#allocation2 + $0x98] sm:$0xff] }
 0x635   : > { %5607 = vrot.lane.b32.xlu0 %v5427_v40, %s8118_s23  ;;  %v5471_v40 = vld [vmem:[#allocation2 + $0x62] sm:$0xff]  ;;  %v8094_v32 = vld [vmem:[%s12172_s5 + $0x118] sm:$0xff]  }
 0x637   : > { %5641 = vrot.lane.b32.xlu1 %v5444_v35, %s8118_s23  ;;  %v5511_v35 = vld [vmem:[#allocation2 + $0x242] sm:$0xff] }
 0x639   : > { %5643 = vrot.lane.b32.xlu0 %v5445_v11, %s8118_s23  ;;  %v5476_v11 = vld [vmem:[#allocation2 + $0x9a] sm:$0xff] }
 0x667   : > { %v5646_v49 = vpop.permute.xlu0 %5645 }
 0x668   : > { %v10997_v47 = vsel %vm5679_vm12, %v5338_v60, %v5646_v49  ;;  %v11070_v60 = vpack.c.bf16 %v5472_v31, %v5471_v40  ;;  %v5509_v49 = vld [vmem:[#allocation2 + $0x22a] sm:$0xff]  ;;  %v5514_v40 = vld [vmem:[#allocation2 + $0x262] sm:$0xff] }
 0x669   : > { %6202 = vmatmul.mubr.bf16.vlgmr.msra.gmra.mxu1 %v10997_v47  ;;  %v5648_v14 = vpop.permute.xlu1 %5647  ;;  %v8095_v31 = vld [vmem:[%s12172_s5 + $0x50] sm:$0xff]  }
 0x66a   : > { %6409 = vmatpush1.bf16.msra.mxu1 %v8077_v44  ;;  %7693 = vmatprep.mubr.msk.bf16.mxu1 %vm5679_vm12, %v10994_v15  ;;  %v11016_v26 = vsel %vm5679_vm12, %v5339_v20, %v5648_v14  ;;  %v8086_v44 = vld [vmem:[%s12172_s5 + $0xd8] sm:$0xff]   ;;  %v11086_v14 = vpack.c.bf16 %v5510_v3, %v5509_v49  ;;  %v5294_v20 = vld [vmem:[#allocation2 + $0x230] sm:$0xff] }
 0x66b   : > { %v5610_v18 = vpop.permute.xlu0 %5609  ;;  %6410 = vmatprep.subr.bf16.mxu1 %v8117_v21  ;;  %v5477_v3 = vld [vmem:[#allocation2 + $0xaa] sm:$0xff] }
 0x66c   : > { %v11012_v38 = vsel %vm5679_vm12, %v5320_v63, %v5610_v18  ;;  %v5323_v63 = vpack.c.bf16 %v5256_v43, %v5255_v33  ;;  %v5473_v18 = vld [vmem:[#allocation2 + $0x7a] sm:$0xff] }
 0x66d   : > { %6074 = vmatmul.mubr.bf16.vlgmr.msra.gmra.mxu0 %v11012_v38  ;;  %v5612_v42 = vpop.permute.xlu1 %5611  ;;  %v5297_v43 = vld [vmem:[#allocation2 + $0x258] sm:$0xff] }
 0x66e   : > { %6801 = vmatpush1.bf16.msra.mxu0 %v8078_v50  ;;  %7677 = vmatprep.mubr.msk.bf16.mxu0 %vm5679_vm12, %v11005_v24  ;;  %v11033_v58 = vsel %vm5679_vm12, %v5321_v55, %v5612_v42  ;;  %v5293_v50 = vld [vmem:[#allocation2 + $0x228] sm:$0xff] }
 0x66f   : > { %6411 = vmatpush1.bf16.msra.mxu1 %v8079_v1  ;;  %6802 = vmatprep.subr.bf16.mxu0 %v8117_v21  ;;  %v5650_v36 = vpop.permute.xlu0 %5649  ;;  %v5474_v1 = vld [vmem:[#allocation2 + $0x82] sm:$0xff]  ;;  %v5342_v55 = vpack.c.bf16 %v5294_v20, %v5293_v50  ;;  %v5512_v42 = vld [vmem:[#allocation2 + $0x24a] sm:$0xff] }
 0x670   : > { %6412 = vmatprep.subr.bf16.mxu1 %v8117_v21  ;;  %v11050_v12 = vsel %vm5679_vm12, %v5340_v2, %v5650_v36  ;;  %v11102_v23 = vpack.c.bf16 %v5474_v1, %v5473_v18  ;;  %v11118_v2 = vpack.c.bf16 %v5512_v42, %v5511_v35  ;;  %v8093_v36 = vld [vmem:[%s12172_s5 + $0x58] sm:$0xff]   ;;  %v5262_v18 = vld [vmem:[#allocation2 + $0xb0] sm:$0xff]  ;;  %v8098_v1 = vld [vmem:[%s12172_s5 + $0x108] sm:$0xff]  }
 0x671   : > { %6210 = vmatmul.mubr.bf16.gmra.mxu1 %v11016_v26  ;;  %v5614_v7 = vpop.permute.xlu1 %5613  ;;  %v5299_v42 = vld [vmem:[#allocation2 + $0x270] sm:$0xff] }
 0x672   : > { %7694 = vmatprep.mubr.msk.bf16.mxu1 %vm5679_vm12, %v11020_v29  ;;  %6803 = vmatpush1.bf16.msra.mxu0 %v8080_v25  ;;  %v11066_v5 = vsel %vm5679_vm12, %v5322_v28, %v5614_v7  ;;  %v5258_v25 = vld [vmem:[#allocation2 + $0x80] sm:$0xff]  ;;  %v5259_v28 = vld [vmem:[#allocation2 + $0x90] sm:$0xff] }
 0x673   : > { %6413 = vmatpush1.bf16.msra.mxu1 %v8081_v37  ;;  %6804 = vmatprep.subr.bf16.mxu0 %v8117_v21  ;;  %v5652_v8 = vpop.permute.xlu0 %5651  ;;  %v5324_v37 = vpack.c.bf16 %v5258_v25, %v5257_v19  ;;  %v5513_v7 = vld [vmem:[#allocation2 + $0x25a] sm:$0xff] }
 0x674   : > { %6414 = vmatprep.subr.bf16.mxu1 %v8117_v21  ;;  %v11082_v13 = vsel %vm5679_vm12, %v5341_v41, %v5652_v8  ;;  %v5325_v41 = vpack.c.bf16 %v5260_v45, %v5259_v28  ;;  %v11150_v33 = vpack.c.bf16 %v5514_v40, %v5513_v7  ;;  %v8096_v8 = vld [vmem:[%s12172_s5 + $0x110] sm:$0xff]   ;;  %v5516_v19 = vld [vmem:[#allocation2 + $0x27a] sm:$0xff]  ;;  %v5264_v28 = vld [vmem:[#allocation2 + $0xc8] sm:$0xff] }
 0x675   : > { %6082 = vmatmul.mubr.bf16.gmra.mxu0 %v11033_v58  ;;  %v5616_v61 = vpop.permute.xlu1 %5615  ;;  %v8099_v25 = vld [vmem:[%s12172_s5 + $0x40] sm:$0xff]   ;;  %v5517_v45 = vld [vmem:[#allocation2 + $0x28a] sm:$0xff] }
 0x676   : > { %7678 = vmatprep.mubr.msk.bf16.mxu0 %vm5679_vm12, %v11037_v9  ;;  %6805 = vmatpush1.bf16.msra.mxu0 %v8082_v53  ;;  %v11098_v39 = vsel %vm5679_vm12, %v5323_v63, %v5616_v61  ;;  %v5475_v53 = vld [vmem:[#allocation2 + $0x92] sm:$0xff]  ;;  %v8097_v63 = vld [vmem:[%s12172_s5 + $0x48] sm:$0xff]  }
 0x677   : > { %6415 = vmatpush1.bf16.msra.mxu1 %v8083_v52  ;;  %6806 = vmatprep.subr.bf16.mxu0 %v8117_v21  ;;  %v5654_v17 = vpop.permute.xlu0 %5653  ;;  %v11134_v52 = vpack.c.bf16 %v5476_v11, %v5475_v53  ;;  %v5261_v61 = vld [vmem:[#allocation2 + $0xa8] sm:$0xff]  ;;  %v5345_v53 = vpack.c.bf16 %v5300_v59, %v5299_v42  ;;  %v5483_v42 = vld [vmem:[#allocation2 + $0xf2] sm:$0xff] }
 0x678   : > { %6416 = vmatprep.subr.bf16.mxu1 %v8117_v21  ;;  %v11114_v27 = vsel %vm5679_vm12, %v5342_v55, %v5654_v17  ;;  %v5515_v55 = vld [vmem:[#allocation2 + $0x272] sm:$0xff]  ;;  %v5326_v17 = vpack.c.bf16 %v5262_v18, %v5261_v61  ;;  %v5301_v40 = vld [vmem:[#allocation2 + $0x288] sm:$0xff] }
 0x679   : > { %6218 = vmatmul.mubr.bf16.gmra.mxu1 %v11050_v12  ;;  %v5618_v16 = vpop.permute.xlu1 %5617  ;;  %v11182_v35 = vpack.c.bf16 %v5516_v19, %v5515_v55  ;;  %v5519_v61 = vld [vmem:[#allocation2 + $0x2a2] sm:$0xff]  ;;  %v5520_v18 = vld [vmem:[#allocation2 + $0x2aa] sm:$0xff] }
 0x67a   : > { %7695 = vmatprep.mubr.msk.bf16.mxu1 %vm5679_vm12, %v11054_v6  ;;  %6807 = vmatpush1.bf16.msra.mxu0 %v8084_v62  ;;  %v11130_v46 = vsel %vm5679_vm12, %v5324_v37, %v5618_v16  ;;  %v11218_v55 = vpack.c.bf16 %v5520_v18, %v5519_v61  ;;  %v5303_v19 = vld [vmem:[#allocation2 + $0x2a0] sm:$0xff]  ;;  %v5270_v18 = vld [vmem:[#allocation2 + $0x110] sm:$0xff] }
 0x67b   : > { %6417 = vmatpush1.bf16.msra.mxu1 %v8085_v30  ;;  %6808 = vmatprep.subr.bf16.mxu0 %v8117_v21  ;;  %v5656_v62 = vpop.permute.xlu0 %5655 }
 0x67c   : > { %6418 = vmatprep.subr.bf16.mxu1 %v8117_v21  ;;  %v11146_v30 = vsel %vm5679_vm12, %v5343_v54, %v5656_v62  ;;  %12256 = vst [vmem:[#allocation16_spill] sm:$0xff] %v11218_v55 }
 0x67d   : > { %6090 = vmatmul.mubr.bf16.gmra.mxu0 %v11066_v5  ;;  %v5620_v49 = vpop.permute.xlu1 %5619 }
 0x67e   : > { %7679 = vmatprep.mubr.msk.bf16.mxu0 %vm5679_vm12, %v11070_v60  ;;  %6809 = vmatpush1.bf16.msra.mxu0 %v8086_v44  ;;  %v5298_v44 = vld [vmem:[#allocation2 + $0x260] sm:$0xff]  ;;  %v11162_v50 = vsel %vm5679_vm12, %v5325_v41, %v5620_v49  ;;  %v5302_v41 = vld [vmem:[#allocation2 + $0x290] sm:$0xff] }
 0x67f   : > { %6419 = vmatpush1.bf16.msra.mxu1 %v8087_v51  ;;  %6810 = vmatprep.subr.bf16.mxu0 %v8117_v21  ;;  %v5478_v51 = vld [vmem:[#allocation2 + $0xb2] sm:$0xff]  ;;  %v5344_v20 = vpack.c.bf16 %v5298_v44, %v5297_v43  ;;  %v5481_v43 = vld [vmem:[#allocation2 + $0xda] sm:$0xff]  ;;  %v5482_v44 = vld [vmem:[#allocation2 + $0xe2] sm:$0xff]  ;;  %v5346_v49 = vpack.c.bf16 %v5302_v41, %v5301_v40 }
 0x680   : > { %6420 = vmatprep.subr.bf16.mxu1 %v8117_v21  ;;  %v5305_v40 = vld [vmem:[#allocation2 + $0x2b8] sm:$0xff]  ;;  %v5306_v41 = vld [vmem:[#allocation2 + $0x2c0] sm:$0xff] }
 0x681   : > { %6226 = vmatmul.mubr.bf16.gmra.mxu1 %v11082_v13  ;;  %v5622_v37 = vpop.permute.xlu1 %5621 }
 0x682   : > { %7696 = vmatprep.mubr.msk.bf16.mxu1 %vm5679_vm12, %v11086_v14  ;;  %6811 = vmatpush1.bf16.msra.mxu0 %v8088_v0  ;;  %v11166_v0 = vpack.c.bf16 %v5478_v51, %v5477_v3  ;;  %v11190_v16 = vsel %vm5679_vm12, %v5326_v17, %v5622_v37  ;;  %v11210_v3 = vpack.c.bf16 %v5482_v44, %v5481_v43  ;;  %v5265_v51 = vld [vmem:[#allocation2 + $0xd8] sm:$0xff]  ;;  %v5304_v17 = vld [vmem:[#allocation2 + $0x2a8] sm:$0xff] }
 0x683   : > { %6421 = vmatpush1.bf16.msra.mxu1 %v8089_v22  ;;  %6812 = vmatprep.subr.bf16.mxu0 %v8117_v21  ;;  %v5658_v22 = vpop.permute.xlu0 %5657  ;;  %v5347_v59 = vpack.c.bf16 %v5304_v17, %v5303_v19  ;;  %v5485_v43 = vld [vmem:[#allocation2 + $0x10a] sm:$0xff]  ;;  %v5486_v44 = vld [vmem:[#allocation2 + $0x112] sm:$0xff]  ;;  %v5524_v19 = vld [vmem:[#allocation2 + $0x2da] sm:$0xff] }
 0x684   : > { %6422 = vmatprep.subr.bf16.mxu1 %v8117_v21 }
 0x685   : > { %6098 = vmatmul.mubr.bf16.gmra.mxu0 %v11098_v39 }
 0x686   : > { %7680 = vmatprep.mubr.msk.bf16.mxu0 %vm5679_vm12, %v11102_v23  ;;  %6813 = vmatpush1.bf16.msra.mxu0 %v8090_v4  ;;  %v11178_v4 = vsel %vm5679_vm12, %v5344_v20, %v5658_v22  ;;  %v5266_v20 = vld [vmem:[#allocation2 + $0xe0] sm:$0xff] }
 0x687   : > { %6423 = vmatpush1.bf16.msra.mxu1 %v8091_v56  ;;  %6814 = vmatprep.subr.bf16.mxu0 %v8117_v21  ;;  %v8100_v56 = vld [vmem:[%s12172_s5 + $0x100] sm:$0xff]   ;;  %v5660_v54 = vpop.permute.xlu0 %5659  ;;  %v5328_v22 = vpack.c.bf16 %v5266_v20, %v5265_v51  ;;  %v5348_v51 = vpack.c.bf16 %v5306_v41, %v5305_v40  ;;  %v5269_v20 = vld [vmem:[#allocation2 + $0x108] sm:$0xff] }
 0x688   : > { %6432 = vmatprep.subr.bf16.mxu1 %v8117_v21  ;;  %v5330_v17 = vpack.c.bf16 %v5270_v18, %v5269_v20  ;;  %v5271_v40 = vld [vmem:[#allocation2 + $0x120] sm:$0xff]  ;;  %v5272_v41 = vld [vmem:[#allocation2 + $0x128] sm:$0xff] }
 0x689   : > { %6234 = vmatmul.mubr.bf16.gmra.mxu1 %v11114_v27  ;;  %v5331_v20 = vpack.c.bf16 %v5272_v41, %v5271_v40  ;;  %v5309_v18 = vld [vmem:[#allocation2 + $0x2e8] sm:$0xff]  ;;  %v5274_v40 = vld [vmem:[#allocation2 + $0x140] sm:$0xff] }
 0x68a   : > { %7697 = vmatprep.mubr.msk.bf16.mxu1 %vm5679_vm12, %v11118_v2  ;;  %6815 = vmatpush1.bf16.msra.mxu0 %v8092_v57  ;;  %v5480_v57 = vld [vmem:[#allocation2 + $0xca] sm:$0xff] }
 0x68b   : > { %6433 = vmatpush2.bf16.msra.mxu1 %v8093_v36  ;;  %6824 = vmatprep.subr.bf16.mxu0 %v8117_v21  ;;  %v11194_v11 = vpack.c.bf16 %v5480_v57, %v5479_v34  ;;  %v5263_v36 = vld [vmem:[#allocation2 + $0xc0] sm:$0xff]  ;;  %v5267_v57 = vld [vmem:[#allocation2 + $0xf0] sm:$0xff] }
 0x68c   : > { %6434 = vmatprep.subr.bf16.mxu1 %v8117_v21  ;;  %v5327_v62 = vpack.c.bf16 %v5264_v28, %v5263_v36  ;;  %v5268_v36 = vld [vmem:[#allocation2 + $0xf8] sm:$0xff]  ;;  %v5522_v28 = vld [vmem:[#allocation2 + $0x2c2] sm:$0xff]  ;;  %v5528_v41 = vld [vmem:[#allocation2 + $0x30a] sm:$0xff] }
 0x68d   : > { %6106 = vmatmul.mubr.bf16.gmra.mxu0 %v11130_v46 }
 0x68e   : > { %7681 = vmatprep.mubr.msk.bf16.mxu0 %vm5679_vm12, %v11134_v52  ;;  %6825 = vmatpush2.bf16.msra.mxu0 %v8094_v32  ;;  %v5518_v32 = vld [vmem:[#allocation2 + $0x292] sm:$0xff] }
 0x68f   : > { %6435 = vmatpush2.bf16.msra.mxu1 %v8095_v31  ;;  %6826 = vmatprep.subr.bf16.mxu0 %v8117_v21  ;;  %v11202_v7 = vpack.c.bf16 %v5518_v32, %v5517_v45  ;;  %v5624_v31 = vpop.permute.xlu1 %5623  ;;  %v5329_v32 = vpack.c.bf16 %v5268_v36, %v5267_v57  ;;  %v5308_v57 = vld [vmem:[#allocation2 + $0x2d8] sm:$0xff]  ;;  %v5488_v36 = vld [vmem:[#allocation2 + $0x12a] sm:$0xff] }
 0x690   : > { %6436 = vmatprep.subr.bf16.mxu1 %v8117_v21 }
 0x691   : > { %6242 = vmatmul.mubr.bf16.gmra.mxu1 %v11146_v30 }
 0x692   : > { %7698 = vmatprep.mubr.msk.bf16.mxu1 %vm5679_vm12, %v11150_v33  ;;  %6827 = vmatpush2.bf16.msra.mxu0 %v8096_v8  ;;  %v11206_v8 = vsel %vm5679_vm12, %v5327_v62, %v5624_v31 }
 0x693   : > { %6437 = vmatpush2.bf16.msra.mxu1 %v8097_v63  ;;  %6828 = vmatprep.subr.bf16.mxu0 %v8117_v21  ;;  %v5662_v63 = vpop.permute.xlu0 %5661 }
 0x694   : > { %6438 = vmatprep.subr.bf16.mxu1 %v8117_v21 }
 0x695   : > { %6114 = vmatmul.mubr.bf16.gmra.mxu0 %v11162_v50 }
 0x696   : > { %7682 = vmatprep.mubr.msk.bf16.mxu0 %vm5679_vm12, %v11166_v0  ;;  %6829 = vmatpush2.bf16.msra.mxu0 %v8098_v1  ;;  %v11214_v1 = vsel %vm5679_vm12, %v5346_v49, %v5662_v63  ;;  %v11242_v63 = vpack.c.bf16 %v5486_v44, %v5485_v43  ;;  %v5525_v43 = vld [vmem:[#allocation2 + $0x2ea] sm:$0xff]  ;;  %v5526_v44 = vld [vmem:[#allocation2 + $0x2f2] sm:$0xff] }
 0x697   : > { %6439 = vmatpush2.bf16.msra.mxu1 %v8099_v25  ;;  %6830 = vmatprep.subr.bf16.mxu0 %v8117_v21  ;;  %v11198_v21 = vsel %vm5679_vm12, %v5345_v53, %v5660_v54  ;;  %v5626_v25 = vpop.permute.xlu1 %5625  ;;  %v5664_v53 = vpop.permute.xlu0 %5663  ;;  %v5521_v54 = vld [vmem:[#allocation2 + $0x2ba] sm:$0xff] }
 0x698   : > { %v11222_v37 = vsel %vm5679_vm12, %v5328_v22, %v5626_v25  ;;  %v11230_v45 = vsel %vm5679_vm12, %v5347_v59, %v5664_v53  ;;  %v11234_v62 = vpack.c.bf16 %v5522_v28, %v5521_v54  ;;  %v5523_v22 = vld [vmem:[#allocation2 + $0x2d2] sm:$0xff]  ;;  %v5487_v53 = vld [vmem:[#allocation2 + $0x122] sm:$0xff] }
 0x699   : > { %6250 = vmatmul.mubr.bf16.gmra.mxu1 %v11178_v4  ;;  %12257 = vst [vmem:[#allocation17_spill] sm:$0xff] %v11230_v45 }
 0x69a   : > { %7699 = vmatprep.mubr.msk.bf16.mxu1 %vm5679_vm12, %v11182_v35  ;;  %6831 = vmatpush2.bf16.msra.mxu0 %v8100_v56  ;;  %v5484_v56 = vld [vmem:[#allocation2 + $0xfa] sm:$0xff]  ;;  %12258 = vst [vmem:[#allocation18_spill] sm:$0xff] %v11234_v62 }
 0x69b   : > { %v11226_v34 = vpack.c.bf16 %v5484_v56, %v5483_v42  ;;  %v5628_v31 = vpop.permute.xlu1 %5627  ;;  %v5666_v61 = vpop.permute.xlu0 %5665  ;;  %v11250_v42 = vpack.c.bf16 %v5524_v19, %v5523_v22  ;;  %v5307_v56 = vld [vmem:[#allocation2 + $0x2d0] sm:$0xff] }
 0x69c   : > { %v11238_v49 = vsel %vm5679_vm12, %v5329_v32, %v5628_v31  ;;  %v11246_v25 = vsel %vm5679_vm12, %v5348_v51, %v5666_v61  ;;  %v5349_v28 = vpack.c.bf16 %v5308_v57, %v5307_v56  ;;  %v11258_v32 = vpack.c.bf16 %v5488_v36, %v5487_v53  ;;  %v5310_v19 = vld [vmem:[#allocation2 + $0x2f0] sm:$0xff]  ;;  %v5490_v56 = vld [vmem:[#allocation2 + $0x142] sm:$0xff]  ;;  %v5273_v36 = vld [vmem:[#allocation2 + $0x138] sm:$0xff] }
 0x69d   : > { %6122 = vmatmul.mubr.bf16.gmra.mxu0 %v11190_v16  ;;  %12259 = vst [vmem:[#allocation19_spill] sm:$0xff] %v11246_v25  ;;  %12260 = vst [vmem:[#allocation20_spill] sm:$0xff] %v11250_v42  ;;  %v11266_v61 = vpack.c.bf16 %v5526_v44, %v5525_v43  ;;  %v5350_v57 = vpack.c.bf16 %v5310_v19, %v5309_v18  ;;  %v5332_v44 = vpack.c.bf16 %v5274_v40, %v5273_v36  ;;  %v5312_v19 = vld [vmem:[#allocation2 + $0x308] sm:$0xff]  ;;  %v5276_v40 = vld [vmem:[#allocation2 + $0x158] sm:$0xff] }
 0x69e   : > { %7683 = vmatprep.mubr.msk.bf16.mxu0 %vm5679_vm12, %v11194_v11 }
 0x69f   : > { %v5630_v59 = vpop.permute.xlu1 %5629  ;;  %v5668_v31 = vpop.permute.xlu0 %5667  ;;  %12262 = vst [vmem:[#allocation22_spill] sm:$0xff] %v11266_v61 }
 0x6a0   : > { %v11254_v54 = vsel %vm5679_vm12, %v5330_v17, %v5630_v59  ;;  %v11262_v51 = vsel %vm5679_vm12, %v5349_v28, %v5668_v31  ;;  %v5489_v17 = vld [vmem:[#allocation2 + $0x13a] sm:$0xff]  ;;  %v5527_v31 = vld [vmem:[#allocation2 + $0x302] sm:$0xff] }
 0x6a1   : > { %6258 = vmatmul.mubr.bf16.gmra.mxu1 %v11198_v21  ;;  %12261 = vst [vmem:[#allocation21_spill] sm:$0xff] %v11262_v51  ;;  %v11274_v53 = vpack.c.bf16 %v5490_v56, %v5489_v17  ;;  %v5491_v17 = vld [vmem:[#allocation2 + $0x152] sm:$0xff]  ;;  %v5492_v56 = vld [vmem:[#allocation2 + $0x15a] sm:$0xff] }
 0x6a2   : > { %7700 = vmatprep.mubr.msk.bf16.mxu1 %vm5679_vm12, %v11202_v7 }
 0x6a3   : > { %v5632_v22 = vpop.permute.xlu1 %5631  ;;  %v5670_v28 = vpop.permute.xlu0 %5669 }
 0x6a4   : > { %v11270_v59 = vsel %vm5679_vm12, %v5331_v20, %v5632_v22  ;;  %v11278_v43 = vsel %vm5679_vm12, %v5350_v57, %v5670_v28  ;;  %v11282_v20 = vpack.c.bf16 %v5528_v41, %v5527_v31  ;;  %v5311_v22 = vld [vmem:[#allocation2 + $0x300] sm:$0xff]  ;;  %v11290_v28 = vpack.c.bf16 %v5492_v56, %v5491_v17  ;;  %v5493_v17 = vld [vmem:[#allocation2 + $0x16a] sm:$0xff]  ;;  %v5494_v56 = vld [vmem:[#allocation2 + $0x172] sm:$0xff] }
 0x6a5   : > { %6130 = vmatmul.mubr.bf16.gmra.mxu0 %v11206_v8  ;;  %12263 = vst [vmem:[#allocation23_spill] sm:$0xff] %v11278_v43  ;;  %v5351_v57 = vpack.c.bf16 %v5312_v19, %v5311_v22  ;;  %v5529_v31 = vld [vmem:[#allocation2 + $0x31a] sm:$0xff]  ;;  %v5530_v41 = vld [vmem:[#allocation2 + $0x322] sm:$0xff] }
 0x6a6   : > { %7684 = vmatprep.mubr.msk.bf16.mxu0 %vm5679_vm12, %v11210_v3  ;;  %12264 = vst [vmem:[#allocation24_spill] sm:$0xff] %v11282_v20  ;;  %v5314_v19 = vld [vmem:[#allocation2 + $0x320] sm:$0xff] }
 0x6a7   : > { %v5634_v18 = vpop.permute.xlu1 %5633  ;;  %v5672_v36 = vpop.permute.xlu0 %5671 }
 0x6a9   : > { %6266 = vmatmul.mubr.bf16.gmra.mxu1 %v11214_v1 }
 0x6aa   : > { %7701 = vmatprep.mubr.msk.bf16.mxu1 %vm5679_vm12, %v11218_v55 }
 0x6ab   : > { %v5636_v22 = vpop.permute.xlu1 %5635 }
 0x6ad   : > { %6138 = vmatmul.mubr.bf16.gmra.mxu0 %v11222_v37 }
 0x6ae   : > { %7685 = vmatprep.mubr.msk.bf16.mxu0 %vm5679_vm12, %v11226_v34 }
 0x6b1   : > { %6274 = vmatmul.mubr.bf16.gmra.mxu1 %v11230_v45  ;;  %v5279_v45 = vld [vmem:[#allocation2 + $0x180] sm:$0xff] }
 0x6b2   : > { %7702 = vmatprep.mubr.msk.bf16.mxu1 %vm5679_vm12, %v11234_v62 }
 0x6b5   : > { %6146 = vmatmul.mubr.bf16.gmra.mxu0 %v11238_v49 }
 0x6b6   : > { %7686 = vmatprep.mubr.msk.bf16.mxu0 %vm5679_vm12, %v11242_v63 }
 0x6b9   : > { %6282 = vmatmul.mubr.bf16.gmra.mxu1 %v11246_v25  ;;  %v5277_v25 = vld [vmem:[#allocation2 + $0x168] sm:$0xff] }
 0x6ba   : > { %7703 = vmatprep.mubr.msk.bf16.mxu1 %vm5679_vm12, %v11250_v42  ;;  %v11294_v42 = vsel %vm5679_vm12, %v5351_v57, %v5672_v36  ;;  %v11306_v36 = vpack.c.bf16 %v5494_v56, %v5493_v17  ;;  %v5495_v17 = vld [vmem:[#allocation2 + $0x182] sm:$0xff]  ;;  %v5496_v56 = vld [vmem:[#allocation2 + $0x18a] sm:$0xff] }
 0x6bb   : > { %12265 = vst [vmem:[#allocation25_spill] sm:$0xff] %v11294_v42 }
 0x6bd   : > { %6154 = vmatmul.mubr.bf16.gmra.mxu0 %v11254_v54 }
 0x6be   : > { %7687 = vmatprep.mubr.msk.bf16.mxu0 %vm5679_vm12, %v11258_v32 }
 0x6c1   : > { %6290 = vmatmul.mubr.bf16.gmra.mxu1 %v11262_v51  ;;  %v5275_v51 = vld [vmem:[#allocation2 + $0x150] sm:$0xff] }
 0x6c2   : > { %7704 = vmatprep.mubr.msk.bf16.mxu1 %vm5679_vm12, %v11266_v61  ;;  %v11286_v61 = vsel %vm5679_vm12, %v5332_v44, %v5634_v18  ;;  %v5333_v44 = vpack.c.bf16 %v5276_v40, %v5275_v51  ;;  %v11298_v18 = vpack.c.bf16 %v5530_v41, %v5529_v31  ;;  %v5674_v51 = vpop.permute.xlu0 %5673  ;;  %v5278_v40 = vld [vmem:[#allocation2 + $0x170] sm:$0xff]  ;;  %v5532_v41 = vld [vmem:[#allocation2 + $0x33a] sm:$0xff] }
 0x6c3   : > { %v5531_v31 = vld [vmem:[#allocation2 + $0x332] sm:$0xff] }
 0x6c4   : > { %12266 = vst [vmem:[#allocation26_spill] sm:$0xff] %v11298_v18 }
 0x6c5   : > { %6162 = vmatmul.mubr.bf16.gmra.mxu0 %v11270_v59 }
 0x6c6   : > { %7688 = vmatprep.mubr.msk.bf16.mxu0 %vm5679_vm12, %v11274_v53 }
 0x6c9   : > { %6298 = vmatmul.mubr.bf16.gmra.mxu1 %v11278_v43  ;;  %v11302_v43 = vsel %vm5679_vm12, %v5333_v44, %v5636_v22  ;;  %v5334_v44 = vpack.c.bf16 %v5278_v40, %v5277_v25  ;;  %v11314_v22 = vpack.c.bf16 %v5532_v41, %v5531_v31  ;;  %v5676_v25 = vpop.permute.xlu0 %5675  ;;  %v5280_v40 = vld [vmem:[#allocation2 + $0x188] sm:$0xff] }
 0x6ca   : > { %7705 = vmatprep.mubr.msk.bf16.mxu1 %vm5679_vm12, %v11282_v20  ;;  %v5313_v20 = vld [vmem:[#allocation2 + $0x318] sm:$0xff]  ;;  %v5463_v31 = vld [vmem:[#allocation2 + $0x2] sm:$0xff]  ;;  %v5464_v41 = vld [vmem:[#allocation2 + $0xa] sm:$0xff] }
 0x6cb   : > { %v5352_v57 = vpack.c.bf16 %v5314_v19, %v5313_v20  ;;  %12268 = vst [vmem:[#allocation28_spill] sm:$0xff] %v11314_v22  ;;  %v5638_v20 = vpop.permute.xlu1 %5637  ;;  %v5316_v19 = vld [vmem:[#allocation2 + $0x338] sm:$0xff] }
 0x6cd   : > { %6170 = vmatmul.mubr.bf16.gmra.mxu0 %v11286_v61  ;;  %v11310_v62 = vsel %vm5679_vm12, %v5352_v57, %v5674_v51  ;;  %v11322_v51 = vpack.c.bf16 %v5496_v56, %v5495_v17  ;;  %v5608_v56 = vpop.permute.xlu0 %5607 }
 0x6ce   : > { %7689 = vmatprep.mubr.msk.bf16.mxu0 %vm5679_vm12, %v11290_v28  ;;  %12267 = vst [vmem:[#allocation27_spill] sm:$0xff] %v11310_v62 }
 0x6d1   : > { %6306 = vmatmul.mubr.bf16.gmra.mxu1 %v11294_v42  ;;  %v11318_v42 = vsel %vm5679_vm12, %v5334_v44, %v5638_v20  ;;  %v5335_v44 = vpack.c.bf16 %v5280_v40, %v5279_v45  ;;  %v5535_v20 = vpack.c.bf16 %v5464_v41, %v5463_v31  ;;  %v5425_v45 = vld [vmem:[#allocation2 + $0x349] sm:$0xff] }
 0x6d2   : > { %7706 = vmatprep.mubr.msk.bf16.mxu1 %vm5679_vm12, %v11298_v18  ;;  %v5315_v18 = vld [vmem:[#allocation2 + $0x330] sm:$0xff] }
 0x6d3   : > { %v5353_v57 = vpack.c.bf16 %v5316_v19, %v5315_v18  ;;  %v5248_v18 = vld [vmem:[#allocation2 + $0x8] sm:$0xff] }
 0x6d5   : > { %6178 = vmatmul.mubr.bf16.gmra.mxu0 %v11302_v43  ;;  %v11326_v55 = vsel %vm5679_vm12, %v5353_v57, %v5676_v25 }
 0x6d6   : > { %7690 = vmatprep.mubr.msk.bf16.mxu0 %vm5679_vm12, %v11306_v36 }
 0x6d9   : > { %6314 = vmatmul.mubr.bf16.gmra.mxu1 %v11310_v62  ;;  %v5640_v62 = vpop.permute.xlu1 %5639 }
 0x6da   : > { %7707 = vmatprep.mubr.msk.bf16.mxu1 %vm5679_vm12, %v11314_v22  ;;  %v5247_v22 = vld [vmem:[#allocation2] sm:$0xff]  ;;  %v11332_v19 = vsel %vm5679_vm12, %v5335_v44, %v5640_v62  ;;  %v5426_v62 = vld [vmem:[#allocation2 + $0x351] sm:$0xff] }
 0x6db   : > { %v5319_v17 = vpack.c.bf16 %v5248_v18, %v5247_v22  ;;  %v5462_v22 = vpack.c.bf16 %v5426_v62, %v5425_v45 }
 0x6dd   : > { %6186 = vmatmul.mubr.bf16.gmra.mxu0 %v11318_v42  ;;  %v5682_v57 = vsel %vm5679_vm12, %v5319_v17, %v5608_v56  ;;  %5677 = vrot.lane.b32.xlu1 %v5462_v22, %s8118_s23 }
 0x6de   : > { %7691 = vmatprep.mubr.msk.bf16.mxu0 %vm5679_vm12, %v11322_v51 }
 0x6e1   : > { %6322 = vmatmul.mubr.bf16.gmra.mxu1 %v11326_v55 }
 0x6e2   : > { %7720 = vmatprep.mubr.msk.bf16.mxu1 %vm5679_vm12, %v5535_v20 }
 0x6e5   : > { %6194 = vmatmul.mubr.bf16.gmra.mxu0 %v11332_v19 }
 0x6e6   : > { %7788 = vmatprep.mubr.msk.bf16.mxu0 %vm5679_vm12, %v11005_v24 }
 0x6e9   : > { %6441 = vmatmul.mubr.bf16.vlgmr.msra.gmra.mxu1 %v5682_v57 }
 0x6ea   : > { %7721 = vmatprep.mubr.msk.bf16.mxu1 %vm5679_vm12, %v10941_v10 }
 0x6ed   : > { %6833 = vmatmul.mubr.bf16.vlgmr.msra.gmra.mxu0 %v11033_v58 }
 0x6ee   : > { %7789 = vmatprep.mubr.msk.bf16.mxu0 %vm5679_vm12, %v11037_v9 }
 0x6f1   : > { %6449 = vmatmul.mubr.bf16.gmra.mxu1 %v11012_v38 }
 0x6f2   : > { %7722 = vmatprep.mubr.msk.bf16.mxu1 %vm5679_vm12, %v11005_v24 }
 0x6f5   : > { %6841 = vmatmul.mubr.bf16.gmra.mxu0 %v11066_v5 }
 0x6f6   : > { %7790 = vmatprep.mubr.msk.bf16.mxu0 %vm5679_vm12, %v11070_v60 }
 0x6f9   : > { %6457 = vmatmul.mubr.bf16.gmra.mxu1 %v11033_v58 }
 0x6fa   : > { %7723 = vmatprep.mubr.msk.bf16.mxu1 %vm5679_vm12, %v11037_v9 }
 0x6fd   : > { %6849 = vmatmul.mubr.bf16.gmra.mxu0 %v11098_v39 }
 0x6fe   : > { %7791 = vmatprep.mubr.msk.bf16.mxu0 %vm5679_vm12, %v11102_v23 }
 0x701   : > { %6465 = vmatmul.mubr.bf16.gmra.mxu1 %v11066_v5 }
 0x702   : > { %7724 = vmatprep.mubr.msk.bf16.mxu1 %vm5679_vm12, %v11070_v60 }
 0x705   : > { %6857 = vmatmul.mubr.bf16.gmra.mxu0 %v11130_v46 }
 0x706   : > { %7792 = vmatprep.mubr.msk.bf16.mxu0 %vm5679_vm12, %v11134_v52 }
 0x709   : > { %6473 = vmatmul.mubr.bf16.gmra.mxu1 %v11098_v39 }
 0x70a   : > { %7725 = vmatprep.mubr.msk.bf16.mxu1 %vm5679_vm12, %v11102_v23 }
 0x70d   : > { %6865 = vmatmul.mubr.bf16.gmra.mxu0 %v11162_v50 }
 0x70e   : > { %7793 = vmatprep.mubr.msk.bf16.mxu0 %vm5679_vm12, %v11166_v0 }
 0x711   : > { %6481 = vmatmul.mubr.bf16.gmra.mxu1 %v11130_v46 }
 0x712   : > { %7726 = vmatprep.mubr.msk.bf16.mxu1 %vm5679_vm12, %v11134_v52 }
 0x715   : > { %6873 = vmatmul.mubr.bf16.gmra.mxu0 %v11190_v16 }
 0x716   : > { %7794 = vmatprep.mubr.msk.bf16.mxu0 %vm5679_vm12, %v11194_v11 }
 0x719   : > { %6489 = vmatmul.mubr.bf16.gmra.mxu1 %v11162_v50 }
 0x71a   : > { %7727 = vmatprep.mubr.msk.bf16.mxu1 %vm5679_vm12, %v11166_v0 }
 0x71d   : > { %6881 = vmatmul.mubr.bf16.gmra.mxu0 %v11206_v8 }
 0x71e   : > { %7795 = vmatprep.mubr.msk.bf16.mxu0 %vm5679_vm12, %v11210_v3 }
 0x721   : > { %6497 = vmatmul.mubr.bf16.gmra.mxu1 %v11190_v16 }
 0x722   : > { %7728 = vmatprep.mubr.msk.bf16.mxu1 %vm5679_vm12, %v11194_v11 }
 0x725   : > { %6889 = vmatmul.mubr.bf16.gmra.mxu0 %v11222_v37 }
 0x726   : > { %7796 = vmatprep.mubr.msk.bf16.mxu0 %vm5679_vm12, %v11226_v34 }
 0x729   : > { %v11387_v10 = vpop.f32.mrf.mxu1  ;;  %6505 = vmatmul.mubr.bf16.gmra.mxu1 %v11206_v8 }
 0x72a   : > { %7729 = vmatprep.mubr.msk.bf16.mxu1 %vm5679_vm12, %v11210_v3 }
 0x72b   : > { %v6205_v24 = vpop.f32.mrf.mxu1 }
 0x72d   : > { %v11392_v38 = vpop.f32.mrf.mxu0  ;;  %v11394_v58 = vpop.f32.mrf.mxu1  ;;  %6897 = vmatmul.mubr.bf16.gmra.mxu0 %v11238_v49 }
 0x72e   : > { %7797 = vmatprep.mubr.msk.bf16.mxu0 %vm5679_vm12, %v11242_v63 }
 0x72f   : > { %v6077_v9 = vpop.f32.mrf.mxu0  ;;  %v6208_v5 = vpop.f32.mrf.mxu1 }
 0x731   : > { %v11399_v60 = vpop.f32.mrf.mxu0  ;;  %v11401_v39 = vpop.f32.mrf.mxu1  ;;  %6513 = vmatmul.mubr.bf16.gmra.mxu1 %v11222_v37 }
 0x732   : > { %7730 = vmatprep.mubr.msk.bf16.mxu1 %vm5679_vm12, %v11226_v34 }
 0x733   : > { %v6080_v23 = vpop.f32.mrf.mxu0  ;;  %v6213_v46 = vpop.f32.mrf.mxu1 }
 0x735   : > { %v11406_v52 = vpop.f32.mrf.mxu0  ;;  %v11408_v50 = vpop.f32.mrf.mxu1  ;;  %6905 = vmatmul.mubr.bf16.gmra.mxu0 %v11254_v54 }
 0x736   : > { %7798 = vmatprep.mubr.msk.bf16.mxu0 %vm5679_vm12, %v11258_v32 }
 0x737   : > { %v6085_v0 = vpop.f32.mrf.mxu0  ;;  %v6216_v16 = vpop.f32.mrf.mxu1 }
 0x739   : > { %v11413_v11 = vpop.f32.mrf.mxu0  ;;  %v11415_v8 = vpop.f32.mrf.mxu1  ;;  %6521 = vmatmul.mubr.bf16.gmra.mxu1 %v11238_v49 }
 0x73a   : > { %7731 = vmatprep.mubr.msk.bf16.mxu1 %vm5679_vm12, %v11242_v63 }
 0x73b   : > { %v6088_v3 = vpop.f32.mrf.mxu0  ;;  %v6221_v37 = vpop.f32.mrf.mxu1 }
 0x73c   : > { %v5497_v37 = vld [vmem:[#allocation2 + $0x19a] sm:$0xff] }
 0x73d   : > { %v11420_v34 = vpop.f32.mrf.mxu0  ;;  %v11422_v25 = vpop.f32.mrf.mxu1  ;;  %6913 = vmatmul.mubr.bf16.gmra.mxu0 %v11270_v59 }
 0x73e   : > { %7799 = vmatprep.mubr.msk.bf16.mxu0 %vm5679_vm12, %v11274_v53 }
 0x73f   : > { %v6093_v40 = vpop.f32.mrf.mxu0  ;;  %v6224_v31 = vpop.f32.mrf.mxu1 }
 0x740   : > { %v5498_v40 = vld [vmem:[#allocation2 + $0x1a2] sm:$0xff] }
 0x741   : > { %v11427_v41 = vpop.f32.mrf.mxu0  ;;  %v11429_v44 = vpop.f32.mrf.mxu1  ;;  %6529 = vmatmul.mubr.bf16.gmra.mxu1 %v11254_v54 }
 0x742   : > { %7732 = vmatprep.mubr.msk.bf16.mxu1 %vm5679_vm12, %v11258_v32 }
 0x743   : > { %v6096_v49 = vpop.f32.mrf.mxu0  ;;  %v6229_v63 = vpop.f32.mrf.mxu1 }
 0x744   : > { %v5552_v49 = vpack.c.bf16 %v5498_v40, %v5497_v37 }
 0x745   : > { %v11434_v20 = vpop.f32.mrf.mxu0  ;;  %v11436_v18 = vpop.f32.mrf.mxu1  ;;  %6921 = vmatmul.mubr.bf16.gmra.mxu0 %v11286_v61 }
 0x746   : > { %7800 = vmatprep.mubr.msk.bf16.mxu0 %vm5679_vm12, %v11290_v28 }
 0x747   : > { %v6101_v17 = vpop.f32.mrf.mxu0  ;;  %v6232_v56 = vpop.f32.mrf.mxu1 }
 0x748   : > { %v5282_v56 = vld [vmem:[#allocation2 + $0x1a0] sm:$0xff] }
 0x749   : > { %v11441_v57 = vpop.f32.mrf.mxu0  ;;  %v11443_v45 = vpop.f32.mrf.mxu1  ;;  %6537 = vmatmul.mubr.bf16.gmra.mxu1 %v11270_v59 }
 0x74a   : > { %7733 = vmatprep.mubr.msk.bf16.mxu1 %vm5679_vm12, %v11274_v53 }
 0x74b   : > { %v6104_v54 = vpop.f32.mrf.mxu0  ;;  %v6237_v32 = vpop.f32.mrf.mxu1 }
 0x74c   : > { %v5499_v54 = vld [vmem:[#allocation2 + $0x1b2] sm:$0xff] }
 0x74d   : > { %v11448_v62 = vpop.f32.mrf.mxu0  ;;  %v11450_v22 = vpop.f32.mrf.mxu1  ;;  %6929 = vmatmul.mubr.bf16.gmra.mxu0 %v11302_v43 }
 0x74e   : > { %7801 = vmatprep.mubr.msk.bf16.mxu0 %vm5679_vm12, %v11306_v36 }
 0x74f   : > { %v6109_v24 = vpop.f32.mrf.mxu0  ;;  %v6240_v9 = vpop.f32.mrf.mxu1 }
 0x750   : > { %v5642_v9 = vpop.permute.xlu1 %5641 }
 0x751   : > { %v11455_v5 = vpop.f32.mrf.mxu0  ;;  %v11457_v23 = vpop.f32.mrf.mxu1  ;;  %6545 = vmatmul.mubr.bf16.gmra.mxu1 %v11286_v61 }
 0x752   : > { %7734 = vmatprep.mubr.msk.bf16.mxu1 %vm5679_vm12, %v11290_v28  ;;  %v5281_v28 = vld [vmem:[#allocation2 + $0x198] sm:$0xff] }
 0x753   : > { %v6112_v59 = vpop.f32.mrf.mxu0  ;;  %v6245_v53 = vpop.f32.mrf.mxu1 }
 0x754   : > { %v5336_v59 = vpack.c.bf16 %v5282_v56, %v5281_v28 }
 0x755   : > { %v11462_v46 = vpop.f32.mrf.mxu0  ;;  %v11464_v0 = vpop.f32.mrf.mxu1  ;;  %6937 = vmatmul.mubr.bf16.gmra.mxu0 %v11318_v42 }
 0x756   : > { %7802 = vmatprep.mubr.msk.bf16.mxu0 %vm5679_vm12, %v11322_v51  ;;  %v5500_v51 = vld [vmem:[#allocation2 + $0x1ba] sm:$0xff] }
 0x757   : > { %v6117_v16 = vpop.f32.mrf.mxu0  ;;  %v6248_v3 = vpop.f32.mrf.mxu1 }
 0x758   : > { %v5283_v16 = vld [vmem:[#allocation2 + $0x1b0] sm:$0xff]  ;;  %v5284_v3 = vld [vmem:[#allocation2 + $0x1b8] sm:$0xff] }
 0x759   : > { %v11469_v31 = vpop.f32.mrf.mxu0  ;;  %v11471_v61 = vpop.f32.mrf.mxu1  ;;  %6553 = vmatmul.mubr.bf16.gmra.mxu1 %v11302_v43  ;;  %v5553_v43 = vpack.c.bf16 %v5500_v51, %v5499_v54 }
 0x75a   : > { %7735 = vmatprep.mubr.msk.bf16.mxu1 %vm5679_vm12, %v11306_v36 }
 0x75b   : > { %v6120_v63 = vpop.f32.mrf.mxu0  ;;  %v6253_v17 = vpop.f32.mrf.mxu1 }
 0x75c   : > { %v5750_v63 = vsel %vm5679_vm12, %v5336_v59, %v5642_v9  ;;  %v5644_v17 = vpop.permute.xlu0 %5643 }
 0x75d   : > { %v11476_v32 = vpop.f32.mrf.mxu0  ;;  %v11478_v24 = vpop.f32.mrf.mxu1  ;;  %6945 = vmatmul.mubr.bf16.gmra.mxu0 %v11332_v19 }
 0x75e   : > { %12269 = vst [vmem:[#allocation29_spill] sm:$0xff] %v11478_v24  ;;  %7803 = vmatprep.mubr.msk.bf16.mxu0 %vm5679_vm12, %v5552_v49  ;;  %v5337_v24 = vpack.c.bf16 %v5284_v3, %v5283_v16 }
 0x75f   : > { %v6125_v53 = vpop.f32.mrf.mxu0  ;;  %v6256_v36 = vpop.f32.mrf.mxu1 }
 0x760   : > { %v5754_v54 = vsel %vm5679_vm12, %v5337_v24, %v5644_v17 }
 0x761   : > { %v11482_v37 = vpop.f32.mrf.mxu0  ;;  %v11484_v40 = vpop.f32.mrf.mxu1  ;;  %6561 = vmatmul.mubr.bf16.gmra.mxu1 %v11318_v42 }
 0x762   : > { %7736 = vmatprep.mubr.msk.bf16.mxu1 %vm5679_vm12, %v5553_v43 }
 0x763   : > { %v6128_v19 = vpop.f32.mrf.mxu0  ;;  %v6261_v28 = vpop.f32.mrf.mxu1 }
 0x765   : > { %v11489_v49 = vpop.f32.mrf.mxu0  ;;  %v11491_v56 = vpop.f32.mrf.mxu1  ;;  %6953 = vmatmul.mubr.bf16.gmra.mxu0 %v5750_v63 }
 0x766   : > { %7804 = vmatprep.mubr.msk.bf16.mxu0 %vm5679_vm12, %v10994_v15 }
 0x767   : > { %v6133_v51 = vpop.f32.mrf.mxu0  ;;  %v6264_v42 = vpop.f32.mrf.mxu1 }
 0x769   : > { %v11496_v53 = vpop.f32.mrf.mxu0  ;;  %v11498_v9 = vpop.f32.mrf.mxu1  ;;  %6569 = vmatmul.mubr.bf16.gmra.mxu1 %v5754_v54 }
 0x76a   : > { %7737 = vmatprep.mubr.msk.bf16.mxu1 %vm5679_vm12, %v10934_v48 }
 0x76b   : > { %v6136_v59 = vpop.f32.mrf.mxu0  ;;  %v6269_v43 = vpop.f32.mrf.mxu1 }
 0x76d   : > { %v11502_v36 = vpop.f32.mrf.mxu0  ;;  %v11504_v16 = vpop.f32.mrf.mxu1  ;;  %6961 = vmatmul.mubr.bf16.gmra.mxu0 %v11016_v26 }
 0x76e   : > { %12270 = vst [vmem:[#allocation30_spill] sm:$0xff] %v11504_v16  ;;  %7805 = vmatprep.mubr.msk.bf16.mxu0 %vm5679_vm12, %v11020_v29 }
 0x76f   : > { %v6141_v24 = vpop.f32.mrf.mxu0  ;;  %v6272_v3 = vpop.f32.mrf.mxu1 }
 0x771   : > { %v11509_v63 = vpop.f32.mrf.mxu0  ;;  %v11511_v17 = vpop.f32.mrf.mxu1  ;;  %6577 = vmatmul.mubr.bf16.gmra.mxu1 %v10997_v47 }
 0x772   : > { %12271 = vst [vmem:[#allocation31_spill] sm:$0xff] %v11511_v17  ;;  %7738 = vmatprep.mubr.msk.bf16.mxu1 %vm5679_vm12, %v10994_v15  ;;  %v12287_v17 = vld [vmem:[#allocation18_spill] sm:$0xff] }
 0x773   : > { %v6144_v48 = vpop.f32.mrf.mxu0  ;;  %v6277_v19 = vpop.f32.mrf.mxu1 }
 0x775   : > { %v11516_v28 = vpop.f32.mrf.mxu0  ;;  %v11518_v54 = vpop.f32.mrf.mxu1  ;;  %6969 = vmatmul.mubr.bf16.gmra.mxu0 %v11050_v12 }
 0x776   : > { %12272 = vst [vmem:[#allocation32_spill] sm:$0xff] %v11518_v54  ;;  %7806 = vmatprep.mubr.msk.bf16.mxu0 %vm5679_vm12, %v11054_v6  ;;  %v7153_v54 = vld [vmem:[%s12167_s0] sm:$0xff] }
 0x777   : > { %v6149_v51 = vpop.f32.mrf.mxu0  ;;  %v6280_v42 = vpop.f32.mrf.mxu1 }
 0x779   : > { %v11523_v59 = vpop.f32.mrf.mxu0  ;;  %v11525_v43 = vpop.f32.mrf.mxu1  ;;  %6585 = vmatmul.mubr.bf16.gmra.mxu1 %v11016_v26 }
 0x77a   : > { %12273 = vst [vmem:[#allocation33_spill] sm:$0xff] %v11525_v43  ;;  %7739 = vmatprep.mubr.msk.bf16.mxu1 %vm5679_vm12, %v11020_v29 }
 0x77b   : > { %v6152_v15 = vpop.f32.mrf.mxu0  ;;  %v6285_v47 = vpop.f32.mrf.mxu1 }
 0x77d   : > { %v11530_v24 = vpop.f32.mrf.mxu0  ;;  %v11532_v3 = vpop.f32.mrf.mxu1  ;;  %6977 = vmatmul.mubr.bf16.gmra.mxu0 %v11082_v13 }
 0x77e   : > { %12274 = vst [vmem:[#allocation34_spill] sm:$0xff] %v11532_v3  ;;  %7807 = vmatprep.mubr.msk.bf16.mxu0 %vm5679_vm12, %v11086_v14 }
 0x77f   : > { %v6157_v48 = vpop.f32.mrf.mxu0  ;;  %v6288_v19 = vpop.f32.mrf.mxu1 }
 0x781   : > { %v11537_v51 = vpop.f32.mrf.mxu0  ;;  %v11539_v42 = vpop.f32.mrf.mxu1  ;;  %6593 = vmatmul.mubr.bf16.gmra.mxu1 %v11050_v12 }
 0x782   : > { %12275 = vst [vmem:[#allocation35_spill] sm:$0xff] %v11539_v42  ;;  %7740 = vmatprep.mubr.msk.bf16.mxu1 %vm5679_vm12, %v11054_v6 }
 0x783   : > { %v6160_v26 = vpop.f32.mrf.mxu0  ;;  %v6293_v29 = vpop.f32.mrf.mxu1 }
 0x785   : > { %v11544_v15 = vpop.f32.mrf.mxu0  ;;  %v11546_v47 = vpop.f32.mrf.mxu1  ;;  %6985 = vmatmul.mubr.bf16.gmra.mxu0 %v11114_v27 }
 0x786   : > { %12276 = vst [vmem:[#allocation36_spill] sm:$0xff] %v11546_v47  ;;  %7808 = vmatprep.mubr.msk.bf16.mxu0 %vm5679_vm12, %v11118_v2 }
 0x787   : > { %v6165_v48 = vpop.f32.mrf.mxu0  ;;  %v6296_v19 = vpop.f32.mrf.mxu1 }
 0x789   : > { %v11551_v3 = vpop.f32.mrf.mxu0  ;;  %v11553_v42 = vpop.f32.mrf.mxu1  ;;  %6601 = vmatmul.mubr.bf16.gmra.mxu1 %v11082_v13 }
 0x78a   : > { %12277 = vst [vmem:[#allocation37_spill] sm:$0xff] %v11553_v42  ;;  %7741 = vmatprep.mubr.msk.bf16.mxu1 %vm5679_vm12, %v11086_v14 }
 0x78b   : > { %v6168_v12 = vpop.f32.mrf.mxu0  ;;  %v6301_v6 = vpop.f32.mrf.mxu1 }
 0x78d   : > { %v11558_v26 = vpop.f32.mrf.mxu0  ;;  %v11560_v29 = vpop.f32.mrf.mxu1  ;;  %6993 = vmatmul.mubr.bf16.gmra.mxu0 %v11146_v30 }
 0x78e   : > { %12278 = vst [vmem:[#allocation38_spill] sm:$0xff] %v11560_v29  ;;  %7809 = vmatprep.mubr.msk.bf16.mxu0 %vm5679_vm12, %v11150_v33 }
 0x78f   : > { %v6173_v48 = vpop.f32.mrf.mxu0  ;;  %v6304_v19 = vpop.f32.mrf.mxu1 }
 0x791   : > { %v11565_v47 = vpop.f32.mrf.mxu0  ;;  %v11567_v42 = vpop.f32.mrf.mxu1  ;;  %6609 = vmatmul.mubr.bf16.gmra.mxu1 %v11114_v27 }
 0x792   : > { %12279 = vst [vmem:[#allocation39_spill] sm:$0xff] %v11567_v42  ;;  %7742 = vmatprep.mubr.msk.bf16.mxu1 %vm5679_vm12, %v11118_v2 }
 0x793   : > { %v6176_v13 = vpop.f32.mrf.mxu0  ;;  %v6309_v14 = vpop.f32.mrf.mxu1 }
 0x795   : > { %v11572_v12 = vpop.f32.mrf.mxu0  ;;  %v11574_v6 = vpop.f32.mrf.mxu1  ;;  %7001 = vmatmul.mubr.bf16.gmra.mxu0 %v11178_v4 }
 0x796   : > { %12280 = vst [vmem:[#allocation40_spill] sm:$0xff] %v11574_v6  ;;  %7810 = vmatprep.mubr.msk.bf16.mxu0 %vm5679_vm12, %v11182_v35 }
 0x797   : > { %v6181_v48 = vpop.f32.mrf.mxu0  ;;  %v6312_v19 = vpop.f32.mrf.mxu1 }
 0x799   : > { %v11579_v29 = vpop.f32.mrf.mxu0  ;;  %v11581_v42 = vpop.f32.mrf.mxu1  ;;  %6617 = vmatmul.mubr.bf16.gmra.mxu1 %v11146_v30 }
 0x79a   : > { %12281 = vst [vmem:[#allocation41_spill] sm:$0xff] %v11581_v42  ;;  %7743 = vmatprep.mubr.msk.bf16.mxu1 %vm5679_vm12, %v11150_v33 }
 0x79b   : > { %v6184_v27 = vpop.f32.mrf.mxu0  ;;  %v6317_v2 = vpop.f32.mrf.mxu1 }
 0x79d   : > { %v11586_v13 = vpop.f32.mrf.mxu0  ;;  %v11588_v14 = vpop.f32.mrf.mxu1  ;;  %7009 = vmatmul.mubr.bf16.gmra.mxu0 %v11198_v21 }
 0x79e   : > { %12282 = vst [vmem:[#allocation42_spill] sm:$0xff] %v11588_v14  ;;  %7811 = vmatprep.mubr.msk.bf16.mxu0 %vm5679_vm12, %v11202_v7  ;;  %v12285_v14 = vld [vmem:[#allocation16_spill] sm:$0xff] }
 0x79f   : > { %v6189_v48 = vpop.f32.mrf.mxu0  ;;  %v6320_v19 = vpop.f32.mrf.mxu1 }
 0x7a1   : > { %v11593_v6 = vpop.f32.mrf.mxu0  ;;  %v11595_v42 = vpop.f32.mrf.mxu1  ;;  %6625 = vmatmul.mubr.bf16.gmra.mxu1 %v11178_v4 }
 0x7a2   : > { %12283 = vst [vmem:[#allocation43_spill] sm:$0xff] %v11595_v42  ;;  %7744 = vmatprep.mubr.msk.bf16.mxu1 %vm5679_vm12, %v11182_v35 }
 0x7a3   : > { %v6192_v30 = vpop.f32.mrf.mxu0  ;;  %v6325_v33 = vpop.f32.mrf.mxu1 }
 0x7a5   : > { %v11600_v27 = vpop.f32.mrf.mxu0  ;;  %v11602_v2 = vpop.f32.mrf.mxu1  ;;  %7017 = vmatmul.mubr.bf16.gmra.mxu0 %v11214_v1 }
 0x7a6   : > { %12284 = vst [vmem:[#allocation44_spill] sm:$0xff] %v11602_v2  ;;  %7812 = vmatprep.mubr.msk.bf16.mxu0 %vm5679_vm12, %v12285_v14 }
 0x7a7   : > { %v6197_v48 = vpop.f32.mrf.mxu0  ;;  %v6328_v19 = vpop.f32.mrf.mxu1 }
 0x7a8   : > { %v12286_v48 = vld [vmem:[#allocation17_spill] sm:$0xff] }
 0x7a9   : > { %v11607_v43 = vpop.f32.mrf.mxu0  ;;  %v6442_v42 = vpop.f32.mrf.mxu1  ;;  %6633 = vmatmul.mubr.bf16.gmra.mxu1 %v11198_v21 }
 0x7aa   : > { %7745 = vmatprep.mubr.msk.bf16.mxu1 %vm5679_vm12, %v11202_v7  ;;  %v6443_v30 = vadd.f32 %v6442_v42, %v11392_v38  ;;  %v7154_v42 = vld [vmem:[%s12167_s0 + $0x8] sm:$0xff] }
 0x7ab   : > { %v6200_v4 = vpop.f32.mrf.mxu0  ;;  %v6444_v35 = vpop.f32.mrf.mxu1 }
 0x7ad   : > { %v6445_v33 = vpop.f32.mrf.mxu1  ;;  %v6834_v2 = vpop.f32.mrf.mxu0  ;;  %7025 = vmatmul.mubr.bf16.gmra.mxu0 %v12286_v48 }
 0x7ae   : > { %v7089_v19 = vadd.f32 %v6834_v2, %v6443_v30  ;;  %7813 = vmatprep.mubr.msk.bf16.mxu0 %vm5679_vm12, %v12287_v17  ;;  %v6446_v7 = vadd.f32 %v6445_v33, %v11399_v60 }
 0x7af   : > { %v6447_v21 = vpop.f32.mrf.mxu1  ;;  %v6836_v16 = vpop.f32.mrf.mxu0 }
 0x7b0   : > { %v7217_v4 = vsub.f32 %v7153_v54, %v7089_v19  ;;  %v7155_v19 = vld [vmem:[%s12167_s0 + $0x10] sm:$0xff]  ;;  %v12288_v21 = vld [vmem:[#allocation19_spill] sm:$0xff] }
 0x7b1   : > { %v6450_v35 = vpop.f32.mrf.mxu1  ;;  %6641 = vmatmul.mubr.bf16.gmra.mxu1 %v11214_v1  ;;  %v6837_v38 = vpop.f32.mrf.mxu0 }
 0x7b2   : > { %7282 = vst.msk [vmem:[%s12173_s6] sm:$0xff] %vm7281_vm13, %v7217_v4  ;;  %v7090_v2 = vadd.f32 %v6837_v38, %v6446_v7  ;;  %7746 = vmatprep.mubr.msk.bf16.mxu1 %vm5679_vm12, %v12285_v14  ;;  %v6451_v54 = vadd.f32 %v6450_v35, %v11406_v52  ;;  %v12289_v14 = vld [vmem:[#allocation20_spill] sm:$0xff] }
 0x7b3   : > { %v6452_v16 = vpop.f32.mrf.mxu1  ;;  %v6839_v60 = vpop.f32.mrf.mxu0 }
 0x7b4   : > { %v7218_v30 = vsub.f32 %v7154_v42, %v7090_v2  ;;  %v7156_v16 = vld [vmem:[%s12167_s0 + $0x18] sm:$0xff] }
 0x7b5   : > { %v6453_v1 = vpop.f32.mrf.mxu1  ;;  %v6842_v33 = vpop.f32.mrf.mxu0  ;;  %7033 = vmatmul.mubr.bf16.gmra.mxu0 %v12288_v21 }
 0x7b6   : > { %7283 = vst.msk [vmem:[%s12173_s6 + $0x8] sm:$0xff] %vm7281_vm13, %v7218_v30  ;;  %v7091_v7 = vadd.f32 %v6842_v33, %v6451_v54  ;;  %7814 = vmatprep.mubr.msk.bf16.mxu0 %vm5679_vm12, %v12289_v14  ;;  %v6454_v35 = vadd.f32 %v6453_v1, %v11413_v11 }
 0x7b7   : > { %v6455_v4 = vpop.f32.mrf.mxu1  ;;  %v6844_v52 = vpop.f32.mrf.mxu0 }
 0x7b8   : > { %v7219_v38 = vsub.f32 %v7155_v19, %v7091_v7  ;;  %v7157_v19 = vld [vmem:[%s12167_s0 + $0x20] sm:$0xff]  ;;  %v12290_v7 = vld [vmem:[#allocation21_spill] sm:$0xff] }
 0x7b9   : > { %v6458_v42 = vpop.f32.mrf.mxu1  ;;  %6649 = vmatmul.mubr.bf16.gmra.mxu1 %v12286_v48  ;;  %v6845_v2 = vpop.f32.mrf.mxu0 }
 0x7ba   : > { %7284 = vst.msk [vmem:[%s12173_s6 + $0x10] sm:$0xff] %vm7281_vm13, %v7219_v38  ;;  %v7092_v60 = vadd.f32 %v6845_v2, %v6454_v35  ;;  %7747 = vmatprep.mubr.msk.bf16.mxu1 %vm5679_vm12, %v12287_v17  ;;  %v6459_v30 = vadd.f32 %v6458_v42, %v11420_v34  ;;  %v12291_v17 = vld [vmem:[#allocation22_spill] sm:$0xff] }
 0x7bb   : > { %v6460_v54 = vpop.f32.mrf.mxu1  ;;  %v6847_v11 = vpop.f32.mrf.mxu0 }
 0x7bc   : > { %v7220_v1 = vsub.f32 %v7156_v16, %v7092_v60  ;;  %v7158_v16 = vld [vmem:[%s12167_s0 + $0x28] sm:$0xff] }
 0x7bd   : > { %v6461_v48 = vpop.f32.mrf.mxu1  ;;  %v6850_v33 = vpop.f32.mrf.mxu0  ;;  %7041 = vmatmul.mubr.bf16.gmra.mxu0 %v12290_v7 }
 0x7be   : > { %7285 = vst.msk [vmem:[%s12173_s6 + $0x18] sm:$0xff] %vm7281_vm13, %v7220_v1  ;;  %v7093_v4 = vadd.f32 %v6850_v33, %v6459_v30  ;;  %7815 = vmatprep.mubr.msk.bf16.mxu0 %vm5679_vm12, %v12291_v17  ;;  %v6462_v35 = vadd.f32 %v6461_v48, %v11427_v41  ;;  %v7159_v48 = vld [vmem:[%s12167_s0 + $0x30] sm:$0xff]  ;;  %v12292_v33 = vld [vmem:[#allocation23_spill] sm:$0xff] }
 0x7bf   : > { %v6463_v52 = vpop.f32.mrf.mxu1  ;;  %v6852_v34 = vpop.f32.mrf.mxu0 }
 0x7c0   : > { %v7221_v38 = vsub.f32 %v7157_v19, %v7093_v4 }
 0x7c1   : > { %v6466_v42 = vpop.f32.mrf.mxu1  ;;  %6657 = vmatmul.mubr.bf16.gmra.mxu1 %v12288_v21  ;;  %v6853_v2 = vpop.f32.mrf.mxu0 }
 0x7c2   : > { %7286 = vst.msk [vmem:[%s12173_s6 + $0x20] sm:$0xff] %vm7281_vm13, %v7221_v38  ;;  %v7094_v60 = vadd.f32 %v6853_v2, %v6462_v35  ;;  %7748 = vmatprep.mubr.msk.bf16.mxu1 %vm5679_vm12, %v12289_v14  ;;  %v6467_v11 = vadd.f32 %v6466_v42, %v11434_v20  ;;  %v12293_v14 = vld [vmem:[#allocation24_spill] sm:$0xff]  ;;  %v7160_v42 = vld [vmem:[%s12167_s0 + $0x38] sm:$0xff] }
 0x7c3   : > { %v6468_v54 = vpop.f32.mrf.mxu1  ;;  %v6855_v41 = vpop.f32.mrf.mxu0 }
 0x7c4   : > { %v7222_v30 = vsub.f32 %v7158_v16, %v7094_v60 }
 0x7c5   : > { %v6469_v21 = vpop.f32.mrf.mxu1  ;;  %v6858_v1 = vpop.f32.mrf.mxu0  ;;  %7049 = vmatmul.mubr.bf16.gmra.mxu0 %v12292_v33 }
 0x7c6   : > { %7287 = vst.msk [vmem:[%s12173_s6 + $0x28] sm:$0xff] %vm7281_vm13, %v7222_v30  ;;  %v7095_v19 = vadd.f32 %v6858_v1, %v6467_v11  ;;  %7816 = vmatprep.mubr.msk.bf16.mxu0 %vm5679_vm12, %v12293_v14  ;;  %v6470_v52 = vadd.f32 %v6469_v21, %v11441_v57  ;;  %v7161_v11 = vld [vmem:[%s12167_s0 + $0x40] sm:$0xff]  ;;  %v12294_v30 = vld [vmem:[#allocation25_spill] sm:$0xff] }
 0x7c7   : > { %v6471_v4 = vpop.f32.mrf.mxu1  ;;  %v6860_v20 = vpop.f32.mrf.mxu0 }
 0x7c8   : > { %v7223_v34 = vsub.f32 %v7159_v48, %v7095_v19 }
 0x7c9   : > { %v6474_v35 = vpop.f32.mrf.mxu1  ;;  %6665 = vmatmul.mubr.bf16.gmra.mxu1 %v12290_v7  ;;  %v6861_v38 = vpop.f32.mrf.mxu0 }
 0x7ca   : > { %7288 = vst.msk [vmem:[%s12173_s6 + $0x30] sm:$0xff] %vm7281_vm13, %v7223_v34  ;;  %v7096_v2 = vadd.f32 %v6861_v38, %v6470_v52  ;;  %7749 = vmatprep.mubr.msk.bf16.mxu1 %vm5679_vm12, %v12291_v17  ;;  %v6475_v60 = vadd.f32 %v6474_v35, %v11448_v62  ;;  %v12295_v17 = vld [vmem:[#allocation26_spill] sm:$0xff]  ;;  %v7162_v52 = vld [vmem:[%s12167_s0 + $0x48] sm:$0xff] }
 0x7cb   : > { %v6476_v16 = vpop.f32.mrf.mxu1  ;;  %v6863_v57 = vpop.f32.mrf.mxu0 }
 0x7cc   : > { %v7224_v54 = vsub.f32 %v7160_v42, %v7096_v2  ;;  %v7163_v16 = vld [vmem:[%s12167_s0 + $0x50] sm:$0xff]  ;;  %v12296_v57 = vld [vmem:[#allocation27_spill] sm:$0xff] }
 0x7cd   : > { %v6477_v7 = vpop.f32.mrf.mxu1  ;;  %v6866_v41 = vpop.f32.mrf.mxu0  ;;  %7057 = vmatmul.mubr.bf16.gmra.mxu0 %v12294_v30 }
 0x7ce   : > { %7289 = vst.msk [vmem:[%s12173_s6 + $0x38] sm:$0xff] %vm7281_vm13, %v7224_v54  ;;  %v7097_v21 = vadd.f32 %v6866_v41, %v6475_v60  ;;  %7817 = vmatprep.mubr.msk.bf16.mxu0 %vm5679_vm12, %v12295_v17  ;;  %v6478_v48 = vadd.f32 %v6477_v7, %v11455_v5  ;;  %v5533_v7 = vld [vmem:[#allocation2 + $0x34a] sm:$0xff]  ;;  %v5534_v41 = vld [vmem:[#allocation2 + $0x352] sm:$0xff] }
 0x7cf   : > { %v6479_v1 = vpop.f32.mrf.mxu1  ;;  %v6868_v62 = vpop.f32.mrf.mxu0 }
 0x7d0   : > { %v7225_v19 = vsub.f32 %v7161_v11, %v7097_v21 }
 0x7d1   : > { %v6482_v4 = vpop.f32.mrf.mxu1  ;;  %6673 = vmatmul.mubr.bf16.gmra.mxu1 %v12292_v33  ;;  %v6869_v20 = vpop.f32.mrf.mxu0 }
 0x7d2   : > { %7290 = vst.msk [vmem:[%s12173_s6 + $0x40] sm:$0xff] %vm7281_vm13, %v7225_v19  ;;  %v7098_v34 = vadd.f32 %v6869_v20, %v6478_v48  ;;  %7750 = vmatprep.mubr.msk.bf16.mxu1 %vm5679_vm12, %v12293_v14  ;;  %v6483_v38 = vadd.f32 %v6482_v4, %v11462_v46  ;;  %v12297_v14 = vld [vmem:[#allocation28_spill] sm:$0xff]  ;;  %v7164_v48 = vld [vmem:[%s12167_s0 + $0x58] sm:$0xff]  ;;  %v5570_v4 = vpack.c.bf16 %v5534_v41, %v5533_v7 }
 0x7d3   : > { %v6484_v35 = vpop.f32.mrf.mxu1  ;;  %v6871_v5 = vpop.f32.mrf.mxu0 }
 0x7d4   : > { %v7226_v42 = vsub.f32 %v7162_v52, %v7098_v34  ;;  %v5317_v52 = vld [vmem:[#allocation2 + $0x348] sm:$0xff]  ;;  %v5318_v34 = vld [vmem:[#allocation2 + $0x350] sm:$0xff] }
 0x7d5   : > { %v6485_v33 = vpop.f32.mrf.mxu1  ;;  %v6874_v2 = vpop.f32.mrf.mxu0  ;;  %7065 = vmatmul.mubr.bf16.gmra.mxu0 %v12296_v57 }
 0x7d6   : > { %7291 = vst.msk [vmem:[%s12173_s6 + $0x48] sm:$0xff] %vm7281_vm13, %v7226_v42  ;;  %v7099_v60 = vadd.f32 %v6874_v2, %v6483_v38  ;;  %7818 = vmatprep.mubr.msk.bf16.mxu0 %vm5679_vm12, %v12297_v14  ;;  %v6486_v11 = vadd.f32 %v6485_v33, %v11469_v31  ;;  %v7165_v42 = vld [vmem:[%s12167_s0 + $0x60] sm:$0xff]  ;;  %v5678_v33 = vpop.permute.xlu1 %5677  ;;  %v5354_v2 = vpack.c.bf16 %v5318_v34, %v5317_v52 }
 0x7d7   : > { %v6487_v54 = vpop.f32.mrf.mxu1  ;;  %v6876_v46 = vpop.f32.mrf.mxu0 }
 0x7d8   : > { %v7227_v21 = vsub.f32 %v7163_v16, %v7099_v60  ;;  %v5822_v41 = vsel %vm5679_vm12, %v5354_v2, %v5678_v33  ;;  %v7169_v2 = vld [vmem:[%s12167_s0 + $0x80] sm:$0xff] }
 0x7d9   : > { %v6490_v1 = vpop.f32.mrf.mxu1  ;;  %6681 = vmatmul.mubr.bf16.gmra.mxu1 %v12294_v30  ;;  %v6877_v62 = vpop.f32.mrf.mxu0 }
 0x7da   : > { %7292 = vst.msk [vmem:[%s12173_s6 + $0x50] sm:$0xff] %vm7281_vm13, %v7227_v21  ;;  %v7100_v19 = vadd.f32 %v6877_v62, %v6486_v11  ;;  %7751 = vmatprep.mubr.msk.bf16.mxu1 %vm5679_vm12, %v12295_v17  ;;  %v6491_v30 = vadd.f32 %v6490_v1, %v11476_v32 }
 0x7db   : > { %v6492_v31 = vpop.f32.mrf.mxu1  ;;  %v6879_v20 = vpop.f32.mrf.mxu0 }
 0x7dc   : > { %v7228_v35 = vsub.f32 %v7164_v48, %v7100_v19  ;;  %v7167_v48 = vld [vmem:[%s12167_s0 + $0x70] sm:$0xff] }
 0x7dd   : > { %v6493_v5 = vpop.f32.mrf.mxu1  ;;  %v6882_v38 = vpop.f32.mrf.mxu0  ;;  %7073 = vmatmul.mubr.bf16.gmra.mxu0 %v11326_v55  ;;  %v7166_v55 = vld [vmem:[%s12167_s0 + $0x68] sm:$0xff] }
 0x7de   : > { %7293 = vst.msk [vmem:[%s12173_s6 + $0x58] sm:$0xff] %vm7281_vm13, %v7228_v35  ;;  %v7101_v17 = vadd.f32 %v6882_v38, %v6491_v30  ;;  %7819 = vmatprep.mubr.msk.bf16.mxu0 %vm5679_vm12, %v5570_v4  ;;  %v6494_v60 = vadd.f32 %v6493_v5, %v11482_v37  ;;  %v7168_v30 = vld [vmem:[%s12167_s0 + $0x78] sm:$0xff] }
 0x7df   : > { %v6495_v32 = vpop.f32.mrf.mxu1  ;;  %v6884_v16 = vpop.f32.mrf.mxu0 }
 0x7e0   : > { %v7229_v14 = vsub.f32 %v7165_v42, %v7101_v17 }
 0x7e1   : > { %v6498_v54 = vpop.f32.mrf.mxu1  ;;  %6689 = vmatmul.mubr.bf16.gmra.mxu1 %v12296_v57  ;;  %v6885_v46 = vpop.f32.mrf.mxu0 }
 0x7e2   : > { %7294 = vst.msk [vmem:[%s12173_s6 + $0x60] sm:$0xff] %vm7281_vm13, %v7229_v14  ;;  %v7102_v7 = vadd.f32 %v6885_v46, %v6494_v60  ;;  %v6499_v37 = vadd.f32 %v6498_v54, %v11489_v49 }
 0x7e3   : > { %v6500_v11 = vpop.f32.mrf.mxu1  ;;  %v6887_v21 = vpop.f32.mrf.mxu0 }
 0x7e4   : > { %v7230_v1 = vsub.f32 %v7166_v55, %v7102_v7  ;;  %v7170_v55 = vld [vmem:[%s12167_s0 + $0x88] sm:$0xff] }
 0x7e5   : > { %v6501_v62 = vpop.f32.mrf.mxu1  ;;  %v6890_v57 = vpop.f32.mrf.mxu0  ;;  %7081 = vmatmul.mubr.bf16.gmra.mxu0 %v5822_v41 }
 0x7e6   : > { %7295 = vst.msk [vmem:[%s12173_s6 + $0x68] sm:$0xff] %vm7281_vm13, %v7230_v1  ;;  %v7103_v19 = vadd.f32 %v6890_v57, %v6499_v37  ;;  %v6502_v20 = vadd.f32 %v6501_v62, %v11496_v53  ;;  %v7171_v62 = vld [vmem:[%s12167_s0 + $0x90] sm:$0xff] }
 0x7e7   : > { %v6503_v4 = vpop.f32.mrf.mxu1  ;;  %v6892_v31 = vpop.f32.mrf.mxu0 }
 0x7e8   : > { %v7231_v52 = vsub.f32 %v7167_v48, %v7103_v19 }
 0x7e9   : > { %v6506_v49 = vpop.f32.mrf.mxu1  ;;  %v6893_v34 = vpop.f32.mrf.mxu0 }
 0x7ea   : > { %7296 = vst.msk [vmem:[%s12173_s6 + $0x70] sm:$0xff] %vm7281_vm13, %v7231_v52  ;;  %v7104_v35 = vadd.f32 %v6893_v34, %v6502_v20  ;;  %v6507_v42 = vadd.f32 %v6506_v49, %v11502_v36  ;;  %v7172_v52 = vld [vmem:[%s12167_s0 + $0x98] sm:$0xff] }
 0x7eb   : > { %v6508_v5 = vpop.f32.mrf.mxu1  ;;  %v6895_v38 = vpop.f32.mrf.mxu0 }
 0x7ec   : > { %v7232_v17 = vsub.f32 %v7168_v30, %v7104_v35 }
 0x7ed   : > { %v6509_v33 = vpop.f32.mrf.mxu1  ;;  %v6898_v53 = vpop.f32.mrf.mxu0 }
 0x7ee   : > { %7297 = vst.msk [vmem:[%s12173_s6 + $0x78] sm:$0xff] %vm7281_vm13, %v7232_v17  ;;  %v7105_v32 = vadd.f32 %v6898_v53, %v6507_v42  ;;  %v6510_v14 = vadd.f32 %v6509_v33, %v11509_v63  ;;  %v7173_v42 = vld [vmem:[%s12167_s0 + $0xa0] sm:$0xff] }
 0x7ef   : > { %v6511_v16 = vpop.f32.mrf.mxu1  ;;  %v6900_v60 = vpop.f32.mrf.mxu0 }
 0x7f0   : > { %v7233_v54 = vsub.f32 %v7169_v2, %v7105_v32  ;;  %v7174_v60 = vld [vmem:[%s12167_s0 + $0xa8] sm:$0xff] }
 0x7f1   : > { %v6514_v46 = vpop.f32.mrf.mxu1  ;;  %v6901_v36 = vpop.f32.mrf.mxu0 }
 0x7f2   : > { %7298 = vst.msk [vmem:[%s12173_s6 + $0x80] sm:$0xff] %vm7281_vm13, %v7233_v54  ;;  %v7106_v7 = vadd.f32 %v6901_v36, %v6510_v14  ;;  %v6515_v21 = vadd.f32 %v6514_v46, %v11516_v28 }
 0x7f3   : > { %v6516_v41 = vpop.f32.mrf.mxu1  ;;  %v6903_v11 = vpop.f32.mrf.mxu0 }
 0x7f4   : > { %v7234_v37 = vsub.f32 %v7170_v55, %v7106_v7  ;;  %v7175_v41 = vld [vmem:[%s12167_s0 + $0xb0] sm:$0xff] }
 0x7f5   : > { %v6517_v1 = vpop.f32.mrf.mxu1  ;;  %v6906_v63 = vpop.f32.mrf.mxu0 }
 0x7f6   : > { %7299 = vst.msk [vmem:[%s12173_s6 + $0x88] sm:$0xff] %vm7281_vm13, %v7234_v37  ;;  %v7107_v57 = vadd.f32 %v6906_v63, %v6515_v21  ;;  %v6518_v4 = vadd.f32 %v6517_v1, %v11523_v59 }
 0x7f7   : > { %v6519_v48 = vpop.f32.mrf.mxu1  ;;  %v6908_v19 = vpop.f32.mrf.mxu0 }
 0x7f8   : > { %v7235_v31 = vsub.f32 %v7171_v62, %v7107_v57  ;;  %v7176_v57 = vld [vmem:[%s12167_s0 + $0xb8] sm:$0xff] }
 0x7f9   : > { %v6522_v20 = vpop.f32.mrf.mxu1  ;;  %v6909_v28 = vpop.f32.mrf.mxu0 }
 0x7fa   : > { %7300 = vst.msk [vmem:[%s12173_s6 + $0x90] sm:$0xff] %vm7281_vm13, %v7235_v31  ;;  %v7108_v49 = vadd.f32 %v6909_v28, %v6518_v4  ;;  %v6523_v35 = vadd.f32 %v6522_v20, %v11530_v24 }
 0x7fb   : > { %v6524_v34 = vpop.f32.mrf.mxu1  ;;  %v6911_v30 = vpop.f32.mrf.mxu0 }
 0x7fc   : > { %v7236_v5 = vsub.f32 %v7172_v52, %v7108_v49  ;;  %v7177_v52 = vld [vmem:[%s12167_s0 + $0xc0] sm:$0xff] }
 0x7fd   : > { %v6525_v38 = vpop.f32.mrf.mxu1  ;;  %v6914_v59 = vpop.f32.mrf.mxu0 }
 0x7fe   : > { %7301 = vst.msk [vmem:[%s12173_s6 + $0x98] sm:$0xff] %vm7281_vm13, %v7236_v5  ;;  %v7109_v17 = vadd.f32 %v6914_v59, %v6523_v35  ;;  %v6526_v2 = vadd.f32 %v6525_v38, %v11537_v51  ;;  %v7178_v59 = vld [vmem:[%s12167_s0 + $0xc8] sm:$0xff] }
 0x7ff   : > { %v6527_v33 = vpop.f32.mrf.mxu1  ;;  %v6916_v53 = vpop.f32.mrf.mxu0 }
 0x800   : > { %v7237_v32 = vsub.f32 %v7173_v42, %v7109_v17 }
 0x801   : > { %v6530_v16 = vpop.f32.mrf.mxu1  ;;  %v6917_v24 = vpop.f32.mrf.mxu0 }
 0x802   : > { %7302 = vst.msk [vmem:[%s12173_s6 + $0xa0] sm:$0xff] %vm7281_vm13, %v7237_v32  ;;  %v7110_v14 = vadd.f32 %v6917_v24, %v6526_v2  ;;  %v6531_v36 = vadd.f32 %v6530_v16, %v11544_v15  ;;  %v7179_v16 = vld [vmem:[%s12167_s0 + $0xd0] sm:$0xff] }
 0x803   : > { %v6532_v54 = vpop.f32.mrf.mxu1  ;;  %v6919_v46 = vpop.f32.mrf.mxu0 }
 0x804   : > { %v7238_v55 = vsub.f32 %v7174_v60, %v7110_v14 }
 0x805   : > { %v6533_v7 = vpop.f32.mrf.mxu1  ;;  %v6922_v51 = vpop.f32.mrf.mxu0 }
 0x806   : > { %7303 = vst.msk [vmem:[%s12173_s6 + $0xa8] sm:$0xff] %vm7281_vm13, %v7238_v55  ;;  %v7111_v11 = vadd.f32 %v6922_v51, %v6531_v36  ;;  %v6534_v1 = vadd.f32 %v6533_v7, %v11551_v3  ;;  %v7180_v55 = vld [vmem:[%s12167_s0 + $0xd8] sm:$0xff] }
 0x807   : > { %v6535_v21 = vpop.f32.mrf.mxu1  ;;  %v6924_v37 = vpop.f32.mrf.mxu0 }
 0x808   : > { %v7239_v63 = vsub.f32 %v7175_v41, %v7111_v11 }
 0x809   : > { %v6538_v62 = vpop.f32.mrf.mxu1  ;;  %v6925_v15 = vpop.f32.mrf.mxu0 }
 0x80a   : > { %7304 = vst.msk [vmem:[%s12173_s6 + $0xb0] sm:$0xff] %vm7281_vm13, %v7239_v63  ;;  %v7112_v48 = vadd.f32 %v6925_v15, %v6534_v1  ;;  %v6539_v31 = vadd.f32 %v6538_v62, %v11558_v26  ;;  %v7181_v1 = vld [vmem:[%s12167_s0 + $0xe0] sm:$0xff] }
 0x80b   : > { %v6540_v19 = vpop.f32.mrf.mxu1  ;;  %v6927_v4 = vpop.f32.mrf.mxu0 }
 0x80c   : > { %v7240_v20 = vsub.f32 %v7176_v57, %v7112_v48  ;;  %v7182_v4 = vld [vmem:[%s12167_s0 + $0xe8] sm:$0xff] }
 0x80d   : > { %v6541_v28 = vpop.f32.mrf.mxu1  ;;  %v6930_v3 = vpop.f32.mrf.mxu0 }
 0x80e   : > { %7305 = vst.msk [vmem:[%s12173_s6 + $0xb8] sm:$0xff] %vm7281_vm13, %v7240_v20  ;;  %v7113_v49 = vadd.f32 %v6930_v3, %v6539_v31  ;;  %v6542_v35 = vadd.f32 %v6541_v28, %v11565_v47 }
 0x80f   : > { %v6543_v34 = vpop.f32.mrf.mxu1  ;;  %v6932_v30 = vpop.f32.mrf.mxu0 }
 0x810   : > { %v7241_v5 = vsub.f32 %v7177_v52, %v7113_v49  ;;  %v7183_v34 = vld [vmem:[%s12167_s0 + $0xf0] sm:$0xff] }
 0x811   : > { %v6546_v38 = vpop.f32.mrf.mxu1  ;;  %v6933_v26 = vpop.f32.mrf.mxu0 }
 0x812   : > { %7306 = vst.msk [vmem:[%s12173_s6 + $0xc0] sm:$0xff] %vm7281_vm13, %v7241_v5  ;;  %v7114_v42 = vadd.f32 %v6933_v26, %v6542_v35  ;;  %v6547_v53 = vadd.f32 %v6546_v38, %v11572_v12 }
 0x813   : > { %v6548_v17 = vpop.f32.mrf.mxu1  ;;  %v6935_v33 = vpop.f32.mrf.mxu0 }
 0x814   : > { %v7242_v2 = vsub.f32 %v7178_v59, %v7114_v42  ;;  %v7184_v42 = vld [vmem:[%s12167_s0 + $0xf8] sm:$0xff] }
 0x815   : > { %v6549_v32 = vpop.f32.mrf.mxu1  ;;  %v6938_v47 = vpop.f32.mrf.mxu0 }
 0x816   : > { %7307 = vst.msk [vmem:[%s12173_s6 + $0xc8] sm:$0xff] %vm7281_vm13, %v7242_v2  ;;  %v7115_v24 = vadd.f32 %v6938_v47, %v6547_v53  ;;  %v6550_v54 = vadd.f32 %v6549_v32, %v11579_v29 }
 0x817   : > { %v6551_v60 = vpop.f32.mrf.mxu1  ;;  %v6940_v14 = vpop.f32.mrf.mxu0 }
 0x818   : > { %v7243_v46 = vsub.f32 %v7179_v16, %v7115_v24  ;;  %v7185_v16 = vld [vmem:[%s12167_s0 + $0x100] sm:$0xff] }
 0x819   : > { %v6554_v36 = vpop.f32.mrf.mxu1  ;;  %v6941_v12 = vpop.f32.mrf.mxu0 }
 0x81a   : > { %7308 = vst.msk [vmem:[%s12173_s6 + $0xd0] sm:$0xff] %vm7281_vm13, %v7243_v46  ;;  %v7116_v7 = vadd.f32 %v6941_v12, %v6550_v54  ;;  %v6555_v11 = vadd.f32 %v6554_v36, %v11586_v13  ;;  %v7186_v12 = vld [vmem:[%s12167_s0 + $0x108] sm:$0xff] }
 0x81b   : > { %v6556_v51 = vpop.f32.mrf.mxu1  ;;  %v6943_v41 = vpop.f32.mrf.mxu0 }
 0x81c   : > { %v7244_v21 = vsub.f32 %v7180_v55, %v7116_v7 }
 0x81d   : > { %v6557_v37 = vpop.f32.mrf.mxu1  ;;  %v6946_v29 = vpop.f32.mrf.mxu0 }
 0x81e   : > { %7309 = vst.msk [vmem:[%s12173_s6 + $0xd8] sm:$0xff] %vm7281_vm13, %v7244_v21  ;;  %v7117_v63 = vadd.f32 %v6946_v29, %v6555_v11  ;;  %v6558_v57 = vadd.f32 %v6557_v37, %v11593_v6  ;;  %v7187_v37 = vld [vmem:[%s12167_s0 + $0x110] sm:$0xff] }
 0x81f   : > { %v6559_v62 = vpop.f32.mrf.mxu1  ;;  %v6948_v15 = vpop.f32.mrf.mxu0 }
 0x820   : > { %v7245_v48 = vsub.f32 %v7181_v1, %v7117_v63 }
 0x821   : > { %v6562_v19 = vpop.f32.mrf.mxu1  ;;  %v6949_v13 = vpop.f32.mrf.mxu0 }
 0x822   : > { %7310 = vst.msk [vmem:[%s12173_s6 + $0xe0] sm:$0xff] %vm7281_vm13, %v7245_v48  ;;  %v7118_v31 = vadd.f32 %v6949_v13, %v6558_v57  ;;  %v6563_v3 = vadd.f32 %v6562_v19, %v11600_v27  ;;  %v7188_v48 = vld [vmem:[%s12167_s0 + $0x118] sm:$0xff] }
 0x823   : > { %v6564_v20 = vpop.f32.mrf.mxu1  ;;  %v6951_v28 = vpop.f32.mrf.mxu0 }
 0x824   : > { %v7246_v52 = vsub.f32 %v7182_v4, %v7118_v31 }
 0x825   : > { %v6565_v49 = vpop.f32.mrf.mxu1  ;;  %v6954_v6 = vpop.f32.mrf.mxu0 }
 0x826   : > { %7311 = vst.msk [vmem:[%s12173_s6 + $0xe8] sm:$0xff] %vm7281_vm13, %v7246_v52  ;;  %v7119_v30 = vadd.f32 %v6954_v6, %v6563_v3  ;;  %v6566_v38 = vadd.f32 %v6565_v49, %v11607_v43  ;;  %v7189_v3 = vld [vmem:[%s12167_s0 + $0x120] sm:$0xff] }
 0x827   : > { %v6567_v35 = vpop.f32.mrf.mxu1  ;;  %v6956_v5 = vpop.f32.mrf.mxu0 }
 0x828   : > { %v7247_v26 = vsub.f32 %v7183_v34, %v7119_v30  ;;  %v7190_v5 = vld [vmem:[%s12167_s0 + $0x128] sm:$0xff] }
 0x829   : > { %v6570_v59 = vpop.f32.mrf.mxu1  ;;  %v6957_v27 = vpop.f32.mrf.mxu0 }
 0x82a   : > { %7312 = vst.msk [vmem:[%s12173_s6 + $0xf0] sm:$0xff] %vm7281_vm13, %v7247_v26  ;;  %v7120_v17 = vadd.f32 %v6957_v27, %v6566_v38  ;;  %v6571_v2 = vadd.f32 %v6570_v59, %v11387_v10 }
 0x82b   : > { %v6572_v33 = vpop.f32.mrf.mxu1  ;;  %v6959_v53 = vpop.f32.mrf.mxu0 }
 0x82c   : > { %v7248_v32 = vsub.f32 %v7184_v42, %v7120_v17  ;;  %v7191_v33 = vld [vmem:[%s12167_s0 + $0x130] sm:$0xff] }
 0x82d   : > { %v6573_v47 = vpop.f32.mrf.mxu1  ;;  %v6962_v43 = vpop.f32.mrf.mxu0 }
 0x82e   : > { %7313 = vst.msk [vmem:[%s12173_s6 + $0xf8] sm:$0xff] %vm7281_vm13, %v7248_v32  ;;  %v7121_v24 = vadd.f32 %v6962_v43, %v6571_v2  ;;  %v6574_v54 = vadd.f32 %v6573_v47, %v11394_v58 }
 0x82f   : > { %v6575_v60 = vpop.f32.mrf.mxu1  ;;  %v6964_v14 = vpop.f32.mrf.mxu0 }
 0x830   : > { %v7249_v46 = vsub.f32 %v7185_v16, %v7121_v24  ;;  %v7192_v24 = vld [vmem:[%s12167_s0 + $0x138] sm:$0xff] }
 0x831   : > { %v6578_v36 = vpop.f32.mrf.mxu1  ;;  %v6965_v10 = vpop.f32.mrf.mxu0 }
 0x832   : > { %7314 = vst.msk [vmem:[%s12173_s6 + $0x100] sm:$0xff] %vm7281_vm13, %v7249_v46  ;;  %v7122_v55 = vadd.f32 %v6965_v10, %v6574_v54  ;;  %v6579_v41 = vadd.f32 %v6578_v36, %v11401_v39 }
 0x833   : > { %v6580_v7 = vpop.f32.mrf.mxu1  ;;  %v6967_v51 = vpop.f32.mrf.mxu0 }
 0x834   : > { %v7250_v11 = vsub.f32 %v7186_v12, %v7122_v55  ;;  %v7193_v12 = vld [vmem:[%s12167_s0 + $0x140] sm:$0xff] }
 0x835   : > { %v6581_v21 = vpop.f32.mrf.mxu1  ;;  %v6970_v58 = vpop.f32.mrf.mxu0 }
 0x836   : > { %7315 = vst.msk [vmem:[%s12173_s6 + $0x108] sm:$0xff] %vm7281_vm13, %v7250_v11  ;;  %v7123_v29 = vadd.f32 %v6970_v58, %v6579_v41  ;;  %v6582_v62 = vadd.f32 %v6581_v21, %v11408_v50  ;;  %v7194_v58 = vld [vmem:[%s12167_s0 + $0x148] sm:$0xff] }
 0x837   : > { %v6583_v1 = vpop.f32.mrf.mxu1  ;;  %v6972_v63 = vpop.f32.mrf.mxu0 }
 0x838   : > { %v7251_v15 = vsub.f32 %v7187_v37, %v7123_v29 }
 0x839   : > { %v6586_v57 = vpop.f32.mrf.mxu1  ;;  %v6973_v39 = vpop.f32.mrf.mxu0 }
 0x83a   : > { %7316 = vst.msk [vmem:[%s12173_s6 + $0x110] sm:$0xff] %vm7281_vm13, %v7251_v15  ;;  %v7124_v19 = vadd.f32 %v6973_v39, %v6582_v62  ;;  %v6587_v31 = vadd.f32 %v6586_v57, %v11415_v8  ;;  %v7195_v57 = vld [vmem:[%s12167_s0 + $0x150] sm:$0xff] }
 0x83b   : > { %v6588_v13 = vpop.f32.mrf.mxu1  ;;  %v6975_v4 = vpop.f32.mrf.mxu0 }
 0x83c   : > { %v7252_v20 = vsub.f32 %v7188_v48, %v7124_v19 }
 0x83d   : > { %v6589_v28 = vpop.f32.mrf.mxu1  ;;  %v6978_v50 = vpop.f32.mrf.mxu0 }
 0x83e   : > { %7317 = vst.msk [vmem:[%s12173_s6 + $0x118] sm:$0xff] %vm7281_vm13, %v7252_v20  ;;  %v7125_v52 = vadd.f32 %v6978_v50, %v6587_v31  ;;  %v6590_v34 = vadd.f32 %v6589_v28, %v11422_v25  ;;  %v7196_v20 = vld [vmem:[%s12167_s0 + $0x158] sm:$0xff] }
 0x83f   : > { %v6591_v49 = vpop.f32.mrf.mxu1  ;;  %v6980_v6 = vpop.f32.mrf.mxu0 }
 0x840   : > { %v7253_v30 = vsub.f32 %v7189_v3, %v7125_v52 }
 0x841   : > { %v6594_v35 = vpop.f32.mrf.mxu1  ;;  %v6981_v8 = vpop.f32.mrf.mxu0 }
 0x842   : > { %7318 = vst.msk [vmem:[%s12173_s6 + $0x120] sm:$0xff] %vm7281_vm13, %v7253_v30  ;;  %v7126_v38 = vadd.f32 %v6981_v8, %v6590_v34  ;;  %v6595_v27 = vadd.f32 %v6594_v35, %v11429_v44  ;;  %v7197_v34 = vld [vmem:[%s12167_s0 + $0x160] sm:$0xff] }
 0x843   : > { %v6596_v26 = vpop.f32.mrf.mxu1  ;;  %v6983_v59 = vpop.f32.mrf.mxu0 }
 0x844   : > { %v7254_v42 = vsub.f32 %v7190_v5, %v7126_v38  ;;  %v12298_v5 = vld [vmem:[#allocation29_spill] sm:$0xff] }
 0x845   : > { %v6597_v17 = vpop.f32.mrf.mxu1  ;;  %v6986_v25 = vpop.f32.mrf.mxu0 }
 0x846   : > { %7319 = vst.msk [vmem:[%s12173_s6 + $0x128] sm:$0xff] %vm7281_vm13, %v7254_v42  ;;  %v7127_v53 = vadd.f32 %v6986_v25, %v6595_v27  ;;  %v6598_v47 = vadd.f32 %v6597_v17, %v11436_v18  ;;  %v7198_v27 = vld [vmem:[%s12167_s0 + $0x168] sm:$0xff] }
 0x847   : > { %v6599_v2 = vpop.f32.mrf.mxu1  ;;  %v6988_v32 = vpop.f32.mrf.mxu0 }
 0x848   : > { %v7255_v43 = vsub.f32 %v7191_v33, %v7127_v53 }
 0x849   : > { %v6602_v16 = vpop.f32.mrf.mxu1  ;;  %v6989_v44 = vpop.f32.mrf.mxu0 }
 0x84a   : > { %7320 = vst.msk [vmem:[%s12173_s6 + $0x130] sm:$0xff] %vm7281_vm13, %v7255_v43  ;;  %v7128_v60 = vadd.f32 %v6989_v44, %v6598_v47  ;;  %v6603_v46 = vadd.f32 %v6602_v16, %v11443_v45  ;;  %v7199_v47 = vld [vmem:[%s12167_s0 + $0x170] sm:$0xff] }
 0x84b   : > { %v6604_v14 = vpop.f32.mrf.mxu1  ;;  %v6991_v54 = vpop.f32.mrf.mxu0 }
 0x84c   : > { %v7256_v36 = vsub.f32 %v7192_v24, %v7128_v60  ;;  %v7200_v54 = vld [vmem:[%s12167_s0 + $0x178] sm:$0xff] }
 0x84d   : > { %v6605_v10 = vpop.f32.mrf.mxu1  ;;  %v6994_v18 = vpop.f32.mrf.mxu0 }
 0x84e   : > { %7321 = vst.msk [vmem:[%s12173_s6 + $0x138] sm:$0xff] %vm7281_vm13, %v7256_v36  ;;  %v7129_v55 = vadd.f32 %v6994_v18, %v6603_v46  ;;  %v6606_v41 = vadd.f32 %v6605_v10, %v11450_v22 }
 0x84f   : > { %v6607_v7 = vpop.f32.mrf.mxu1  ;;  %v6996_v51 = vpop.f32.mrf.mxu0 }
 0x850   : > { %v7257_v11 = vsub.f32 %v7193_v12, %v7129_v55  ;;  %v7201_v7 = vld [vmem:[%s12167_s0 + $0x180] sm:$0xff] }
 0x851   : > { %v6610_v21 = vpop.f32.mrf.mxu1  ;;  %v6997_v45 = vpop.f32.mrf.mxu0 }
 0x852   : > { %7322 = vst.msk [vmem:[%s12173_s6 + $0x140] sm:$0xff] %vm7281_vm13, %v7257_v11  ;;  %v7130_v37 = vadd.f32 %v6997_v45, %v6606_v41  ;;  %v6611_v63 = vadd.f32 %v6610_v21, %v11457_v23  ;;  %v12299_v21 = vld [vmem:[#allocation30_spill] sm:$0xff] }
 0x853   : > { %v6612_v29 = vpop.f32.mrf.mxu1  ;;  %v6999_v1 = vpop.f32.mrf.mxu0 }
 0x854   : > { %v7258_v62 = vsub.f32 %v7194_v58, %v7130_v37  ;;  %v7202_v29 = vld [vmem:[%s12167_s0 + $0x188] sm:$0xff] }
 0x855   : > { %v6613_v15 = vpop.f32.mrf.mxu1  ;;  %v7002_v22 = vpop.f32.mrf.mxu0 }
 0x856   : > { %7323 = vst.msk [vmem:[%s12173_s6 + $0x148] sm:$0xff] %vm7281_vm13, %v7258_v62  ;;  %v7131_v39 = vadd.f32 %v7002_v22, %v6611_v63  ;;  %v6614_v13 = vadd.f32 %v6613_v15, %v11464_v0  ;;  %v12300_v15 = vld [vmem:[#allocation31_spill] sm:$0xff] }
 0x857   : > { %v6615_v48 = vpop.f32.mrf.mxu1  ;;  %v7004_v19 = vpop.f32.mrf.mxu0 }
 0x858   : > { %v7259_v4 = vsub.f32 %v7195_v57, %v7131_v39  ;;  %v7203_v19 = vld [vmem:[%s12167_s0 + $0x190] sm:$0xff] }
 0x859   : > { %v6618_v31 = vpop.f32.mrf.mxu1  ;;  %v7005_v23 = vpop.f32.mrf.mxu0 }
 0x85a   : > { %7324 = vst.msk [vmem:[%s12173_s6 + $0x150] sm:$0xff] %vm7281_vm13, %v7259_v4  ;;  %v7132_v28 = vadd.f32 %v7005_v23, %v6614_v13  ;;  %v6619_v52 = vadd.f32 %v6618_v31, %v11471_v61  ;;  %v12301_v23 = vld [vmem:[#allocation32_spill] sm:$0xff] }
 0x85b   : > { %v6620_v50 = vpop.f32.mrf.mxu1  ;;  %v7007_v3 = vpop.f32.mrf.mxu0 }
 0x85c   : > { %v7260_v49 = vsub.f32 %v7196_v20, %v7132_v28 }
 0x85d   : > { %v6621_v6 = vpop.f32.mrf.mxu1  ;;  %v7010_v0 = vpop.f32.mrf.mxu0 }
 0x85e   : > { %7325 = vst.msk [vmem:[%s12173_s6 + $0x158] sm:$0xff] %vm7281_vm13, %v7260_v49  ;;  %v7133_v30 = vadd.f32 %v7010_v0, %v6619_v52  ;;  %v6622_v38 = vadd.f32 %v6621_v6, %v12298_v5  ;;  %v7204_v52 = vld [vmem:[%s12167_s0 + $0x198] sm:$0xff] }
 0x85f   : > { %v6623_v35 = vpop.f32.mrf.mxu1  ;;  %v7012_v8 = vpop.f32.mrf.mxu0 }
 0x860   : > { %v7261_v26 = vsub.f32 %v7197_v34, %v7133_v30  ;;  %v12302_v34 = vld [vmem:[#allocation33_spill] sm:$0xff] }
 0x861   : > { %v6626_v59 = vpop.f32.mrf.mxu1  ;;  %v7013_v61 = vpop.f32.mrf.mxu0 }
 0x862   : > { %7326 = vst.msk [vmem:[%s12173_s6 + $0x160] sm:$0xff] %vm7281_vm13, %v7261_v26  ;;  %v7134_v42 = vadd.f32 %v7013_v61, %v6622_v38  ;;  %v6627_v33 = vadd.f32 %v6626_v59, %v11484_v40  ;;  %v7205_v38 = vld [vmem:[%s12167_s0 + $0x1a0] sm:$0xff] }
 0x863   : > { %v6628_v17 = vpop.f32.mrf.mxu1  ;;  %v7015_v25 = vpop.f32.mrf.mxu0 }
 0x864   : > { %v7262_v53 = vsub.f32 %v7198_v27, %v7134_v42  ;;  %v12303_v27 = vld [vmem:[#allocation34_spill] sm:$0xff] }
 0x865   : > { %v6629_v2 = vpop.f32.mrf.mxu1  ;;  %v7018_v32 = vpop.f32.mrf.mxu0 }
 0x866   : > { %7327 = vst.msk [vmem:[%s12173_s6 + $0x168] sm:$0xff] %vm7281_vm13, %v7262_v53  ;;  %v7135_v43 = vadd.f32 %v7018_v32, %v6627_v33  ;;  %v6630_v24 = vadd.f32 %v6629_v2, %v11491_v56  ;;  %v7206_v53 = vld [vmem:[%s12167_s0 + $0x1a8] sm:$0xff] }
 0x867   : > { %v6631_v16 = vpop.f32.mrf.mxu1  ;;  %v7020_v44 = vpop.f32.mrf.mxu0 }
 0x868   : > { %v7263_v60 = vsub.f32 %v7199_v47, %v7135_v43  ;;  %v12304_v43 = vld [vmem:[#allocation35_spill] sm:$0xff] }
 0x869   : > { %v6634_v14 = vpop.f32.mrf.mxu1  ;;  %v7021_v40 = vpop.f32.mrf.mxu0 }
 0x86a   : > { %7328 = vst.msk [vmem:[%s12173_s6 + $0x170] sm:$0xff] %vm7281_vm13, %v7263_v60  ;;  %v7136_v46 = vadd.f32 %v7021_v40, %v6630_v24  ;;  %v6635_v18 = vadd.f32 %v6634_v14, %v11498_v9  ;;  %v7207_v14 = vld [vmem:[%s12167_s0 + $0x1b0] sm:$0xff] }
 0x86b   : > { %v6636_v36 = vpop.f32.mrf.mxu1  ;;  %v7023_v10 = vpop.f32.mrf.mxu0 }
 0x86c   : > { %v7264_v12 = vsub.f32 %v7200_v54, %v7136_v46  ;;  %v12305_v36 = vld [vmem:[#allocation36_spill] sm:$0xff] }
 0x86d   : > { %v6637_v55 = vpop.f32.mrf.mxu1  ;;  %v7026_v56 = vpop.f32.mrf.mxu0 }
 0x86e   : > { %7329 = vst.msk [vmem:[%s12173_s6 + $0x178] sm:$0xff] %vm7281_vm13, %v7264_v12  ;;  %v7137_v51 = vadd.f32 %v7026_v56, %v6635_v18  ;;  %v6638_v45 = vadd.f32 %v6637_v55, %v12299_v21  ;;  %v7208_v56 = vld [vmem:[%s12167_s0 + $0x1b8] sm:$0xff] }
 0x86f   : > { %v6639_v41 = vpop.f32.mrf.mxu1  ;;  %v7028_v11 = vpop.f32.mrf.mxu0 }
 0x870   : > { %v7265_v58 = vsub.f32 %v7201_v7, %v7137_v51  ;;  %v12306_v11 = vld [vmem:[#allocation37_spill] sm:$0xff] }
 0x871   : > { %v6642_v37 = vpop.f32.mrf.mxu1  ;;  %v7029_v9 = vpop.f32.mrf.mxu0 }
 0x872   : > { %7330 = vst.msk [vmem:[%s12173_s6 + $0x180] sm:$0xff] %vm7281_vm13, %v7265_v58  ;;  %v7138_v1 = vadd.f32 %v7029_v9, %v6638_v45  ;;  %v6643_v22 = vadd.f32 %v6642_v37, %v12300_v15  ;;  %v7209_v9 = vld [vmem:[%s12167_s0 + $0x1c0] sm:$0xff] }
 0x873   : > { %v6644_v63 = vpop.f32.mrf.mxu1  ;;  %v7031_v62 = vpop.f32.mrf.mxu0 }
 0x874   : > { %v7266_v57 = vsub.f32 %v7202_v29, %v7138_v1  ;;  %v12307_v62 = vld [vmem:[#allocation38_spill] sm:$0xff] }
 0x875   : > { %v6645_v39 = vpop.f32.mrf.mxu1  ;;  %v7034_v48 = vpop.f32.mrf.mxu0 }
 0x876   : > { %7331 = vst.msk [vmem:[%s12173_s6 + $0x188] sm:$0xff] %vm7281_vm13, %v7266_v57  ;;  %v7139_v13 = vadd.f32 %v7034_v48, %v6643_v22  ;;  %v6646_v20 = vadd.f32 %v6645_v39, %v12301_v23  ;;  %v7210_v48 = vld [vmem:[%s12167_s0 + $0x1c8] sm:$0xff] }
 0x877   : > { %v6647_v4 = vpop.f32.mrf.mxu1  ;;  %v7036_v31 = vpop.f32.mrf.mxu0 }
 0x878   : > { %v7267_v28 = vsub.f32 %v7203_v19, %v7139_v13  ;;  %v12308_v31 = vld [vmem:[#allocation39_spill] sm:$0xff] }
 0x879   : > { %v6650_v50 = vpop.f32.mrf.mxu1  ;;  %v7037_v3 = vpop.f32.mrf.mxu0 }
 0x87a   : > { %7332 = vst.msk [vmem:[%s12173_s6 + $0x190] sm:$0xff] %vm7281_vm13, %v7267_v28  ;;  %v7140_v49 = vadd.f32 %v7037_v3, %v6646_v20  ;;  %v6651_v30 = vadd.f32 %v6650_v50, %v12302_v34  ;;  %v7211_v3 = vld [vmem:[%s12167_s0 + $0x1d0] sm:$0xff] }
 0x87b   : > { %v6652_v6 = vpop.f32.mrf.mxu1  ;;  %v7039_v0 = vpop.f32.mrf.mxu0 }
 0x87c   : > { %v7268_v35 = vsub.f32 %v7204_v52, %v7140_v49  ;;  %v12309_v0 = vld [vmem:[#allocation40_spill] sm:$0xff] }
 0x87d   : > { %v6653_v8 = vpop.f32.mrf.mxu1  ;;  %v7042_v5 = vpop.f32.mrf.mxu0 }
 0x87e   : > { %7333 = vst.msk [vmem:[%s12173_s6 + $0x198] sm:$0xff] %vm7281_vm13, %v7268_v35  ;;  %v7141_v26 = vadd.f32 %v7042_v5, %v6651_v30  ;;  %v6654_v42 = vadd.f32 %v6653_v8, %v12303_v27  ;;  %v7212_v5 = vld [vmem:[%s12167_s0 + $0x1d8] sm:$0xff] }
 0x87f   : > { %v6655_v59 = vpop.f32.mrf.mxu1  ;;  %v7044_v61 = vpop.f32.mrf.mxu0 }
 0x880   : > { %v7269_v17 = vsub.f32 %v7205_v38, %v7141_v26  ;;  %v12310_v61 = vld [vmem:[#allocation41_spill] sm:$0xff] }
 0x881   : > { %v6658_v25 = vpop.f32.mrf.mxu1  ;;  %v7045_v33 = vpop.f32.mrf.mxu0 }
 0x882   : > { %7334 = vst.msk [vmem:[%s12173_s6 + $0x1a0] sm:$0xff] %vm7281_vm13, %v7269_v17  ;;  %v7142_v2 = vadd.f32 %v7045_v33, %v6654_v42  ;;  %v6659_v16 = vadd.f32 %v6658_v25, %v12304_v43  ;;  %v7213_v33 = vld [vmem:[%s12167_s0 + $0x1e0] sm:$0xff] }
 0x883   : > { %v6660_v32 = vpop.f32.mrf.mxu1  ;;  %v7047_v47 = vpop.f32.mrf.mxu0 }
 0x884   : > { %v7270_v44 = vsub.f32 %v7206_v53, %v7142_v2  ;;  %v12311_v47 = vld [vmem:[#allocation42_spill] sm:$0xff] }
 0x885   : > { %v6661_v24 = vpop.f32.mrf.mxu1  ;;  %v7050_v60 = vpop.f32.mrf.mxu0 }
 0x886   : > { %7335 = vst.msk [vmem:[%s12173_s6 + $0x1a8] sm:$0xff] %vm7281_vm13, %v7270_v44  ;;  %v7143_v40 = vadd.f32 %v7050_v60, %v6659_v16  ;;  %v6662_v10 = vadd.f32 %v6661_v24, %v12305_v36  ;;  %v7214_v60 = vld [vmem:[%s12167_s0 + $0x1e8] sm:$0xff] }
 0x887   : > { %v6663_v54 = vpop.f32.mrf.mxu1  ;;  %v7052_v46 = vpop.f32.mrf.mxu0 }
 0x888   : > { %v7271_v18 = vsub.f32 %v7207_v14, %v7143_v40  ;;  %v12312_v46 = vld [vmem:[#allocation43_spill] sm:$0xff] }
 0x889   : > { %v6666_v12 = vpop.f32.mrf.mxu1  ;;  %v7053_v55 = vpop.f32.mrf.mxu0 }
 0x88a   : > { %7336 = vst.msk [vmem:[%s12173_s6 + $0x1b0] sm:$0xff] %vm7281_vm13, %v7271_v18  ;;  %v7144_v7 = vadd.f32 %v7053_v55, %v6662_v10  ;;  %v6667_v21 = vadd.f32 %v6666_v12, %v12306_v11  ;;  %v7215_v55 = vld [vmem:[%s12167_s0 + $0x1f0] sm:$0xff] }
 0x88b   : > { %v6668_v51 = vpop.f32.mrf.mxu1  ;;  %v7055_v41 = vpop.f32.mrf.mxu0 }
 0x88c   : > { %v7272_v45 = vsub.f32 %v7208_v56, %v7144_v7  ;;  %v12313_v41 = vld [vmem:[#allocation44_spill] sm:$0xff] }
 0x88d   : > { %v6669_v58 = vpop.f32.mrf.mxu1  ;;  %v7058_v37 = vpop.f32.mrf.mxu0 }
 0x88e   : > { %7337 = vst.msk [vmem:[%s12173_s6 + $0x1b8] sm:$0xff] %vm7281_vm13, %v7272_v45  ;;  %v7145_v29 = vadd.f32 %v7058_v37, %v6667_v21  ;;  %v6670_v15 = vadd.f32 %v6669_v58, %v12307_v62  ;;  %v7216_v58 = vld [vmem:[%s12167_s0 + $0x1f8] sm:$0xff] }
 0x88f   : > { %v6671_v1 = vpop.f32.mrf.mxu1  ;;  %v7060_v63 = vpop.f32.mrf.mxu0 }
 0x890   : > { %v7273_v22 = vsub.f32 %v7209_v9, %v7145_v29 }
 0x891   : > { %v6674_v57 = vpop.f32.mrf.mxu1  ;;  %v7061_v39 = vpop.f32.mrf.mxu0 }
 0x892   : > { %7338 = vst.msk [vmem:[%s12173_s6 + $0x1c0] sm:$0xff] %vm7281_vm13, %v7273_v22  ;;  %v7146_v19 = vadd.f32 %v7061_v39, %v6670_v15  ;;  %v6675_v23 = vadd.f32 %v6674_v57, %v12308_v31 }
 0x893   : > { %v6676_v13 = vpop.f32.mrf.mxu1  ;;  %v7063_v4 = vpop.f32.mrf.mxu0 }
 0x894   : > { %v7274_v20 = vsub.f32 %v7210_v48, %v7146_v19 }
 0x895   : > { %v6677_v28 = vpop.f32.mrf.mxu1  ;;  %v7066_v50 = vpop.f32.mrf.mxu0 }
 0x896   : > { %7339 = vst.msk [vmem:[%s12173_s6 + $0x1c8] sm:$0xff] %vm7281_vm13, %v7274_v20  ;;  %v7147_v52 = vadd.f32 %v7066_v50, %v6675_v23  ;;  %v6678_v34 = vadd.f32 %v6677_v28, %v12309_v0 }
 0x897   : > { %v6679_v49 = vpop.f32.mrf.mxu1  ;;  %v7068_v6 = vpop.f32.mrf.mxu0 }
 0x898   : > { %v7275_v30 = vsub.f32 %v7211_v3, %v7147_v52 }
 0x899   : > { %v6682_v35 = vpop.f32.mrf.mxu1  ;;  %v7069_v8 = vpop.f32.mrf.mxu0 }
 0x89a   : > { %7340 = vst.msk [vmem:[%s12173_s6 + $0x1d0] sm:$0xff] %vm7281_vm13, %v7275_v30  ;;  %v7148_v38 = vadd.f32 %v7069_v8, %v6678_v34  ;;  %v6683_v27 = vadd.f32 %v6682_v35, %v12310_v61 }
 0x89b   : > { %v6684_v26 = vpop.f32.mrf.mxu1  ;;  %v7071_v59 = vpop.f32.mrf.mxu0 }
 0x89c   : > { %v7276_v42 = vsub.f32 %v7212_v5, %v7148_v38 }
 0x89d   : > { %v6685_v17 = vpop.f32.mrf.mxu1  ;;  %v7074_v25 = vpop.f32.mrf.mxu0 }
 0x89e   : > { %7341 = vst.msk [vmem:[%s12173_s6 + $0x1d8] sm:$0xff] %vm7281_vm13, %v7276_v42  ;;  %v7149_v53 = vadd.f32 %v7074_v25, %v6683_v27  ;;  %v6686_v43 = vadd.f32 %v6685_v17, %v12311_v47 }
 0x89f   : > { %v6687_v2 = vpop.f32.mrf.mxu1  ;;  %v7076_v32 = vpop.f32.mrf.mxu0 }
 0x8a0   : > { %v7277_v16 = vsub.f32 %v7213_v33, %v7149_v53 }
 0x8a1   : > { %v6690_v44 = vpop.f32.mrf.mxu1  ;;  %v7077_v24 = vpop.f32.mrf.mxu0 }
 0x8a2   : > { %7342 = vst.msk [vmem:[%s12173_s6 + $0x1e0] sm:$0xff] %vm7281_vm13, %v7277_v16  ;;  %v7150_v14 = vadd.f32 %v7077_v24, %v6686_v43  ;;  %v6691_v36 = vadd.f32 %v6690_v44, %v12312_v46 }
 0x8a3   : > { %v6692_v40 = vpop.f32.mrf.mxu1  ;;  %v7079_v54 = vpop.f32.mrf.mxu0 }
 0x8a4   : > { %v7278_v10 = vsub.f32 %v7214_v60, %v7150_v14 }
 0x8a5   : > { %v6693_v18 = vpop.f32.mrf.mxu1  ;;  %v7082_v12 = vpop.f32.mrf.mxu0 }
 0x8a6   : > { %7343 = vst.msk [vmem:[%s12173_s6 + $0x1e8] sm:$0xff] %vm7281_vm13, %v7278_v10  ;;  %v7151_v56 = vadd.f32 %v7082_v12, %v6691_v36  ;;  %v6694_v11 = vadd.f32 %v6693_v18, %v12313_v41 }
 0x8a7   : > { %v6695_v7 = vpop.f32.mrf.mxu1  ;;  %v7084_v51 = vpop.f32.mrf.mxu0 }
 0x8a8   : > { %v7279_v21 = vsub.f32 %v7215_v55, %v7151_v56 }
 0x8a9   : > { %v7085_v45 = vpop.f32.mrf.mxu0 }
 0x8aa   : > { %7344 = vst.msk [vmem:[%s12173_s6 + $0x1f0] sm:$0xff] %vm7281_vm13, %v7279_v21  ;;  %v7152_v37 = vadd.f32 %v7085_v45, %v6694_v11 }
 0x8ab   : > { %v7087_v9 = vpop.f32.mrf.mxu0 }
 0x8ac   : > { %v7280_v29 = vsub.f32 %v7216_v58, %v7152_v37 }
 0x8ae   : > { %7345 = vst.msk [vmem:[%s12173_s6 + $0x1f8] sm:$0xff] %vm7281_vm13, %v7280_v29 }
 0x8af PF: > { %s16_s21 = sadd.s32 1, %s8107_s21  }
 0x8b0   : > { %p13_p11 = scmp.ge.s32.totalorder %s16_s21, 8  }
 0x8b2   :  { %15 = sbr.rel (!%p13_p11) target bundleno = 1 (0x1), region = 91 }

</bundles_post_ra>
